<compile_context>
chip_gen: v6e
topology: v6e:2x2x1
jax: 0.10.0
libtpu: 0.0.40
codegen_flags: <defaults>
</compile_context>

<pallas_src>
import jax
import jax.numpy as jnp
import numpy as np
from jax import lax
from jax.experimental import pallas as pl
from jax.experimental.pallas import tpu as pltpu


def _round_up(n, m):
    return (n + m - 1) // m * m


def _scoped_vmem_limit_bytes():
    """Per-generation scoped-VMEM limit, leaving headroom for compiler scratch."""
    phys = 128 * 1024 * 1024
    try:
        phys = int(getattr(pltpu.get_tpu_info(), "vmem_capacity_bytes", phys))
    except Exception:
        pass
    # v7x (64 MiB physical) -> ~48 MiB; v5e/v6e (128 MiB) -> 100 MiB.
    return max(32 * 1024 * 1024,
               min(phys - 16 * 1024 * 1024, 100 * 1024 * 1024))


def gru_chunk_kernel(x_ref, wzr_xT_ref, wzr_hT_ref, w_candT_ref,
                     out_ref, h_ref, xzr_ref):
    """One grid step == t_chunk timesteps of the GRU recurrence for one
    batch block.

    x_ref       : (t_chunk, b_blk, dimIn_p)   input chunk (compute dtype)
    wzr_xT_ref  : (dimIn_p, dimG_p)           fused [Wz_x;Wr_xx;Wr_hx]^T
    wzr_hT_ref  : (dimH_p, dimG_p)            fused [Wz_h;Wr_xh;Wr_hh]^T
    w_candT_ref : (dimIn_p+dimH_p, dimH_p)    fused candidate [W_x,W_h]^T
    out_ref     : (t_chunk, b_blk, dimH_p)    outputs (f32)
    h_ref       : (b_blk, dimH_p) f32 scratch persistent hidden state
    xzr_ref     : (t_chunk*b_blk, dimG_p) f32 scratch, in-kernel x-projections
    """
    t_chunk, b_blk, dimIn_p = x_ref.shape
    dimH_p = h_ref.shape[1]
    cdt = x_ref.dtype            # MXU operand dtype (f32 or bf16)

    # h = 0 at the first time chunk of each batch block (h=None in PyTorch).
    @pl.when(pl.program_id(1) == 0)
    def _():
        h_ref[...] = jnp.zeros_like(h_ref)

    # x-projection of the fused z/r gates for the WHOLE chunk in one MXU dot
    # (M = t_chunk * b_blk); lives only in VMEM scratch, never touches HBM.
    x_all = x_ref[...].reshape(t_chunk * b_blk, dimIn_p)
    xzr_ref[...] = jnp.dot(x_all, wzr_xT_ref[...],
                           preferred_element_type=jnp.float32)

    # Loop-invariant weight loads hoisted out of the timestep loop.
    wzr_hT = wzr_hT_ref[...]
    w_candT = w_candT_ref[...]

    def step(t, h):
        x_t = x_ref[t]                                     # (b_blk, dimIn_p)
        row = pl.multiple_of(t * b_blk, b_blk)
        zr = xzr_ref[pl.ds(row, b_blk), :] + jnp.dot(
            h.astype(cdt), wzr_hT, preferred_element_type=jnp.float32)
        # sigmoid(v) == 0.5 * (1 + tanh(v / 2)): one EUP op per gate tile.
        zr = 0.5 * (1.0 + jnp.tanh(0.5 * zr))
        zt = zr[:, :dimH_p]                                # update gate
        rt_x = zr[:, dimH_p:dimH_p + dimIn_p]              # reset gate, x cols
        rt_h = zr[:, dimH_p + dimIn_p:]                    # reset gate, h cols
        # Candidate tanh((rt * [x, h]) @ W^T) as ONE fused K-dim MXU dot.
        cand = jnp.concatenate([rt_x * x_t, rt_h * h], axis=1)
        hprim = jnp.tanh(jnp.dot(cand.astype(cdt), w_candT,
                                 preferred_element_type=jnp.float32))
        h_new = (1.0 - zt) * h + zt * hprim
        out_ref[t] = h_new
        return h_new

    # Partial unroll: LLO scheduling visibility without a vreg-pressure cliff.
    h_ref[...] = lax.fori_loop(0, t_chunk, step, h_ref[...],
                               unroll=min(t_chunk, 8))


def gru_forward(x, w, wz, wr, *, t_chunk=None, b_blk=None,
                compute_dtype=jnp.float32):
    """GRU forward.  x: (T, B, dimIn) f32 -> res: (T, B, dimH) f32.

    w  : (dimH, dimIn+dimH)        self.linear  (candidate) weight
    wz : (dimH, dimIn+dimH)        self.linearZ (update)    weight
    wr : (dimIn+dimH, dimIn+dimH)  self.linearR (reset)     weight
    compute_dtype : dtype of the MXU operands (weights + matmul LHS); the
        hidden state, gate math and accumulation always stay float32.
    b_blk : batch-block size (defaults to whole padded batch).
        # TODO(synk): on v7x set b_blk = padded_B // 2 so the "parallel" batch
        # grid axis is sharded across the chip's two TensorCores.
    """
    T, B, dimIn = x.shape
    dimH = w.shape[0]
    dimCat = dimIn + dimH
    assert w.shape == (dimH, dimCat)
    assert wz.shape == (dimH, dimCat)
    assert wr.shape == (dimCat, dimCat)

    f32 = jnp.float32
    x = x.astype(f32)
    w, wz, wr = w.astype(f32), wz.astype(f32), wr.astype(f32)

    cbytes = np.dtype(compute_dtype).itemsize
    LANE = 128
    sub = 8 * (4 // cbytes)                 # f32 -> 8, bf16 -> 16 sublanes

    dimIn_p = _round_up(dimIn, LANE)
    dimH_p = _round_up(dimH, LANE)
    dimG_p = dimH_p + dimIn_p + dimH_p      # fused [z | r_x | r_h] gate width
    dimCat_p = dimIn_p + dimH_p

    B_p = _round_up(B, sub)
    if b_blk is None:
        b_blk = B_p
    else:
        b_blk = _round_up(min(b_blk, B_p), sub)
        B_p = _round_up(B_p, b_blk)
    n_b = B_p // b_blk

    vmem_limit = _scoped_vmem_limit_bytes()

    if t_chunk is None:
        # t_chunk <= (budget - weights - h) / per-timestep-bytes.  Weights are
        # conservatively assumed double-buffered (worst case if Buffered(1)
        # is not honored by the running JAX version).
        weight_bytes = 2 * cbytes * (dimIn_p * dimG_p + dimH_p * dimG_p
                                     + dimCat_p * dimH_p)
        fixed_bytes = weight_bytes + 4 * b_blk * dimH_p       # h scratch
        per_t_bytes = b_blk * (2 * cbytes * dimIn_p           # x (x2 buffers)
                               + 2 * 4 * dimH_p               # out (x2 buffers)
                               + 4 * dimG_p)                  # xzr scratch
        budget = int(0.8 * vmem_limit) - fixed_bytes
        t_chunk = int(max(1, min(T, budget // per_t_bytes, 128)))

    n_chunks = -(-T // t_chunk)
    t_pad = n_chunks * t_chunk

    # ---- One-time weight prep (hoisted out of the kernel) -------------------
    # x/h column split, z/r fusion, zero padding so every [z | r_x | r_h]
    # segment boundary lands on a 128-lane multiple, pre-transposed for direct
    # MXU feed, cast to the compute dtype.
    def pad2(a, rows, cols):
        return jnp.pad(a, ((0, rows - a.shape[0]), (0, cols - a.shape[1])))

    wz_x, wz_h = wz[:, :dimIn], wz[:, dimIn:]
    wr_xx, wr_xh = wr[:dimIn, :dimIn], wr[:dimIn, dimIn:]
    wr_hx, wr_hh = wr[dimIn:, :dimIn], wr[dimIn:, dimIn:]
    w_x, w_h = w[:, :dimIn], w[:, dimIn:]

    wzr_xT = jnp.concatenate(
        [pad2(wz_x, dimH_p, dimIn_p),
         pad2(wr_xx, dimIn_p, dimIn_p),
         pad2(wr_hx, dimH_p, dimIn_p)], axis=0).T.astype(compute_dtype)
    wzr_hT = jnp.concatenate(
        [pad2(wz_h, dimH_p, dimH_p),
         pad2(wr_xh, dimIn_p, dimH_p),
         pad2(wr_hh, dimH_p, dimH_p)], axis=0).T.astype(compute_dtype)
    w_candT = jnp.concatenate(
        [pad2(w_x, dimH_p, dimIn_p),
         pad2(w_h, dimH_p, dimH_p)], axis=1).T.astype(compute_dtype)

    x_p = jnp.pad(x, ((0, t_pad - T), (0, B_p - B), (0, dimIn_p - dimIn)))
    x_p = x_p.astype(compute_dtype)

    grid = (n_b, n_chunks)

    def build(single_buffer_weights):
        def w_spec(rows, cols):
            if single_buffer_weights:
                # Grid-invariant: one VMEM buffer instead of the default two.
                return pl.BlockSpec((rows, cols), lambda b, c: (0, 0),
                                    pipeline_mode=pl.Buffered(1))
            return pl.BlockSpec((rows, cols), lambda b, c: (0, 0))

        return pl.pallas_call(
            gru_chunk_kernel,
            out_shape=jax.ShapeDtypeStruct((t_pad, B_p, dimH_p), jnp.float32),
            grid_spec=pltpu.PrefetchScalarGridSpec(
                num_scalar_prefetch=0,
                grid=grid,
                in_specs=[
                    pl.BlockSpec((t_chunk, b_blk, dimIn_p),
                                 lambda b, c: (c, b, 0)),        # x chunk
                    w_spec(dimIn_p, dimG_p),      # [Wz_x;Wr_xx;Wr_hx]^T
                    w_spec(dimH_p, dimG_p),       # [Wz_h;Wr_xh;Wr_hh]^T
                    w_spec(dimCat_p, dimH_p),     # candidate [W_x,W_h]^T
                ],
                out_specs=pl.BlockSpec((t_chunk, b_blk, dimH_p),
                                       lambda b, c: (c, b, 0)),
                scratch_shapes=[
                    pltpu.VMEM((b_blk, dimH_p), jnp.float32),          # h
                    pltpu.VMEM((t_chunk * b_blk, dimG_p), jnp.float32),  # xzr
                ],
            ),
            compiler_params=pltpu.CompilerParams(
                # batch blocks are independent (megacore-shardable on v7x);
                # the time-chunk axis is a true recurrence -> sequential.
                dimension_semantics=("parallel", "arbitrary"),
                vmem_limit_bytes=vmem_limit,
            ),
        )

    try:
        out = build(True)(x_p, wzr_xT, wzr_hT, w_candT)
    except Exception:
        # Fallback for JAX versions without BlockSpec.pipeline_mode support.
        out = build(False)(x_p, wzr_xT, wzr_hT, w_candT)

    return out[:T, :B, :dimH]


def gru_reference(x, w, wz, wr):
    """Plain-JAX reference mirroring the PyTorch forward exactly."""
    T, B, dimIn = x.shape
    dimH = w.shape[0]
    h = jnp.zeros((B, dimH), jnp.float32)
    outs = []
    for t in range(T):
        xh = jnp.concatenate([x[t], h], axis=1)
        zt = jax.nn.sigmoid(xh @ wz.T)
        rt = jax.nn.sigmoid(xh @ wr.T)
        hprim = jnp.tanh((rt * xh) @ w.T)
        h = (1.0 - zt) * h + zt * hprim
        outs.append(h)
    return jnp.stack(outs, axis=0)


if __name__ == "__main__":
    # Small shapes consistent with the module: x is (T, B, dimIn).
    T, B, dimIn, dimH, dimOut = 8, 2, 8, 32, 16
    dimCat = dimIn + dimH

    key = jax.random.PRNGKey(0)
    kx, kw, kwz, kwr, _ = jax.random.split(key, 5)

    x = jax.random.normal(kx, (T, B, dimIn), dtype=jnp.float32)

    # Deterministic parameter init (nn.Linear-like uniform fan-in scaling).
    def init_linear(k, out_f, in_f):
        bound = 1.0 / np.sqrt(in_f)
        return jax.random.uniform(k, (out_f, in_f), jnp.float32, -bound, bound)

    w = init_linear(kw, dimH, dimCat)        # self.linear
    wz = init_linear(kwz, dimH, dimCat)      # self.linearZ
    wr = init_linear(kwr, dimCat, dimCat)    # self.linearR
    # TODO(synk): linearDecode (dimH -> dimOut) is not used in forward(); omitted.

    ref = gru_reference(x, w, wz, wr)

    # f32 MXU path: same math as the reference modulo summation order.
    res = jax.block_until_ready(gru_forward(x, w, wz, wr))
    np.testing.assert_allclose(np.asarray(res), np.asarray(ref),
                               rtol=1e-5, atol=1e-5)

    # bf16 MXU path (weights + matmul LHS in bf16, f32 state/accumulation):
    # ~2x MXU throughput on v5e, near-native rate on v6e/v7x.
    res_bf16 = jax.block_until_ready(
        gru_forward(x, w, wz, wr, compute_dtype=jnp.bfloat16))
    np.testing.assert_allclose(np.asarray(res_bf16), np.asarray(ref),
                               rtol=1e-1, atol=1e-1)

    print("KERNEL_OK")
</pallas_src>

<mosaic_0001>
module attributes {stable_mosaic.version = 11 : i64} {
  func.func @gru_chunk_kernel(%arg0: i32, %arg1: i32, %arg2: memref<8x8x128xf32, #tpu.memory_space<vmem>>, %arg3: memref<128x384xf32, #tpu.memory_space<vmem>>, %arg4: memref<128x384xf32, #tpu.memory_space<vmem>>, %arg5: memref<256x128xf32, #tpu.memory_space<vmem>>, %arg6: memref<8x8x128xf32, #tpu.memory_space<vmem>>, %arg7: memref<8x128xf32, #tpu.memory_space<vmem>>, %arg8: memref<64x384xf32, #tpu.memory_space<vmem>>) attributes {dimension_semantics = [#tpu.dimension_semantics<parallel>, #tpu.dimension_semantics<arbitrary>], iteration_bounds = array<i64: 1, 1>, scalar_prefetch = 0 : i64, scratch_operands = 2 : i64, tpu.core_type = #tpu.core_type<tc>, window_params = [{transform_indices = @transform_0, window_bounds = array<i64: 8, 8, 128>}, {pipeline_mode = #tpu.pipeline_mode<synchronous>, transform_indices = @transform_1, window_bounds = array<i64: 128, 384>}, {pipeline_mode = #tpu.pipeline_mode<synchronous>, transform_indices = @transform_2, window_bounds = array<i64: 128, 384>}, {pipeline_mode = #tpu.pipeline_mode<synchronous>, transform_indices = @transform_3, window_bounds = array<i64: 256, 128>}, {transform_indices = @transform_4, window_bounds = array<i64: 8, 8, 128>}]} {
    %c0_i32 = arith.constant 0 : i32
    %0 = arith.cmpi eq, %arg1, %c0_i32 : i32
    %1 = arith.extui %0 : i1 to i32
    %c0_i32_0 = arith.constant 0 : i32
    %2 = arith.cmpi ne, %1, %c0_i32_0 : i32
    scf.if %2 {
      %cst_112 = arith.constant 0.000000e+00 : f32
      %276 = vector.broadcast %cst_112 : f32 to vector<8x128xf32>
      %c0_113 = arith.constant 0 : index
      %c0_114 = arith.constant 0 : index
      %277 = vector.load %arg7[%c0_113, %c0_114] : memref<8x128xf32, #tpu.memory_space<vmem>>, vector<8x128xf32>
      tpu.vector_store %arg7[%c0_113, %c0_114], %276 {strides = array<i32>} : memref<8x128xf32, #tpu.memory_space<vmem>>, vector<8x128xf32>,
    } else {
    }
    %c0 = arith.constant 0 : index
    %c0_1 = arith.constant 0 : index
    %c0_2 = arith.constant 0 : index
    %3 = vector.load %arg2[%c0, %c0_1, %c0_2] : memref<8x8x128xf32, #tpu.memory_space<vmem>>, vector<8x8x128xf32>
    %4 = vector.shape_cast %3 : vector<8x8x128xf32> to vector<64x128xf32>
    %c0_3 = arith.constant 0 : index
    %c0_4 = arith.constant 0 : index
    %5 = vector.load %arg3[%c0_3, %c0_4] : memref<128x384xf32, #tpu.memory_space<vmem>>, vector<128x384xf32>
    %cst = arith.constant dense<0.000000e+00> : vector<64x384xf32>
    %6 = tpu.matmul %4, %5, %cst {dimension_numbers = #tpu.dot_dimension_numbers<[1], [0], [0], [1], [0, 0, 1, 1], [], []>} : vector<64x128xf32>, vector<128x384xf32>, vector<64x384xf32> -> vector<64x384xf32>
    %c0_5 = arith.constant 0 : index
    %c0_6 = arith.constant 0 : index
    %7 = vector.load %arg8[%c0_5, %c0_6] : memref<64x384xf32, #tpu.memory_space<vmem>>, vector<64x384xf32>
    tpu.vector_store %arg8[%c0_5, %c0_6], %6 {strides = array<i32>} : memref<64x384xf32, #tpu.memory_space<vmem>>, vector<64x384xf32>,
    %c0_7 = arith.constant 0 : index
    %c0_8 = arith.constant 0 : index
    %8 = vector.load %arg4[%c0_7, %c0_8] : memref<128x384xf32, #tpu.memory_space<vmem>>, vector<128x384xf32>
    %c0_9 = arith.constant 0 : index
    %c0_10 = arith.constant 0 : index
    %9 = vector.load %arg5[%c0_9, %c0_10] : memref<256x128xf32, #tpu.memory_space<vmem>>, vector<256x128xf32>
    %c0_11 = arith.constant 0 : index
    %c0_12 = arith.constant 0 : index
    %10 = vector.load %arg7[%c0_11, %c0_12] : memref<8x128xf32, #tpu.memory_space<vmem>>, vector<8x128xf32>
    %c0_i32_13 = arith.constant 0 : i32
    %11 = arith.index_cast %c0_i32_13 : i32 to index
    %c0_14 = arith.constant 0 : index
    %c0_15 = arith.constant 0 : index
    %12 = vector.load %arg2[%11, %c0_14, %c0_15] : memref<8x8x128xf32, #tpu.memory_space<vmem>>, vector<1x8x128xf32>
    %13 = vector.shape_cast %12 : vector<1x8x128xf32> to vector<8x128xf32>
    %c8_i32 = arith.constant 8 : i32
    %14 = arith.muli %c0_i32_13, %c8_i32 : i32
    %15 = tpu.assume_multiple %14, 8 : i32
    %16 = arith.index_cast %15 : i32 to index
    %c0_16 = arith.constant 0 : index
    %17 = vector.load %arg8[%16, %c0_16] : memref<64x384xf32, #tpu.memory_space<vmem>>, vector<8x384xf32>
    %cst_17 = arith.constant dense<0.000000e+00> : vector<8x384xf32>
    %18 = tpu.matmul %10, %8, %cst_17 {dimension_numbers = #tpu.dot_dimension_numbers<[1], [0], [0], [1], [0, 0, 1, 1], [], []>} : vector<8x128xf32>, vector<128x384xf32>, vector<8x384xf32> -> vector<8x384xf32>
    %19 = arith.addf %17, %18 : vector<8x384xf32>
    %cst_18 = arith.constant 5.000000e-01 : f32
    %20 = vector.broadcast %cst_18 : f32 to vector<8x384xf32>
    %21 = arith.mulf %20, %19 : vector<8x384xf32>
    %22 = math.tanh %21 : vector<8x384xf32>
    %cst_19 = arith.constant 1.000000e+00 : f32
    %23 = vector.broadcast %cst_19 : f32 to vector<8x384xf32>
    %24 = arith.addf %23, %22 : vector<8x384xf32>
    %cst_20 = arith.constant 5.000000e-01 : f32
    %25 = vector.broadcast %cst_20 : f32 to vector<8x384xf32>
    %26 = arith.mulf %25, %24 : vector<8x384xf32>
    %27 = vector.extract_strided_slice %26 {offsets = [0, 0], sizes = [8, 128], strides = [1, 1]} : vector<8x384xf32> to vector<8x128xf32>
    %28 = vector.extract_strided_slice %26 {offsets = [0, 128], sizes = [8, 128], strides = [1, 1]} : vector<8x384xf32> to vector<8x128xf32>
    %29 = vector.extract_strided_slice %26 {offsets = [0, 256], sizes = [8, 128], strides = [1, 1]} : vector<8x384xf32> to vector<8x128xf32>
    %30 = arith.mulf %28, %13 : vector<8x128xf32>
    %31 = arith.mulf %29, %10 : vector<8x128xf32>
    %32 = tpu.concatenate %30, %31 in 1 : vector<8x128xf32>, vector<8x128xf32> -> vector<8x256xf32>
    %cst_21 = arith.constant dense<0.000000e+00> : vector<8x128xf32>
    %33 = tpu.matmul %32, %9, %cst_21 {dimension_numbers = #tpu.dot_dimension_numbers<[1], [0], [0], [1], [0, 0, 1, 1], [], []>} : vector<8x256xf32>, vector<256x128xf32>, vector<8x128xf32> -> vector<8x128xf32>
    %34 = math.tanh %33 : vector<8x128xf32>
    %cst_22 = arith.constant 1.000000e+00 : f32
    %35 = vector.broadcast %cst_22 : f32 to vector<8x128xf32>
    %36 = arith.subf %35, %27 : vector<8x128xf32>
    %37 = arith.mulf %36, %10 : vector<8x128xf32>
    %38 = arith.mulf %27, %34 : vector<8x128xf32>
    %39 = arith.addf %37, %38 : vector<8x128xf32>
    %40 = arith.index_cast %c0_i32_13 : i32 to index
    %c0_23 = arith.constant 0 : index
    %c0_24 = arith.constant 0 : index
    %41 = vector.load %arg6[%40, %c0_23, %c0_24] : memref<8x8x128xf32, #tpu.memory_space<vmem>>, vector<1x8x128xf32>
    %42 = vector.shape_cast %41 : vector<1x8x128xf32> to vector<8x128xf32>
    %43 = vector.shape_cast %39 : vector<8x128xf32> to vector<1x8x128xf32>
    tpu.vector_store %arg6[%40, %c0_23, %c0_24], %43 {strides = array<i32>} : memref<8x8x128xf32, #tpu.memory_space<vmem>>, vector<1x8x128xf32>,
    %c1_i32 = arith.constant 1 : i32
    %44 = arith.index_cast %c1_i32 : i32 to index
    %c0_25 = arith.constant 0 : index
    %c0_26 = arith.constant 0 : index
    %45 = vector.load %arg2[%44, %c0_25, %c0_26] : memref<8x8x128xf32, #tpu.memory_space<vmem>>, vector<1x8x128xf32>
    %46 = vector.shape_cast %45 : vector<1x8x128xf32> to vector<8x128xf32>
    %c8_i32_27 = arith.constant 8 : i32
    %47 = arith.muli %c1_i32, %c8_i32_27 : i32
    %48 = tpu.assume_multiple %47, 8 : i32
    %49 = arith.index_cast %48 : i32 to index
    %c0_28 = arith.constant 0 : index
    %50 = vector.load %arg8[%49, %c0_28] : memref<64x384xf32, #tpu.memory_space<vmem>>, vector<8x384xf32>
    %cst_29 = arith.constant dense<0.000000e+00> : vector<8x384xf32>
    %51 = tpu.matmul %39, %8, %cst_29 {dimension_numbers = #tpu.dot_dimension_numbers<[1], [0], [0], [1], [0, 0, 1, 1], [], []>} : vector<8x128xf32>, vector<128x384xf32>, vector<8x384xf32> -> vector<8x384xf32>
    %52 = arith.addf %50, %51 : vector<8x384xf32>
    %cst_30 = arith.constant 5.000000e-01 : f32
    %53 = vector.broadcast %cst_30 : f32 to vector<8x384xf32>
    %54 = arith.mulf %53, %52 : vector<8x384xf32>
    %55 = math.tanh %54 : vector<8x384xf32>
    %cst_31 = arith.constant 1.000000e+00 : f32
    %56 = vector.broadcast %cst_31 : f32 to vector<8x384xf32>
    %57 = arith.addf %56, %55 : vector<8x384xf32>
    %cst_32 = arith.constant 5.000000e-01 : f32
    %58 = vector.broadcast %cst_32 : f32 to vector<8x384xf32>
    %59 = arith.mulf %58, %57 : vector<8x384xf32>
    %60 = vector.extract_strided_slice %59 {offsets = [0, 0], sizes = [8, 128], strides = [1, 1]} : vector<8x384xf32> to vector<8x128xf32>
    %61 = vector.extract_strided_slice %59 {offsets = [0, 128], sizes = [8, 128], strides = [1, 1]} : vector<8x384xf32> to vector<8x128xf32>
    %62 = vector.extract_strided_slice %59 {offsets = [0, 256], sizes = [8, 128], strides = [1, 1]} : vector<8x384xf32> to vector<8x128xf32>
    %63 = arith.mulf %61, %46 : vector<8x128xf32>
    %64 = arith.mulf %62, %39 : vector<8x128xf32>
    %65 = tpu.concatenate %63, %64 in 1 : vector<8x128xf32>, vector<8x128xf32> -> vector<8x256xf32>
    %cst_33 = arith.constant dense<0.000000e+00> : vector<8x128xf32>
    %66 = tpu.matmul %65, %9, %cst_33 {dimension_numbers = #tpu.dot_dimension_numbers<[1], [0], [0], [1], [0, 0, 1, 1], [], []>} : vector<8x256xf32>, vector<256x128xf32>, vector<8x128xf32> -> vector<8x128xf32>
    %67 = math.tanh %66 : vector<8x128xf32>
    %cst_34 = arith.constant 1.000000e+00 : f32
    %68 = vector.broadcast %cst_34 : f32 to vector<8x128xf32>
    %69 = arith.subf %68, %60 : vector<8x128xf32>
    %70 = arith.mulf %69, %39 : vector<8x128xf32>
    %71 = arith.mulf %60, %67 : vector<8x128xf32>
    %72 = arith.addf %70, %71 : vector<8x128xf32>
    %73 = arith.index_cast %c1_i32 : i32 to index
    %c0_35 = arith.constant 0 : index
    %c0_36 = arith.constant 0 : index
    %74 = vector.load %arg6[%73, %c0_35, %c0_36] : memref<8x8x128xf32, #tpu.memory_space<vmem>>, vector<1x8x128xf32>
    %75 = vector.shape_cast %74 : vector<1x8x128xf32> to vector<8x128xf32>
    %76 = vector.shape_cast %72 : vector<8x128xf32> to vector<1x8x128xf32>
    tpu.vector_store %arg6[%73, %c0_35, %c0_36], %76 {strides = array<i32>} : memref<8x8x128xf32, #tpu.memory_space<vmem>>, vector<1x8x128xf32>,
    %c2_i32 = arith.constant 2 : i32
    %77 = arith.index_cast %c2_i32 : i32 to index
    %c0_37 = arith.constant 0 : index
    %c0_38 = arith.constant 0 : index
    %78 = vector.load %arg2[%77, %c0_37, %c0_38] : memref<8x8x128xf32, #tpu.memory_space<vmem>>, vector<1x8x128xf32>
    %79 = vector.shape_cast %78 : vector<1x8x128xf32> to vector<8x128xf32>
    %c8_i32_39 = arith.constant 8 : i32
    %80 = arith.muli %c2_i32, %c8_i32_39 : i32
    %81 = tpu.assume_multiple %80, 8 : i32
    %82 = arith.index_cast %81 : i32 to index
    %c0_40 = arith.constant 0 : index
    %83 = vector.load %arg8[%82, %c0_40] : memref<64x384xf32, #tpu.memory_space<vmem>>, vector<8x384xf32>
    %cst_41 = arith.constant dense<0.000000e+00> : vector<8x384xf32>
    %84 = tpu.matmul %72, %8, %cst_41 {dimension_numbers = #tpu.dot_dimension_numbers<[1], [0], [0], [1], [0, 0, 1, 1], [], []>} : vector<8x128xf32>, vector<128x384xf32>, vector<8x384xf32> -> vector<8x384xf32>
    %85 = arith.addf %83, %84 : vector<8x384xf32>
    %cst_42 = arith.constant 5.000000e-01 : f32
    %86 = vector.broadcast %cst_42 : f32 to vector<8x384xf32>
    %87 = arith.mulf %86, %85 : vector<8x384xf32>
    %88 = math.tanh %87 : vector<8x384xf32>
    %cst_43 = arith.constant 1.000000e+00 : f32
    %89 = vector.broadcast %cst_43 : f32 to vector<8x384xf32>
    %90 = arith.addf %89, %88 : vector<8x384xf32>
    %cst_44 = arith.constant 5.000000e-01 : f32
    %91 = vector.broadcast %cst_44 : f32 to vector<8x384xf32>
    %92 = arith.mulf %91, %90 : vector<8x384xf32>
    %93 = vector.extract_strided_slice %92 {offsets = [0, 0], sizes = [8, 128], strides = [1, 1]} : vector<8x384xf32> to vector<8x128xf32>
    %94 = vector.extract_strided_slice %92 {offsets = [0, 128], sizes = [8, 128], strides = [1, 1]} : vector<8x384xf32> to vector<8x128xf32>
    %95 = vector.extract_strided_slice %92 {offsets = [0, 256], sizes = [8, 128], strides = [1, 1]} : vector<8x384xf32> to vector<8x128xf32>
    %96 = arith.mulf %94, %79 : vector<8x128xf32>
    %97 = arith.mulf %95, %72 : vector<8x128xf32>
    %98 = tpu.concatenate %96, %97 in 1 : vector<8x128xf32>, vector<8x128xf32> -> vector<8x256xf32>
    %cst_45 = arith.constant dense<0.000000e+00> : vector<8x128xf32>
    %99 = tpu.matmul %98, %9, %cst_45 {dimension_numbers = #tpu.dot_dimension_numbers<[1], [0], [0], [1], [0, 0, 1, 1], [], []>} : vector<8x256xf32>, vector<256x128xf32>, vector<8x128xf32> -> vector<8x128xf32>
    %100 = math.tanh %99 : vector<8x128xf32>
    %cst_46 = arith.constant 1.000000e+00 : f32
    %101 = vector.broadcast %cst_46 : f32 to vector<8x128xf32>
    %102 = arith.subf %101, %93 : vector<8x128xf32>
    %103 = arith.mulf %102, %72 : vector<8x128xf32>
    %104 = arith.mulf %93, %100 : vector<8x128xf32>
    %105 = arith.addf %103, %104 : vector<8x128xf32>
    %106 = arith.index_cast %c2_i32 : i32 to index
    %c0_47 = arith.constant 0 : index
    %c0_48 = arith.constant 0 : index
    %107 = vector.load %arg6[%106, %c0_47, %c0_48] : memref<8x8x128xf32, #tpu.memory_space<vmem>>, vector<1x8x128xf32>
    %108 = vector.shape_cast %107 : vector<1x8x128xf32> to vector<8x128xf32>
    %109 = vector.shape_cast %105 : vector<8x128xf32> to vector<1x8x128xf32>
    tpu.vector_store %arg6[%106, %c0_47, %c0_48], %109 {strides = array<i32>} : memref<8x8x128xf32, #tpu.memory_space<vmem>>, vector<1x8x128xf32>,
    %c3_i32 = arith.constant 3 : i32
    %110 = arith.index_cast %c3_i32 : i32 to index
    %c0_49 = arith.constant 0 : index
    %c0_50 = arith.constant 0 : index
    %111 = vector.load %arg2[%110, %c0_49, %c0_50] : memref<8x8x128xf32, #tpu.memory_space<vmem>>, vector<1x8x128xf32>
    %112 = vector.shape_cast %111 : vector<1x8x128xf32> to vector<8x128xf32>
    %c8_i32_51 = arith.constant 8 : i32
    %113 = arith.muli %c3_i32, %c8_i32_51 : i32
    %114 = tpu.assume_multiple %113, 8 : i32
    %115 = arith.index_cast %114 : i32 to index
    %c0_52 = arith.constant 0 : index
    %116 = vector.load %arg8[%115, %c0_52] : memref<64x384xf32, #tpu.memory_space<vmem>>, vector<8x384xf32>
    %cst_53 = arith.constant dense<0.000000e+00> : vector<8x384xf32>
    %117 = tpu.matmul %105, %8, %cst_53 {dimension_numbers = #tpu.dot_dimension_numbers<[1], [0], [0], [1], [0, 0, 1, 1], [], []>} : vector<8x128xf32>, vector<128x384xf32>, vector<8x384xf32> -> vector<8x384xf32>
    %118 = arith.addf %116, %117 : vector<8x384xf32>
    %cst_54 = arith.constant 5.000000e-01 : f32
    %119 = vector.broadcast %cst_54 : f32 to vector<8x384xf32>
    %120 = arith.mulf %119, %118 : vector<8x384xf32>
    %121 = math.tanh %120 : vector<8x384xf32>
    %cst_55 = arith.constant 1.000000e+00 : f32
    %122 = vector.broadcast %cst_55 : f32 to vector<8x384xf32>
    %123 = arith.addf %122, %121 : vector<8x384xf32>
    %cst_56 = arith.constant 5.000000e-01 : f32
    %124 = vector.broadcast %cst_56 : f32 to vector<8x384xf32>
    %125 = arith.mulf %124, %123 : vector<8x384xf32>
    %126 = vector.extract_strided_slice %125 {offsets = [0, 0], sizes = [8, 128], strides = [1, 1]} : vector<8x384xf32> to vector<8x128xf32>
    %127 = vector.extract_strided_slice %125 {offsets = [0, 128], sizes = [8, 128], strides = [1, 1]} : vector<8x384xf32> to vector<8x128xf32>
    %128 = vector.extract_strided_slice %125 {offsets = [0, 256], sizes = [8, 128], strides = [1, 1]} : vector<8x384xf32> to vector<8x128xf32>
    %129 = arith.mulf %127, %112 : vector<8x128xf32>
    %130 = arith.mulf %128, %105 : vector<8x128xf32>
    %131 = tpu.concatenate %129, %130 in 1 : vector<8x128xf32>, vector<8x128xf32> -> vector<8x256xf32>
    %cst_57 = arith.constant dense<0.000000e+00> : vector<8x128xf32>
    %132 = tpu.matmul %131, %9, %cst_57 {dimension_numbers = #tpu.dot_dimension_numbers<[1], [0], [0], [1], [0, 0, 1, 1], [], []>} : vector<8x256xf32>, vector<256x128xf32>, vector<8x128xf32> -> vector<8x128xf32>
    %133 = math.tanh %132 : vector<8x128xf32>
    %cst_58 = arith.constant 1.000000e+00 : f32
    %134 = vector.broadcast %cst_58 : f32 to vector<8x128xf32>
    %135 = arith.subf %134, %126 : vector<8x128xf32>
    %136 = arith.mulf %135, %105 : vector<8x128xf32>
    %137 = arith.mulf %126, %133 : vector<8x128xf32>
    %138 = arith.addf %136, %137 : vector<8x128xf32>
    %139 = arith.index_cast %c3_i32 : i32 to index
    %c0_59 = arith.constant 0 : index
    %c0_60 = arith.constant 0 : index
    %140 = vector.load %arg6[%139, %c0_59, %c0_60] : memref<8x8x128xf32, #tpu.memory_space<vmem>>, vector<1x8x128xf32>
    %141 = vector.shape_cast %140 : vector<1x8x128xf32> to vector<8x128xf32>
    %142 = vector.shape_cast %138 : vector<8x128xf32> to vector<1x8x128xf32>
    tpu.vector_store %arg6[%139, %c0_59, %c0_60], %142 {strides = array<i32>} : memref<8x8x128xf32, #tpu.memory_space<vmem>>, vector<1x8x128xf32>,
    %c4_i32 = arith.constant 4 : i32
    %143 = arith.index_cast %c4_i32 : i32 to index
    %c0_61 = arith.constant 0 : index
    %c0_62 = arith.constant 0 : index
    %144 = vector.load %arg2[%143, %c0_61, %c0_62] : memref<8x8x128xf32, #tpu.memory_space<vmem>>, vector<1x8x128xf32>
    %145 = vector.shape_cast %144 : vector<1x8x128xf32> to vector<8x128xf32>
    %c8_i32_63 = arith.constant 8 : i32
    %146 = arith.muli %c4_i32, %c8_i32_63 : i32
    %147 = tpu.assume_multiple %146, 8 : i32
    %148 = arith.index_cast %147 : i32 to index
    %c0_64 = arith.constant 0 : index
    %149 = vector.load %arg8[%148, %c0_64] : memref<64x384xf32, #tpu.memory_space<vmem>>, vector<8x384xf32>
    %cst_65 = arith.constant dense<0.000000e+00> : vector<8x384xf32>
    %150 = tpu.matmul %138, %8, %cst_65 {dimension_numbers = #tpu.dot_dimension_numbers<[1], [0], [0], [1], [0, 0, 1, 1], [], []>} : vector<8x128xf32>, vector<128x384xf32>, vector<8x384xf32> -> vector<8x384xf32>
    %151 = arith.addf %149, %150 : vector<8x384xf32>
    %cst_66 = arith.constant 5.000000e-01 : f32
    %152 = vector.broadcast %cst_66 : f32 to vector<8x384xf32>
    %153 = arith.mulf %152, %151 : vector<8x384xf32>
    %154 = math.tanh %153 : vector<8x384xf32>
    %cst_67 = arith.constant 1.000000e+00 : f32
    %155 = vector.broadcast %cst_67 : f32 to vector<8x384xf32>
    %156 = arith.addf %155, %154 : vector<8x384xf32>
    %cst_68 = arith.constant 5.000000e-01 : f32
    %157 = vector.broadcast %cst_68 : f32 to vector<8x384xf32>
    %158 = arith.mulf %157, %156 : vector<8x384xf32>
    %159 = vector.extract_strided_slice %158 {offsets = [0, 0], sizes = [8, 128], strides = [1, 1]} : vector<8x384xf32> to vector<8x128xf32>
    %160 = vector.extract_strided_slice %158 {offsets = [0, 128], sizes = [8, 128], strides = [1, 1]} : vector<8x384xf32> to vector<8x128xf32>
    %161 = vector.extract_strided_slice %158 {offsets = [0, 256], sizes = [8, 128], strides = [1, 1]} : vector<8x384xf32> to vector<8x128xf32>
    %162 = arith.mulf %160, %145 : vector<8x128xf32>
    %163 = arith.mulf %161, %138 : vector<8x128xf32>
    %164 = tpu.concatenate %162, %163 in 1 : vector<8x128xf32>, vector<8x128xf32> -> vector<8x256xf32>
    %cst_69 = arith.constant dense<0.000000e+00> : vector<8x128xf32>
    %165 = tpu.matmul %164, %9, %cst_69 {dimension_numbers = #tpu.dot_dimension_numbers<[1], [0], [0], [1], [0, 0, 1, 1], [], []>} : vector<8x256xf32>, vector<256x128xf32>, vector<8x128xf32> -> vector<8x128xf32>
    %166 = math.tanh %165 : vector<8x128xf32>
    %cst_70 = arith.constant 1.000000e+00 : f32
    %167 = vector.broadcast %cst_70 : f32 to vector<8x128xf32>
    %168 = arith.subf %167, %159 : vector<8x128xf32>
    %169 = arith.mulf %168, %138 : vector<8x128xf32>
    %170 = arith.mulf %159, %166 : vector<8x128xf32>
    %171 = arith.addf %169, %170 : vector<8x128xf32>
    %172 = arith.index_cast %c4_i32 : i32 to index
    %c0_71 = arith.constant 0 : index
    %c0_72 = arith.constant 0 : index
    %173 = vector.load %arg6[%172, %c0_71, %c0_72] : memref<8x8x128xf32, #tpu.memory_space<vmem>>, vector<1x8x128xf32>
    %174 = vector.shape_cast %173 : vector<1x8x128xf32> to vector<8x128xf32>
    %175 = vector.shape_cast %171 : vector<8x128xf32> to vector<1x8x128xf32>
    tpu.vector_store %arg6[%172, %c0_71, %c0_72], %175 {strides = array<i32>} : memref<8x8x128xf32, #tpu.memory_space<vmem>>, vector<1x8x128xf32>,
    %c5_i32 = arith.constant 5 : i32
    %176 = arith.index_cast %c5_i32 : i32 to index
    %c0_73 = arith.constant 0 : index
    %c0_74 = arith.constant 0 : index
    %177 = vector.load %arg2[%176, %c0_73, %c0_74] : memref<8x8x128xf32, #tpu.memory_space<vmem>>, vector<1x8x128xf32>
    %178 = vector.shape_cast %177 : vector<1x8x128xf32> to vector<8x128xf32>
    %c8_i32_75 = arith.constant 8 : i32
    %179 = arith.muli %c5_i32, %c8_i32_75 : i32
    %180 = tpu.assume_multiple %179, 8 : i32
    %181 = arith.index_cast %180 : i32 to index
    %c0_76 = arith.constant 0 : index
    %182 = vector.load %arg8[%181, %c0_76] : memref<64x384xf32, #tpu.memory_space<vmem>>, vector<8x384xf32>
    %cst_77 = arith.constant dense<0.000000e+00> : vector<8x384xf32>
    %183 = tpu.matmul %171, %8, %cst_77 {dimension_numbers = #tpu.dot_dimension_numbers<[1], [0], [0], [1], [0, 0, 1, 1], [], []>} : vector<8x128xf32>, vector<128x384xf32>, vector<8x384xf32> -> vector<8x384xf32>
    %184 = arith.addf %182, %183 : vector<8x384xf32>
    %cst_78 = arith.constant 5.000000e-01 : f32
    %185 = vector.broadcast %cst_78 : f32 to vector<8x384xf32>
    %186 = arith.mulf %185, %184 : vector<8x384xf32>
    %187 = math.tanh %186 : vector<8x384xf32>
    %cst_79 = arith.constant 1.000000e+00 : f32
    %188 = vector.broadcast %cst_79 : f32 to vector<8x384xf32>
    %189 = arith.addf %188, %187 : vector<8x384xf32>
    %cst_80 = arith.constant 5.000000e-01 : f32
    %190 = vector.broadcast %cst_80 : f32 to vector<8x384xf32>
    %191 = arith.mulf %190, %189 : vector<8x384xf32>
    %192 = vector.extract_strided_slice %191 {offsets = [0, 0], sizes = [8, 128], strides = [1, 1]} : vector<8x384xf32> to vector<8x128xf32>
    %193 = vector.extract_strided_slice %191 {offsets = [0, 128], sizes = [8, 128], strides = [1, 1]} : vector<8x384xf32> to vector<8x128xf32>
    %194 = vector.extract_strided_slice %191 {offsets = [0, 256], sizes = [8, 128], strides = [1, 1]} : vector<8x384xf32> to vector<8x128xf32>
    %195 = arith.mulf %193, %178 : vector<8x128xf32>
    %196 = arith.mulf %194, %171 : vector<8x128xf32>
    %197 = tpu.concatenate %195, %196 in 1 : vector<8x128xf32>, vector<8x128xf32> -> vector<8x256xf32>
    %cst_81 = arith.constant dense<0.000000e+00> : vector<8x128xf32>
    %198 = tpu.matmul %197, %9, %cst_81 {dimension_numbers = #tpu.dot_dimension_numbers<[1], [0], [0], [1], [0, 0, 1, 1], [], []>} : vector<8x256xf32>, vector<256x128xf32>, vector<8x128xf32> -> vector<8x128xf32>
    %199 = math.tanh %198 : vector<8x128xf32>
    %cst_82 = arith.constant 1.000000e+00 : f32
    %200 = vector.broadcast %cst_82 : f32 to vector<8x128xf32>
    %201 = arith.subf %200, %192 : vector<8x128xf32>
    %202 = arith.mulf %201, %171 : vector<8x128xf32>
    %203 = arith.mulf %192, %199 : vector<8x128xf32>
    %204 = arith.addf %202, %203 : vector<8x128xf32>
    %205 = arith.index_cast %c5_i32 : i32 to index
    %c0_83 = arith.constant 0 : index
    %c0_84 = arith.constant 0 : index
    %206 = vector.load %arg6[%205, %c0_83, %c0_84] : memref<8x8x128xf32, #tpu.memory_space<vmem>>, vector<1x8x128xf32>
    %207 = vector.shape_cast %206 : vector<1x8x128xf32> to vector<8x128xf32>
    %208 = vector.shape_cast %204 : vector<8x128xf32> to vector<1x8x128xf32>
    tpu.vector_store %arg6[%205, %c0_83, %c0_84], %208 {strides = array<i32>} : memref<8x8x128xf32, #tpu.memory_space<vmem>>, vector<1x8x128xf32>,
    %c6_i32 = arith.constant 6 : i32
    %209 = arith.index_cast %c6_i32 : i32 to index
    %c0_85 = arith.constant 0 : index
    %c0_86 = arith.constant 0 : index
    %210 = vector.load %arg2[%209, %c0_85, %c0_86] : memref<8x8x128xf32, #tpu.memory_space<vmem>>, vector<1x8x128xf32>
    %211 = vector.shape_cast %210 : vector<1x8x128xf32> to vector<8x128xf32>
    %c8_i32_87 = arith.constant 8 : i32
    %212 = arith.muli %c6_i32, %c8_i32_87 : i32
    %213 = tpu.assume_multiple %212, 8 : i32
    %214 = arith.index_cast %213 : i32 to index
    %c0_88 = arith.constant 0 : index
    %215 = vector.load %arg8[%214, %c0_88] : memref<64x384xf32, #tpu.memory_space<vmem>>, vector<8x384xf32>
    %cst_89 = arith.constant dense<0.000000e+00> : vector<8x384xf32>
    %216 = tpu.matmul %204, %8, %cst_89 {dimension_numbers = #tpu.dot_dimension_numbers<[1], [0], [0], [1], [0, 0, 1, 1], [], []>} : vector<8x128xf32>, vector<128x384xf32>, vector<8x384xf32> -> vector<8x384xf32>
    %217 = arith.addf %215, %216 : vector<8x384xf32>
    %cst_90 = arith.constant 5.000000e-01 : f32
    %218 = vector.broadcast %cst_90 : f32 to vector<8x384xf32>
    %219 = arith.mulf %218, %217 : vector<8x384xf32>
    %220 = math.tanh %219 : vector<8x384xf32>
    %cst_91 = arith.constant 1.000000e+00 : f32
    %221 = vector.broadcast %cst_91 : f32 to vector<8x384xf32>
    %222 = arith.addf %221, %220 : vector<8x384xf32>
    %cst_92 = arith.constant 5.000000e-01 : f32
    %223 = vector.broadcast %cst_92 : f32 to vector<8x384xf32>
    %224 = arith.mulf %223, %222 : vector<8x384xf32>
    %225 = vector.extract_strided_slice %224 {offsets = [0, 0], sizes = [8, 128], strides = [1, 1]} : vector<8x384xf32> to vector<8x128xf32>
    %226 = vector.extract_strided_slice %224 {offsets = [0, 128], sizes = [8, 128], strides = [1, 1]} : vector<8x384xf32> to vector<8x128xf32>
    %227 = vector.extract_strided_slice %224 {offsets = [0, 256], sizes = [8, 128], strides = [1, 1]} : vector<8x384xf32> to vector<8x128xf32>
    %228 = arith.mulf %226, %211 : vector<8x128xf32>
    %229 = arith.mulf %227, %204 : vector<8x128xf32>
    %230 = tpu.concatenate %228, %229 in 1 : vector<8x128xf32>, vector<8x128xf32> -> vector<8x256xf32>
    %cst_93 = arith.constant dense<0.000000e+00> : vector<8x128xf32>
    %231 = tpu.matmul %230, %9, %cst_93 {dimension_numbers = #tpu.dot_dimension_numbers<[1], [0], [0], [1], [0, 0, 1, 1], [], []>} : vector<8x256xf32>, vector<256x128xf32>, vector<8x128xf32> -> vector<8x128xf32>
    %232 = math.tanh %231 : vector<8x128xf32>
    %cst_94 = arith.constant 1.000000e+00 : f32
    %233 = vector.broadcast %cst_94 : f32 to vector<8x128xf32>
    %234 = arith.subf %233, %225 : vector<8x128xf32>
    %235 = arith.mulf %234, %204 : vector<8x128xf32>
    %236 = arith.mulf %225, %232 : vector<8x128xf32>
    %237 = arith.addf %235, %236 : vector<8x128xf32>
    %238 = arith.index_cast %c6_i32 : i32 to index
    %c0_95 = arith.constant 0 : index
    %c0_96 = arith.constant 0 : index
    %239 = vector.load %arg6[%238, %c0_95, %c0_96] : memref<8x8x128xf32, #tpu.memory_space<vmem>>, vector<1x8x128xf32>
    %240 = vector.shape_cast %239 : vector<1x8x128xf32> to vector<8x128xf32>
    %241 = vector.shape_cast %237 : vector<8x128xf32> to vector<1x8x128xf32>
    tpu.vector_store %arg6[%238, %c0_95, %c0_96], %241 {strides = array<i32>} : memref<8x8x128xf32, #tpu.memory_space<vmem>>, vector<1x8x128xf32>,
    %c7_i32 = arith.constant 7 : i32
    %242 = arith.index_cast %c7_i32 : i32 to index
    %c0_97 = arith.constant 0 : index
    %c0_98 = arith.constant 0 : index
    %243 = vector.load %arg2[%242, %c0_97, %c0_98] : memref<8x8x128xf32, #tpu.memory_space<vmem>>, vector<1x8x128xf32>
    %244 = vector.shape_cast %243 : vector<1x8x128xf32> to vector<8x128xf32>
    %c8_i32_99 = arith.constant 8 : i32
    %245 = arith.muli %c7_i32, %c8_i32_99 : i32
    %246 = tpu.assume_multiple %245, 8 : i32
    %247 = arith.index_cast %246 : i32 to index
    %c0_100 = arith.constant 0 : index
    %248 = vector.load %arg8[%247, %c0_100] : memref<64x384xf32, #tpu.memory_space<vmem>>, vector<8x384xf32>
    %cst_101 = arith.constant dense<0.000000e+00> : vector<8x384xf32>
    %249 = tpu.matmul %237, %8, %cst_101 {dimension_numbers = #tpu.dot_dimension_numbers<[1], [0], [0], [1], [0, 0, 1, 1], [], []>} : vector<8x128xf32>, vector<128x384xf32>, vector<8x384xf32> -> vector<8x384xf32>
    %250 = arith.addf %248, %249 : vector<8x384xf32>
    %cst_102 = arith.constant 5.000000e-01 : f32
    %251 = vector.broadcast %cst_102 : f32 to vector<8x384xf32>
    %252 = arith.mulf %251, %250 : vector<8x384xf32>
    %253 = math.tanh %252 : vector<8x384xf32>
    %cst_103 = arith.constant 1.000000e+00 : f32
    %254 = vector.broadcast %cst_103 : f32 to vector<8x384xf32>
    %255 = arith.addf %254, %253 : vector<8x384xf32>
    %cst_104 = arith.constant 5.000000e-01 : f32
    %256 = vector.broadcast %cst_104 : f32 to vector<8x384xf32>
    %257 = arith.mulf %256, %255 : vector<8x384xf32>
    %258 = vector.extract_strided_slice %257 {offsets = [0, 0], sizes = [8, 128], strides = [1, 1]} : vector<8x384xf32> to vector<8x128xf32>
    %259 = vector.extract_strided_slice %257 {offsets = [0, 128], sizes = [8, 128], strides = [1, 1]} : vector<8x384xf32> to vector<8x128xf32>
    %260 = vector.extract_strided_slice %257 {offsets = [0, 256], sizes = [8, 128], strides = [1, 1]} : vector<8x384xf32> to vector<8x128xf32>
    %261 = arith.mulf %259, %244 : vector<8x128xf32>
    %262 = arith.mulf %260, %237 : vector<8x128xf32>
    %263 = tpu.concatenate %261, %262 in 1 : vector<8x128xf32>, vector<8x128xf32> -> vector<8x256xf32>
    %cst_105 = arith.constant dense<0.000000e+00> : vector<8x128xf32>
    %264 = tpu.matmul %263, %9, %cst_105 {dimension_numbers = #tpu.dot_dimension_numbers<[1], [0], [0], [1], [0, 0, 1, 1], [], []>} : vector<8x256xf32>, vector<256x128xf32>, vector<8x128xf32> -> vector<8x128xf32>
    %265 = math.tanh %264 : vector<8x128xf32>
    %cst_106 = arith.constant 1.000000e+00 : f32
    %266 = vector.broadcast %cst_106 : f32 to vector<8x128xf32>
    %267 = arith.subf %266, %258 : vector<8x128xf32>
    %268 = arith.mulf %267, %237 : vector<8x128xf32>
    %269 = arith.mulf %258, %265 : vector<8x128xf32>
    %270 = arith.addf %268, %269 : vector<8x128xf32>
    %271 = arith.index_cast %c7_i32 : i32 to index
    %c0_107 = arith.constant 0 : index
    %c0_108 = arith.constant 0 : index
    %272 = vector.load %arg6[%271, %c0_107, %c0_108] : memref<8x8x128xf32, #tpu.memory_space<vmem>>, vector<1x8x128xf32>
    %273 = vector.shape_cast %272 : vector<1x8x128xf32> to vector<8x128xf32>
    %274 = vector.shape_cast %270 : vector<8x128xf32> to vector<1x8x128xf32>
    tpu.vector_store %arg6[%271, %c0_107, %c0_108], %274 {strides = array<i32>} : memref<8x8x128xf32, #tpu.memory_space<vmem>>, vector<1x8x128xf32>,
    %c8_i32_109 = arith.constant 8 : i32
    %c0_110 = arith.constant 0 : index
    %c0_111 = arith.constant 0 : index
    %275 = vector.load %arg7[%c0_110, %c0_111] : memref<8x128xf32, #tpu.memory_space<vmem>>, vector<8x128xf32>
    tpu.vector_store %arg7[%c0_110, %c0_111], %270 {strides = array<i32>} : memref<8x128xf32, #tpu.memory_space<vmem>>, vector<8x128xf32>,
    return
  }
  func.func @transform_0(%arg0: i32, %arg1: i32) -> (i32, i32, i32) {
    %c0_i32 = arith.constant 0 : i32
    %c0_i32_0 = arith.constant 0 : i32
    return %arg1, %arg0, %c0_i32 : i32, i32, i32
  }
  func.func @transform_1(%arg0: i32, %arg1: i32) -> (i32, i32) {
    %c0_i32 = arith.constant 0 : i32
    %c0_i32_0 = arith.constant 0 : i32
    %c0_i32_1 = arith.constant 0 : i32
    return %c0_i32, %c0_i32_0 : i32, i32
  }
  func.func @transform_2(%arg0: i32, %arg1: i32) -> (i32, i32) {
    %c0_i32 = arith.constant 0 : i32
    %c0_i32_0 = arith.constant 0 : i32
    %c0_i32_1 = arith.constant 0 : i32
    return %c0_i32, %c0_i32_0 : i32, i32
  }
  func.func @transform_3(%arg0: i32, %arg1: i32) -> (i32, i32) {
    %c0_i32 = arith.constant 0 : i32
    %c0_i32_0 = arith.constant 0 : i32
    %c0_i32_1 = arith.constant 0 : i32
    return %c0_i32, %c0_i32_0 : i32, i32
  }
  func.func @transform_4(%arg0: i32, %arg1: i32) -> (i32, i32, i32) {
    %c0_i32 = arith.constant 0 : i32
    %c0_i32_0 = arith.constant 0 : i32
    return %arg1, %arg0, %c0_i32 : i32, i32, i32
  }
}

module attributes {stable_mosaic.version = 11 : i64} {
  func.func @gru_chunk_kernel(%arg0: i32, %arg1: i32, %arg2: memref<8x8x128xf32, #tpu.memory_space<vmem>>, %arg3: memref<128x384xf32, #tpu.memory_space<vmem>>, %arg4: memref<128x384xf32, #tpu.memory_space<vmem>>, %arg5: memref<256x128xf32, #tpu.memory_space<vmem>>, %arg6: memref<8x8x128xf32, #tpu.memory_space<vmem>>, %arg7: memref<8x128xf32, #tpu.memory_space<vmem>>, %arg8: memref<64x384xf32, #tpu.memory_space<vmem>>) attributes {dimension_semantics = [#tpu.dimension_semantics<parallel>, #tpu.dimension_semantics<arbitrary>], iteration_bounds = array<i64: 1, 1>, scalar_prefetch = 0 : i64, scratch_operands = 2 : i64, tpu.core_type = #tpu.core_type<tc>, window_params = [{transform_indices = @transform_0, window_bounds = array<i64: 8, 8, 128>}, {pipeline_mode = #tpu.pipeline_mode<synchronous>, transform_indices = @transform_1, window_bounds = array<i64: 128, 384>}, {pipeline_mode = #tpu.pipeline_mode<synchronous>, transform_indices = @transform_2, window_bounds = array<i64: 128, 384>}, {pipeline_mode = #tpu.pipeline_mode<synchronous>, transform_indices = @transform_3, window_bounds = array<i64: 256, 128>}, {transform_indices = @transform_4, window_bounds = array<i64: 8, 8, 128>}]} {
    %c0_i32 = arith.constant 0 : i32
    %0 = arith.cmpi eq, %arg1, %c0_i32 : i32
    %1 = arith.extui %0 : i1 to i32
    %c0_i32_0 = arith.constant 0 : i32
    %2 = arith.cmpi ne, %1, %c0_i32_0 : i32
    scf.if %2 {
      %cst_112 = arith.constant 0.000000e+00 : f32
      %276 = vector.broadcast %cst_112 : f32 to vector<8x128xf32>
      %c0_113 = arith.constant 0 : index
      %c0_114 = arith.constant 0 : index
      %277 = vector.load %arg7[%c0_113, %c0_114] : memref<8x128xf32, #tpu.memory_space<vmem>>, vector<8x128xf32>
      tpu.vector_store %arg7[%c0_113, %c0_114], %276 {strides = array<i32>} : memref<8x128xf32, #tpu.memory_space<vmem>>, vector<8x128xf32>,
    } else {
    }
    %c0 = arith.constant 0 : index
    %c0_1 = arith.constant 0 : index
    %c0_2 = arith.constant 0 : index
    %3 = vector.load %arg2[%c0, %c0_1, %c0_2] : memref<8x8x128xf32, #tpu.memory_space<vmem>>, vector<8x8x128xf32>
    %4 = vector.shape_cast %3 : vector<8x8x128xf32> to vector<64x128xf32>
    %c0_3 = arith.constant 0 : index
    %c0_4 = arith.constant 0 : index
    %5 = vector.load %arg3[%c0_3, %c0_4] : memref<128x384xf32, #tpu.memory_space<vmem>>, vector<128x384xf32>
    %cst = arith.constant dense<0.000000e+00> : vector<64x384xf32>
    %6 = tpu.matmul %4, %5, %cst {dimension_numbers = #tpu.dot_dimension_numbers<[1], [0], [0], [1], [0, 0, 1, 1], [], []>} : vector<64x128xf32>, vector<128x384xf32>, vector<64x384xf32> -> vector<64x384xf32>
    %c0_5 = arith.constant 0 : index
    %c0_6 = arith.constant 0 : index
    %7 = vector.load %arg8[%c0_5, %c0_6] : memref<64x384xf32, #tpu.memory_space<vmem>>, vector<64x384xf32>
    tpu.vector_store %arg8[%c0_5, %c0_6], %6 {strides = array<i32>} : memref<64x384xf32, #tpu.memory_space<vmem>>, vector<64x384xf32>,
    %c0_7 = arith.constant 0 : index
    %c0_8 = arith.constant 0 : index
    %8 = vector.load %arg4[%c0_7, %c0_8] : memref<128x384xf32, #tpu.memory_space<vmem>>, vector<128x384xf32>
    %c0_9 = arith.constant 0 : index
    %c0_10 = arith.constant 0 : index
    %9 = vector.load %arg5[%c0_9, %c0_10] : memref<256x128xf32, #tpu.memory_space<vmem>>, vector<256x128xf32>
    %c0_11 = arith.constant 0 : index
    %c0_12 = arith.constant 0 : index
    %10 = vector.load %arg7[%c0_11, %c0_12] : memref<8x128xf32, #tpu.memory_space<vmem>>, vector<8x128xf32>
    %c0_i32_13 = arith.constant 0 : i32
    %11 = arith.index_cast %c0_i32_13 : i32 to index
    %c0_14 = arith.constant 0 : index
    %c0_15 = arith.constant 0 : index
    %12 = vector.load %arg2[%11, %c0_14, %c0_15] : memref<8x8x128xf32, #tpu.memory_space<vmem>>, vector<1x8x128xf32>
    %13 = vector.shape_cast %12 : vector<1x8x128xf32> to vector<8x128xf32>
    %c8_i32 = arith.constant 8 : i32
    %14 = arith.muli %c0_i32_13, %c8_i32 : i32
    %15 = tpu.assume_multiple %14, 8 : i32
    %16 = arith.index_cast %15 : i32 to index
    %c0_16 = arith.constant 0 : index
    %17 = vector.load %arg8[%16, %c0_16] : memref<64x384xf32, #tpu.memory_space<vmem>>, vector<8x384xf32>
    %cst_17 = arith.constant dense<0.000000e+00> : vector<8x384xf32>
    %18 = tpu.matmul %10, %8, %cst_17 {dimension_numbers = #tpu.dot_dimension_numbers<[1], [0], [0], [1], [0, 0, 1, 1], [], []>} : vector<8x128xf32>, vector<128x384xf32>, vector<8x384xf32> -> vector<8x384xf32>
    %19 = arith.addf %17, %18 : vector<8x384xf32>
    %cst_18 = arith.constant 5.000000e-01 : f32
    %20 = vector.broadcast %cst_18 : f32 to vector<8x384xf32>
    %21 = arith.mulf %20, %19 : vector<8x384xf32>
    %22 = math.tanh %21 : vector<8x384xf32>
    %cst_19 = arith.constant 1.000000e+00 : f32
    %23 = vector.broadcast %cst_19 : f32 to vector<8x384xf32>
    %24 = arith.addf %23, %22 : vector<8x384xf32>
    %cst_20 = arith.constant 5.000000e-01 : f32
    %25 = vector.broadcast %cst_20 : f32 to vector<8x384xf32>
    %26 = arith.mulf %25, %24 : vector<8x384xf32>
    %27 = vector.extract_strided_slice %26 {offsets = [0, 0], sizes = [8, 128], strides = [1, 1]} : vector<8x384xf32> to vector<8x128xf32>
    %28 = vector.extract_strided_slice %26 {offsets = [0, 128], sizes = [8, 128], strides = [1, 1]} : vector<8x384xf32> to vector<8x128xf32>
    %29 = vector.extract_strided_slice %26 {offsets = [0, 256], sizes = [8, 128], strides = [1, 1]} : vector<8x384xf32> to vector<8x128xf32>
    %30 = arith.mulf %28, %13 : vector<8x128xf32>
    %31 = arith.mulf %29, %10 : vector<8x128xf32>
    %32 = tpu.concatenate %30, %31 in 1 : vector<8x128xf32>, vector<8x128xf32> -> vector<8x256xf32>
    %cst_21 = arith.constant dense<0.000000e+00> : vector<8x128xf32>
    %33 = tpu.matmul %32, %9, %cst_21 {dimension_numbers = #tpu.dot_dimension_numbers<[1], [0], [0], [1], [0, 0, 1, 1], [], []>} : vector<8x256xf32>, vector<256x128xf32>, vector<8x128xf32> -> vector<8x128xf32>
    %34 = math.tanh %33 : vector<8x128xf32>
    %cst_22 = arith.constant 1.000000e+00 : f32
    %35 = vector.broadcast %cst_22 : f32 to vector<8x128xf32>
    %36 = arith.subf %35, %27 : vector<8x128xf32>
    %37 = arith.mulf %36, %10 : vector<8x128xf32>
    %38 = arith.mulf %27, %34 : vector<8x128xf32>
    %39 = arith.addf %37, %38 : vector<8x128xf32>
    %40 = arith.index_cast %c0_i32_13 : i32 to index
    %c0_23 = arith.constant 0 : index
    %c0_24 = arith.constant 0 : index
    %41 = vector.load %arg6[%40, %c0_23, %c0_24] : memref<8x8x128xf32, #tpu.memory_space<vmem>>, vector<1x8x128xf32>
    %42 = vector.shape_cast %41 : vector<1x8x128xf32> to vector<8x128xf32>
    %43 = vector.shape_cast %39 : vector<8x128xf32> to vector<1x8x128xf32>
    tpu.vector_store %arg6[%40, %c0_23, %c0_24], %43 {strides = array<i32>} : memref<8x8x128xf32, #tpu.memory_space<vmem>>, vector<1x8x128xf32>,
    %c1_i32 = arith.constant 1 : i32
    %44 = arith.index_cast %c1_i32 : i32 to index
    %c0_25 = arith.constant 0 : index
    %c0_26 = arith.constant 0 : index
    %45 = vector.load %arg2[%44, %c0_25, %c0_26] : memref<8x8x128xf32, #tpu.memory_space<vmem>>, vector<1x8x128xf32>
    %46 = vector.shape_cast %45 : vector<1x8x128xf32> to vector<8x128xf32>
    %c8_i32_27 = arith.constant 8 : i32
    %47 = arith.muli %c1_i32, %c8_i32_27 : i32
    %48 = tpu.assume_multiple %47, 8 : i32
    %49 = arith.index_cast %48 : i32 to index
    %c0_28 = arith.constant 0 : index
    %50 = vector.load %arg8[%49, %c0_28] : memref<64x384xf32, #tpu.memory_space<vmem>>, vector<8x384xf32>
    %cst_29 = arith.constant dense<0.000000e+00> : vector<8x384xf32>
    %51 = tpu.matmul %39, %8, %cst_29 {dimension_numbers = #tpu.dot_dimension_numbers<[1], [0], [0], [1], [0, 0, 1, 1], [], []>} : vector<8x128xf32>, vector<128x384xf32>, vector<8x384xf32> -> vector<8x384xf32>
    %52 = arith.addf %50, %51 : vector<8x384xf32>
    %cst_30 = arith.constant 5.000000e-01 : f32
    %53 = vector.broadcast %cst_30 : f32 to vector<8x384xf32>
    %54 = arith.mulf %53, %52 : vector<8x384xf32>
    %55 = math.tanh %54 : vector<8x384xf32>
    %cst_31 = arith.constant 1.000000e+00 : f32
    %56 = vector.broadcast %cst_31 : f32 to vector<8x384xf32>
    %57 = arith.addf %56, %55 : vector<8x384xf32>
    %cst_32 = arith.constant 5.000000e-01 : f32
    %58 = vector.broadcast %cst_32 : f32 to vector<8x384xf32>
    %59 = arith.mulf %58, %57 : vector<8x384xf32>
    %60 = vector.extract_strided_slice %59 {offsets = [0, 0], sizes = [8, 128], strides = [1, 1]} : vector<8x384xf32> to vector<8x128xf32>
    %61 = vector.extract_strided_slice %59 {offsets = [0, 128], sizes = [8, 128], strides = [1, 1]} : vector<8x384xf32> to vector<8x128xf32>
    %62 = vector.extract_strided_slice %59 {offsets = [0, 256], sizes = [8, 128], strides = [1, 1]} : vector<8x384xf32> to vector<8x128xf32>
    %63 = arith.mulf %61, %46 : vector<8x128xf32>
    %64 = arith.mulf %62, %39 : vector<8x128xf32>
    %65 = tpu.concatenate %63, %64 in 1 : vector<8x128xf32>, vector<8x128xf32> -> vector<8x256xf32>
    %cst_33 = arith.constant dense<0.000000e+00> : vector<8x128xf32>
    %66 = tpu.matmul %65, %9, %cst_33 {dimension_numbers = #tpu.dot_dimension_numbers<[1], [0], [0], [1], [0, 0, 1, 1], [], []>} : vector<8x256xf32>, vector<256x128xf32>, vector<8x128xf32> -> vector<8x128xf32>
    %67 = math.tanh %66 : vector<8x128xf32>
    %cst_34 = arith.constant 1.000000e+00 : f32
    %68 = vector.broadcast %cst_34 : f32 to vector<8x128xf32>
    %69 = arith.subf %68, %60 : vector<8x128xf32>
    %70 = arith.mulf %69, %39 : vector<8x128xf32>
    %71 = arith.mulf %60, %67 : vector<8x128xf32>
    %72 = arith.addf %70, %71 : vector<8x128xf32>
    %73 = arith.index_cast %c1_i32 : i32 to index
    %c0_35 = arith.constant 0 : index
    %c0_36 = arith.constant 0 : index
    %74 = vector.load %arg6[%73, %c0_35, %c0_36] : memref<8x8x128xf32, #tpu.memory_space<vmem>>, vector<1x8x128xf32>
    %75 = vector.shape_cast %74 : vector<1x8x128xf32> to vector<8x128xf32>
    %76 = vector.shape_cast %72 : vector<8x128xf32> to vector<1x8x128xf32>
    tpu.vector_store %arg6[%73, %c0_35, %c0_36], %76 {strides = array<i32>} : memref<8x8x128xf32, #tpu.memory_space<vmem>>, vector<1x8x128xf32>,
    %c2_i32 = arith.constant 2 : i32
    %77 = arith.index_cast %c2_i32 : i32 to index
    %c0_37 = arith.constant 0 : index
    %c0_38 = arith.constant 0 : index
    %78 = vector.load %arg2[%77, %c0_37, %c0_38] : memref<8x8x128xf32, #tpu.memory_space<vmem>>, vector<1x8x128xf32>
    %79 = vector.shape_cast %78 : vector<1x8x128xf32> to vector<8x128xf32>
    %c8_i32_39 = arith.constant 8 : i32
    %80 = arith.muli %c2_i32, %c8_i32_39 : i32
    %81 = tpu.assume_multiple %80, 8 : i32
    %82 = arith.index_cast %81 : i32 to index
    %c0_40 = arith.constant 0 : index
    %83 = vector.load %arg8[%82, %c0_40] : memref<64x384xf32, #tpu.memory_space<vmem>>, vector<8x384xf32>
    %cst_41 = arith.constant dense<0.000000e+00> : vector<8x384xf32>
    %84 = tpu.matmul %72, %8, %cst_41 {dimension_numbers = #tpu.dot_dimension_numbers<[1], [0], [0], [1], [0, 0, 1, 1], [], []>} : vector<8x128xf32>, vector<128x384xf32>, vector<8x384xf32> -> vector<8x384xf32>
    %85 = arith.addf %83, %84 : vector<8x384xf32>
    %cst_42 = arith.constant 5.000000e-01 : f32
    %86 = vector.broadcast %cst_42 : f32 to vector<8x384xf32>
    %87 = arith.mulf %86, %85 : vector<8x384xf32>
    %88 = math.tanh %87 : vector<8x384xf32>
    %cst_43 = arith.constant 1.000000e+00 : f32
    %89 = vector.broadcast %cst_43 : f32 to vector<8x384xf32>
    %90 = arith.addf %89, %88 : vector<8x384xf32>
    %cst_44 = arith.constant 5.000000e-01 : f32
    %91 = vector.broadcast %cst_44 : f32 to vector<8x384xf32>
    %92 = arith.mulf %91, %90 : vector<8x384xf32>
    %93 = vector.extract_strided_slice %92 {offsets = [0, 0], sizes = [8, 128], strides = [1, 1]} : vector<8x384xf32> to vector<8x128xf32>
    %94 = vector.extract_strided_slice %92 {offsets = [0, 128], sizes = [8, 128], strides = [1, 1]} : vector<8x384xf32> to vector<8x128xf32>
    %95 = vector.extract_strided_slice %92 {offsets = [0, 256], sizes = [8, 128], strides = [1, 1]} : vector<8x384xf32> to vector<8x128xf32>
    %96 = arith.mulf %94, %79 : vector<8x128xf32>
    %97 = arith.mulf %95, %72 : vector<8x128xf32>
    %98 = tpu.concatenate %96, %97 in 1 : vector<8x128xf32>, vector<8x128xf32> -> vector<8x256xf32>
    %cst_45 = arith.constant dense<0.000000e+00> : vector<8x128xf32>
    %99 = tpu.matmul %98, %9, %cst_45 {dimension_numbers = #tpu.dot_dimension_numbers<[1], [0], [0], [1], [0, 0, 1, 1], [], []>} : vector<8x256xf32>, vector<256x128xf32>, vector<8x128xf32> -> vector<8x128xf32>
    %100 = math.tanh %99 : vector<8x128xf32>
    %cst_46 = arith.constant 1.000000e+00 : f32
    %101 = vector.broadcast %cst_46 : f32 to vector<8x128xf32>
    %102 = arith.subf %101, %93 : vector<8x128xf32>
    %103 = arith.mulf %102, %72 : vector<8x128xf32>
    %104 = arith.mulf %93, %100 : vector<8x128xf32>
    %105 = arith.addf %103, %104 : vector<8x128xf32>
    %106 = arith.index_cast %c2_i32 : i32 to index
    %c0_47 = arith.constant 0 : index
    %c0_48 = arith.constant 0 : index
    %107 = vector.load %arg6[%106, %c0_47, %c0_48] : memref<8x8x128xf32, #tpu.memory_space<vmem>>, vector<1x8x128xf32>
    %108 = vector.shape_cast %107 : vector<1x8x128xf32> to vector<8x128xf32>
    %109 = vector.shape_cast %105 : vector<8x128xf32> to vector<1x8x128xf32>
    tpu.vector_store %arg6[%106, %c0_47, %c0_48], %109 {strides = array<i32>} : memref<8x8x128xf32, #tpu.memory_space<vmem>>, vector<1x8x128xf32>,
    %c3_i32 = arith.constant 3 : i32
    %110 = arith.index_cast %c3_i32 : i32 to index
    %c0_49 = arith.constant 0 : index
    %c0_50 = arith.constant 0 : index
    %111 = vector.load %arg2[%110, %c0_49, %c0_50] : memref<8x8x128xf32, #tpu.memory_space<vmem>>, vector<1x8x128xf32>
    %112 = vector.shape_cast %111 : vector<1x8x128xf32> to vector<8x128xf32>
    %c8_i32_51 = arith.constant 8 : i32
    %113 = arith.muli %c3_i32, %c8_i32_51 : i32
    %114 = tpu.assume_multiple %113, 8 : i32
    %115 = arith.index_cast %114 : i32 to index
    %c0_52 = arith.constant 0 : index
    %116 = vector.load %arg8[%115, %c0_52] : memref<64x384xf32, #tpu.memory_space<vmem>>, vector<8x384xf32>
    %cst_53 = arith.constant dense<0.000000e+00> : vector<8x384xf32>
    %117 = tpu.matmul %105, %8, %cst_53 {dimension_numbers = #tpu.dot_dimension_numbers<[1], [0], [0], [1], [0, 0, 1, 1], [], []>} : vector<8x128xf32>, vector<128x384xf32>, vector<8x384xf32> -> vector<8x384xf32>
    %118 = arith.addf %116, %117 : vector<8x384xf32>
    %cst_54 = arith.constant 5.000000e-01 : f32
    %119 = vector.broadcast %cst_54 : f32 to vector<8x384xf32>
    %120 = arith.mulf %119, %118 : vector<8x384xf32>
    %121 = math.tanh %120 : vector<8x384xf32>
    %cst_55 = arith.constant 1.000000e+00 : f32
    %122 = vector.broadcast %cst_55 : f32 to vector<8x384xf32>
    %123 = arith.addf %122, %121 : vector<8x384xf32>
    %cst_56 = arith.constant 5.000000e-01 : f32
    %124 = vector.broadcast %cst_56 : f32 to vector<8x384xf32>
    %125 = arith.mulf %124, %123 : vector<8x384xf32>
    %126 = vector.extract_strided_slice %125 {offsets = [0, 0], sizes = [8, 128], strides = [1, 1]} : vector<8x384xf32> to vector<8x128xf32>
    %127 = vector.extract_strided_slice %125 {offsets = [0, 128], sizes = [8, 128], strides = [1, 1]} : vector<8x384xf32> to vector<8x128xf32>
    %128 = vector.extract_strided_slice %125 {offsets = [0, 256], sizes = [8, 128], strides = [1, 1]} : vector<8x384xf32> to vector<8x128xf32>
    %129 = arith.mulf %127, %112 : vector<8x128xf32>
    %130 = arith.mulf %128, %105 : vector<8x128xf32>
    %131 = tpu.concatenate %129, %130 in 1 : vector<8x128xf32>, vector<8x128xf32> -> vector<8x256xf32>
    %cst_57 = arith.constant dense<0.000000e+00> : vector<8x128xf32>
    %132 = tpu.matmul %131, %9, %cst_57 {dimension_numbers = #tpu.dot_dimension_numbers<[1], [0], [0], [1], [0, 0, 1, 1], [], []>} : vector<8x256xf32>, vector<256x128xf32>, vector<8x128xf32> -> vector<8x128xf32>
    %133 = math.tanh %132 : vector<8x128xf32>
    %cst_58 = arith.constant 1.000000e+00 : f32
    %134 = vector.broadcast %cst_58 : f32 to vector<8x128xf32>
    %135 = arith.subf %134, %126 : vector<8x128xf32>
    %136 = arith.mulf %135, %105 : vector<8x128xf32>
    %137 = arith.mulf %126, %133 : vector<8x128xf32>
    %138 = arith.addf %136, %137 : vector<8x128xf32>
    %139 = arith.index_cast %c3_i32 : i32 to index
    %c0_59 = arith.constant 0 : index
    %c0_60 = arith.constant 0 : index
    %140 = vector.load %arg6[%139, %c0_59, %c0_60] : memref<8x8x128xf32, #tpu.memory_space<vmem>>, vector<1x8x128xf32>
    %141 = vector.shape_cast %140 : vector<1x8x128xf32> to vector<8x128xf32>
    %142 = vector.shape_cast %138 : vector<8x128xf32> to vector<1x8x128xf32>
    tpu.vector_store %arg6[%139, %c0_59, %c0_60], %142 {strides = array<i32>} : memref<8x8x128xf32, #tpu.memory_space<vmem>>, vector<1x8x128xf32>,
    %c4_i32 = arith.constant 4 : i32
    %143 = arith.index_cast %c4_i32 : i32 to index
    %c0_61 = arith.constant 0 : index
    %c0_62 = arith.constant 0 : index
    %144 = vector.load %arg2[%143, %c0_61, %c0_62] : memref<8x8x128xf32, #tpu.memory_space<vmem>>, vector<1x8x128xf32>
    %145 = vector.shape_cast %144 : vector<1x8x128xf32> to vector<8x128xf32>
    %c8_i32_63 = arith.constant 8 : i32
    %146 = arith.muli %c4_i32, %c8_i32_63 : i32
    %147 = tpu.assume_multiple %146, 8 : i32
    %148 = arith.index_cast %147 : i32 to index
    %c0_64 = arith.constant 0 : index
    %149 = vector.load %arg8[%148, %c0_64] : memref<64x384xf32, #tpu.memory_space<vmem>>, vector<8x384xf32>
    %cst_65 = arith.constant dense<0.000000e+00> : vector<8x384xf32>
    %150 = tpu.matmul %138, %8, %cst_65 {dimension_numbers = #tpu.dot_dimension_numbers<[1], [0], [0], [1], [0, 0, 1, 1], [], []>} : vector<8x128xf32>, vector<128x384xf32>, vector<8x384xf32> -> vector<8x384xf32>
    %151 = arith.addf %149, %150 : vector<8x384xf32>
    %cst_66 = arith.constant 5.000000e-01 : f32
    %152 = vector.broadcast %cst_66 : f32 to vector<8x384xf32>
    %153 = arith.mulf %152, %151 : vector<8x384xf32>
    %154 = math.tanh %153 : vector<8x384xf32>
    %cst_67 = arith.constant 1.000000e+00 : f32
    %155 = vector.broadcast %cst_67 : f32 to vector<8x384xf32>
    %156 = arith.addf %155, %154 : vector<8x384xf32>
    %cst_68 = arith.constant 5.000000e-01 : f32
    %157 = vector.broadcast %cst_68 : f32 to vector<8x384xf32>
    %158 = arith.mulf %157, %156 : vector<8x384xf32>
    %159 = vector.extract_strided_slice %158 {offsets = [0, 0], sizes = [8, 128], strides = [1, 1]} : vector<8x384xf32> to vector<8x128xf32>
    %160 = vector.extract_strided_slice %158 {offsets = [0, 128], sizes = [8, 128], strides = [1, 1]} : vector<8x384xf32> to vector<8x128xf32>
    %161 = vector.extract_strided_slice %158 {offsets = [0, 256], sizes = [8, 128], strides = [1, 1]} : vector<8x384xf32> to vector<8x128xf32>
    %162 = arith.mulf %160, %145 : vector<8x128xf32>
    %163 = arith.mulf %161, %138 : vector<8x128xf32>
    %164 = tpu.concatenate %162, %163 in 1 : vector<8x128xf32>, vector<8x128xf32> -> vector<8x256xf32>
    %cst_69 = arith.constant dense<0.000000e+00> : vector<8x128xf32>
    %165 = tpu.matmul %164, %9, %cst_69 {dimension_numbers = #tpu.dot_dimension_numbers<[1], [0], [0], [1], [0, 0, 1, 1], [], []>} : vector<8x256xf32>, vector<256x128xf32>, vector<8x128xf32> -> vector<8x128xf32>
    %166 = math.tanh %165 : vector<8x128xf32>
    %cst_70 = arith.constant 1.000000e+00 : f32
    %167 = vector.broadcast %cst_70 : f32 to vector<8x128xf32>
    %168 = arith.subf %167, %159 : vector<8x128xf32>
    %169 = arith.mulf %168, %138 : vector<8x128xf32>
    %170 = arith.mulf %159, %166 : vector<8x128xf32>
    %171 = arith.addf %169, %170 : vector<8x128xf32>
    %172 = arith.index_cast %c4_i32 : i32 to index
    %c0_71 = arith.constant 0 : index
    %c0_72 = arith.constant 0 : index
    %173 = vector.load %arg6[%172, %c0_71, %c0_72] : memref<8x8x128xf32, #tpu.memory_space<vmem>>, vector<1x8x128xf32>
    %174 = vector.shape_cast %173 : vector<1x8x128xf32> to vector<8x128xf32>
    %175 = vector.shape_cast %171 : vector<8x128xf32> to vector<1x8x128xf32>
    tpu.vector_store %arg6[%172, %c0_71, %c0_72], %175 {strides = array<i32>} : memref<8x8x128xf32, #tpu.memory_space<vmem>>, vector<1x8x128xf32>,
    %c5_i32 = arith.constant 5 : i32
    %176 = arith.index_cast %c5_i32 : i32 to index
    %c0_73 = arith.constant 0 : index
    %c0_74 = arith.constant 0 : index
    %177 = vector.load %arg2[%176, %c0_73, %c0_74] : memref<8x8x128xf32, #tpu.memory_space<vmem>>, vector<1x8x128xf32>
    %178 = vector.shape_cast %177 : vector<1x8x128xf32> to vector<8x128xf32>
    %c8_i32_75 = arith.constant 8 : i32
    %179 = arith.muli %c5_i32, %c8_i32_75 : i32
    %180 = tpu.assume_multiple %179, 8 : i32
    %181 = arith.index_cast %180 : i32 to index
    %c0_76 = arith.constant 0 : index
    %182 = vector.load %arg8[%181, %c0_76] : memref<64x384xf32, #tpu.memory_space<vmem>>, vector<8x384xf32>
    %cst_77 = arith.constant dense<0.000000e+00> : vector<8x384xf32>
    %183 = tpu.matmul %171, %8, %cst_77 {dimension_numbers = #tpu.dot_dimension_numbers<[1], [0], [0], [1], [0, 0, 1, 1], [], []>} : vector<8x128xf32>, vector<128x384xf32>, vector<8x384xf32> -> vector<8x384xf32>
    %184 = arith.addf %182, %183 : vector<8x384xf32>
    %cst_78 = arith.constant 5.000000e-01 : f32
    %185 = vector.broadcast %cst_78 : f32 to vector<8x384xf32>
    %186 = arith.mulf %185, %184 : vector<8x384xf32>
    %187 = math.tanh %186 : vector<8x384xf32>
    %cst_79 = arith.constant 1.000000e+00 : f32
    %188 = vector.broadcast %cst_79 : f32 to vector<8x384xf32>
    %189 = arith.addf %188, %187 : vector<8x384xf32>
    %cst_80 = arith.constant 5.000000e-01 : f32
    %190 = vector.broadcast %cst_80 : f32 to vector<8x384xf32>
    %191 = arith.mulf %190, %189 : vector<8x384xf32>
    %192 = vector.extract_strided_slice %191 {offsets = [0, 0], sizes = [8, 128], strides = [1, 1]} : vector<8x384xf32> to vector<8x128xf32>
    %193 = vector.extract_strided_slice %191 {offsets = [0, 128], sizes = [8, 128], strides = [1, 1]} : vector<8x384xf32> to vector<8x128xf32>
    %194 = vector.extract_strided_slice %191 {offsets = [0, 256], sizes = [8, 128], strides = [1, 1]} : vector<8x384xf32> to vector<8x128xf32>
    %195 = arith.mulf %193, %178 : vector<8x128xf32>
    %196 = arith.mulf %194, %171 : vector<8x128xf32>
    %197 = tpu.concatenate %195, %196 in 1 : vector<8x128xf32>, vector<8x128xf32> -> vector<8x256xf32>
    %cst_81 = arith.constant dense<0.000000e+00> : vector<8x128xf32>
    %198 = tpu.matmul %197, %9, %cst_81 {dimension_numbers = #tpu.dot_dimension_numbers<[1], [0], [0], [1], [0, 0, 1, 1], [], []>} : vector<8x256xf32>, vector<256x128xf32>, vector<8x128xf32> -> vector<8x128xf32>
    %199 = math.tanh %198 : vector<8x128xf32>
    %cst_82 = arith.constant 1.000000e+00 : f32
    %200 = vector.broadcast %cst_82 : f32 to vector<8x128xf32>
    %201 = arith.subf %200, %192 : vector<8x128xf32>
    %202 = arith.mulf %201, %171 : vector<8x128xf32>
    %203 = arith.mulf %192, %199 : vector<8x128xf32>
    %204 = arith.addf %202, %203 : vector<8x128xf32>
    %205 = arith.index_cast %c5_i32 : i32 to index
    %c0_83 = arith.constant 0 : index
    %c0_84 = arith.constant 0 : index
    %206 = vector.load %arg6[%205, %c0_83, %c0_84] : memref<8x8x128xf32, #tpu.memory_space<vmem>>, vector<1x8x128xf32>
    %207 = vector.shape_cast %206 : vector<1x8x128xf32> to vector<8x128xf32>
    %208 = vector.shape_cast %204 : vector<8x128xf32> to vector<1x8x128xf32>
    tpu.vector_store %arg6[%205, %c0_83, %c0_84], %208 {strides = array<i32>} : memref<8x8x128xf32, #tpu.memory_space<vmem>>, vector<1x8x128xf32>,
    %c6_i32 = arith.constant 6 : i32
    %209 = arith.index_cast %c6_i32 : i32 to index
    %c0_85 = arith.constant 0 : index
    %c0_86 = arith.constant 0 : index
    %210 = vector.load %arg2[%209, %c0_85, %c0_86] : memref<8x8x128xf32, #tpu.memory_space<vmem>>, vector<1x8x128xf32>
    %211 = vector.shape_cast %210 : vector<1x8x128xf32> to vector<8x128xf32>
    %c8_i32_87 = arith.constant 8 : i32
    %212 = arith.muli %c6_i32, %c8_i32_87 : i32
    %213 = tpu.assume_multiple %212, 8 : i32
    %214 = arith.index_cast %213 : i32 to index
    %c0_88 = arith.constant 0 : index
    %215 = vector.load %arg8[%214, %c0_88] : memref<64x384xf32, #tpu.memory_space<vmem>>, vector<8x384xf32>
    %cst_89 = arith.constant dense<0.000000e+00> : vector<8x384xf32>
    %216 = tpu.matmul %204, %8, %cst_89 {dimension_numbers = #tpu.dot_dimension_numbers<[1], [0], [0], [1], [0, 0, 1, 1], [], []>} : vector<8x128xf32>, vector<128x384xf32>, vector<8x384xf32> -> vector<8x384xf32>
    %217 = arith.addf %215, %216 : vector<8x384xf32>
    %cst_90 = arith.constant 5.000000e-01 : f32
    %218 = vector.broadcast %cst_90 : f32 to vector<8x384xf32>
    %219 = arith.mulf %218, %217 : vector<8x384xf32>
    %220 = math.tanh %219 : vector<8x384xf32>
    %cst_91 = arith.constant 1.000000e+00 : f32
    %221 = vector.broadcast %cst_91 : f32 to vector<8x384xf32>
    %222 = arith.addf %221, %220 : vector<8x384xf32>
    %cst_92 = arith.constant 5.000000e-01 : f32
    %223 = vector.broadcast %cst_92 : f32 to vector<8x384xf32>
    %224 = arith.mulf %223, %222 : vector<8x384xf32>
    %225 = vector.extract_strided_slice %224 {offsets = [0, 0], sizes = [8, 128], strides = [1, 1]} : vector<8x384xf32> to vector<8x128xf32>
    %226 = vector.extract_strided_slice %224 {offsets = [0, 128], sizes = [8, 128], strides = [1, 1]} : vector<8x384xf32> to vector<8x128xf32>
    %227 = vector.extract_strided_slice %224 {offsets = [0, 256], sizes = [8, 128], strides = [1, 1]} : vector<8x384xf32> to vector<8x128xf32>
    %228 = arith.mulf %226, %211 : vector<8x128xf32>
    %229 = arith.mulf %227, %204 : vector<8x128xf32>
    %230 = tpu.concatenate %228, %229 in 1 : vector<8x128xf32>, vector<8x128xf32> -> vector<8x256xf32>
    %cst_93 = arith.constant dense<0.000000e+00> : vector<8x128xf32>
    %231 = tpu.matmul %230, %9, %cst_93 {dimension_numbers = #tpu.dot_dimension_numbers<[1], [0], [0], [1], [0, 0, 1, 1], [], []>} : vector<8x256xf32>, vector<256x128xf32>, vector<8x128xf32> -> vector<8x128xf32>
    %232 = math.tanh %231 : vector<8x128xf32>
    %cst_94 = arith.constant 1.000000e+00 : f32
    %233 = vector.broadcast %cst_94 : f32 to vector<8x128xf32>
    %234 = arith.subf %233, %225 : vector<8x128xf32>
    %235 = arith.mulf %234, %204 : vector<8x128xf32>
    %236 = arith.mulf %225, %232 : vector<8x128xf32>
    %237 = arith.addf %235, %236 : vector<8x128xf32>
    %238 = arith.index_cast %c6_i32 : i32 to index
    %c0_95 = arith.constant 0 : index
    %c0_96 = arith.constant 0 : index
    %239 = vector.load %arg6[%238, %c0_95, %c0_96] : memref<8x8x128xf32, #tpu.memory_space<vmem>>, vector<1x8x128xf32>
    %240 = vector.shape_cast %239 : vector<1x8x128xf32> to vector<8x128xf32>
    %241 = vector.shape_cast %237 : vector<8x128xf32> to vector<1x8x128xf32>
    tpu.vector_store %arg6[%238, %c0_95, %c0_96], %241 {strides = array<i32>} : memref<8x8x128xf32, #tpu.memory_space<vmem>>, vector<1x8x128xf32>,
    %c7_i32 = arith.constant 7 : i32
    %242 = arith.index_cast %c7_i32 : i32 to index
    %c0_97 = arith.constant 0 : index
    %c0_98 = arith.constant 0 : index
    %243 = vector.load %arg2[%242, %c0_97, %c0_98] : memref<8x8x128xf32, #tpu.memory_space<vmem>>, vector<1x8x128xf32>
    %244 = vector.shape_cast %243 : vector<1x8x128xf32> to vector<8x128xf32>
    %c8_i32_99 = arith.constant 8 : i32
    %245 = arith.muli %c7_i32, %c8_i32_99 : i32
    %246 = tpu.assume_multiple %245, 8 : i32
    %247 = arith.index_cast %246 : i32 to index
    %c0_100 = arith.constant 0 : index
    %248 = vector.load %arg8[%247, %c0_100] : memref<64x384xf32, #tpu.memory_space<vmem>>, vector<8x384xf32>
    %cst_101 = arith.constant dense<0.000000e+00> : vector<8x384xf32>
    %249 = tpu.matmul %237, %8, %cst_101 {dimension_numbers = #tpu.dot_dimension_numbers<[1], [0], [0], [1], [0, 0, 1, 1], [], []>} : vector<8x128xf32>, vector<128x384xf32>, vector<8x384xf32> -> vector<8x384xf32>
    %250 = arith.addf %248, %249 : vector<8x384xf32>
    %cst_102 = arith.constant 5.000000e-01 : f32
    %251 = vector.broadcast %cst_102 : f32 to vector<8x384xf32>
    %252 = arith.mulf %251, %250 : vector<8x384xf32>
    %253 = math.tanh %252 : vector<8x384xf32>
    %cst_103 = arith.constant 1.000000e+00 : f32
    %254 = vector.broadcast %cst_103 : f32 to vector<8x384xf32>
    %255 = arith.addf %254, %253 : vector<8x384xf32>
    %cst_104 = arith.constant 5.000000e-01 : f32
    %256 = vector.broadcast %cst_104 : f32 to vector<8x384xf32>
    %257 = arith.mulf %256, %255 : vector<8x384xf32>
    %258 = vector.extract_strided_slice %257 {offsets = [0, 0], sizes = [8, 128], strides = [1, 1]} : vector<8x384xf32> to vector<8x128xf32>
    %259 = vector.extract_strided_slice %257 {offsets = [0, 128], sizes = [8, 128], strides = [1, 1]} : vector<8x384xf32> to vector<8x128xf32>
    %260 = vector.extract_strided_slice %257 {offsets = [0, 256], sizes = [8, 128], strides = [1, 1]} : vector<8x384xf32> to vector<8x128xf32>
    %261 = arith.mulf %259, %244 : vector<8x128xf32>
    %262 = arith.mulf %260, %237 : vector<8x128xf32>
    %263 = tpu.concatenate %261, %262 in 1 : vector<8x128xf32>, vector<8x128xf32> -> vector<8x256xf32>
    %cst_105 = arith.constant dense<0.000000e+00> : vector<8x128xf32>
    %264 = tpu.matmul %263, %9, %cst_105 {dimension_numbers = #tpu.dot_dimension_numbers<[1], [0], [0], [1], [0, 0, 1, 1], [], []>} : vector<8x256xf32>, vector<256x128xf32>, vector<8x128xf32> -> vector<8x128xf32>
    %265 = math.tanh %264 : vector<8x128xf32>
    %cst_106 = arith.constant 1.000000e+00 : f32
    %266 = vector.broadcast %cst_106 : f32 to vector<8x128xf32>
    %267 = arith.subf %266, %258 : vector<8x128xf32>
    %268 = arith.mulf %267, %237 : vector<8x128xf32>
    %269 = arith.mulf %258, %265 : vector<8x128xf32>
    %270 = arith.addf %268, %269 : vector<8x128xf32>
    %271 = arith.index_cast %c7_i32 : i32 to index
    %c0_107 = arith.constant 0 : index
    %c0_108 = arith.constant 0 : index
    %272 = vector.load %arg6[%271, %c0_107, %c0_108] : memref<8x8x128xf32, #tpu.memory_space<vmem>>, vector<1x8x128xf32>
    %273 = vector.shape_cast %272 : vector<1x8x128xf32> to vector<8x128xf32>
    %274 = vector.shape_cast %270 : vector<8x128xf32> to vector<1x8x128xf32>
    tpu.vector_store %arg6[%271, %c0_107, %c0_108], %274 {strides = array<i32>} : memref<8x8x128xf32, #tpu.memory_space<vmem>>, vector<1x8x128xf32>,
    %c8_i32_109 = arith.constant 8 : i32
    %c0_110 = arith.constant 0 : index
    %c0_111 = arith.constant 0 : index
    %275 = vector.load %arg7[%c0_110, %c0_111] : memref<8x128xf32, #tpu.memory_space<vmem>>, vector<8x128xf32>
    tpu.vector_store %arg7[%c0_110, %c0_111], %270 {strides = array<i32>} : memref<8x128xf32, #tpu.memory_space<vmem>>, vector<8x128xf32>,
    return
  }
  func.func @transform_0(%arg0: i32, %arg1: i32) -> (i32, i32, i32) {
    %c0_i32 = arith.constant 0 : i32
    %c0_i32_0 = arith.constant 0 : i32
    return %arg1, %arg0, %c0_i32 : i32, i32, i32
  }
  func.func @transform_1(%arg0: i32, %arg1: i32) -> (i32, i32) {
    %c0_i32 = arith.constant 0 : i32
    %c0_i32_0 = arith.constant 0 : i32
    %c0_i32_1 = arith.constant 0 : i32
    return %c0_i32, %c0_i32_0 : i32, i32
  }
  func.func @transform_2(%arg0: i32, %arg1: i32) -> (i32, i32) {
    %c0_i32 = arith.constant 0 : i32
    %c0_i32_0 = arith.constant 0 : i32
    %c0_i32_1 = arith.constant 0 : i32
    return %c0_i32, %c0_i32_0 : i32, i32
  }
  func.func @transform_3(%arg0: i32, %arg1: i32) -> (i32, i32) {
    %c0_i32 = arith.constant 0 : i32
    %c0_i32_0 = arith.constant 0 : i32
    %c0_i32_1 = arith.constant 0 : i32
    return %c0_i32, %c0_i32_0 : i32, i32
  }
  func.func @transform_4(%arg0: i32, %arg1: i32) -> (i32, i32, i32) {
    %c0_i32 = arith.constant 0 : i32
    %c0_i32_0 = arith.constant 0 : i32
    return %arg1, %arg0, %c0_i32 : i32, i32, i32
  }
}

</mosaic_0001>

<bundles_post_ra>
// kernel: tpu_custom_call.1
= control target key start
LH: loop header
LB: loop body
LE: loop exit
PB: predicated region body
PF: predicated region fallthrough
CT: control target
= control target key end

     0   :  { %9 = vsyncpa [#allocation5], 0  ;;  %s4767_s0 = inlined_call_operand.hbm [shape: f32[8,8,128], index: 0, kind: input, shape index: {}]   ;;  %s4768_s1 = inlined_call_operand.hbm [shape: f32[128,384], index: 1, kind: input, shape index: {}]   ;;  %s4769_s2 = inlined_call_operand.hbm [shape: f32[128,384], index: 2, kind: input, shape index: {}]   ;;  %s4770_s3 = inlined_call_operand.hbm [shape: f32[256,128], index: 3, kind: input, shape index: {}]   ;;  %s4771_s4 = inlined_call_operand.hbm [shape: f32[8,8,128], index: 4, kind: output, shape index: {}]  }
   0x1   :  { %10 = vsyncpa [#allocation8], 0 }
   0x2   :  { %11 = vsyncpa [#allocation11], 0 }
   0x3   :  { %12 = vsyncpa [#allocation6], 0  ;;  %s3462_s15 = smov [#allocation7]  }
   0x4   :  { %s30_s16 = sshll.u32 %s3462_s15, 4  ;;  %s31_s16 = int_to_ptr.vmem [resolvable:$true] %s30_s16 }
   0x5   :  { %s3362_s17 = scalar_lea.vmem %s31_s16, 6144  ;;  %p3367_p1 = scmp.lt.s32.totalorder %s31_s16, %s31_s16 }
   0x6   :  { %p3363_p0 = scmp.ne.s32.totalorder %s31_s16, %s3362_s17  ;;  %p3368_p2 = scmp.lt.s32.totalorder %s3362_s17, %s3362_s17 }
   0x8   :  { %p3369_p3 = por %p3368_p2, %p3367_p1 }
   0xa   :  { %p3370_p4 = pnand %p3369_p3, %p3363_p0 }
   0xc   :  { %3373 = shalt.err (!%p3370_p4)
}
   0xd   :  { %s3463_s18 = smov 384   ;;  %s3464_s19 = smov 24  }
   0xe   :  { %36 = dma.hbm_to_vmem [thread:$0]  %s4768_s1, 6144, %s31_s16, [#allocation8], %s3463_s18, %s3463_s18, %s3464_s19  }
   0xf   :  { %s3465_s22 = smov [#allocation4]  }
  0x10   :  { %s18_s23 = sshll.u32 %s3465_s22, 4  ;;  %s19_s23 = int_to_ptr.vmem [resolvable:$true] %s18_s23 }
  0x11   :  { %s3382_s24 = scalar_lea.vmem %s19_s23, 1024  ;;  %p3387_p6 = scmp.lt.s32.totalorder %s19_s23, %s19_s23 }
  0x12   :  { %p3383_p5 = scmp.ne.s32.totalorder %s19_s23, %s3382_s24  ;;  %p3388_p7 = scmp.lt.s32.totalorder %s3382_s24, %s3382_s24 }
  0x14   :  { %p3389_p8 = por %p3388_p7, %p3387_p6 }
  0x16   :  { %p3390_p9 = pnand %p3389_p8, %p3383_p5 }
  0x18   :  { %3393 = shalt.err (!%p3390_p9)
}
  0x19   :  { %s3466_s25 = smov 128   ;;  %s3467_s26 = smov 8  }
  0x1a   :  { %24 = dma.hbm_to_vmem [thread:$0]  %s4767_s0, 1024, %s19_s23, [#allocation5], %s3466_s25, %s3466_s25, %s3467_s26  }
  0x1b   :  { %s3468_s1 = smov [#allocation9]   ;;  %s3469_s30 = smov [#allocation10]  }
  0x1c   :  { %s42_s29 = sshll.u32 %s3468_s1, 4  ;;  %s54_s5 = sshll.u32 %s3469_s30, 4  ;;  %s43_s29 = int_to_ptr.vmem [resolvable:$true] %s42_s29  ;;  %s55_s5 = int_to_ptr.vmem [resolvable:$true] %s54_s5 }
  0x1d   :  { %s3402_s6 = scalar_lea.vmem %s43_s29, 6144  ;;  %p3407_p11 = scmp.lt.s32.totalorder %s43_s29, %s43_s29 }
  0x1e   :  { %p3403_p10 = scmp.ne.s32.totalorder %s43_s29, %s3402_s6  ;;  %p3408_p12 = scmp.lt.s32.totalorder %s3402_s6, %s3402_s6 }
  0x20   :  { %p3409_p13 = por %p3408_p12, %p3407_p11 }
  0x22   :  { %p3410_p0 = pnand %p3409_p13, %p3403_p10 }
  0x24   :  { %3413 = shalt.err (!%p3410_p0)
}
  0x25   :  { %48 = dma.hbm_to_vmem [thread:$0]  %s4769_s2, 6144, %s43_s29, [#allocation8], %s3463_s18, %s3463_s18, %s3464_s19  }
  0x26   :  { %s3422_s0 = scalar_lea.vmem %s55_s5, 4096  ;;  %p3427_p2 = scmp.lt.s32.totalorder %s55_s5, %s55_s5 }
  0x27   :  { %p3423_p1 = scmp.ne.s32.totalorder %s55_s5, %s3422_s0  ;;  %p3428_p3 = scmp.lt.s32.totalorder %s3422_s0, %s3422_s0 }
  0x29   :  { %p3429_p4 = por %p3428_p3, %p3427_p2 }
  0x2b   :  { %p3430_p5 = pnand %p3429_p4, %p3423_p1 }
  0x2d   :  { %3433 = shalt.err (!%p3430_p5)
}
  0x2e   :  { %60 = dma.hbm_to_vmem [thread:$0]  %s4770_s3, 4096, %s55_s5, [#allocation11], %s3466_s25, %s3466_s25, %s3467_s26  }
  0x2f   :  { %3454 = dma.done.wait [#allocation5], 1024  }
  0x30   :  { %3455 = vsyncadd [#allocation5], 4294966272 }
  0x31   :  { %3456 = dma.done.wait [#allocation8], 12288  }
  0x32   :  { %3457 = vsyncadd [#allocation8], 4294955008 }
  0x33   :  { %3458 = dma.done.wait [#allocation11], 4096  }
  0x34   :  { %3459 = vsyncadd [#allocation11], 4294963200  ;;  %v4772_v0 = vmov 0.0   ;;  %v132_v1 = vld [vmem:[#allocation7 + $0x170] sm:$0xff]  ;;  %v133_v2 = vld [vmem:[#allocation7 + $0x178] sm:$0xff]  ;;  %vm3471_vm0 = vmmov 0  }
  0x35   :  { %198 = vmatprep.mubr.f32.mxu0 %v4772_v0  ;;  %v131_v3 = vld [vmem:[#allocation7 + $0x168] sm:$0xff]  ;;  %134 = vmatprep.subr.mxu0 %v132_v1  ;;  %v129_v4 = vld [vmem:[#allocation7 + $0x158] sm:$0xff]  ;;  %v130_v5 = vld [vmem:[#allocation7 + $0x160] sm:$0xff]  ;;  %s3472_s2 = smov [#allocation12]  }
  0x36   :  { %2866 = vmatprep.subr.mxu1 %v133_v2  ;;  %v128_v6 = vld [vmem:[#allocation7 + $0x150] sm:$0xff]  ;;  %135 = vmatpush1.msra.mxu0 %v131_v3  ;;  %v126_v7 = vld [vmem:[#allocation7 + $0x140] sm:$0xff]  ;;  %v127_v8 = vld [vmem:[#allocation7 + $0x148] sm:$0xff]  ;;  %s2405_s3 = sshll.u32 %s3472_s2, 4  ;;  %s2406_s3 = int_to_ptr.vmem [resolvable:$true] %s2405_s3 }
  0x37   :  { %2867 = vmatpush3.msra.mxu1 %v133_v2  ;;  %136 = vmatprep.subr.mxu0 %v129_v4  ;;  %v125_v9 = vld [vmem:[#allocation7 + $0x138] sm:$0xff]  ;;  %v123_v10 = vld [vmem:[#allocation7 + $0x128] sm:$0xff]  ;;  %v124_v11 = vld [vmem:[#allocation7 + $0x130] sm:$0xff]  ;;  %s3434_s11 = scalar_lea.vmem %s2406_s3, 1024  ;;  %p3439_p7 = scmp.lt.s32.totalorder %s2406_s3, %s2406_s3 }
  0x38   :  { %2868 = vmatprep.subr.mxu1 %v130_v5  ;;  %137 = vmatpush1.msra.mxu0 %v128_v6  ;;  %v122_v12 = vld [vmem:[#allocation7 + $0x120] sm:$0xff]  ;;  %v120_v13 = vld [vmem:[#allocation7 + $0x110] sm:$0xff]  ;;  %v121_v14 = vld [vmem:[#allocation7 + $0x118] sm:$0xff]  ;;  %p3435_p6 = scmp.ne.s32.totalorder %s2406_s3, %s3434_s11  ;;  %p3440_p8 = scmp.lt.s32.totalorder %s3434_s11, %s3434_s11 }
  0x39   :  { %2869 = vmatpush3.msra.mxu1 %v130_v5  ;;  %138 = vmatprep.subr.mxu0 %v126_v7  ;;  %v119_v15 = vld [vmem:[#allocation7 + $0x108] sm:$0xff]  ;;  %v117_v16 = vld [vmem:[#allocation7 + $0xf8] sm:$0xff]  ;;  %v118_v17 = vld [vmem:[#allocation7 + $0x100] sm:$0xff] }
  0x3a   :  { %2870 = vmatprep.subr.mxu1 %v127_v8  ;;  %139 = vmatpush1.msra.mxu0 %v125_v9  ;;  %v116_v18 = vld [vmem:[#allocation7 + $0xf0] sm:$0xff]  ;;  %v114_v19 = vld [vmem:[#allocation7 + $0xe0] sm:$0xff]  ;;  %v115_v20 = vld [vmem:[#allocation7 + $0xe8] sm:$0xff]  ;;  %p3441_p9 = por %p3440_p8, %p3439_p7 }
  0x3b   :  { %2871 = vmatpush3.msra.mxu1 %v127_v8  ;;  %140 = vmatprep.subr.mxu0 %v123_v10  ;;  %v113_v21 = vld [vmem:[#allocation7 + $0xd8] sm:$0xff]  ;;  %v111_v22 = vld [vmem:[#allocation7 + $0xc8] sm:$0xff]  ;;  %v112_v23 = vld [vmem:[#allocation7 + $0xd0] sm:$0xff] }
  0x3c   :  { %2872 = vmatprep.subr.mxu1 %v124_v11  ;;  %141 = vmatpush1.msra.mxu0 %v122_v12  ;;  %v110_v24 = vld [vmem:[#allocation7 + $0xc0] sm:$0xff]  ;;  %v108_v25 = vld [vmem:[#allocation7 + $0xb0] sm:$0xff]  ;;  %v109_v26 = vld [vmem:[#allocation7 + $0xb8] sm:$0xff]  ;;  %p3442_p10 = pnand %p3441_p9, %p3435_p6 }
  0x3d   :  { %2873 = vmatpush3.msra.mxu1 %v124_v11  ;;  %142 = vmatprep.subr.mxu0 %v120_v13  ;;  %v107_v27 = vld [vmem:[#allocation7 + $0xa8] sm:$0xff]  ;;  %v105_v28 = vld [vmem:[#allocation7 + $0x98] sm:$0xff]  ;;  %v106_v29 = vld [vmem:[#allocation7 + $0xa0] sm:$0xff] }
  0x3e   :  { %2874 = vmatprep.subr.mxu1 %v121_v14  ;;  %143 = vmatpush1.msra.mxu0 %v119_v15  ;;  %v104_v30 = vld [vmem:[#allocation7 + $0x90] sm:$0xff]  ;;  %v102_v31 = vld [vmem:[#allocation7 + $0x80] sm:$0xff]  ;;  %v103_v32 = vld [vmem:[#allocation7 + $0x88] sm:$0xff] }
  0x3f   :  { %2875 = vmatpush3.msra.mxu1 %v121_v14  ;;  %144 = vmatprep.subr.mxu0 %v117_v16  ;;  %v101_v33 = vld [vmem:[#allocation7 + $0x78] sm:$0xff]  ;;  %v99_v34 = vld [vmem:[#allocation7 + $0x68] sm:$0xff]  ;;  %v100_v35 = vld [vmem:[#allocation7 + $0x70] sm:$0xff] }
  0x40   :  { %2876 = vmatprep.subr.mxu1 %v118_v17  ;;  %145 = vmatpush1.msra.mxu0 %v116_v18  ;;  %v98_v36 = vld [vmem:[#allocation7 + $0x60] sm:$0xff]  ;;  %v96_v37 = vld [vmem:[#allocation7 + $0x50] sm:$0xff]  ;;  %v97_v38 = vld [vmem:[#allocation7 + $0x58] sm:$0xff] }
  0x41   :  { %2877 = vmatpush3.msra.mxu1 %v118_v17  ;;  %146 = vmatprep.subr.mxu0 %v114_v19  ;;  %v95_v39 = vld [vmem:[#allocation7 + $0x48] sm:$0xff]  ;;  %v93_v40 = vld [vmem:[#allocation7 + $0x38] sm:$0xff]  ;;  %v94_v41 = vld [vmem:[#allocation7 + $0x40] sm:$0xff] }
  0x42   :  { %2878 = vmatprep.subr.mxu1 %v115_v20  ;;  %147 = vmatpush1.msra.mxu0 %v113_v21  ;;  %v92_v42 = vld [vmem:[#allocation7 + $0x30] sm:$0xff]  ;;  %v90_v43 = vld [vmem:[#allocation7 + $0x20] sm:$0xff]  ;;  %v91_v44 = vld [vmem:[#allocation7 + $0x28] sm:$0xff] }
  0x43   :  { %2879 = vmatpush3.msra.mxu1 %v115_v20  ;;  %148 = vmatprep.subr.mxu0 %v111_v22  ;;  %v89_v45 = vld [vmem:[#allocation7 + $0x18] sm:$0xff]  ;;  %v87_v46 = vld [vmem:[#allocation7 + $0x8] sm:$0xff]  ;;  %v88_v47 = vld [vmem:[#allocation7 + $0x10] sm:$0xff] }
  0x44   :  { %2880 = vmatprep.subr.mxu1 %v112_v23  ;;  %149 = vmatpush1.msra.mxu0 %v110_v24  ;;  %v86_v48 = vld [vmem:[#allocation7] sm:$0xff]  ;;  %v3525_v50 = vld [vmem:[#allocation9 + $0x170] sm:$0xff]  ;;  %v3527_v51 = vld [vmem:[#allocation4 + $0x8] sm:$0xff] }
  0x45   :  { %2881 = vmatpush3.msra.mxu1 %v112_v23  ;;  %150 = vmatprep.subr.mxu0 %v108_v25  ;;  %v3523_v49 = vld [vmem:[#allocation4] sm:$0xff]  ;;  %4928 = vst [vmem:[#allocation17_spill] sm:$0xff] %v3527_v51  ;;  %v3529_v52 = vld [vmem:[#allocation9 + $0x168] sm:$0xff]  ;;  %v3533_v53 = vld [vmem:[#allocation9 + $0x178] sm:$0xff] }
  0x46   :  { %2882 = vmatprep.subr.mxu1 %v109_v26  ;;  %151 = vmatpush1.msra.mxu0 %v107_v27  ;;  %v3535_v54 = vld [vmem:[#allocation9 + $0x158] sm:$0xff]  ;;  %v3541_v55 = vld [vmem:[#allocation9 + $0x150] sm:$0xff]  ;;  %v3543_v56 = vld [vmem:[#allocation9 + $0x160] sm:$0xff] }
  0x47   :  { %2883 = vmatpush3.msra.mxu1 %v109_v26  ;;  %152 = vmatprep.subr.mxu0 %v105_v28  ;;  %v3547_v57 = vld [vmem:[#allocation9 + $0x140] sm:$0xff]  ;;  %v3551_v58 = vld [vmem:[#allocation9 + $0x138] sm:$0xff]  ;;  %v3555_v59 = vld [vmem:[#allocation9 + $0x148] sm:$0xff] }
  0x48   :  { %2884 = vmatprep.subr.mxu1 %v106_v29  ;;  %153 = vmatpush1.msra.mxu0 %v104_v30  ;;  %v3557_v60 = vld [vmem:[#allocation9 + $0x128] sm:$0xff]  ;;  %v3563_v61 = vld [vmem:[#allocation9 + $0x120] sm:$0xff]  ;;  %v3565_v62 = vld [vmem:[#allocation9 + $0x130] sm:$0xff] }
  0x49   :  { %2885 = vmatpush3.msra.mxu1 %v106_v29  ;;  %154 = vmatprep.subr.mxu0 %v102_v31  ;;  %v80_v63 = vld [vmem:[#allocation4 + $0x10] sm:$0xff]  ;;  %v3573_v2 = vld [vmem:[#allocation9 + $0x108] sm:$0xff]  ;;  %v3577_v3 = vld [vmem:[#allocation9 + $0x118] sm:$0xff] }
  0x4a   :  { %2886 = vmatprep.subr.mxu1 %v103_v32  ;;  %155 = vmatpush1.msra.mxu0 %v101_v33  ;;  %v3569_v1 = vld [vmem:[#allocation9 + $0x110] sm:$0xff]  ;;  %v3579_v4 = vld [vmem:[#allocation9 + $0xf8] sm:$0xff]  ;;  %v3586_v6 = vld [vmem:[#allocation9 + $0x100] sm:$0xff] }
  0x4b   :  { %2887 = vmatpush3.msra.mxu1 %v103_v32  ;;  %156 = vmatprep.subr.mxu0 %v99_v34  ;;  %v3584_v5 = vld [vmem:[#allocation9 + $0xf0] sm:$0xff]  ;;  %v81_v7 = vld [vmem:[#allocation4 + $0x18] sm:$0xff]  ;;  %v3590_v8 = vld [vmem:[#allocation9 + $0xe0] sm:$0xff] }
  0x4c   :  { %2888 = vmatprep.subr.mxu1 %v100_v35  ;;  %157 = vmatpush1.msra.mxu0 %v98_v36  ;;  %v3594_v9 = vld [vmem:[#allocation9 + $0xd8] sm:$0xff]  ;;  %v3598_v10 = vld [vmem:[#allocation9 + $0xe8] sm:$0xff]  ;;  %v3605_v12 = vld [vmem:[#allocation9 + $0xc0] sm:$0xff] }
  0x4d   :  { %2889 = vmatpush3.msra.mxu1 %v100_v35  ;;  %158 = vmatprep.subr.mxu0 %v96_v37  ;;  %4929 = vst [vmem:[#allocation18_spill] sm:$0xff] %v3594_v9  ;;  %v3600_v11 = vld [vmem:[#allocation9 + $0xc8] sm:$0xff]  ;;  %4931 = vst [vmem:[#allocation20_spill] sm:$0xff] %v3605_v12  ;;  %v3607_v13 = vld [vmem:[#allocation9 + $0xd0] sm:$0xff] }
  0x4e   :  { %2890 = vmatprep.subr.mxu1 %v97_v38  ;;  %159 = vmatpush1.msra.mxu0 %v95_v39  ;;  %4930 = vst [vmem:[#allocation19_spill] sm:$0xff] %v3600_v11  ;;  %v82_v14 = vld [vmem:[#allocation4 + $0x20] sm:$0xff]  ;;  %v3611_v15 = vld [vmem:[#allocation9 + $0xb0] sm:$0xff]  ;;  %v3615_v16 = vld [vmem:[#allocation9 + $0xa8] sm:$0xff] }
  0x4f   :  { %2891 = vmatpush3.msra.mxu1 %v97_v38  ;;  %160 = vmatprep.subr.mxu0 %v93_v40  ;;  %4932 = vst [vmem:[#allocation21_spill] sm:$0xff] %v3611_v15  ;;  %4933 = vst [vmem:[#allocation22_spill] sm:$0xff] %v3615_v16  ;;  %v3619_v17 = vld [vmem:[#allocation9 + $0xb8] sm:$0xff]  ;;  %v3626_v19 = vld [vmem:[#allocation9 + $0x90] sm:$0xff] }
  0x50   :  { %2892 = vmatprep.subr.mxu1 %v94_v41  ;;  %161 = vmatpush1.msra.mxu0 %v92_v42  ;;  %v3621_v18 = vld [vmem:[#allocation9 + $0x98] sm:$0xff]  ;;  %4935 = vst [vmem:[#allocation24_spill] sm:$0xff] %v3626_v19  ;;  %v3630_v20 = vld [vmem:[#allocation9 + $0xa0] sm:$0xff]  ;;  %v83_v21 = vld [vmem:[#allocation4 + $0x28] sm:$0xff] }
  0x51   :  { %2893 = vmatpush3.msra.mxu1 %v94_v41  ;;  %162 = vmatprep.subr.mxu0 %v90_v43  ;;  %4934 = vst [vmem:[#allocation23_spill] sm:$0xff] %v3621_v18  ;;  %v3634_v22 = vld [vmem:[#allocation9 + $0x80] sm:$0xff]  ;;  %v3637_v23 = vld [vmem:[#allocation9 + $0x78] sm:$0xff]  ;;  %v3640_v24 = vld [vmem:[#allocation9 + $0x88] sm:$0xff] }
  0x52   :  { %2894 = vmatprep.subr.mxu1 %v91_v44  ;;  %163 = vmatpush1.msra.mxu0 %v89_v45  ;;  %4936 = vst [vmem:[#allocation25_spill] sm:$0xff] %v3634_v22  ;;  %4937 = vst [vmem:[#allocation26_spill] sm:$0xff] %v3637_v23  ;;  %v3642_v25 = vld [vmem:[#allocation9 + $0x68] sm:$0xff]  ;;  %v3647_v26 = vld [vmem:[#allocation9 + $0x60] sm:$0xff] }
  0x53   :  { %2895 = vmatpush3.msra.mxu1 %v91_v44  ;;  %164 = vmatprep.subr.mxu0 %v87_v46  ;;  %4938 = vst [vmem:[#allocation27_spill] sm:$0xff] %v3642_v25  ;;  %4939 = vst [vmem:[#allocation28_spill] sm:$0xff] %v3647_v26  ;;  %v3651_v27 = vld [vmem:[#allocation9 + $0x70] sm:$0xff]  ;;  %v3658_v30 = vld [vmem:[#allocation9 + $0x48] sm:$0xff] }
  0x54   :  { %2896 = vmatprep.subr.mxu1 %v88_v47  ;;  %165 = vmatpush1.msra.mxu0 %v86_v48  ;;  %v84_v28 = vld [vmem:[#allocation4 + $0x30] sm:$0xff]  ;;  %4941 = vst [vmem:[#allocation30_spill] sm:$0xff] %v3658_v30  ;;  %v3661_v31 = vld [vmem:[#allocation9 + $0x58] sm:$0xff]  ;;  %v3672_v34 = vld [vmem:[#allocation9 + $0x40] sm:$0xff] }
  0x55   :  { %2897 = vmatpush3.msra.mxu1 %v88_v47  ;;  %199 = vmatmul.mubr.f32.vlgmr.msra.gmra.mxu0 %v3523_v49  ;;  %v3655_v29 = vld [vmem:[#allocation9 + $0x50] sm:$0xff]  ;;  %v3663_v32 = vld [vmem:[#allocation9 + $0x38] sm:$0xff]  ;;  %v3676_v36 = vld [vmem:[#allocation9 + $0x20] sm:$0xff] }
  0x56   :  { %2898 = vmatprep.mubr.f32.mxu1 %v3523_v49  ;;  %464 = vmatprep.subr.mxu0 %v3525_v50  ;;  %4940 = vst [vmem:[#allocation29_spill] sm:$0xff] %v3655_v29  ;;  %4942 = vst [vmem:[#allocation31_spill] sm:$0xff] %v3663_v32  ;;  %v3668_v33 = vld [vmem:[#allocation9 + $0x30] sm:$0xff]  ;;  %v85_v35 = vld [vmem:[#allocation4 + $0x38] sm:$0xff] }
  0x57   :  { %2910 = vmatprep.subr.mxu1 %v4772_v0  ;;  %2899 = vmatmul.mubr.f32.vlgmr.msra.gmra.mxu1 %v3527_v51  ;;  %4943 = vst [vmem:[#allocation32_spill] sm:$0xff] %v3668_v33  ;;  %4944 = vst [vmem:[#allocation33_spill] sm:$0xff] %v3676_v36  ;;  %v3679_v37 = vld [vmem:[#allocation9 + $0x18] sm:$0xff]  ;;  %v3682_v38 = vld [vmem:[#allocation9 + $0x28] sm:$0xff] }
  0x58   :  { %465 = vmatpush1.msra.mxu0 %v3529_v52  ;;  %2911 = vmatpush3.msra.mxu1 %v3533_v53  ;;  %4945 = vst [vmem:[#allocation34_spill] sm:$0xff] %v3679_v37  ;;  %v3684_v39 = vld [vmem:[#allocation9 + $0x8] sm:$0xff]  ;;  %v3687_v40 = vld [vmem:[#allocation9] sm:$0xff]  ;;  %v3691_v41 = vld [vmem:[#allocation9 + $0x10] sm:$0xff] }
  0x59   :  { %466 = vmatprep.subr.mxu0 %v3535_v54  ;;  %2912 = vmatprep.subr.mxu1 %v4772_v0  ;;  %4946 = vst [vmem:[#allocation35_spill] sm:$0xff] %v3684_v39  ;;  %4947 = vst [vmem:[#allocation36_spill] sm:$0xff] %v3687_v40  ;;  %v3736_v42 = vld [vmem:[#allocation10 + $0xf8] sm:$0xff]  ;;  %v3742_v44 = vld [vmem:[#allocation10 + $0xf0] sm:$0xff] }
  0x5a   :  { %204 = vmatprep.mubr.f32.mxu0 %v4772_v0  ;;  %467 = vmatpush1.msra.mxu0 %v3541_v55  ;;  %4948 = vst [vmem:[#allocation37_spill] sm:$0xff] %v3736_v42  ;;  %v3740_v43 = vld [vmem:[#allocation10 + $0x78] sm:$0xff]  ;;  %v3746_v45 = vld [vmem:[#allocation10 + $0x70] sm:$0xff]  ;;  %v3748_v46 = vld [vmem:[#allocation10 + $0xe8] sm:$0xff] }
  0x5b   :  { %2913 = vmatpush3.msra.mxu1 %v3543_v56  ;;  %205 = vmatmul.mubr.f32.gmra.mxu0 %v3527_v51  ;;  %v3752_v47 = vld [vmem:[#allocation10 + $0x68] sm:$0xff]  ;;  %v3755_v48 = vld [vmem:[#allocation10 + $0xe0] sm:$0xff] }
  0x5c   :  { %468 = vmatprep.subr.mxu0 %v3547_v57  ;;  %2914 = vmatprep.subr.mxu1 %v4772_v0  ;;  %v3779_v51 = vld [vmem:[#allocation10 + $0xc0] sm:$0xff] }
  0x5d   :  { %469 = vmatpush1.msra.mxu0 %v3551_v58  ;;  %2915 = vmatpush3.msra.mxu1 %v3555_v59  ;;  %4949 = vst [vmem:[#allocation38_spill] sm:$0xff] %v3779_v51 }
  0x5e   :  { %470 = vmatprep.subr.mxu0 %v3557_v60  ;;  %2916 = vmatprep.subr.mxu1 %v4772_v0 }
  0x5f   :  { %210 = vmatprep.mubr.f32.mxu0 %v4772_v0  ;;  %471 = vmatpush1.msra.mxu0 %v3563_v61 }
  0x60   :  { %2917 = vmatpush3.msra.mxu1 %v3565_v62  ;;  %211 = vmatmul.mubr.f32.gmra.mxu0 %v80_v63 }
  0x61   :  { %472 = vmatprep.subr.mxu0 %v3569_v1  ;;  %2918 = vmatprep.subr.mxu1 %v4772_v0 }
  0x62   :  { %473 = vmatpush1.msra.mxu0 %v3573_v2  ;;  %2919 = vmatpush3.msra.mxu1 %v3577_v3 }
  0x63   :  { %474 = vmatprep.subr.mxu0 %v3579_v4  ;;  %2920 = vmatprep.subr.mxu1 %v4772_v0 }
  0x64   :  { %216 = vmatprep.mubr.f32.mxu0 %v4772_v0  ;;  %475 = vmatpush1.msra.mxu0 %v3584_v5 }
  0x65   :  { %2921 = vmatpush3.msra.mxu1 %v3586_v6  ;;  %217 = vmatmul.mubr.f32.gmra.mxu0 %v81_v7 }
  0x66   :  { %476 = vmatprep.subr.mxu0 %v3590_v8  ;;  %2922 = vmatprep.subr.mxu1 %v4772_v0 }
  0x67   :  { %477 = vmatpush1.msra.mxu0 %v3594_v9  ;;  %2923 = vmatpush3.msra.mxu1 %v3598_v10 }
  0x68   :  { %478 = vmatprep.subr.mxu0 %v3600_v11  ;;  %2924 = vmatprep.subr.mxu1 %v4772_v0 }
  0x69   :  { %222 = vmatprep.mubr.f32.mxu0 %v4772_v0  ;;  %479 = vmatpush1.msra.mxu0 %v3605_v12 }
  0x6a   :  { %2925 = vmatpush3.msra.mxu1 %v3607_v13  ;;  %223 = vmatmul.mubr.f32.gmra.mxu0 %v82_v14 }
  0x6b   :  { %480 = vmatprep.subr.mxu0 %v3611_v15  ;;  %2926 = vmatprep.subr.mxu1 %v4772_v0 }
  0x6c   :  { %481 = vmatpush1.msra.mxu0 %v3615_v16  ;;  %2927 = vmatpush3.msra.mxu1 %v3619_v17 }
  0x6d   :  { %482 = vmatprep.subr.mxu0 %v3621_v18  ;;  %2928 = vmatprep.subr.mxu1 %v4772_v0 }
  0x6e   :  { %228 = vmatprep.mubr.f32.mxu0 %v4772_v0  ;;  %2901 = vmatprep.mubr.f32.mxu1 %v80_v63  ;;  %v3758_v63 = vld [vmem:[#allocation10 + $0x60] sm:$0xff] }
  0x6f   :  { %483 = vmatpush1.msra.mxu0 %v3626_v19  ;;  %2929 = vmatpush3.msra.mxu1 %v3630_v20 }
  0x70   :  { %229 = vmatmul.mubr.f32.gmra.mxu0 %v83_v21  ;;  %2902 = vmatmul.mubr.f32.gmra.mxu1 %v81_v7  ;;  %v3761_v7 = vld [vmem:[#allocation10 + $0xd8] sm:$0xff] }
  0x71   :  { %484 = vmatprep.subr.mxu0 %v3634_v22  ;;  %2930 = vmatprep.subr.mxu1 %v4772_v0 }
  0x72   :  { %485 = vmatpush1.msra.mxu0 %v3637_v23  ;;  %2931 = vmatpush3.msra.mxu1 %v3640_v24 }
  0x73   :  { %486 = vmatprep.subr.mxu0 %v3642_v25  ;;  %2932 = vmatprep.subr.mxu1 %v4772_v0 }
  0x74   :  { %234 = vmatprep.mubr.f32.mxu0 %v4772_v0  ;;  %2904 = vmatprep.mubr.f32.mxu1 %v82_v14  ;;  %v3764_v14 = vld [vmem:[#allocation10 + $0x58] sm:$0xff] }
  0x75   :  { %487 = vmatpush1.msra.mxu0 %v3647_v26  ;;  %2933 = vmatpush3.msra.mxu1 %v3651_v27 }
  0x76   :  { %235 = vmatmul.mubr.f32.gmra.mxu0 %v84_v28  ;;  %2905 = vmatmul.mubr.f32.gmra.mxu1 %v83_v21  ;;  %v3767_v21 = vld [vmem:[#allocation10 + $0xd0] sm:$0xff] }
  0x77   :  { %488 = vmatprep.subr.mxu0 %v3655_v29  ;;  %2934 = vmatprep.subr.mxu1 %v4772_v0 }
  0x78   :  { %489 = vmatpush1.msra.mxu0 %v3658_v30  ;;  %2935 = vmatpush3.msra.mxu1 %v3661_v31 }
  0x79   :  { %490 = vmatprep.subr.mxu0 %v3663_v32  ;;  %2936 = vmatprep.subr.mxu1 %v4772_v0 }
  0x7a   :  { %240 = vmatprep.mubr.f32.mxu0 %v4772_v0  ;;  %2907 = vmatprep.mubr.f32.mxu1 %v84_v28  ;;  %v3770_v28 = vld [vmem:[#allocation10 + $0x50] sm:$0xff] }
  0x7b   :  { %491 = vmatpush1.msra.mxu0 %v3668_v33  ;;  %2937 = vmatpush3.msra.mxu1 %v3672_v34 }
  0x7c   :  { %241 = vmatmul.mubr.f32.gmra.mxu0 %v85_v35  ;;  %2908 = vmatmul.mubr.f32.gmra.mxu1 %v85_v35  ;;  %v3773_v35 = vld [vmem:[#allocation10 + $0xc8] sm:$0xff] }
  0x7d   :  { %492 = vmatprep.subr.mxu0 %v3676_v36  ;;  %2938 = vmatprep.subr.mxu1 %v4772_v0 }
  0x7e   :  { %493 = vmatpush1.msra.mxu0 %v3679_v37  ;;  %2939 = vmatpush3.msra.mxu1 %v3682_v38 }
  0x7f   :  { %494 = vmatprep.subr.mxu0 %v3684_v39  ;;  %2940 = vmatprep.subr.mxu1 %v4772_v0 }
  0x80   :  { %495 = vmatpush1.msra.mxu0 %v3687_v40  ;;  %528 = vmatprep.mubr.f32.mxu0 %v4772_v0 }
  0x81   :  { %2941 = vmatpush3.msra.mxu1 %v3691_v41  ;;  %2942 = vmatprep.mubr.msk.f32.mxu1 %vm3471_vm0, %v4772_v0 }
  0x82   :  { %529 = vmatmul.mubr.f32.vlgmr.msra.gmra.mxu0 %v4772_v0  ;;  %2943 = vmatmul.mubr.f32.vlgmr.msra.gmra.mxu1 %v4772_v0 }
  0x83   :  { %706 = vmatprep.subr.mxu1 %v3525_v50  ;;  %770 = vmatprep.mubr.f32.mxu1 %v4772_v0  ;;  %v3776_v0 = vld [vmem:[#allocation10 + $0x48] sm:$0xff] }
  0x84   :  { %707 = vmatpush1.msra.mxu1 %v3529_v52  ;;  %2467 = vmatprep.subr.mxu0 %v3736_v42 }
  0x85   :  { %708 = vmatprep.subr.mxu1 %v3535_v54  ;;  %2468 = vmatpush3.msra.mxu0 %v3740_v43 }
  0x86   :  { %709 = vmatpush1.msra.mxu1 %v3541_v55  ;;  %2469 = vmatprep.subr.mxu0 %v3742_v44 }
  0x87   :  { %710 = vmatprep.subr.mxu1 %v3547_v57  ;;  %2470 = vmatpush3.msra.mxu0 %v3746_v45 }
  0x88   :  { %711 = vmatpush1.msra.mxu1 %v3551_v58  ;;  %2471 = vmatprep.subr.mxu0 %v3748_v46 }
  0x89   :  { %712 = vmatprep.subr.mxu1 %v3557_v60  ;;  %2472 = vmatpush3.msra.mxu0 %v3752_v47 }
  0x8a   :  { %713 = vmatpush1.msra.mxu1 %v3563_v61  ;;  %2473 = vmatprep.subr.mxu0 %v3755_v48 }
  0x8b   :  { %714 = vmatprep.subr.mxu1 %v3569_v1  ;;  %2474 = vmatpush3.msra.mxu0 %v3758_v63 }
  0x8c   :  { %715 = vmatpush1.msra.mxu1 %v3573_v2  ;;  %2475 = vmatprep.subr.mxu0 %v3761_v7 }
  0x8d   :  { %716 = vmatprep.subr.mxu1 %v3579_v4  ;;  %2476 = vmatpush3.msra.mxu0 %v3764_v14 }
  0x8e   :  { %717 = vmatpush1.msra.mxu1 %v3584_v5  ;;  %2477 = vmatprep.subr.mxu0 %v3767_v21 }
  0x8f   :  { %718 = vmatprep.subr.mxu1 %v3590_v8  ;;  %2478 = vmatpush3.msra.mxu0 %v3770_v28 }
  0x90   :  { %719 = vmatpush1.msra.mxu1 %v3594_v9  ;;  %2479 = vmatprep.subr.mxu0 %v3773_v35 }
  0x91   :  { %720 = vmatprep.subr.mxu1 %v3600_v11  ;;  %2480 = vmatpush3.msra.mxu0 %v3776_v0 }
  0x92   :  { %721 = vmatpush1.msra.mxu1 %v3605_v12  ;;  %2481 = vmatprep.subr.mxu0 %v3779_v51 }
  0x93   :  { %722 = vmatprep.subr.mxu1 %v3611_v15 }
  0x94   :  { %723 = vmatpush1.msra.mxu1 %v3615_v16 }
  0x95   :  { %724 = vmatprep.subr.mxu1 %v3621_v18 }
  0x96   :  { %725 = vmatpush1.msra.mxu1 %v3626_v19 }
  0x97   :  { %726 = vmatprep.subr.mxu1 %v3634_v22 }
  0x98   :  { %727 = vmatpush1.msra.mxu1 %v3637_v23  ;;  %v3815_v23 = vld [vmem:[#allocation10 + $0x90] sm:$0xff] }
  0x99   :  { %728 = vmatprep.subr.mxu1 %v3642_v25  ;;  %v3812_v25 = vld [vmem:[#allocation10 + $0x18] sm:$0xff]  ;;  %4961 = vst [vmem:[#allocation50_spill] sm:$0xff] %v3815_v23 }
  0x9a   :  { %729 = vmatpush1.msra.mxu1 %v3647_v26  ;;  %v3809_v26 = vld [vmem:[#allocation10 + $0x98] sm:$0xff]  ;;  %4960 = vst [vmem:[#allocation49_spill] sm:$0xff] %v3812_v25 }
  0x9b   :  { %730 = vmatprep.subr.mxu1 %v3655_v29  ;;  %v3806_v29 = vld [vmem:[#allocation10 + $0x20] sm:$0xff]  ;;  %4959 = vst [vmem:[#allocation48_spill] sm:$0xff] %v3809_v26 }
  0x9c   :  { %731 = vmatpush1.msra.mxu1 %v3658_v30  ;;  %v3803_v30 = vld [vmem:[#allocation10 + $0xa0] sm:$0xff]  ;;  %4958 = vst [vmem:[#allocation47_spill] sm:$0xff] %v3806_v29 }
  0x9d   :  { %732 = vmatprep.subr.mxu1 %v3663_v32  ;;  %v3800_v32 = vld [vmem:[#allocation10 + $0x28] sm:$0xff]  ;;  %4957 = vst [vmem:[#allocation46_spill] sm:$0xff] %v3803_v30 }
  0x9e   :  { %733 = vmatpush1.msra.mxu1 %v3668_v33  ;;  %v3797_v33 = vld [vmem:[#allocation10 + $0xa8] sm:$0xff]  ;;  %4956 = vst [vmem:[#allocation45_spill] sm:$0xff] %v3800_v32 }
  0x9f   :  { %734 = vmatprep.subr.mxu1 %v3676_v36  ;;  %v3794_v36 = vld [vmem:[#allocation10 + $0x30] sm:$0xff]  ;;  %4955 = vst [vmem:[#allocation44_spill] sm:$0xff] %v3797_v33 }
  0xa0   :  { %735 = vmatpush1.msra.mxu1 %v3679_v37  ;;  %v3791_v37 = vld [vmem:[#allocation10 + $0xb0] sm:$0xff]  ;;  %4954 = vst [vmem:[#allocation43_spill] sm:$0xff] %v3794_v36 }
  0xa1   :  { %736 = vmatprep.subr.mxu1 %v3684_v39  ;;  %v3788_v39 = vld [vmem:[#allocation10 + $0x38] sm:$0xff]  ;;  %4953 = vst [vmem:[#allocation42_spill] sm:$0xff] %v3791_v37 }
  0xa2   :  { %737 = vmatpush1.msra.mxu1 %v3687_v40  ;;  %v3785_v40 = vld [vmem:[#allocation10 + $0xb8] sm:$0xff]  ;;  %4952 = vst [vmem:[#allocation41_spill] sm:$0xff] %v3788_v39 }
  0xa3   :  { %2519 = vmatprep.subr.mxu1 %v3736_v42  ;;  %v3782_v42 = vld [vmem:[#allocation10 + $0x40] sm:$0xff]  ;;  %4951 = vst [vmem:[#allocation40_spill] sm:$0xff] %v3785_v40 }
  0xa4   :  { %4950 = vst [vmem:[#allocation39_spill] sm:$0xff] %v3782_v42  ;;  %2482 = vmatpush3.msra.mxu0 %v3782_v42 }
  0xa5   :  { %2483 = vmatprep.subr.mxu0 %v3785_v40 }
  0xa6   :  { %2484 = vmatpush3.msra.mxu0 %v3788_v39 }
  0xa7   :  { %2485 = vmatprep.subr.mxu0 %v3791_v37 }
  0xa8   :  { %2486 = vmatpush3.msra.mxu0 %v3794_v36 }
  0xa9   :  { %2487 = vmatprep.subr.mxu0 %v3797_v33 }
  0xaa   :  { %2488 = vmatpush3.msra.mxu0 %v3800_v32  ;;  %v3818_v32 = vld [vmem:[#allocation10 + $0x10] sm:$0xff] }
  0xab   :  { %2489 = vmatprep.subr.mxu0 %v3803_v30  ;;  %4962 = vst [vmem:[#allocation51_spill] sm:$0xff] %v3818_v32  ;;  %v3821_v30 = vld [vmem:[#allocation10 + $0x88] sm:$0xff] }
  0xac   :  { %2490 = vmatpush3.msra.mxu0 %v3806_v29  ;;  %4963 = vst [vmem:[#allocation52_spill] sm:$0xff] %v3821_v30  ;;  %v3824_v29 = vld [vmem:[#allocation10 + $0x8] sm:$0xff] }
  0xad   :  { %2491 = vmatprep.subr.mxu0 %v3809_v26  ;;  %4964 = vst [vmem:[#allocation53_spill] sm:$0xff] %v3824_v29  ;;  %v3827_v26 = vld [vmem:[#allocation10 + $0x80] sm:$0xff] }
  0xae   :  { %2492 = vmatpush3.msra.mxu0 %v3812_v25  ;;  %4965 = vst [vmem:[#allocation54_spill] sm:$0xff] %v3827_v26  ;;  %v3830_v25 = vld [vmem:[#allocation10] sm:$0xff] }
  0xaf   :  { %2493 = vmatprep.subr.mxu0 %v3815_v23  ;;  %4966 = vst [vmem:[#allocation55_spill] sm:$0xff] %v3830_v25  ;;  %v4967_v23 = vmov 0.0  }
  0xb0   :  { %2494 = vmatpush3.msra.mxu0 %v3818_v32 }
  0xb1   :  { %2495 = vmatprep.subr.mxu0 %v3821_v30 }
  0xb2   :  { %2496 = vmatpush3.msra.mxu0 %v3824_v29 }
  0xb3   :  { %2497 = vmatprep.subr.mxu0 %v3827_v26 }
  0xb4   :  { %2498 = vmatpush3.msra.mxu0 %v3830_v25 }
  0xb5   :  { %2945 = vmatprep.subr.mxu0 %v4967_v23 }
 0x115   :  { %v200_v22 = vpop.f32.mrf.mxu0 }
 0x117   :  { %v202_v32 = vpop.f32.mrf.mxu0  ;;  %v3846_v26 = vpop.f32.mrf.mxu1 }
 0x118   :  { %4974 = vst [vmem:[#allocation62_spill] sm:$0xff] %v3846_v26 }
 0x119   :  { %v313_v16 = vpop.f32.mrf.mxu1 }
 0x11b   :  { %v3834_v33 = vpop.f32.mrf.mxu0 }
 0x11c   :  { %4968 = vst [vmem:[#allocation56_spill] sm:$0xff] %v3834_v33 }
 0x11d   :  { %v3836_v19 = vpop.f32.mrf.mxu0 }
 0x11e   :  { %4969 = vst [vmem:[#allocation57_spill] sm:$0xff] %v3836_v19 }
 0x120   :  { %v3838_v30 = vpop.f32.mrf.mxu0 }
 0x121   :  { %4970 = vst [vmem:[#allocation58_spill] sm:$0xff] %v3838_v30 }
 0x122   :  { %v3840_v36 = vpop.f32.mrf.mxu0 }
 0x123   :  { %4971 = vst [vmem:[#allocation59_spill] sm:$0xff] %v3840_v36 }
 0x125   :  { %v3842_v29 = vpop.f32.mrf.mxu0 }
 0x126   :  { %4972 = vst [vmem:[#allocation60_spill] sm:$0xff] %v3842_v29 }
 0x127   :  { %v3844_v18 = vpop.f32.mrf.mxu0 }
 0x128   :  { %4973 = vst [vmem:[#allocation61_spill] sm:$0xff] %v3844_v18 }
 0x12a   :  { %v3848_v37 = vpop.f32.mrf.mxu0 }
 0x12b   :  { %4975 = vst [vmem:[#allocation63_spill] sm:$0xff] %v3848_v37 }
 0x12c   :  { %v3850_v25 = vpop.f32.mrf.mxu0 }
 0x12d   :  { %4976 = vst [vmem:[#allocation64_spill] sm:$0xff] %v3850_v25 }
 0x130   :  { %v3852_v39 = vpop.f32.mrf.mxu0  ;;  %v3854_v33 = vpop.f32.mrf.mxu1 }
 0x131   :  { %4977 = vst [vmem:[#allocation65_spill] sm:$0xff] %v3852_v39  ;;  %4978 = vst [vmem:[#allocation66_spill] sm:$0xff] %v3854_v33 }
 0x132   :  { %v3856_v19 = vpop.f32.mrf.mxu0  ;;  %v3858_v30 = vpop.f32.mrf.mxu1 }
 0x133   :  { %4979 = vst [vmem:[#allocation67_spill] sm:$0xff] %v3856_v19  ;;  %4980 = vst [vmem:[#allocation68_spill] sm:$0xff] %v3858_v30 }
 0x136   :  { %v3860_v36 = vpop.f32.mrf.mxu0  ;;  %v3862_v29 = vpop.f32.mrf.mxu1 }
 0x137   :  { %4981 = vst [vmem:[#allocation69_spill] sm:$0xff] %v3860_v36  ;;  %4982 = vst [vmem:[#allocation70_spill] sm:$0xff] %v3862_v29 }
 0x138   :  { %v3864_v18 = vpop.f32.mrf.mxu0  ;;  %v3866_v26 = vpop.f32.mrf.mxu1 }
 0x139   :  { %4983 = vst [vmem:[#allocation71_spill] sm:$0xff] %v3864_v18  ;;  %4984 = vst [vmem:[#allocation72_spill] sm:$0xff] %v3866_v26 }
 0x13c   :  { %v3868_v37 = vpop.f32.mrf.mxu0  ;;  %v3870_v25 = vpop.f32.mrf.mxu1 }
 0x13d   :  { %4985 = vst [vmem:[#allocation73_spill] sm:$0xff] %v3868_v37  ;;  %4986 = vst [vmem:[#allocation74_spill] sm:$0xff] %v3870_v25 }
 0x13e   :  { %v3872_v15 = vpop.f32.mrf.mxu0  ;;  %v3874_v39 = vpop.f32.mrf.mxu1 }
 0x13f   :  { %4987 = vst [vmem:[#allocation75_spill] sm:$0xff] %v3872_v15  ;;  %4988 = vst [vmem:[#allocation76_spill] sm:$0xff] %v3874_v39 }
 0x142   :  { %v530_v33 = vpop.f32.mrf.mxu0  ;;  %v601_v40 = vpop.f32.mrf.mxu1 }
 0x143   :  { %v605_v19 = vadd.f32 %v530_v33, %v200_v22  ;;  %v607_v30 = vadd.f32 %v601_v40, %v313_v16  ;;  %v4992_v33 = vld [vmem:[#allocation39_spill] sm:$0xff]  ;;  %v4996_v40 = vld [vmem:[#allocation41_spill] sm:$0xff] }
 0x144   :  { %v532_v12 = vpop.f32.mrf.mxu0  ;;  %v2944_v42 = vpop.f32.mrf.mxu1 }
 0x145   :  { %v606_v36 = vadd.f32 %v532_v12, %v202_v32  ;;  %v610_v29 = vmul.f32 0.5, %v607_v30  ;;  %v4990_v30 = vld [vmem:[#allocation38_spill] sm:$0xff]  ;;  %v4991_v32 = vld [vmem:[#allocation19_spill] sm:$0xff] }
 0x146   :  { %v4997_v42 = vld [vmem:[#allocation22_spill] sm:$0xff] }
 0x147   :  { %v609_v11 = vmul.f32 0.5, %v606_v36  ;;  %3201 = vtanh.f32 %v610_v29  ;;  %v4993_v36 = vld [vmem:[#allocation20_spill] sm:$0xff] }
 0x149   :  { %3203 = vtanh.f32 %v609_v11 }
 0x154   :  { %v3202_v18 = vpop.eup %3201 }
 0x155   :  { %v616_v37 = vadd.f32 1.0, %v3202_v18 }
 0x156   :  { %v3204_v26 = vpop.eup %3203 }
 0x157   :  { %v615_v51 = vadd.f32 1.0, %v3204_v26  ;;  %v619_v25 = vmul.f32 0.5, %v616_v37  ;;  %v4994_v37 = vld [vmem:[#allocation40_spill] sm:$0xff] }
 0x159   :  { %v618_v9 = vmul.f32 0.5, %v615_v51  ;;  %v621_v15 = vmul.f32 0.0, %v619_v25 }
 0x15b   :  { %v620_v39 = vmul.f32 %v618_v9, %v3523_v49  ;;  %686 = vmatprep.mubr.f32.mxu0 %v621_v15  ;;  %v608_v49 = vmul.f32 0.5, %v605_v19  ;;  %v4989_v19 = vld [vmem:[#allocation18_spill] sm:$0xff] }
 0x15d   :  { %687 = vmatmul.mubr.f32.vlgmr.msra.gmra.mxu0 %v620_v39  ;;  %3205 = vtanh.f32 %v608_v49  ;;  %v4995_v39 = vld [vmem:[#allocation21_spill] sm:$0xff]  ;;  %v4998_v49 = vld [vmem:[#allocation42_spill] sm:$0xff] }
 0x15e   :  { %2946 = vmatpush3.msra.mxu0 %v3533_v53  ;;  %2977 = vmatprep.mubr.msk.f32.mxu0 %vm3471_vm0, %v4967_v23 }
 0x15f   :  { %2947 = vmatprep.subr.mxu0 %v4967_v23 }
 0x160   :  { %2948 = vmatpush3.msra.mxu0 %v3543_v56 }
 0x161   :  { %2949 = vmatprep.subr.mxu0 %v4967_v23 }
 0x162   :  { %2950 = vmatpush3.msra.mxu0 %v3555_v59 }
 0x163   :  { %2951 = vmatprep.subr.mxu0 %v4967_v23 }
 0x164   :  { %2952 = vmatpush3.msra.mxu0 %v3565_v62 }
 0x165   :  { %2953 = vmatprep.subr.mxu0 %v4967_v23 }
 0x166   :  { %2954 = vmatpush3.msra.mxu0 %v3577_v3 }
 0x167   :  { %2955 = vmatprep.subr.mxu0 %v4967_v23 }
 0x168   :  { %2956 = vmatpush3.msra.mxu0 %v3586_v6 }
 0x169   :  { %2957 = vmatprep.subr.mxu0 %v4967_v23 }
 0x16a   :  { %2958 = vmatpush3.msra.mxu0 %v3598_v10  ;;  %v3206_v12 = vpop.eup %3205 }
 0x16b   :  { %2959 = vmatprep.subr.mxu0 %v4967_v23  ;;  %v614_v15 = vadd.f32 1.0, %v3206_v12  ;;  %v5002_v12 = vld [vmem:[#allocation44_spill] sm:$0xff] }
 0x16c   :  { %2960 = vmatpush3.msra.mxu0 %v3607_v13 }
 0x16d   :  { %2961 = vmatprep.subr.mxu0 %v4967_v23  ;;  %v617_v16 = vmul.f32 0.5, %v614_v15  ;;  %v5003_v15 = vld [vmem:[#allocation25_spill] sm:$0xff] }
 0x16e   :  { %2962 = vmatpush3.msra.mxu0 %v3619_v17 }
 0x16f   :  { %2963 = vmatprep.subr.mxu0 %v4967_v23  ;;  %v693_v18 = vsub.f32 1.0, %v617_v16 }
 0x170   :  { %2964 = vmatpush3.msra.mxu0 %v3630_v20 }
 0x171   :  { %2965 = vmatprep.subr.mxu0 %v4967_v23  ;;  %v694_v25 = vmul.f32 0.0, %v693_v18  ;;  %v5005_v18 = vld [vmem:[#allocation26_spill] sm:$0xff] }
 0x172   :  { %2966 = vmatpush3.msra.mxu0 %v3640_v24 }
 0x173   :  { %2967 = vmatprep.subr.mxu0 %v4967_v23 }
 0x174   :  { %2968 = vmatpush3.msra.mxu0 %v3651_v27 }
 0x175   :  { %2969 = vmatprep.subr.mxu0 %v4967_v23 }
 0x176   :  { %2970 = vmatpush3.msra.mxu0 %v3661_v31 }
 0x177   :  { %2971 = vmatprep.subr.mxu0 %v4967_v23 }
 0x178   :  { %2972 = vmatpush3.msra.mxu0 %v3672_v34 }
 0x179   :  { %2973 = vmatprep.subr.mxu0 %v4967_v23 }
 0x17a   :  { %2974 = vmatpush3.msra.mxu0 %v3682_v38 }
 0x17b   :  { %2975 = vmatprep.subr.mxu0 %v4967_v23 }
 0x17c   :  { %2976 = vmatpush3.msra.mxu0 %v3691_v41 }
 0x17d   :  { %949 = vmatprep.subr.mxu0 %v3525_v50 }
 0x21d   :  { %v2499_v51 = vpop.f32.mrf.mxu0 }
 0x21f   :  { %v2500_v9 = vpop.f32.mrf.mxu0 }
 0x220   :  { %v2501_v11 = vadd.f32 %v2500_v9, %v2499_v51  ;;  %v4999_v51 = vld [vmem:[#allocation23_spill] sm:$0xff] }
 0x221   :  { %v5000_v9 = vld [vmem:[#allocation43_spill] sm:$0xff] }
 0x222   :  { %3207 = vtanh.f32 %v2501_v11  ;;  %v5001_v11 = vld [vmem:[#allocation24_spill] sm:$0xff] }
 0x22f   :  { %v3208_v22 = vpop.eup %3207 }
 0x230   :  { %v695_v26 = vmul.f32 %v3208_v22, %v617_v16  ;;  %v5004_v16 = vld [vmem:[#allocation45_spill] sm:$0xff]  ;;  %v5006_v22 = vld [vmem:[#allocation46_spill] sm:$0xff] }
 0x232   :  { %v3911_v29 = vadd.f32 %v695_v26, %v694_v25  ;;  %v5007_v25 = vld [vmem:[#allocation27_spill] sm:$0xff] }
 0x233   :  { %v5008_v26 = vld [vmem:[#allocation47_spill] sm:$0xff] }
 0x234   :  { %771 = vmatmul.mubr.f32.vlgmr.msra.gmra.mxu1 %v3911_v29  ;;  %697 = vst [vmem:[#allocation12] sm:$0xff] %v3911_v29  ;;  %2978 = vmatmul.mubr.f32.vlgmr.msra.gmra.mxu0 %v3911_v29 }
 0x235   :  { %2520 = vmatpush3.msra.mxu1 %v3740_v43  ;;  %950 = vmatpush1.msra.mxu0 %v3529_v52 }
 0x236   :  { %2521 = vmatprep.subr.mxu1 %v3742_v44  ;;  %951 = vmatprep.subr.mxu0 %v3535_v54 }
 0x237   :  { %2522 = vmatpush3.msra.mxu1 %v3746_v45  ;;  %952 = vmatpush1.msra.mxu0 %v3541_v55 }
 0x238   :  { %2523 = vmatprep.subr.mxu1 %v3748_v46  ;;  %953 = vmatprep.subr.mxu0 %v3547_v57 }
 0x239   :  { %2524 = vmatpush3.msra.mxu1 %v3752_v47  ;;  %954 = vmatpush1.msra.mxu0 %v3551_v58 }
 0x23a   :  { %2525 = vmatprep.subr.mxu1 %v3755_v48  ;;  %955 = vmatprep.subr.mxu0 %v3557_v60 }
 0x23b   :  { %2526 = vmatpush3.msra.mxu1 %v3758_v63  ;;  %956 = vmatpush1.msra.mxu0 %v3563_v61 }
 0x23c   :  { %2527 = vmatprep.subr.mxu1 %v3761_v7  ;;  %957 = vmatprep.subr.mxu0 %v3569_v1 }
 0x23d   :  { %2528 = vmatpush3.msra.mxu1 %v3764_v14  ;;  %958 = vmatpush1.msra.mxu0 %v3573_v2 }
 0x23e   :  { %2529 = vmatprep.subr.mxu1 %v3767_v21  ;;  %959 = vmatprep.subr.mxu0 %v3579_v4 }
 0x23f   :  { %2530 = vmatpush3.msra.mxu1 %v3770_v28  ;;  %960 = vmatpush1.msra.mxu0 %v3584_v5 }
 0x240   :  { %2531 = vmatprep.subr.mxu1 %v3773_v35  ;;  %961 = vmatprep.subr.mxu0 %v3590_v8 }
 0x241   :  { %2532 = vmatpush3.msra.mxu1 %v3776_v0  ;;  %962 = vmatpush1.msra.mxu0 %v4989_v19 }
 0x242   :  { %2533 = vmatprep.subr.mxu1 %v4990_v30  ;;  %963 = vmatprep.subr.mxu0 %v4991_v32  ;;  %v5029_v32 = vld [vmem:[#allocation17_spill] sm:$0xff] }
 0x243   :  { %2534 = vmatpush3.msra.mxu1 %v4992_v33  ;;  %964 = vmatpush1.msra.mxu0 %v4993_v36 }
 0x244   :  { %2535 = vmatprep.subr.mxu1 %v4994_v37  ;;  %965 = vmatprep.subr.mxu0 %v4995_v39 }
 0x245   :  { %2536 = vmatpush3.msra.mxu1 %v4996_v40  ;;  %966 = vmatpush1.msra.mxu0 %v4997_v42 }
 0x246   :  { %2537 = vmatprep.subr.mxu1 %v4998_v49  ;;  %967 = vmatprep.subr.mxu0 %v4999_v51  ;;  %v5009_v49 = vld [vmem:[#allocation28_spill] sm:$0xff] }
 0x247   :  { %2538 = vmatpush3.msra.mxu1 %v5000_v9  ;;  %968 = vmatpush1.msra.mxu0 %v5001_v11  ;;  %v5010_v51 = vld [vmem:[#allocation48_spill] sm:$0xff]  ;;  %v5011_v9 = vld [vmem:[#allocation29_spill] sm:$0xff] }
 0x248   :  { %2539 = vmatprep.subr.mxu1 %v5002_v12  ;;  %969 = vmatprep.subr.mxu0 %v5003_v15  ;;  %v5012_v11 = vld [vmem:[#allocation49_spill] sm:$0xff]  ;;  %v5013_v12 = vld [vmem:[#allocation30_spill] sm:$0xff] }
 0x249   :  { %2540 = vmatpush3.msra.mxu1 %v5004_v16  ;;  %970 = vmatpush1.msra.mxu0 %v5005_v18  ;;  %v5014_v15 = vld [vmem:[#allocation50_spill] sm:$0xff]  ;;  %v5015_v16 = vld [vmem:[#allocation31_spill] sm:$0xff] }
 0x24a   :  { %2541 = vmatprep.subr.mxu1 %v5006_v22  ;;  %971 = vmatprep.subr.mxu0 %v5007_v25  ;;  %v5016_v18 = vld [vmem:[#allocation51_spill] sm:$0xff]  ;;  %v5017_v22 = vld [vmem:[#allocation32_spill] sm:$0xff] }
 0x24b   :  { %2542 = vmatpush3.msra.mxu1 %v5008_v26  ;;  %972 = vmatpush1.msra.mxu0 %v5009_v49  ;;  %v5018_v25 = vld [vmem:[#allocation52_spill] sm:$0xff]  ;;  %v5019_v26 = vld [vmem:[#allocation33_spill] sm:$0xff] }
 0x24c   :  { %2543 = vmatprep.subr.mxu1 %v5010_v51  ;;  %973 = vmatprep.subr.mxu0 %v5011_v9  ;;  %v5020_v49 = vld [vmem:[#allocation53_spill] sm:$0xff]  ;;  %v5021_v51 = vld [vmem:[#allocation34_spill] sm:$0xff] }
 0x24d   :  { %2544 = vmatpush3.msra.mxu1 %v5012_v11  ;;  %974 = vmatpush1.msra.mxu0 %v5013_v12  ;;  %v5022_v9 = vld [vmem:[#allocation54_spill] sm:$0xff]  ;;  %v5023_v11 = vld [vmem:[#allocation35_spill] sm:$0xff] }
 0x24e   :  { %2545 = vmatprep.subr.mxu1 %v5014_v15  ;;  %975 = vmatprep.subr.mxu0 %v5015_v16  ;;  %v5024_v12 = vld [vmem:[#allocation55_spill] sm:$0xff]  ;;  %v5025_v15 = vld [vmem:[#allocation36_spill] sm:$0xff] }
 0x24f   :  { %2546 = vmatpush3.msra.mxu1 %v5016_v18  ;;  %976 = vmatpush1.msra.mxu0 %v5017_v22  ;;  %v5026_v22 = vld [vmem:[#allocation37_spill] sm:$0xff]  ;;  %v5027_v18 = vld [vmem:[#allocation62_spill] sm:$0xff] }
 0x250   :  { %2547 = vmatprep.subr.mxu1 %v5018_v25  ;;  %977 = vmatprep.subr.mxu0 %v5019_v26 }
 0x251   :  { %2548 = vmatpush3.msra.mxu1 %v5020_v49  ;;  %978 = vmatpush1.msra.mxu0 %v5021_v51 }
 0x252   :  { %2549 = vmatprep.subr.mxu1 %v5022_v9  ;;  %979 = vmatprep.subr.mxu0 %v5023_v11  ;;  %v5028_v9 = vld [vmem:[#allocation57_spill] sm:$0xff] }
 0x253   :  { %2550 = vmatpush3.msra.mxu1 %v5024_v12  ;;  %980 = vmatpush1.msra.mxu0 %v5025_v15 }
 0x254   :  { %2980 = vmatprep.subr.mxu1 %v4967_v23  ;;  %1013 = vmatprep.mubr.f32.mxu0 %v4967_v23 }
 0x255   :  { %2571 = vmatprep.subr.mxu0 %v5026_v22 }
 0x2f4   :  { %v772_v25 = vpop.f32.mrf.mxu1  ;;  %v843_v26 = vpop.f32.mrf.mxu0 }
 0x2f5   :  { %v849_v49 = vadd.f32 %v5027_v18, %v843_v26  ;;  %v5055_v18 = vld [vmem:[#allocation50_spill] sm:$0xff]  ;;  %v5058_v26 = vld [vmem:[#allocation32_spill] sm:$0xff] }
 0x2f6   :  { %v774_v16 = vpop.f32.mrf.mxu1  ;;  %v2979_v51 = vpop.f32.mrf.mxu0 }
 0x2f7   :  { %v852_v42 = vmul.f32 0.5, %v849_v49  ;;  %v848_v40 = vadd.f32 %v774_v16, %v5028_v9  ;;  %v5048_v49 = vld [vmem:[#allocation27_spill] sm:$0xff]  ;;  %v5050_v9 = vld [vmem:[#allocation28_spill] sm:$0xff]  ;;  %v5054_v16 = vld [vmem:[#allocation30_spill] sm:$0xff] }
 0x2f8   :  { %v5049_v51 = vld [vmem:[#allocation47_spill] sm:$0xff] }
 0x2f9   :  { %v851_v11 = vmul.f32 0.5, %v848_v40  ;;  %3209 = vtanh.f32 %v852_v42  ;;  %v5046_v40 = vld [vmem:[#allocation26_spill] sm:$0xff] }
 0x2fa   :  { %v5047_v42 = vld [vmem:[#allocation46_spill] sm:$0xff] }
 0x2fb   :  { %3211 = vtanh.f32 %v851_v11  ;;  %v5051_v11 = vld [vmem:[#allocation48_spill] sm:$0xff] }
 0x306   :  { %v3210_v12 = vpop.eup %3209 }
 0x307   :  { %v858_v39 = vadd.f32 1.0, %v3210_v12  ;;  %v5052_v12 = vld [vmem:[#allocation29_spill] sm:$0xff] }
 0x308   :  { %v3212_v15 = vpop.eup %3211 }
 0x309   :  { %v857_v37 = vadd.f32 1.0, %v3212_v15  ;;  %v861_v36 = vmul.f32 0.5, %v858_v39  ;;  %v5053_v15 = vld [vmem:[#allocation49_spill] sm:$0xff] }
 0x30b   :  { %v860_v33 = vmul.f32 0.5, %v857_v37  ;;  %v863_v22 = vmul.f32 %v861_v36, %v3911_v29 }
 0x30d   :  { %v862_v30 = vmul.f32 %v860_v33, %v5029_v32  ;;  %928 = vmatprep.mubr.f32.mxu1 %v863_v22  ;;  %v5056_v22 = vld [vmem:[#allocation31_spill] sm:$0xff] }
 0x30f   :  { %929 = vmatmul.mubr.f32.vlgmr.msra.gmra.mxu1 %v862_v30 }
 0x310   :  { %2981 = vmatpush3.msra.mxu1 %v3533_v53  ;;  %3012 = vmatprep.mubr.msk.f32.mxu1 %vm3471_vm0, %v4967_v23  ;;  %v5030_v53 = vld [vmem:[#allocation56_spill] sm:$0xff] }
 0x311   :  { %2982 = vmatprep.subr.mxu1 %v4967_v23 }
 0x312   :  { %2983 = vmatpush3.msra.mxu1 %v3543_v56  ;;  %v847_v56 = vadd.f32 %v772_v25, %v5030_v53  ;;  %v5057_v25 = vld [vmem:[#allocation51_spill] sm:$0xff]  ;;  %v5059_v53 = vld [vmem:[#allocation52_spill] sm:$0xff] }
 0x313   :  { %2984 = vmatprep.subr.mxu1 %v4967_v23 }
 0x314   :  { %2985 = vmatpush3.msra.mxu1 %v3555_v59  ;;  %v850_v59 = vmul.f32 0.5, %v847_v56  ;;  %v5060_v56 = vld [vmem:[#allocation33_spill] sm:$0xff] }
 0x315   :  { %2986 = vmatprep.subr.mxu1 %v4967_v23 }
 0x316   :  { %2987 = vmatpush3.msra.mxu1 %v3565_v62  ;;  %3213 = vtanh.f32 %v850_v59  ;;  %v5061_v59 = vld [vmem:[#allocation53_spill] sm:$0xff] }
 0x317   :  { %2988 = vmatprep.subr.mxu1 %v4967_v23 }
 0x318   :  { %2989 = vmatpush3.msra.mxu1 %v3577_v3 }
 0x319   :  { %2990 = vmatprep.subr.mxu1 %v4967_v23 }
 0x31a   :  { %2991 = vmatpush3.msra.mxu1 %v3586_v6 }
 0x31b   :  { %2992 = vmatprep.subr.mxu1 %v4967_v23 }
 0x31c   :  { %2993 = vmatpush3.msra.mxu1 %v3598_v10 }
 0x31d   :  { %2994 = vmatprep.subr.mxu1 %v4967_v23 }
 0x31e   :  { %2995 = vmatpush3.msra.mxu1 %v3607_v13 }
 0x31f   :  { %2996 = vmatprep.subr.mxu1 %v4967_v23 }
 0x320   :  { %2997 = vmatpush3.msra.mxu1 %v3619_v17 }
 0x321   :  { %2998 = vmatprep.subr.mxu1 %v4967_v23 }
 0x322   :  { %2999 = vmatpush3.msra.mxu1 %v3630_v20 }
 0x323   :  { %3000 = vmatprep.subr.mxu1 %v4967_v23  ;;  %v3214_v10 = vpop.eup %3213 }
 0x324   :  { %3001 = vmatpush3.msra.mxu1 %v3640_v24  ;;  %v856_v13 = vadd.f32 1.0, %v3214_v10  ;;  %v5065_v10 = vld [vmem:[#allocation55_spill] sm:$0xff] }
 0x325   :  { %3002 = vmatprep.subr.mxu1 %v4967_v23 }
 0x326   :  { %3003 = vmatpush3.msra.mxu1 %v3651_v27  ;;  %v859_v30 = vmul.f32 0.5, %v856_v13  ;;  %v5066_v13 = vld [vmem:[#allocation36_spill] sm:$0xff] }
 0x327   :  { %3004 = vmatprep.subr.mxu1 %v4967_v23 }
 0x328   :  { %3005 = vmatpush3.msra.mxu1 %v3661_v31  ;;  %v935_v32 = vsub.f32 1.0, %v859_v30 }
 0x329   :  { %3006 = vmatprep.subr.mxu1 %v4967_v23 }
 0x32a   :  { %3007 = vmatpush3.msra.mxu1 %v3672_v34  ;;  %v936_v36 = vmul.f32 %v935_v32, %v3911_v29  ;;  %v5044_v29 = vld [vmem:[#allocation25_spill] sm:$0xff] }
 0x32b   :  { %3008 = vmatprep.subr.mxu1 %v4967_v23 }
 0x32c   :  { %3009 = vmatpush3.msra.mxu1 %v3682_v38 }
 0x32d   :  { %3010 = vmatprep.subr.mxu1 %v4967_v23 }
 0x32e   :  { %3011 = vmatpush3.msra.mxu1 %v3691_v41 }
 0x32f   :  { %1192 = vmatprep.subr.mxu1 %v3525_v50  ;;  %v5031_v50 = vld [vmem:[#allocation38_spill] sm:$0xff] }
 0x3cf   :  { %v2551_v62 = vpop.f32.mrf.mxu1 }
 0x3d1   :  { %v2552_v3 = vpop.f32.mrf.mxu1 }
 0x3d2   :  { %v2553_v6 = vadd.f32 %v2552_v3, %v2551_v62  ;;  %v5062_v62 = vld [vmem:[#allocation34_spill] sm:$0xff] }
 0x3d3   :  { %v5063_v3 = vld [vmem:[#allocation54_spill] sm:$0xff] }
 0x3d4   :  { %3215 = vtanh.f32 %v2553_v6  ;;  %v5064_v6 = vld [vmem:[#allocation35_spill] sm:$0xff] }
 0x3e1   :  { %v3216_v33 = vpop.eup %3215 }
 0x3e2   :  { %v937_v37 = vmul.f32 %v3216_v33, %v859_v30  ;;  %v5067_v30 = vld [vmem:[#allocation37_spill] sm:$0xff] }
 0x3e4   :  { %v4021_v39 = vadd.f32 %v937_v37, %v936_v36  ;;  %v5068_v36 = vld [vmem:[#allocation68_spill] sm:$0xff] }
 0x3e6   :  { %1014 = vmatmul.mubr.f32.vlgmr.msra.gmra.mxu0 %v4021_v39  ;;  %940 = vst [vmem:[#allocation12 + $0x8] sm:$0xff] %v4021_v39  ;;  %3013 = vmatmul.mubr.f32.vlgmr.msra.gmra.mxu1 %v4021_v39 }
 0x3e7   :  { %2572 = vmatpush3.msra.mxu0 %v3740_v43  ;;  %1193 = vmatpush1.msra.mxu1 %v3529_v52  ;;  %v5032_v52 = vld [vmem:[#allocation19_spill] sm:$0xff] }
 0x3e8   :  { %2573 = vmatprep.subr.mxu0 %v3742_v44  ;;  %1194 = vmatprep.subr.mxu1 %v3535_v54  ;;  %v5033_v54 = vld [vmem:[#allocation39_spill] sm:$0xff] }
 0x3e9   :  { %2574 = vmatpush3.msra.mxu0 %v3746_v45  ;;  %1195 = vmatpush1.msra.mxu1 %v3541_v55  ;;  %v5034_v55 = vld [vmem:[#allocation20_spill] sm:$0xff] }
 0x3ea   :  { %2575 = vmatprep.subr.mxu0 %v3748_v46  ;;  %1196 = vmatprep.subr.mxu1 %v3547_v57  ;;  %v5035_v57 = vld [vmem:[#allocation40_spill] sm:$0xff] }
 0x3eb   :  { %2576 = vmatpush3.msra.mxu0 %v3752_v47  ;;  %1197 = vmatpush1.msra.mxu1 %v3551_v58  ;;  %v5036_v58 = vld [vmem:[#allocation21_spill] sm:$0xff] }
 0x3ec   :  { %2577 = vmatprep.subr.mxu0 %v3755_v48  ;;  %1198 = vmatprep.subr.mxu1 %v3557_v60  ;;  %v5037_v60 = vld [vmem:[#allocation41_spill] sm:$0xff] }
 0x3ed   :  { %2578 = vmatpush3.msra.mxu0 %v3758_v63  ;;  %1199 = vmatpush1.msra.mxu1 %v3563_v61  ;;  %v5038_v61 = vld [vmem:[#allocation22_spill] sm:$0xff] }
 0x3ee   :  { %2579 = vmatprep.subr.mxu0 %v3761_v7  ;;  %1200 = vmatprep.subr.mxu1 %v3569_v1  ;;  %v5039_v1 = vld [vmem:[#allocation42_spill] sm:$0xff] }
 0x3ef   :  { %2580 = vmatpush3.msra.mxu0 %v3764_v14  ;;  %1201 = vmatpush1.msra.mxu1 %v3573_v2  ;;  %v5040_v2 = vld [vmem:[#allocation23_spill] sm:$0xff] }
 0x3f0   :  { %2581 = vmatprep.subr.mxu0 %v3767_v21  ;;  %1202 = vmatprep.subr.mxu1 %v3579_v4  ;;  %v5041_v4 = vld [vmem:[#allocation43_spill] sm:$0xff] }
 0x3f1   :  { %2582 = vmatpush3.msra.mxu0 %v3770_v28  ;;  %1203 = vmatpush1.msra.mxu1 %v3584_v5  ;;  %v5042_v5 = vld [vmem:[#allocation24_spill] sm:$0xff] }
 0x3f2   :  { %2583 = vmatprep.subr.mxu0 %v3773_v35  ;;  %1204 = vmatprep.subr.mxu1 %v3590_v8  ;;  %v5043_v8 = vld [vmem:[#allocation44_spill] sm:$0xff] }
 0x3f3   :  { %2584 = vmatpush3.msra.mxu0 %v3776_v0  ;;  %1205 = vmatpush1.msra.mxu1 %v4989_v19  ;;  %v5045_v19 = vld [vmem:[#allocation45_spill] sm:$0xff] }
 0x3f4   :  { %2585 = vmatprep.subr.mxu0 %v5031_v50  ;;  %1206 = vmatprep.subr.mxu1 %v5032_v52 }
 0x3f5   :  { %2586 = vmatpush3.msra.mxu0 %v5033_v54  ;;  %1207 = vmatpush1.msra.mxu1 %v5034_v55 }
 0x3f6   :  { %2587 = vmatprep.subr.mxu0 %v5035_v57  ;;  %1208 = vmatprep.subr.mxu1 %v5036_v58 }
 0x3f7   :  { %2588 = vmatpush3.msra.mxu0 %v5037_v60  ;;  %1209 = vmatpush1.msra.mxu1 %v5038_v61  ;;  %v5069_v61 = vld [vmem:[#allocation59_spill] sm:$0xff] }
 0x3f8   :  { %2589 = vmatprep.subr.mxu0 %v5039_v1  ;;  %1210 = vmatprep.subr.mxu1 %v5040_v2 }
 0x3f9   :  { %2590 = vmatpush3.msra.mxu0 %v5041_v4  ;;  %1211 = vmatpush1.msra.mxu1 %v5042_v5 }
 0x3fa   :  { %2591 = vmatprep.subr.mxu0 %v5043_v8  ;;  %1212 = vmatprep.subr.mxu1 %v5044_v29 }
 0x3fb   :  { %2592 = vmatpush3.msra.mxu0 %v5045_v19  ;;  %1213 = vmatpush1.msra.mxu1 %v5046_v40 }
 0x3fc   :  { %2593 = vmatprep.subr.mxu0 %v5047_v42  ;;  %1214 = vmatprep.subr.mxu1 %v5048_v49 }
 0x3fd   :  { %2594 = vmatpush3.msra.mxu0 %v5049_v51  ;;  %1215 = vmatpush1.msra.mxu1 %v5050_v9 }
 0x3fe   :  { %2595 = vmatprep.subr.mxu0 %v5051_v11  ;;  %1216 = vmatprep.subr.mxu1 %v5052_v12 }
 0x3ff   :  { %2596 = vmatpush3.msra.mxu0 %v5053_v15  ;;  %1217 = vmatpush1.msra.mxu1 %v5054_v16 }
 0x400   :  { %2597 = vmatprep.subr.mxu0 %v5055_v18  ;;  %1218 = vmatprep.subr.mxu1 %v5056_v22 }
 0x401   :  { %2598 = vmatpush3.msra.mxu0 %v5057_v25  ;;  %1219 = vmatpush1.msra.mxu1 %v5058_v26  ;;  %v3265_v26 = vld [vmem:[#allocation4 + $0x10] sm:$0xff] }
 0x402   :  { %2599 = vmatprep.subr.mxu0 %v5059_v53  ;;  %1220 = vmatprep.subr.mxu1 %v5060_v56 }
 0x403   :  { %2600 = vmatpush3.msra.mxu0 %v5061_v59  ;;  %1221 = vmatpush1.msra.mxu1 %v5062_v62  ;;  %v4096_v62 = vld [vmem:[#allocation9 + $0x178] sm:$0xff] }
 0x404   :  { %2601 = vmatprep.subr.mxu0 %v5063_v3  ;;  %1222 = vmatprep.subr.mxu1 %v5064_v6  ;;  %v4102_v6 = vld [vmem:[#allocation9 + $0x160] sm:$0xff] }
 0x405   :  { %2602 = vmatpush3.msra.mxu0 %v5065_v10  ;;  %1223 = vmatpush1.msra.mxu1 %v5066_v13  ;;  %v4106_v13 = vld [vmem:[#allocation9 + $0x148] sm:$0xff] }
 0x406   :  { %3015 = vmatprep.subr.mxu0 %v4967_v23  ;;  %1256 = vmatprep.mubr.f32.mxu1 %v4967_v23 }
 0x407   :  { %2623 = vmatprep.subr.mxu1 %v5067_v30 }
 0x4a6   :  { %v4091_v32 = vpop.f32.mrf.mxu0  ;;  %v1086_v33 = vpop.f32.mrf.mxu1 }
 0x4a7   :  { %v1092_v37 = vadd.f32 %v1086_v33, %v5068_v36  ;;  %v4110_v33 = vld [vmem:[#allocation9 + $0x130] sm:$0xff]  ;;  %v4114_v36 = vld [vmem:[#allocation9 + $0x118] sm:$0xff] }
 0x4a8   :  { %v1017_v52 = vpop.f32.mrf.mxu0  ;;  %v3014_v55 = vpop.f32.mrf.mxu1 }
 0x4a9   :  { %v1095_v58 = vmul.f32 0.5, %v1092_v37  ;;  %v1091_v2 = vadd.f32 %v1017_v52, %v5069_v61  ;;  %v4118_v37 = vld [vmem:[#allocation9 + $0x100] sm:$0xff]  ;;  %v4122_v52 = vld [vmem:[#allocation9 + $0xe8] sm:$0xff]  ;;  %v4126_v55 = vld [vmem:[#allocation9 + $0xd0] sm:$0xff] }
 0x4ab   :  { %v1094_v5 = vmul.f32 0.5, %v1091_v2  ;;  %3217 = vtanh.f32 %v1095_v58 }
 0x4ad   :  { %3219 = vtanh.f32 %v1094_v5 }
 0x4b8   :  { %v3218_v29 = vpop.eup %3217 }
 0x4b9   :  { %v1101_v49 = vadd.f32 1.0, %v3218_v29 }
 0x4ba   :  { %v3220_v40 = vpop.eup %3219 }
 0x4bb   :  { %v1100_v9 = vadd.f32 1.0, %v3220_v40  ;;  %v1104_v12 = vmul.f32 0.5, %v1101_v49 }
 0x4bd   :  { %v1103_v16 = vmul.f32 0.5, %v1100_v9  ;;  %v1106_v22 = vmul.f32 %v1104_v12, %v4021_v39  ;;  %v4161_v9 = vld [vmem:[#allocation9 + $0x158] sm:$0xff]  ;;  %v4169_v12 = vld [vmem:[#allocation9 + $0x140] sm:$0xff] }
 0x4bf   :  { %v1105_v56 = vmul.f32 %v3265_v26, %v1103_v16  ;;  %1171 = vmatprep.mubr.f32.mxu0 %v1106_v22  ;;  %v5089_v16 = vld [vmem:[#allocation66_spill] sm:$0xff] }
 0x4c1   :  { %1172 = vmatmul.mubr.f32.vlgmr.msra.gmra.mxu0 %v1105_v56 }
 0x4c2   :  { %3016 = vmatpush3.msra.mxu0 %v4096_v62  ;;  %3047 = vmatprep.mubr.msk.f32.mxu0 %vm3471_vm0, %v4967_v23 }
 0x4c3   :  { %3017 = vmatprep.subr.mxu0 %v4967_v23 }
 0x4c4   :  { %3018 = vmatpush3.msra.mxu0 %v4102_v6 }
 0x4c5   :  { %3019 = vmatprep.subr.mxu0 %v4967_v23 }
 0x4c6   :  { %3020 = vmatpush3.msra.mxu0 %v4106_v13 }
 0x4c7   :  { %3021 = vmatprep.subr.mxu0 %v4967_v23 }
 0x4c8   :  { %3022 = vmatpush3.msra.mxu0 %v4110_v33 }
 0x4c9   :  { %3023 = vmatprep.subr.mxu0 %v4967_v23 }
 0x4ca   :  { %3024 = vmatpush3.msra.mxu0 %v4114_v36 }
 0x4cb   :  { %3025 = vmatprep.subr.mxu0 %v4967_v23 }
 0x4cc   :  { %3026 = vmatpush3.msra.mxu0 %v4118_v37 }
 0x4cd   :  { %3027 = vmatprep.subr.mxu0 %v4967_v23 }
 0x4ce   :  { %3028 = vmatpush3.msra.mxu0 %v4122_v52 }
 0x4cf   :  { %3029 = vmatprep.subr.mxu0 %v4967_v23 }
 0x4d0   :  { %3030 = vmatpush3.msra.mxu0 %v4126_v55 }
 0x4d1   :  { %3031 = vmatprep.subr.mxu0 %v4967_v23 }
 0x4d2   :  { %3032 = vmatpush3.msra.mxu0 %v3619_v17  ;;  %v4145_v17 = vld [vmem:[#allocation9 + $0x170] sm:$0xff] }
 0x4d3   :  { %3033 = vmatprep.subr.mxu0 %v4967_v23 }
 0x4d4   :  { %3034 = vmatpush3.msra.mxu0 %v3630_v20  ;;  %v5070_v20 = vld [vmem:[#allocation58_spill] sm:$0xff] }
 0x4d5   :  { %3035 = vmatprep.subr.mxu0 %v4967_v23 }
 0x4d6   :  { %3036 = vmatpush3.msra.mxu0 %v3640_v24  ;;  %v1090_v24 = vadd.f32 %v4091_v32, %v5070_v20  ;;  %v4157_v32 = vld [vmem:[#allocation9 + $0x168] sm:$0xff]  ;;  %v5090_v20 = vld [vmem:[#allocation61_spill] sm:$0xff] }
 0x4d7   :  { %3037 = vmatprep.subr.mxu0 %v4967_v23 }
 0x4d8   :  { %3038 = vmatpush3.msra.mxu0 %v3651_v27  ;;  %v1093_v27 = vmul.f32 0.5, %v1090_v24 }
 0x4d9   :  { %3039 = vmatprep.subr.mxu0 %v4967_v23 }
 0x4da   :  { %3040 = vmatpush3.msra.mxu0 %v3661_v31  ;;  %3221 = vtanh.f32 %v1093_v27 }
 0x4db   :  { %3041 = vmatprep.subr.mxu0 %v4967_v23 }
 0x4dc   :  { %3042 = vmatpush3.msra.mxu0 %v3672_v34 }
 0x4dd   :  { %3043 = vmatprep.subr.mxu0 %v4967_v23 }
 0x4de   :  { %3044 = vmatpush3.msra.mxu0 %v3682_v38 }
 0x4df   :  { %3045 = vmatprep.subr.mxu0 %v4967_v23 }
 0x4e0   :  { %3046 = vmatpush3.msra.mxu0 %v3691_v41 }
 0x4e1   :  { %1435 = vmatprep.subr.mxu0 %v4145_v17 }
 0x4e7   :  { %v3222_v61 = vpop.eup %3221 }
 0x4e8   :  { %v1099_v2 = vadd.f32 1.0, %v3222_v61 }
 0x4ea   :  { %v1102_v38 = vmul.f32 0.5, %v1099_v2  ;;  %v1185_v2 = vld [vmem:[#allocation4 + $0x18] sm:$0xff] }
 0x4ec   :  { %v1178_v5 = vsub.f32 1.0, %v1102_v38 }
 0x4ee   :  { %v1179_v41 = vmul.f32 %v1178_v5, %v4021_v39  ;;  %v4165_v39 = vld [vmem:[#allocation9 + $0x150] sm:$0xff] }
 0x581   :  { %v2603_v31 = vpop.f32.mrf.mxu0 }
 0x583   :  { %v2604_v58 = vpop.f32.mrf.mxu0 }
 0x584   :  { %v2605_v34 = vadd.f32 %v2604_v58, %v2603_v31 }
 0x586   :  { %3223 = vtanh.f32 %v2605_v34 }
 0x593   :  { %v3224_v29 = vpop.eup %3223 }
 0x594   :  { %v1180_v40 = vmul.f32 %v3224_v29, %v1102_v38  ;;  %v4304_v29 = vld [vmem:[#allocation9 + $0xb8] sm:$0xff] }
 0x596   :  { %v4151_v49 = vadd.f32 %v1180_v40, %v1179_v41  ;;  %v4308_v41 = vld [vmem:[#allocation9 + $0xa0] sm:$0xff]  ;;  %v4312_v40 = vld [vmem:[#allocation9 + $0x88] sm:$0xff] }
 0x598   :  { %1257 = vmatmul.mubr.f32.vlgmr.msra.gmra.mxu1 %v4151_v49  ;;  %1183 = vst [vmem:[#allocation12 + $0x10] sm:$0xff] %v4151_v49  ;;  %3048 = vmatmul.mubr.f32.vlgmr.msra.gmra.mxu0 %v4151_v49 }
 0x599   :  { %2624 = vmatpush3.msra.mxu1 %v3740_v43  ;;  %1436 = vmatpush1.msra.mxu0 %v4157_v32  ;;  %v4173_v43 = vld [vmem:[#allocation9 + $0x138] sm:$0xff] }
 0x59a   :  { %2625 = vmatprep.subr.mxu1 %v3742_v44  ;;  %1437 = vmatprep.subr.mxu0 %v4161_v9  ;;  %v4177_v44 = vld [vmem:[#allocation9 + $0x128] sm:$0xff] }
 0x59b   :  { %2626 = vmatpush3.msra.mxu1 %v3746_v45  ;;  %1438 = vmatpush1.msra.mxu0 %v4165_v39  ;;  %v4181_v45 = vld [vmem:[#allocation9 + $0x120] sm:$0xff] }
 0x59c   :  { %2627 = vmatprep.subr.mxu1 %v3748_v46  ;;  %1439 = vmatprep.subr.mxu0 %v4169_v12  ;;  %v4185_v46 = vld [vmem:[#allocation9 + $0x110] sm:$0xff] }
 0x59d   :  { %2628 = vmatpush3.msra.mxu1 %v3752_v47  ;;  %1440 = vmatpush1.msra.mxu0 %v4173_v43  ;;  %v4189_v47 = vld [vmem:[#allocation9 + $0x108] sm:$0xff] }
 0x59e   :  { %2629 = vmatprep.subr.mxu1 %v3755_v48  ;;  %1441 = vmatprep.subr.mxu0 %v4177_v44  ;;  %v4193_v48 = vld [vmem:[#allocation9 + $0xf8] sm:$0xff] }
 0x59f   :  { %2630 = vmatpush3.msra.mxu1 %v3758_v63  ;;  %1442 = vmatpush1.msra.mxu0 %v4181_v45  ;;  %v4197_v63 = vld [vmem:[#allocation9 + $0xf0] sm:$0xff] }
 0x5a0   :  { %2631 = vmatprep.subr.mxu1 %v3761_v7  ;;  %1443 = vmatprep.subr.mxu0 %v4185_v46  ;;  %v4201_v7 = vld [vmem:[#allocation9 + $0xe0] sm:$0xff] }
 0x5a1   :  { %2632 = vmatpush3.msra.mxu1 %v3764_v14  ;;  %1444 = vmatpush1.msra.mxu0 %v4189_v47  ;;  %v4205_v14 = vld [vmem:[#allocation9 + $0xd8] sm:$0xff] }
 0x5a2   :  { %2633 = vmatprep.subr.mxu1 %v3767_v21  ;;  %1445 = vmatprep.subr.mxu0 %v4193_v48  ;;  %v4209_v21 = vld [vmem:[#allocation9 + $0xc8] sm:$0xff] }
 0x5a3   :  { %2634 = vmatpush3.msra.mxu1 %v3770_v28  ;;  %1446 = vmatpush1.msra.mxu0 %v4197_v63  ;;  %5071 = vst [vmem:[#allocation18_spill] sm:$0xff] %v4209_v21  ;;  %v4213_v28 = vld [vmem:[#allocation9 + $0xc0] sm:$0xff] }
 0x5a4   :  { %2635 = vmatprep.subr.mxu1 %v3773_v35  ;;  %1447 = vmatprep.subr.mxu0 %v4201_v7  ;;  %5072 = vst [vmem:[#allocation62_spill] sm:$0xff] %v4213_v28  ;;  %v4217_v35 = vld [vmem:[#allocation9 + $0xb0] sm:$0xff] }
 0x5a5   :  { %2636 = vmatpush3.msra.mxu1 %v3776_v0  ;;  %1448 = vmatpush1.msra.mxu0 %v4205_v14  ;;  %5073 = vst [vmem:[#allocation57_spill] sm:$0xff] %v4217_v35  ;;  %v4221_v0 = vld [vmem:[#allocation9 + $0xa8] sm:$0xff] }
 0x5a6   :  { %2637 = vmatprep.subr.mxu1 %v5031_v50  ;;  %1449 = vmatprep.subr.mxu0 %v4209_v21  ;;  %5074 = vst [vmem:[#allocation17_spill] sm:$0xff] %v4221_v0  ;;  %v4225_v50 = vld [vmem:[#allocation9 + $0x98] sm:$0xff] }
 0x5a7   :  { %2638 = vmatpush3.msra.mxu1 %v5033_v54  ;;  %1450 = vmatpush1.msra.mxu0 %v4213_v28  ;;  %5075 = vst [vmem:[#allocation56_spill] sm:$0xff] %v4225_v50  ;;  %v4229_v54 = vld [vmem:[#allocation9 + $0x90] sm:$0xff] }
 0x5a8   :  { %2639 = vmatprep.subr.mxu1 %v5035_v57  ;;  %1451 = vmatprep.subr.mxu0 %v4217_v35  ;;  %5076 = vst [vmem:[#allocation38_spill] sm:$0xff] %v4229_v54  ;;  %v4233_v57 = vld [vmem:[#allocation9 + $0x80] sm:$0xff] }
 0x5a9   :  { %2640 = vmatpush3.msra.mxu1 %v5037_v60  ;;  %1452 = vmatpush1.msra.mxu0 %v4221_v0  ;;  %5077 = vst [vmem:[#allocation19_spill] sm:$0xff] %v4233_v57  ;;  %v4237_v60 = vld [vmem:[#allocation9 + $0x78] sm:$0xff] }
 0x5aa   :  { %2641 = vmatprep.subr.mxu1 %v5039_v1  ;;  %1453 = vmatprep.subr.mxu0 %v4225_v50  ;;  %5078 = vst [vmem:[#allocation39_spill] sm:$0xff] %v4237_v60  ;;  %v4241_v1 = vld [vmem:[#allocation9 + $0x68] sm:$0xff] }
 0x5ab   :  { %2642 = vmatpush3.msra.mxu1 %v5041_v4  ;;  %1454 = vmatpush1.msra.mxu0 %v4229_v54  ;;  %5079 = vst [vmem:[#allocation20_spill] sm:$0xff] %v4241_v1  ;;  %v4245_v4 = vld [vmem:[#allocation9 + $0x60] sm:$0xff] }
 0x5ac   :  { %2643 = vmatprep.subr.mxu1 %v5043_v8  ;;  %1455 = vmatprep.subr.mxu0 %v4233_v57  ;;  %5080 = vst [vmem:[#allocation40_spill] sm:$0xff] %v4245_v4  ;;  %v4249_v8 = vld [vmem:[#allocation9 + $0x50] sm:$0xff] }
 0x5ad   :  { %2644 = vmatpush3.msra.mxu1 %v5045_v19  ;;  %1456 = vmatpush1.msra.mxu0 %v4237_v60  ;;  %5081 = vst [vmem:[#allocation21_spill] sm:$0xff] %v4249_v8  ;;  %v4253_v19 = vld [vmem:[#allocation9 + $0x48] sm:$0xff] }
 0x5ae   :  { %2645 = vmatprep.subr.mxu1 %v5047_v42  ;;  %1457 = vmatprep.subr.mxu0 %v4241_v1  ;;  %5082 = vst [vmem:[#allocation41_spill] sm:$0xff] %v4253_v19  ;;  %v4257_v42 = vld [vmem:[#allocation9 + $0x38] sm:$0xff] }
 0x5af   :  { %2646 = vmatpush3.msra.mxu1 %v5049_v51  ;;  %1458 = vmatpush1.msra.mxu0 %v4245_v4  ;;  %5083 = vst [vmem:[#allocation22_spill] sm:$0xff] %v4257_v42  ;;  %v4261_v51 = vld [vmem:[#allocation9 + $0x30] sm:$0xff] }
 0x5b0   :  { %2647 = vmatprep.subr.mxu1 %v5051_v11  ;;  %1459 = vmatprep.subr.mxu0 %v4249_v8  ;;  %5084 = vst [vmem:[#allocation42_spill] sm:$0xff] %v4261_v51  ;;  %v4265_v11 = vld [vmem:[#allocation9 + $0x20] sm:$0xff] }
 0x5b1   :  { %2648 = vmatpush3.msra.mxu1 %v5053_v15  ;;  %1460 = vmatpush1.msra.mxu0 %v4253_v19  ;;  %5085 = vst [vmem:[#allocation23_spill] sm:$0xff] %v4265_v11  ;;  %v4269_v15 = vld [vmem:[#allocation9 + $0x18] sm:$0xff] }
 0x5b2   :  { %2649 = vmatprep.subr.mxu1 %v5055_v18  ;;  %1461 = vmatprep.subr.mxu0 %v4257_v42  ;;  %5086 = vst [vmem:[#allocation43_spill] sm:$0xff] %v4269_v15  ;;  %v4273_v18 = vld [vmem:[#allocation9 + $0x8] sm:$0xff] }
 0x5b3   :  { %2650 = vmatpush3.msra.mxu1 %v5057_v25  ;;  %1462 = vmatpush1.msra.mxu0 %v4261_v51  ;;  %5087 = vst [vmem:[#allocation24_spill] sm:$0xff] %v4273_v18  ;;  %v4277_v25 = vld [vmem:[#allocation9] sm:$0xff] }
 0x5b4   :  { %2651 = vmatprep.subr.mxu1 %v5059_v53  ;;  %1463 = vmatprep.subr.mxu0 %v4265_v11  ;;  %5088 = vst [vmem:[#allocation44_spill] sm:$0xff] %v4277_v25 }
 0x5b5   :  { %2652 = vmatpush3.msra.mxu1 %v5061_v59  ;;  %1464 = vmatpush1.msra.mxu0 %v4269_v15 }
 0x5b6   :  { %2653 = vmatprep.subr.mxu1 %v5063_v3  ;;  %1465 = vmatprep.subr.mxu0 %v4273_v18 }
 0x5b7   :  { %2654 = vmatpush3.msra.mxu1 %v5065_v10  ;;  %1466 = vmatpush1.msra.mxu0 %v4277_v25 }
 0x5b8   :  { %3050 = vmatprep.subr.mxu1 %v4967_v23  ;;  %1499 = vmatprep.mubr.f32.mxu0 %v4967_v23 }
 0x5b9   :  { %2675 = vmatprep.subr.mxu0 %v5067_v30 }
 0x658   :  { %v1258_v53 = vpop.f32.mrf.mxu1  ;;  %v1329_v59 = vpop.f32.mrf.mxu0 }
 0x659   :  { %v1335_v3 = vadd.f32 %v5089_v16, %v1329_v59  ;;  %v4316_v59 = vld [vmem:[#allocation9 + $0x70] sm:$0xff]  ;;  %v4320_v16 = vld [vmem:[#allocation9 + $0x58] sm:$0xff] }
 0x65a   :  { %v1260_v22 = vpop.f32.mrf.mxu1  ;;  %v3049_v26 = vpop.f32.mrf.mxu0 }
 0x65b   :  { %v1338_v56 = vmul.f32 0.5, %v1335_v3  ;;  %v1334_v24 = vadd.f32 %v1260_v22, %v5090_v20  ;;  %v4324_v3 = vld [vmem:[#allocation9 + $0x40] sm:$0xff]  ;;  %v4328_v22 = vld [vmem:[#allocation9 + $0x28] sm:$0xff]  ;;  %v4332_v26 = vld [vmem:[#allocation9 + $0x10] sm:$0xff] }
 0x65c   :  { %5091 = vst [vmem:[#allocation25_spill] sm:$0xff] %v4328_v22 }
 0x65d   :  { %v1337_v10 = vmul.f32 0.5, %v1334_v24  ;;  %3225 = vtanh.f32 %v1338_v56  ;;  %v5092_v56 = vld [vmem:[#allocation60_spill] sm:$0xff] }
 0x65e   :  { %v1333_v20 = vadd.f32 %v1258_v53, %v5092_v56  ;;  %v4343_v53 = vld [vmem:[#allocation10 + $0x78] sm:$0xff]  ;;  %v4347_v56 = vld [vmem:[#allocation10 + $0xf0] sm:$0xff] }
 0x65f   :  { %3227 = vtanh.f32 %v1337_v10 }
 0x660   :  { %v1336_v24 = vmul.f32 0.5, %v1333_v20  ;;  %v4355_v20 = vld [vmem:[#allocation10 + $0xe8] sm:$0xff] }
 0x662   :  { %3229 = vtanh.f32 %v1336_v24  ;;  %v4359_v24 = vld [vmem:[#allocation10 + $0x68] sm:$0xff] }
 0x66a   :  { %v3226_v27 = vpop.eup %3225 }
 0x66b   :  { %v1344_v58 = vadd.f32 1.0, %v3226_v27 }
 0x66c   :  { %v3228_v31 = vpop.eup %3227 }
 0x66d   :  { %v1343_v34 = vadd.f32 1.0, %v3228_v31  ;;  %v1347_v61 = vmul.f32 0.5, %v1344_v58 }
 0x66f   :  { %v1346_v38 = vmul.f32 0.5, %v1343_v34  ;;  %v1349_v30 = vmul.f32 %v1347_v61, %v4151_v49  ;;  %v3230_v58 = vpop.eup %3229 }
 0x670   :  { %v1342_v34 = vadd.f32 1.0, %v3230_v58  ;;  %v4375_v58 = vld [vmem:[#allocation10 + $0x58] sm:$0xff] }
 0x671   :  { %v1348_v5 = vmul.f32 %v1346_v38, %v1185_v2  ;;  %1414 = vmatprep.mubr.f32.mxu1 %v1349_v30 }
 0x672   :  { %v1345_v61 = vmul.f32 0.5, %v1342_v34  ;;  %v4379_v34 = vld [vmem:[#allocation10 + $0xd0] sm:$0xff] }
 0x673   :  { %1415 = vmatmul.mubr.f32.vlgmr.msra.gmra.mxu1 %v1348_v5 }
 0x674   :  { %3051 = vmatpush3.msra.mxu1 %v4096_v62  ;;  %3082 = vmatprep.mubr.msk.f32.mxu1 %vm3471_vm0, %v4967_v23  ;;  %v1421_v2 = vsub.f32 1.0, %v1345_v61 }
 0x675   :  { %3052 = vmatprep.subr.mxu1 %v4967_v23 }
 0x676   :  { %3053 = vmatpush3.msra.mxu1 %v4102_v6  ;;  %v1422_v30 = vmul.f32 %v1421_v2, %v4151_v49  ;;  %v4351_v49 = vld [vmem:[#allocation10 + $0x70] sm:$0xff]  ;;  %v4387_v2 = vld [vmem:[#allocation10 + $0xc8] sm:$0xff] }
 0x677   :  { %3054 = vmatprep.subr.mxu1 %v4967_v23  ;;  %5093 = vst [vmem:[#allocation45_spill] sm:$0xff] %v4387_v2 }
 0x678   :  { %3055 = vmatpush3.msra.mxu1 %v4106_v13 }
 0x679   :  { %3056 = vmatprep.subr.mxu1 %v4967_v23 }
 0x67a   :  { %3057 = vmatpush3.msra.mxu1 %v4110_v33 }
 0x67b   :  { %3058 = vmatprep.subr.mxu1 %v4967_v23 }
 0x67c   :  { %3059 = vmatpush3.msra.mxu1 %v4114_v36 }
 0x67d   :  { %3060 = vmatprep.subr.mxu1 %v4967_v23 }
 0x67e   :  { %3061 = vmatpush3.msra.mxu1 %v4118_v37 }
 0x67f   :  { %3062 = vmatprep.subr.mxu1 %v4967_v23 }
 0x680   :  { %3063 = vmatpush3.msra.mxu1 %v4122_v52 }
 0x681   :  { %3064 = vmatprep.subr.mxu1 %v4967_v23 }
 0x682   :  { %3065 = vmatpush3.msra.mxu1 %v4126_v55 }
 0x683   :  { %3066 = vmatprep.subr.mxu1 %v4967_v23 }
 0x684   :  { %3067 = vmatpush3.msra.mxu1 %v4304_v29 }
 0x685   :  { %3068 = vmatprep.subr.mxu1 %v4967_v23 }
 0x686   :  { %3069 = vmatpush3.msra.mxu1 %v4308_v41 }
 0x687   :  { %3070 = vmatprep.subr.mxu1 %v4967_v23 }
 0x688   :  { %3071 = vmatpush3.msra.mxu1 %v4312_v40 }
 0x689   :  { %3072 = vmatprep.subr.mxu1 %v4967_v23 }
 0x68a   :  { %3073 = vmatpush3.msra.mxu1 %v4316_v59 }
 0x68b   :  { %3074 = vmatprep.subr.mxu1 %v4967_v23 }
 0x68c   :  { %3075 = vmatpush3.msra.mxu1 %v4320_v16 }
 0x68d   :  { %3076 = vmatprep.subr.mxu1 %v4967_v23 }
 0x68e   :  { %3077 = vmatpush3.msra.mxu1 %v4324_v3 }
 0x68f   :  { %3078 = vmatprep.subr.mxu1 %v4967_v23 }
 0x690   :  { %3079 = vmatpush3.msra.mxu1 %v4328_v22 }
 0x691   :  { %3080 = vmatprep.subr.mxu1 %v4967_v23 }
 0x692   :  { %3081 = vmatpush3.msra.mxu1 %v4332_v26 }
 0x693   :  { %1678 = vmatprep.subr.mxu1 %v4145_v17 }
 0x733   :  { %v2655_v10 = vpop.f32.mrf.mxu1 }
 0x735   :  { %v2656_v27 = vpop.f32.mrf.mxu1 }
 0x736   :  { %v2657_v31 = vadd.f32 %v2656_v27, %v2655_v10  ;;  %v4363_v10 = vld [vmem:[#allocation10 + $0xe0] sm:$0xff] }
 0x737   :  { %v4367_v27 = vld [vmem:[#allocation10 + $0x60] sm:$0xff] }
 0x738   :  { %3231 = vtanh.f32 %v2657_v31  ;;  %v4371_v31 = vld [vmem:[#allocation10 + $0xd8] sm:$0xff] }
 0x745   :  { %v3232_v38 = vpop.eup %3231 }
 0x746   :  { %v1423_v5 = vmul.f32 %v3232_v38, %v1345_v61  ;;  %v4383_v61 = vld [vmem:[#allocation10 + $0x50] sm:$0xff]  ;;  %v4391_v38 = vld [vmem:[#allocation10 + $0x48] sm:$0xff] }
 0x747   :  { %5094 = vst [vmem:[#allocation26_spill] sm:$0xff] %v4391_v38 }
 0x748   :  { %v4338_v22 = vadd.f32 %v1423_v5, %v1422_v30  ;;  %v4395_v30 = vld [vmem:[#allocation10 + $0xc0] sm:$0xff] }
 0x749   :  { %5095 = vst [vmem:[#allocation46_spill] sm:$0xff] %v4395_v30  ;;  %v4399_v5 = vld [vmem:[#allocation10 + $0x40] sm:$0xff] }
 0x74a   :  { %1500 = vmatmul.mubr.f32.vlgmr.msra.gmra.mxu0 %v4338_v22  ;;  %1426 = vst [vmem:[#allocation12 + $0x18] sm:$0xff] %v4338_v22  ;;  %3083 = vmatmul.mubr.f32.vlgmr.msra.gmra.mxu1 %v4338_v22  ;;  %5096 = vst [vmem:[#allocation27_spill] sm:$0xff] %v4399_v5 }
 0x74b   :  { %2676 = vmatpush3.msra.mxu0 %v4343_v53  ;;  %1679 = vmatpush1.msra.mxu1 %v4157_v32 }
 0x74c   :  { %2677 = vmatprep.subr.mxu0 %v4347_v56  ;;  %1680 = vmatprep.subr.mxu1 %v4161_v9 }
 0x74d   :  { %2678 = vmatpush3.msra.mxu0 %v4351_v49  ;;  %1681 = vmatpush1.msra.mxu1 %v4165_v39 }
 0x74e   :  { %2679 = vmatprep.subr.mxu0 %v4355_v20  ;;  %1682 = vmatprep.subr.mxu1 %v4169_v12 }
 0x74f   :  { %2680 = vmatpush3.msra.mxu0 %v4359_v24  ;;  %1683 = vmatpush1.msra.mxu1 %v4173_v43 }
 0x750   :  { %2681 = vmatprep.subr.mxu0 %v4363_v10  ;;  %1684 = vmatprep.subr.mxu1 %v4177_v44 }
 0x751   :  { %2682 = vmatpush3.msra.mxu0 %v4367_v27  ;;  %1685 = vmatpush1.msra.mxu1 %v4181_v45 }
 0x752   :  { %2683 = vmatprep.subr.mxu0 %v4371_v31  ;;  %1686 = vmatprep.subr.mxu1 %v4185_v46 }
 0x753   :  { %2684 = vmatpush3.msra.mxu0 %v4375_v58  ;;  %1687 = vmatpush1.msra.mxu1 %v4189_v47 }
 0x754   :  { %2685 = vmatprep.subr.mxu0 %v4379_v34  ;;  %1688 = vmatprep.subr.mxu1 %v4193_v48 }
 0x755   :  { %2686 = vmatpush3.msra.mxu0 %v4383_v61  ;;  %1689 = vmatpush1.msra.mxu1 %v4197_v63 }
 0x756   :  { %2687 = vmatprep.subr.mxu0 %v4387_v2  ;;  %1690 = vmatprep.subr.mxu1 %v4201_v7  ;;  %v4403_v2 = vld [vmem:[#allocation10 + $0xb8] sm:$0xff] }
 0x757   :  { %2688 = vmatpush3.msra.mxu0 %v4391_v38  ;;  %1691 = vmatpush1.msra.mxu1 %v4205_v14  ;;  %5097 = vst [vmem:[#allocation47_spill] sm:$0xff] %v4403_v2  ;;  %v4407_v38 = vld [vmem:[#allocation10 + $0x38] sm:$0xff] }
 0x758   :  { %2689 = vmatprep.subr.mxu0 %v4395_v30  ;;  %1692 = vmatprep.subr.mxu1 %v4209_v21  ;;  %5098 = vst [vmem:[#allocation28_spill] sm:$0xff] %v4407_v38  ;;  %v4411_v30 = vld [vmem:[#allocation10 + $0xb0] sm:$0xff] }
 0x759   :  { %2690 = vmatpush3.msra.mxu0 %v4399_v5  ;;  %1693 = vmatpush1.msra.mxu1 %v4213_v28  ;;  %5099 = vst [vmem:[#allocation48_spill] sm:$0xff] %v4411_v30  ;;  %v4415_v5 = vld [vmem:[#allocation10 + $0x30] sm:$0xff] }
 0x75a   :  { %2691 = vmatprep.subr.mxu0 %v4403_v2  ;;  %1694 = vmatprep.subr.mxu1 %v4217_v35  ;;  %5100 = vst [vmem:[#allocation29_spill] sm:$0xff] %v4415_v5  ;;  %v4419_v2 = vld [vmem:[#allocation10 + $0xa8] sm:$0xff] }
 0x75b   :  { %2692 = vmatpush3.msra.mxu0 %v4407_v38  ;;  %1695 = vmatpush1.msra.mxu1 %v4221_v0  ;;  %5101 = vst [vmem:[#allocation49_spill] sm:$0xff] %v4419_v2  ;;  %v4423_v38 = vld [vmem:[#allocation10 + $0x28] sm:$0xff] }
 0x75c   :  { %2693 = vmatprep.subr.mxu0 %v4411_v30  ;;  %1696 = vmatprep.subr.mxu1 %v4225_v50  ;;  %5102 = vst [vmem:[#allocation30_spill] sm:$0xff] %v4423_v38  ;;  %v4427_v30 = vld [vmem:[#allocation10 + $0xa0] sm:$0xff] }
 0x75d   :  { %2694 = vmatpush3.msra.mxu0 %v4415_v5  ;;  %1697 = vmatpush1.msra.mxu1 %v4229_v54  ;;  %5103 = vst [vmem:[#allocation50_spill] sm:$0xff] %v4427_v30  ;;  %v4431_v5 = vld [vmem:[#allocation10 + $0x20] sm:$0xff] }
 0x75e   :  { %2695 = vmatprep.subr.mxu0 %v4419_v2  ;;  %1698 = vmatprep.subr.mxu1 %v4233_v57  ;;  %5104 = vst [vmem:[#allocation31_spill] sm:$0xff] %v4431_v5  ;;  %v4435_v2 = vld [vmem:[#allocation10 + $0x98] sm:$0xff]  ;;  %v1428_v54 = vld [vmem:[#allocation4 + $0x20] sm:$0xff] }
 0x75f   :  { %2696 = vmatpush3.msra.mxu0 %v4423_v38  ;;  %1699 = vmatpush1.msra.mxu1 %v4237_v60  ;;  %5105 = vst [vmem:[#allocation51_spill] sm:$0xff] %v4435_v2  ;;  %v4439_v38 = vld [vmem:[#allocation10 + $0x18] sm:$0xff] }
 0x760   :  { %2697 = vmatprep.subr.mxu0 %v4427_v30  ;;  %1700 = vmatprep.subr.mxu1 %v4241_v1  ;;  %5106 = vst [vmem:[#allocation32_spill] sm:$0xff] %v4439_v38  ;;  %v4443_v30 = vld [vmem:[#allocation10 + $0x90] sm:$0xff] }
 0x761   :  { %2698 = vmatpush3.msra.mxu0 %v4431_v5  ;;  %1701 = vmatpush1.msra.mxu1 %v4245_v4  ;;  %5107 = vst [vmem:[#allocation52_spill] sm:$0xff] %v4443_v30  ;;  %v4447_v5 = vld [vmem:[#allocation10 + $0x10] sm:$0xff] }
 0x762   :  { %2699 = vmatprep.subr.mxu0 %v4435_v2  ;;  %1702 = vmatprep.subr.mxu1 %v4249_v8  ;;  %5108 = vst [vmem:[#allocation33_spill] sm:$0xff] %v4447_v5  ;;  %v4451_v2 = vld [vmem:[#allocation10 + $0x88] sm:$0xff] }
 0x763   :  { %2700 = vmatpush3.msra.mxu0 %v4439_v38  ;;  %1703 = vmatpush1.msra.mxu1 %v4253_v19  ;;  %5109 = vst [vmem:[#allocation53_spill] sm:$0xff] %v4451_v2  ;;  %v4455_v38 = vld [vmem:[#allocation10 + $0x8] sm:$0xff]  ;;  %v5115_v19 = vld [vmem:[#allocation64_spill] sm:$0xff] }
 0x764   :  { %2701 = vmatprep.subr.mxu0 %v4443_v30  ;;  %1704 = vmatprep.subr.mxu1 %v4257_v42  ;;  %5110 = vst [vmem:[#allocation34_spill] sm:$0xff] %v4455_v38  ;;  %v4459_v30 = vld [vmem:[#allocation10 + $0x80] sm:$0xff] }
 0x765   :  { %2702 = vmatpush3.msra.mxu0 %v4447_v5  ;;  %1705 = vmatpush1.msra.mxu1 %v4261_v51  ;;  %5111 = vst [vmem:[#allocation54_spill] sm:$0xff] %v4459_v30  ;;  %v4463_v5 = vld [vmem:[#allocation10] sm:$0xff] }
 0x766   :  { %2703 = vmatprep.subr.mxu0 %v4451_v2  ;;  %1706 = vmatprep.subr.mxu1 %v4265_v11  ;;  %5112 = vst [vmem:[#allocation35_spill] sm:$0xff] %v4463_v5  ;;  %v4469_v11 = vld [vmem:[#allocation10 + $0xf8] sm:$0xff] }
 0x767   :  { %2704 = vmatpush3.msra.mxu0 %v4455_v38  ;;  %1707 = vmatpush1.msra.mxu1 %v4269_v15  ;;  %5113 = vst [vmem:[#allocation55_spill] sm:$0xff] %v4469_v11  ;;  %v5114_v2 = vld [vmem:[#allocation72_spill] sm:$0xff] }
 0x768   :  { %2705 = vmatprep.subr.mxu0 %v4459_v30  ;;  %1708 = vmatprep.subr.mxu1 %v4273_v18 }
 0x769   :  { %2706 = vmatpush3.msra.mxu0 %v4463_v5  ;;  %1709 = vmatpush1.msra.mxu1 %v4277_v25 }
 0x76a   :  { %3085 = vmatprep.subr.mxu0 %v4967_v23  ;;  %1742 = vmatprep.mubr.f32.mxu1 %v4967_v23 }
 0x76b   :  { %2727 = vmatprep.subr.mxu1 %v4469_v11 }
 0x80a   :  { %v1501_v15 = vpop.f32.mrf.mxu0  ;;  %v1572_v38 = vpop.f32.mrf.mxu1 }
 0x80b   :  { %v1578_v30 = vadd.f32 %v1572_v38, %v5114_v2  ;;  %v5120_v38 = vld [vmem:[#allocation46_spill] sm:$0xff] }
 0x80c   :  { %v1503_v51 = vpop.f32.mrf.mxu0  ;;  %v3084_v18 = vpop.f32.mrf.mxu1 }
 0x80d   :  { %v1581_v42 = vmul.f32 0.5, %v1578_v30  ;;  %v1577_v8 = vadd.f32 %v1503_v51, %v5115_v19  ;;  %v5121_v30 = vld [vmem:[#allocation27_spill] sm:$0xff] }
 0x80f   :  { %v1580_v5 = vmul.f32 0.5, %v1577_v8  ;;  %3233 = vtanh.f32 %v1581_v42 }
 0x811   :  { %3235 = vtanh.f32 %v1580_v5  ;;  %v5122_v5 = vld [vmem:[#allocation47_spill] sm:$0xff] }
 0x81c   :  { %v3234_v25 = vpop.eup %3233 }
 0x81d   :  { %v1587_v1 = vadd.f32 1.0, %v3234_v25 }
 0x81e   :  { %v3236_v4 = vpop.eup %3235 }
 0x81f   :  { %v1586_v60 = vadd.f32 1.0, %v3236_v4  ;;  %v1590_v57 = vmul.f32 0.5, %v1587_v1 }
 0x821   :  { %v1589_v50 = vmul.f32 0.5, %v1586_v60  ;;  %v1592_v11 = vmul.f32 %v1590_v57, %v4338_v22 }
 0x823   :  { %v1591_v0 = vmul.f32 %v1589_v50, %v1428_v54  ;;  %1657 = vmatprep.mubr.f32.mxu0 %v1592_v11  ;;  %v5117_v50 = vld [vmem:[#allocation63_spill] sm:$0xff] }
 0x824   :  { %v1576_v54 = vadd.f32 %v1501_v15, %v5117_v50  ;;  %v5118_v15 = vld [vmem:[#allocation45_spill] sm:$0xff]  ;;  %v5123_v50 = vld [vmem:[#allocation28_spill] sm:$0xff] }
 0x825   :  { %1658 = vmatmul.mubr.f32.vlgmr.msra.gmra.mxu0 %v1591_v0  ;;  %v5116_v0 = vld [vmem:[#allocation25_spill] sm:$0xff] }
 0x826   :  { %3086 = vmatpush3.msra.mxu0 %v4096_v62  ;;  %3117 = vmatprep.mubr.msk.f32.mxu0 %vm3471_vm0, %v4967_v23  ;;  %v1579_v57 = vmul.f32 0.5, %v1576_v54  ;;  %v5124_v54 = vld [vmem:[#allocation17_spill] sm:$0xff] }
 0x827   :  { %3087 = vmatprep.subr.mxu0 %v4967_v23 }
 0x828   :  { %3088 = vmatpush3.msra.mxu0 %v4102_v6  ;;  %3237 = vtanh.f32 %v1579_v57  ;;  %v5125_v57 = vld [vmem:[#allocation48_spill] sm:$0xff] }
 0x829   :  { %3089 = vmatprep.subr.mxu0 %v4967_v23 }
 0x82a   :  { %3090 = vmatpush3.msra.mxu0 %v4106_v13 }
 0x82b   :  { %3091 = vmatprep.subr.mxu0 %v4967_v23 }
 0x82c   :  { %3092 = vmatpush3.msra.mxu0 %v4110_v33 }
 0x82d   :  { %3093 = vmatprep.subr.mxu0 %v4967_v23 }
 0x82e   :  { %3094 = vmatpush3.msra.mxu0 %v4114_v36 }
 0x82f   :  { %3095 = vmatprep.subr.mxu0 %v4967_v23 }
 0x830   :  { %3096 = vmatpush3.msra.mxu0 %v4118_v37 }
 0x831   :  { %3097 = vmatprep.subr.mxu0 %v4967_v23 }
 0x832   :  { %3098 = vmatpush3.msra.mxu0 %v4122_v52 }
 0x833   :  { %3099 = vmatprep.subr.mxu0 %v4967_v23 }
 0x834   :  { %3100 = vmatpush3.msra.mxu0 %v4126_v55 }
 0x835   :  { %3101 = vmatprep.subr.mxu0 %v4967_v23  ;;  %v3238_v8 = vpop.eup %3237 }
 0x836   :  { %3102 = vmatpush3.msra.mxu0 %v4304_v29  ;;  %v1585_v19 = vadd.f32 1.0, %v3238_v8  ;;  %v5129_v8 = vld [vmem:[#allocation49_spill] sm:$0xff] }
 0x837   :  { %3103 = vmatprep.subr.mxu0 %v4967_v23 }
 0x838   :  { %3104 = vmatpush3.msra.mxu0 %v4308_v41  ;;  %v1588_v42 = vmul.f32 0.5, %v1585_v19  ;;  %v5130_v19 = vld [vmem:[#allocation19_spill] sm:$0xff] }
 0x839   :  { %3105 = vmatprep.subr.mxu0 %v4967_v23 }
 0x83a   :  { %3106 = vmatpush3.msra.mxu0 %v4312_v40  ;;  %v1664_v51 = vsub.f32 1.0, %v1588_v42 }
 0x83b   :  { %3107 = vmatprep.subr.mxu0 %v4967_v23 }
 0x83c   :  { %3108 = vmatpush3.msra.mxu0 %v4316_v59  ;;  %v1665_v18 = vmul.f32 %v1664_v51, %v4338_v22  ;;  %v5119_v22 = vld [vmem:[#allocation26_spill] sm:$0xff]  ;;  %v5132_v51 = vld [vmem:[#allocation39_spill] sm:$0xff] }
 0x83d   :  { %3109 = vmatprep.subr.mxu0 %v4967_v23 }
 0x83e   :  { %3110 = vmatpush3.msra.mxu0 %v4320_v16 }
 0x83f   :  { %3111 = vmatprep.subr.mxu0 %v4967_v23 }
 0x840   :  { %3112 = vmatpush3.msra.mxu0 %v4324_v3 }
 0x841   :  { %3113 = vmatprep.subr.mxu0 %v4967_v23 }
 0x842   :  { %3114 = vmatpush3.msra.mxu0 %v5116_v0 }
 0x843   :  { %3115 = vmatprep.subr.mxu0 %v4967_v23 }
 0x844   :  { %3116 = vmatpush3.msra.mxu0 %v4332_v26 }
 0x845   :  { %1921 = vmatprep.subr.mxu0 %v4145_v17 }
 0x8e5   :  { %v2707_v60 = vpop.f32.mrf.mxu0 }
 0x8e7   :  { %v2708_v1 = vpop.f32.mrf.mxu0 }
 0x8e8   :  { %v2709_v4 = vadd.f32 %v2708_v1, %v2707_v60  ;;  %v5126_v60 = vld [vmem:[#allocation56_spill] sm:$0xff]  ;;  %v5127_v1 = vld [vmem:[#allocation29_spill] sm:$0xff] }
 0x8ea   :  { %3239 = vtanh.f32 %v2709_v4  ;;  %v5128_v4 = vld [vmem:[#allocation38_spill] sm:$0xff] }
 0x8f7   :  { %v3240_v11 = vpop.eup %3239 }
 0x8f8   :  { %v1666_v25 = vmul.f32 %v3240_v11, %v1588_v42  ;;  %v5131_v42 = vld [vmem:[#allocation30_spill] sm:$0xff] }
 0x8f9   :  { %v5133_v11 = vld [vmem:[#allocation50_spill] sm:$0xff] }
 0x8fa   :  { %v4511_v2 = vadd.f32 %v1666_v25, %v1665_v18  ;;  %v5134_v18 = vld [vmem:[#allocation20_spill] sm:$0xff]  ;;  %v5135_v25 = vld [vmem:[#allocation31_spill] sm:$0xff] }
 0x8fc   :  { %1743 = vmatmul.mubr.f32.vlgmr.msra.gmra.mxu1 %v4511_v2  ;;  %1669 = vst [vmem:[#allocation12 + $0x20] sm:$0xff] %v4511_v2  ;;  %3118 = vmatmul.mubr.f32.vlgmr.msra.gmra.mxu0 %v4511_v2 }
 0x8fd   :  { %2728 = vmatpush3.msra.mxu1 %v4343_v53  ;;  %1922 = vmatpush1.msra.mxu0 %v4157_v32 }
 0x8fe   :  { %2729 = vmatprep.subr.mxu1 %v4347_v56  ;;  %1923 = vmatprep.subr.mxu0 %v4161_v9 }
 0x8ff   :  { %2730 = vmatpush3.msra.mxu1 %v4351_v49  ;;  %1924 = vmatpush1.msra.mxu0 %v4165_v39 }
 0x900   :  { %2731 = vmatprep.subr.mxu1 %v4355_v20  ;;  %1925 = vmatprep.subr.mxu0 %v4169_v12 }
 0x901   :  { %2732 = vmatpush3.msra.mxu1 %v4359_v24  ;;  %1926 = vmatpush1.msra.mxu0 %v4173_v43 }
 0x902   :  { %2733 = vmatprep.subr.mxu1 %v4363_v10  ;;  %1927 = vmatprep.subr.mxu0 %v4177_v44 }
 0x903   :  { %2734 = vmatpush3.msra.mxu1 %v4367_v27  ;;  %1928 = vmatpush1.msra.mxu0 %v4181_v45 }
 0x904   :  { %2735 = vmatprep.subr.mxu1 %v4371_v31  ;;  %1929 = vmatprep.subr.mxu0 %v4185_v46 }
 0x905   :  { %2736 = vmatpush3.msra.mxu1 %v4375_v58  ;;  %1930 = vmatpush1.msra.mxu0 %v4189_v47 }
 0x906   :  { %2737 = vmatprep.subr.mxu1 %v4379_v34  ;;  %1931 = vmatprep.subr.mxu0 %v4193_v48 }
 0x907   :  { %2738 = vmatpush3.msra.mxu1 %v4383_v61  ;;  %1932 = vmatpush1.msra.mxu0 %v4197_v63 }
 0x908   :  { %2739 = vmatprep.subr.mxu1 %v5118_v15  ;;  %1933 = vmatprep.subr.mxu0 %v4201_v7 }
 0x909   :  { %2740 = vmatpush3.msra.mxu1 %v5119_v22  ;;  %1934 = vmatpush1.msra.mxu0 %v4205_v14 }
 0x90a   :  { %2741 = vmatprep.subr.mxu1 %v5120_v38  ;;  %1935 = vmatprep.subr.mxu0 %v4209_v21 }
 0x90b   :  { %2742 = vmatpush3.msra.mxu1 %v5121_v30  ;;  %1936 = vmatpush1.msra.mxu0 %v4213_v28  ;;  %v1671_v30 = vld [vmem:[#allocation4 + $0x28] sm:$0xff] }
 0x90c   :  { %2743 = vmatprep.subr.mxu1 %v5122_v5  ;;  %1937 = vmatprep.subr.mxu0 %v4217_v35 }
 0x90d   :  { %2744 = vmatpush3.msra.mxu1 %v5123_v50  ;;  %1938 = vmatpush1.msra.mxu0 %v5124_v54 }
 0x90e   :  { %2745 = vmatprep.subr.mxu1 %v5125_v57  ;;  %1939 = vmatprep.subr.mxu0 %v5126_v60  ;;  %v5136_v57 = vld [vmem:[#allocation40_spill] sm:$0xff]  ;;  %v5137_v60 = vld [vmem:[#allocation51_spill] sm:$0xff] }
 0x90f   :  { %2746 = vmatpush3.msra.mxu1 %v5127_v1  ;;  %1940 = vmatpush1.msra.mxu0 %v5128_v4  ;;  %v5138_v1 = vld [vmem:[#allocation21_spill] sm:$0xff]  ;;  %v5139_v4 = vld [vmem:[#allocation32_spill] sm:$0xff] }
 0x910   :  { %2747 = vmatprep.subr.mxu1 %v5129_v8  ;;  %1941 = vmatprep.subr.mxu0 %v5130_v19  ;;  %v5140_v8 = vld [vmem:[#allocation41_spill] sm:$0xff]  ;;  %v5141_v19 = vld [vmem:[#allocation52_spill] sm:$0xff] }
 0x911   :  { %2748 = vmatpush3.msra.mxu1 %v5131_v42  ;;  %1942 = vmatpush1.msra.mxu0 %v5132_v51  ;;  %v5142_v42 = vld [vmem:[#allocation22_spill] sm:$0xff]  ;;  %v5143_v51 = vld [vmem:[#allocation33_spill] sm:$0xff] }
 0x912   :  { %2749 = vmatprep.subr.mxu1 %v5133_v11  ;;  %1943 = vmatprep.subr.mxu0 %v5134_v18  ;;  %v5144_v11 = vld [vmem:[#allocation42_spill] sm:$0xff]  ;;  %v5145_v18 = vld [vmem:[#allocation53_spill] sm:$0xff] }
 0x913   :  { %2750 = vmatpush3.msra.mxu1 %v5135_v25  ;;  %1944 = vmatpush1.msra.mxu0 %v5136_v57  ;;  %v5146_v25 = vld [vmem:[#allocation23_spill] sm:$0xff]  ;;  %v5147_v57 = vld [vmem:[#allocation34_spill] sm:$0xff] }
 0x914   :  { %2751 = vmatprep.subr.mxu1 %v5137_v60  ;;  %1945 = vmatprep.subr.mxu0 %v5138_v1  ;;  %v5148_v60 = vld [vmem:[#allocation43_spill] sm:$0xff]  ;;  %v5149_v1 = vld [vmem:[#allocation54_spill] sm:$0xff] }
 0x915   :  { %2752 = vmatpush3.msra.mxu1 %v5139_v4  ;;  %1946 = vmatpush1.msra.mxu0 %v5140_v8  ;;  %v5150_v4 = vld [vmem:[#allocation24_spill] sm:$0xff]  ;;  %v5151_v8 = vld [vmem:[#allocation35_spill] sm:$0xff] }
 0x916   :  { %2753 = vmatprep.subr.mxu1 %v5141_v19  ;;  %1947 = vmatprep.subr.mxu0 %v5142_v42  ;;  %v5152_v19 = vld [vmem:[#allocation44_spill] sm:$0xff] }
 0x917   :  { %2754 = vmatpush3.msra.mxu1 %v5143_v51  ;;  %1948 = vmatpush1.msra.mxu0 %v5144_v11  ;;  %v5153_v11 = vld [vmem:[#allocation55_spill] sm:$0xff]  ;;  %v5154_v51 = vld [vmem:[#allocation70_spill] sm:$0xff] }
 0x918   :  { %2755 = vmatprep.subr.mxu1 %v5145_v18  ;;  %1949 = vmatprep.subr.mxu0 %v5146_v25 }
 0x919   :  { %2756 = vmatpush3.msra.mxu1 %v5147_v57  ;;  %1950 = vmatpush1.msra.mxu0 %v5148_v60 }
 0x91a   :  { %2757 = vmatprep.subr.mxu1 %v5149_v1  ;;  %1951 = vmatprep.subr.mxu0 %v5150_v4  ;;  %v5155_v1 = vld [vmem:[#allocation67_spill] sm:$0xff] }
 0x91b   :  { %2758 = vmatpush3.msra.mxu1 %v5151_v8  ;;  %1952 = vmatpush1.msra.mxu0 %v5152_v19 }
 0x91c   :  { %3120 = vmatprep.subr.mxu1 %v4967_v23  ;;  %1985 = vmatprep.mubr.f32.mxu0 %v4967_v23 }
 0x91d   :  { %2779 = vmatprep.subr.mxu0 %v5153_v11 }
 0x9bc   :  { %v1744_v18 = vpop.f32.mrf.mxu1  ;;  %v1815_v25 = vpop.f32.mrf.mxu0 }
 0x9bd   :  { %v1821_v57 = vadd.f32 %v5154_v51, %v1815_v25  ;;  %v5181_v51 = vld [vmem:[#allocation52_spill] sm:$0xff]  ;;  %v5184_v25 = vld [vmem:[#allocation42_spill] sm:$0xff] }
 0x9be   :  { %v1746_v42 = vpop.f32.mrf.mxu1  ;;  %v3119_v60 = vpop.f32.mrf.mxu0 }
 0x9bf   :  { %v1824_v54 = vmul.f32 0.5, %v1821_v57  ;;  %v1820_v50 = vadd.f32 %v1746_v42, %v5155_v1  ;;  %v5174_v57 = vld [vmem:[#allocation20_spill] sm:$0xff]  ;;  %v5175_v60 = vld [vmem:[#allocation31_spill] sm:$0xff]  ;;  %v5180_v42 = vld [vmem:[#allocation41_spill] sm:$0xff] }
 0x9c0   :  { %v5176_v1 = vld [vmem:[#allocation40_spill] sm:$0xff] }
 0x9c1   :  { %v1823_v4 = vmul.f32 0.5, %v1820_v50  ;;  %3241 = vtanh.f32 %v1824_v54  ;;  %v5172_v50 = vld [vmem:[#allocation39_spill] sm:$0xff]  ;;  %v5173_v54 = vld [vmem:[#allocation50_spill] sm:$0xff] }
 0x9c3   :  { %3243 = vtanh.f32 %v1823_v4  ;;  %v5177_v4 = vld [vmem:[#allocation51_spill] sm:$0xff] }
 0x9ce   :  { %v3242_v8 = vpop.eup %3241 }
 0x9cf   :  { %v1830_v35 = vadd.f32 1.0, %v3242_v8  ;;  %v5178_v8 = vld [vmem:[#allocation21_spill] sm:$0xff] }
 0x9d0   :  { %v3244_v19 = vpop.eup %3243 }
 0x9d1   :  { %v1829_v5 = vadd.f32 1.0, %v3244_v19  ;;  %v1833_v28 = vmul.f32 0.5, %v1830_v35  ;;  %v5179_v19 = vld [vmem:[#allocation32_spill] sm:$0xff] }
 0x9d3   :  { %v1832_v21 = vmul.f32 0.5, %v1829_v5  ;;  %v1835_v11 = vmul.f32 %v1833_v28, %v4511_v2 }
 0x9d5   :  { %v1834_v38 = vmul.f32 %v1832_v21, %v1671_v30  ;;  %1900 = vmatprep.mubr.f32.mxu1 %v1835_v11  ;;  %v5182_v11 = vld [vmem:[#allocation22_spill] sm:$0xff] }
 0x9d7   :  { %1901 = vmatmul.mubr.f32.vlgmr.msra.gmra.mxu1 %v1834_v38 }
 0x9d8   :  { %3121 = vmatpush3.msra.mxu1 %v4096_v62  ;;  %3152 = vmatprep.mubr.msk.f32.mxu1 %vm3471_vm0, %v4967_v23  ;;  %v5156_v62 = vld [vmem:[#allocation65_spill] sm:$0xff] }
 0x9d9   :  { %3122 = vmatprep.subr.mxu1 %v4967_v23 }
 0x9da   :  { %3123 = vmatpush3.msra.mxu1 %v4102_v6  ;;  %v1819_v6 = vadd.f32 %v1744_v18, %v5156_v62  ;;  %v5183_v18 = vld [vmem:[#allocation33_spill] sm:$0xff] }
 0x9db   :  { %3124 = vmatprep.subr.mxu1 %v4967_v23  ;;  %v5185_v62 = vld [vmem:[#allocation53_spill] sm:$0xff] }
 0x9dc   :  { %3125 = vmatpush3.msra.mxu1 %v4106_v13  ;;  %v1822_v13 = vmul.f32 0.5, %v1819_v6  ;;  %v5186_v6 = vld [vmem:[#allocation23_spill] sm:$0xff] }
 0x9dd   :  { %3126 = vmatprep.subr.mxu1 %v4967_v23 }
 0x9de   :  { %3127 = vmatpush3.msra.mxu1 %v4110_v33  ;;  %3245 = vtanh.f32 %v1822_v13  ;;  %v5187_v13 = vld [vmem:[#allocation34_spill] sm:$0xff] }
 0x9df   :  { %3128 = vmatprep.subr.mxu1 %v4967_v23 }
 0x9e0   :  { %3129 = vmatpush3.msra.mxu1 %v4114_v36 }
 0x9e1   :  { %3130 = vmatprep.subr.mxu1 %v4967_v23 }
 0x9e2   :  { %3131 = vmatpush3.msra.mxu1 %v4118_v37 }
 0x9e3   :  { %3132 = vmatprep.subr.mxu1 %v4967_v23 }
 0x9e4   :  { %3133 = vmatpush3.msra.mxu1 %v4122_v52 }
 0x9e5   :  { %3134 = vmatprep.subr.mxu1 %v4967_v23 }
 0x9e6   :  { %3135 = vmatpush3.msra.mxu1 %v4126_v55 }
 0x9e7   :  { %3136 = vmatprep.subr.mxu1 %v4967_v23 }
 0x9e8   :  { %3137 = vmatpush3.msra.mxu1 %v4304_v29 }
 0x9e9   :  { %3138 = vmatprep.subr.mxu1 %v4967_v23 }
 0x9ea   :  { %3139 = vmatpush3.msra.mxu1 %v4308_v41 }
 0x9eb   :  { %3140 = vmatprep.subr.mxu1 %v4967_v23  ;;  %v3246_v52 = vpop.eup %3245 }
 0x9ec   :  { %3141 = vmatpush3.msra.mxu1 %v4312_v40  ;;  %v1828_v55 = vadd.f32 1.0, %v3246_v52  ;;  %v5191_v52 = vld [vmem:[#allocation35_spill] sm:$0xff] }
 0x9ed   :  { %3142 = vmatprep.subr.mxu1 %v4967_v23 }
 0x9ee   :  { %3143 = vmatpush3.msra.mxu1 %v4316_v59  ;;  %v1831_v21 = vmul.f32 0.5, %v1828_v55  ;;  %v5192_v55 = vld [vmem:[#allocation44_spill] sm:$0xff] }
 0x9ef   :  { %3144 = vmatprep.subr.mxu1 %v4967_v23 }
 0x9f0   :  { %3145 = vmatpush3.msra.mxu1 %v4320_v16  ;;  %v1907_v28 = vsub.f32 1.0, %v1831_v21 }
 0x9f1   :  { %3146 = vmatprep.subr.mxu1 %v4967_v23 }
 0x9f2   :  { %3147 = vmatpush3.msra.mxu1 %v4324_v3  ;;  %v1908_v38 = vmul.f32 %v1907_v28, %v4511_v2  ;;  %v5171_v2 = vld [vmem:[#allocation30_spill] sm:$0xff] }
 0x9f3   :  { %3148 = vmatprep.subr.mxu1 %v4967_v23 }
 0x9f4   :  { %3149 = vmatpush3.msra.mxu1 %v5116_v0 }
 0x9f5   :  { %3150 = vmatprep.subr.mxu1 %v4967_v23 }
 0x9f6   :  { %3151 = vmatpush3.msra.mxu1 %v4332_v26 }
 0x9f7   :  { %2164 = vmatprep.subr.mxu1 %v4145_v17  ;;  %v5157_v17 = vld [vmem:[#allocation46_spill] sm:$0xff] }
 0xa97   :  { %v2759_v33 = vpop.f32.mrf.mxu1 }
 0xa99   :  { %v2760_v36 = vpop.f32.mrf.mxu1 }
 0xa9a   :  { %v2761_v37 = vadd.f32 %v2760_v36, %v2759_v33  ;;  %v5188_v33 = vld [vmem:[#allocation43_spill] sm:$0xff]  ;;  %v5189_v36 = vld [vmem:[#allocation54_spill] sm:$0xff] }
 0xa9c   :  { %3247 = vtanh.f32 %v2761_v37  ;;  %v5190_v37 = vld [vmem:[#allocation24_spill] sm:$0xff] }
 0xaa9   :  { %v3248_v35 = vpop.eup %3247 }
 0xaaa   :  { %v1909_v30 = vmul.f32 %v3248_v35, %v1831_v21  ;;  %v5193_v21 = vld [vmem:[#allocation55_spill] sm:$0xff] }
 0xaac   :  { %v4620_v5 = vadd.f32 %v1909_v30, %v1908_v38  ;;  %v5194_v38 = vld [vmem:[#allocation76_spill] sm:$0xff] }
 0xaae   :  { %1986 = vmatmul.mubr.f32.vlgmr.msra.gmra.mxu0 %v4620_v5  ;;  %1912 = vst [vmem:[#allocation12 + $0x28] sm:$0xff] %v4620_v5  ;;  %3153 = vmatmul.mubr.f32.vlgmr.msra.gmra.mxu1 %v4620_v5 }
 0xaaf   :  { %2780 = vmatpush3.msra.mxu0 %v4343_v53  ;;  %2165 = vmatpush1.msra.mxu1 %v4157_v32  ;;  %v5158_v32 = vld [vmem:[#allocation18_spill] sm:$0xff] }
 0xab0   :  { %2781 = vmatprep.subr.mxu0 %v4347_v56  ;;  %2166 = vmatprep.subr.mxu1 %v4161_v9  ;;  %v5159_v9 = vld [vmem:[#allocation27_spill] sm:$0xff] }
 0xab1   :  { %2782 = vmatpush3.msra.mxu0 %v4351_v49  ;;  %2167 = vmatpush1.msra.mxu1 %v4165_v39  ;;  %v5160_v39 = vld [vmem:[#allocation62_spill] sm:$0xff] }
 0xab2   :  { %2783 = vmatprep.subr.mxu0 %v4355_v20  ;;  %2168 = vmatprep.subr.mxu1 %v4169_v12  ;;  %v5161_v12 = vld [vmem:[#allocation47_spill] sm:$0xff] }
 0xab3   :  { %2784 = vmatpush3.msra.mxu0 %v4359_v24  ;;  %2169 = vmatpush1.msra.mxu1 %v4173_v43  ;;  %v5162_v43 = vld [vmem:[#allocation57_spill] sm:$0xff] }
 0xab4   :  { %2785 = vmatprep.subr.mxu0 %v4363_v10  ;;  %2170 = vmatprep.subr.mxu1 %v4177_v44  ;;  %v5163_v44 = vld [vmem:[#allocation28_spill] sm:$0xff] }
 0xab5   :  { %2786 = vmatpush3.msra.mxu0 %v4367_v27  ;;  %2171 = vmatpush1.msra.mxu1 %v4181_v45  ;;  %v5164_v45 = vld [vmem:[#allocation17_spill] sm:$0xff] }
 0xab6   :  { %2787 = vmatprep.subr.mxu0 %v4371_v31  ;;  %2172 = vmatprep.subr.mxu1 %v4185_v46  ;;  %v5165_v46 = vld [vmem:[#allocation48_spill] sm:$0xff] }
 0xab7   :  { %2788 = vmatpush3.msra.mxu0 %v4375_v58  ;;  %2173 = vmatpush1.msra.mxu1 %v4189_v47  ;;  %v5166_v47 = vld [vmem:[#allocation56_spill] sm:$0xff] }
 0xab8   :  { %2789 = vmatprep.subr.mxu0 %v4379_v34  ;;  %2174 = vmatprep.subr.mxu1 %v4193_v48  ;;  %v5167_v48 = vld [vmem:[#allocation29_spill] sm:$0xff] }
 0xab9   :  { %2790 = vmatpush3.msra.mxu0 %v4383_v61  ;;  %2175 = vmatpush1.msra.mxu1 %v4197_v63  ;;  %v5168_v63 = vld [vmem:[#allocation38_spill] sm:$0xff] }
 0xaba   :  { %2791 = vmatprep.subr.mxu0 %v5118_v15  ;;  %2176 = vmatprep.subr.mxu1 %v4201_v7  ;;  %v5169_v7 = vld [vmem:[#allocation49_spill] sm:$0xff] }
 0xabb   :  { %2792 = vmatpush3.msra.mxu0 %v5119_v22  ;;  %2177 = vmatpush1.msra.mxu1 %v4205_v14  ;;  %v5170_v14 = vld [vmem:[#allocation19_spill] sm:$0xff] }
 0xabc   :  { %2793 = vmatprep.subr.mxu0 %v5157_v17  ;;  %2178 = vmatprep.subr.mxu1 %v5158_v32 }
 0xabd   :  { %2794 = vmatpush3.msra.mxu0 %v5159_v9  ;;  %2179 = vmatpush1.msra.mxu1 %v5160_v39 }
 0xabe   :  { %2795 = vmatprep.subr.mxu0 %v5161_v12  ;;  %2180 = vmatprep.subr.mxu1 %v5162_v43 }
 0xabf   :  { %2796 = vmatpush3.msra.mxu0 %v5163_v44  ;;  %2181 = vmatpush1.msra.mxu1 %v5164_v45  ;;  %v5195_v45 = vld [vmem:[#allocation71_spill] sm:$0xff] }
 0xac0   :  { %2797 = vmatprep.subr.mxu0 %v5165_v46  ;;  %2182 = vmatprep.subr.mxu1 %v5166_v47 }
 0xac1   :  { %2798 = vmatpush3.msra.mxu0 %v5167_v48  ;;  %2183 = vmatpush1.msra.mxu1 %v5168_v63 }
 0xac2   :  { %2799 = vmatprep.subr.mxu0 %v5169_v7  ;;  %2184 = vmatprep.subr.mxu1 %v5170_v14 }
 0xac3   :  { %2800 = vmatpush3.msra.mxu0 %v5171_v2  ;;  %2185 = vmatpush1.msra.mxu1 %v5172_v50 }
 0xac4   :  { %2801 = vmatprep.subr.mxu0 %v5173_v54  ;;  %2186 = vmatprep.subr.mxu1 %v5174_v57 }
 0xac5   :  { %2802 = vmatpush3.msra.mxu0 %v5175_v60  ;;  %2187 = vmatpush1.msra.mxu1 %v5176_v1 }
 0xac6   :  { %2803 = vmatprep.subr.mxu0 %v5177_v4  ;;  %2188 = vmatprep.subr.mxu1 %v5178_v8 }
 0xac7   :  { %2804 = vmatpush3.msra.mxu0 %v5179_v19  ;;  %2189 = vmatpush1.msra.mxu1 %v5180_v42  ;;  %v1914_v42 = vld [vmem:[#allocation4 + $0x30] sm:$0xff] }
 0xac8   :  { %2805 = vmatprep.subr.mxu0 %v5181_v51  ;;  %2190 = vmatprep.subr.mxu1 %v5182_v11 }
 0xac9   :  { %2806 = vmatpush3.msra.mxu0 %v5183_v18  ;;  %2191 = vmatpush1.msra.mxu1 %v5184_v25 }
 0xaca   :  { %2807 = vmatprep.subr.mxu0 %v5185_v62  ;;  %2192 = vmatprep.subr.mxu1 %v5186_v6 }
 0xacb   :  { %2808 = vmatpush3.msra.mxu0 %v5187_v13  ;;  %2193 = vmatpush1.msra.mxu1 %v5188_v33  ;;  %v3346_v33 = vld [vmem:[#allocation9 + $0x178] sm:$0xff] }
 0xacc   :  { %2809 = vmatprep.subr.mxu0 %v5189_v36  ;;  %2194 = vmatprep.subr.mxu1 %v5190_v37  ;;  %v3347_v37 = vld [vmem:[#allocation9 + $0x160] sm:$0xff] }
 0xacd   :  { %2810 = vmatpush3.msra.mxu0 %v5191_v52  ;;  %2195 = vmatpush1.msra.mxu1 %v5192_v55  ;;  %v3348_v55 = vld [vmem:[#allocation9 + $0x148] sm:$0xff] }
 0xace   :  { %3155 = vmatprep.subr.mxu0 %v4967_v23  ;;  %2228 = vmatprep.mubr.f32.mxu1 %v4967_v23 }
 0xacf   :  { %2831 = vmatprep.subr.mxu1 %v5193_v21  ;;  %v3349_v21 = vld [vmem:[#allocation9 + $0x130] sm:$0xff] }
 0xb6e   :  { %v1987_v28 = vpop.f32.mrf.mxu0  ;;  %v2058_v35 = vpop.f32.mrf.mxu1 }
 0xb6f   :  { %v2064_v30 = vadd.f32 %v2058_v35, %v5194_v38  ;;  %v3350_v35 = vld [vmem:[#allocation9 + $0x118] sm:$0xff]  ;;  %v3351_v38 = vld [vmem:[#allocation9 + $0x100] sm:$0xff] }
 0xb70   :  { %v1989_v32 = vpop.f32.mrf.mxu0  ;;  %v3154_v39 = vpop.f32.mrf.mxu1 }
 0xb71   :  { %v2067_v43 = vmul.f32 0.5, %v2064_v30  ;;  %v2063_v47 = vadd.f32 %v1989_v32, %v5195_v45  ;;  %v3352_v30 = vld [vmem:[#allocation9 + $0xe8] sm:$0xff]  ;;  %v3353_v32 = vld [vmem:[#allocation9 + $0xd0] sm:$0xff] }
 0xb73   :  { %v2066_v63 = vmul.f32 0.5, %v2063_v47  ;;  %3249 = vtanh.f32 %v2067_v43 }
 0xb75   :  { %3251 = vtanh.f32 %v2066_v63 }
 0xb80   :  { %v3250_v14 = vpop.eup %3249 }
 0xb81   :  { %v2073_v57 = vadd.f32 1.0, %v3250_v14 }
 0xb82   :  { %v3252_v50 = vpop.eup %3251 }
 0xb83   :  { %v2072_v1 = vadd.f32 1.0, %v3252_v50  ;;  %v2076_v8 = vmul.f32 0.5, %v2073_v57 }
 0xb85   :  { %v2075_v11 = vmul.f32 0.5, %v2072_v1  ;;  %v2078_v25 = vmul.f32 %v2076_v8, %v4620_v5 }
 0xb87   :  { %v2077_v6 = vmul.f32 %v2075_v11, %v1914_v42  ;;  %2143 = vmatprep.mubr.f32.mxu0 %v2078_v25 }
 0xb89   :  { %2144 = vmatmul.mubr.f32.vlgmr.msra.gmra.mxu0 %v2077_v6 }
 0xb8a   :  { %3156 = vmatpush3.msra.mxu0 %v3346_v33  ;;  %3187 = vmatprep.mubr.msk.f32.mxu0 %vm3471_vm0, %v4967_v23 }
 0xb8b   :  { %3157 = vmatprep.subr.mxu0 %v4967_v23 }
 0xb8c   :  { %3158 = vmatpush3.msra.mxu0 %v3347_v37 }
 0xb8d   :  { %3159 = vmatprep.subr.mxu0 %v4967_v23 }
 0xb8e   :  { %3160 = vmatpush3.msra.mxu0 %v3348_v55 }
 0xb8f   :  { %3161 = vmatprep.subr.mxu0 %v4967_v23 }
 0xb90   :  { %3162 = vmatpush3.msra.mxu0 %v3349_v21 }
 0xb91   :  { %3163 = vmatprep.subr.mxu0 %v4967_v23 }
 0xb92   :  { %3164 = vmatpush3.msra.mxu0 %v3350_v35 }
 0xb93   :  { %3165 = vmatprep.subr.mxu0 %v4967_v23 }
 0xb94   :  { %3166 = vmatpush3.msra.mxu0 %v3351_v38 }
 0xb95   :  { %3167 = vmatprep.subr.mxu0 %v4967_v23 }
 0xb96   :  { %3168 = vmatpush3.msra.mxu0 %v3352_v30 }
 0xb97   :  { %3169 = vmatprep.subr.mxu0 %v4967_v23 }
 0xb98   :  { %3170 = vmatpush3.msra.mxu0 %v3353_v32 }
 0xb99   :  { %3171 = vmatprep.subr.mxu0 %v4967_v23 }
 0xb9a   :  { %3172 = vmatpush3.msra.mxu0 %v4304_v29  ;;  %v5196_v29 = vld [vmem:[#allocation69_spill] sm:$0xff] }
 0xb9b   :  { %3173 = vmatprep.subr.mxu0 %v4967_v23 }
 0xb9c   :  { %3174 = vmatpush3.msra.mxu0 %v4308_v41  ;;  %v2062_v41 = vadd.f32 %v1987_v28, %v5196_v29 }
 0xb9d   :  { %3175 = vmatprep.subr.mxu0 %v4967_v23 }
 0xb9e   :  { %3176 = vmatpush3.msra.mxu0 %v4312_v40  ;;  %v2065_v40 = vmul.f32 0.5, %v2062_v41 }
 0xb9f   :  { %3177 = vmatprep.subr.mxu0 %v4967_v23 }
 0xba0   :  { %3178 = vmatpush3.msra.mxu0 %v4316_v59  ;;  %3253 = vtanh.f32 %v2065_v40 }
 0xba1   :  { %3179 = vmatprep.subr.mxu0 %v4967_v23 }
 0xba2   :  { %3180 = vmatpush3.msra.mxu0 %v4320_v16 }
 0xba3   :  { %3181 = vmatprep.subr.mxu0 %v4967_v23 }
 0xba4   :  { %3182 = vmatpush3.msra.mxu0 %v4324_v3 }
 0xba5   :  { %3183 = vmatprep.subr.mxu0 %v4967_v23 }
 0xba6   :  { %3184 = vmatpush3.msra.mxu0 %v5116_v0 }
 0xba7   :  { %3185 = vmatprep.subr.mxu0 %v4967_v23 }
 0xba8   :  { %3186 = vmatpush3.msra.mxu0 %v4332_v26 }
 0xbad   :  { %v3254_v16 = vpop.eup %3253 }
 0xbae   :  { %v2071_v45 = vadd.f32 1.0, %v3254_v16 }
 0xbb0   :  { %v2074_v47 = vmul.f32 0.5, %v2071_v45 }
 0xbb2   :  { %v2150_v3 = vsub.f32 1.0, %v2074_v47 }
 0xbb4   :  { %v2151_v14 = vmul.f32 %v2150_v3, %v4620_v5  ;;  %v2157_v5 = vld [vmem:[#allocation4 + $0x38] sm:$0xff] }
 0xc49   :  { %v2811_v59 = vpop.f32.mrf.mxu0 }
 0xc4b   :  { %v2812_v39 = vpop.f32.mrf.mxu0 }
 0xc4c   :  { %v2813_v43 = vadd.f32 %v2812_v39, %v2811_v59 }
 0xc4e   :  { %3255 = vtanh.f32 %v2813_v43 }
 0xc5b   :  { %v3256_v63 = vpop.eup %3255 }
 0xc5c   :  { %v2152_v0 = vmul.f32 %v3256_v63, %v2074_v47 }
 0xc5e   :  { %v4720_v50 = vadd.f32 %v2152_v0, %v2151_v14 }
 0xc60   :  { %2229 = vmatmul.mubr.f32.vlgmr.msra.gmra.mxu1 %v4720_v50  ;;  %2155 = vst [vmem:[#allocation12 + $0x30] sm:$0xff] %v4720_v50  ;;  %3188 = vmatmul.mubr.f32.vlgmr.msra.gmra.mxu0 %v4720_v50 }
 0xc61   :  { %2832 = vmatpush3.msra.mxu1 %v4343_v53  ;;  %v5197_v53 = vld [vmem:[#allocation74_spill] sm:$0xff] }
 0xc62   :  { %2833 = vmatprep.subr.mxu1 %v4347_v56 }
 0xc63   :  { %2834 = vmatpush3.msra.mxu1 %v4351_v49 }
 0xc64   :  { %2835 = vmatprep.subr.mxu1 %v4355_v20 }
 0xc65   :  { %2836 = vmatpush3.msra.mxu1 %v4359_v24 }
 0xc66   :  { %2837 = vmatprep.subr.mxu1 %v4363_v10  ;;  %v5198_v10 = vld [vmem:[#allocation75_spill] sm:$0xff] }
 0xc67   :  { %2838 = vmatpush3.msra.mxu1 %v4367_v27 }
 0xc68   :  { %2839 = vmatprep.subr.mxu1 %v4371_v31 }
 0xc69   :  { %2840 = vmatpush3.msra.mxu1 %v4375_v58 }
 0xc6a   :  { %2841 = vmatprep.subr.mxu1 %v4379_v34 }
 0xc6b   :  { %2842 = vmatpush3.msra.mxu1 %v4383_v61 }
 0xc6c   :  { %2843 = vmatprep.subr.mxu1 %v5118_v15 }
 0xc6d   :  { %2844 = vmatpush3.msra.mxu1 %v5119_v22 }
 0xc6e   :  { %2845 = vmatprep.subr.mxu1 %v5157_v17 }
 0xc6f   :  { %2846 = vmatpush3.msra.mxu1 %v5159_v9 }
 0xc70   :  { %2847 = vmatprep.subr.mxu1 %v5161_v12 }
 0xc71   :  { %2848 = vmatpush3.msra.mxu1 %v5163_v44  ;;  %v5199_v44 = vld [vmem:[#allocation73_spill] sm:$0xff] }
 0xc72   :  { %2849 = vmatprep.subr.mxu1 %v5165_v46 }
 0xc73   :  { %2850 = vmatpush3.msra.mxu1 %v5167_v48 }
 0xc74   :  { %2851 = vmatprep.subr.mxu1 %v5169_v7 }
 0xc75   :  { %2852 = vmatpush3.msra.mxu1 %v5171_v2 }
 0xc76   :  { %2853 = vmatprep.subr.mxu1 %v5173_v54 }
 0xc77   :  { %2854 = vmatpush3.msra.mxu1 %v5175_v60 }
 0xc78   :  { %2855 = vmatprep.subr.mxu1 %v5177_v4 }
 0xc79   :  { %2856 = vmatpush3.msra.mxu1 %v5179_v19 }
 0xc7a   :  { %2857 = vmatprep.subr.mxu1 %v5181_v51 }
 0xc7b   :  { %2858 = vmatpush3.msra.mxu1 %v5183_v18 }
 0xc7c   :  { %2859 = vmatprep.subr.mxu1 %v5185_v62 }
 0xc7d   :  { %2860 = vmatpush3.msra.mxu1 %v5187_v13 }
 0xc7e   :  { %2861 = vmatprep.subr.mxu1 %v5189_v36 }
 0xc7f   :  { %2862 = vmatpush3.msra.mxu1 %v5191_v52 }
 0xd20   :  { %v2230_v23 = vpop.f32.mrf.mxu1  ;;  %v2301_v26 = vpop.f32.mrf.mxu0 }
 0xd21   :  { %v2307_v56 = vadd.f32 %v5197_v53, %v2301_v26  ;;  %v2305_v46 = vadd.f32 %v2230_v23, %v5199_v44 }
 0xd22   :  { %v2232_v49 = vpop.f32.mrf.mxu1  ;;  %v3189_v20 = vpop.f32.mrf.mxu0 }
 0xd23   :  { %v2310_v24 = vmul.f32 0.5, %v2307_v56  ;;  %v2306_v27 = vadd.f32 %v2232_v49, %v5198_v10  ;;  %v2308_v48 = vmul.f32 0.5, %v2305_v46 }
 0xd25   :  { %v2309_v31 = vmul.f32 0.5, %v2306_v27  ;;  %3257 = vtanh.f32 %v2310_v24 }
 0xd27   :  { %3259 = vtanh.f32 %v2309_v31 }
 0xd28   :  { %3261 = vtanh.f32 %v2308_v48 }
 0xd32   :  { %v3258_v58 = vpop.eup %3257 }
 0xd33   :  { %v2316_v61 = vadd.f32 1.0, %v3258_v58 }
 0xd34   :  { %v3260_v34 = vpop.eup %3259 }
 0xd35   :  { %v2315_v15 = vadd.f32 1.0, %v3260_v34  ;;  %v2319_v22 = vmul.f32 0.5, %v2316_v61  ;;  %v3262_v60 = vpop.eup %3261 }
 0xd36   :  { %v2314_v4 = vadd.f32 1.0, %v3262_v60 }
 0xd37   :  { %v2318_v17 = vmul.f32 0.5, %v2315_v15  ;;  %v2321_v9 = vmul.f32 %v2319_v22, %v4720_v50 }
 0xd38   :  { %v2317_v19 = vmul.f32 0.5, %v2314_v4 }
 0xd39   :  { %v2320_v12 = vmul.f32 %v2318_v17, %v2157_v5  ;;  %2386 = vmatprep.mubr.f32.mxu1 %v2321_v9 }
 0xd3a   :  { %v2393_v51 = vsub.f32 1.0, %v2317_v19 }
 0xd3b   :  { %2387 = vmatmul.mubr.f32.vlgmr.msra.gmra.mxu1 %v2320_v12 }
 0xd3c   :  { %v2394_v62 = vmul.f32 %v2393_v51, %v4720_v50 }
 0xdfb   :  { %v2863_v7 = vpop.f32.mrf.mxu1 }
 0xdfd   :  { %v2864_v2 = vpop.f32.mrf.mxu1 }
 0xdfe   :  { %v2865_v54 = vadd.f32 %v2864_v2, %v2863_v7 }
 0xe00   :  { %3263 = vtanh.f32 %v2865_v54 }
 0xe0d   :  { %v3264_v18 = vpop.eup %3263 }
 0xe0e   :  { %v2395_v13 = vmul.f32 %v3264_v18, %v2317_v19 }
 0xe10   :  { %v2396_v36 = vadd.f32 %v2395_v13, %v2394_v62 }
 0xe12   :  { %2398 = vst [vmem:[#allocation12 + $0x38] sm:$0xff] %v2396_v36 }
 0xe13   :  { %3445 = shalt.err (!%p3442_p10)
}
 0xe14   :  { %2411 = dma.vmem_to_hbm [thread:$0]  %s2406_s3, 1024, %s4771_s4, [#allocation6], %s3466_s25, %s3466_s25, %s3467_s26  }
 0xe15   :  { %3460 = dma.done.wait [#allocation6], 1024  }
 0xe16   :  { %3461 = vsyncadd [#allocation6], 4294966272 }
 0xe17   :  { %2415 = vsyncpa [#allocation5], 1 }
 0xe18   :  { %2416 = vsyncpa [#allocation8], 1 }
 0xe19   :  { %2417 = vsyncpa [#allocation11], 1 }
 0xe1a   :  { %2418 = vsyncpa [#allocation6], 1 }

// kernel: tpu_custom_call.1
= control target key start
LH: loop header
LB: loop body
LE: loop exit
PB: predicated region body
PF: predicated region fallthrough
CT: control target
= control target key end

     0   :  { %9 = vsyncpa [#allocation5], 0  ;;  %s4767_s0 = inlined_call_operand.hbm [shape: f32[8,8,128], index: 0, kind: input, shape index: {}]   ;;  %s4768_s1 = inlined_call_operand.hbm [shape: f32[128,384], index: 1, kind: input, shape index: {}]   ;;  %s4769_s2 = inlined_call_operand.hbm [shape: f32[128,384], index: 2, kind: input, shape index: {}]   ;;  %s4770_s3 = inlined_call_operand.hbm [shape: f32[256,128], index: 3, kind: input, shape index: {}]   ;;  %s4771_s4 = inlined_call_operand.hbm [shape: f32[8,8,128], index: 4, kind: output, shape index: {}]  }
   0x1   :  { %10 = vsyncpa [#allocation8], 0 }
   0x2   :  { %11 = vsyncpa [#allocation11], 0 }
   0x3   :  { %12 = vsyncpa [#allocation6], 0  ;;  %s3462_s15 = smov [#allocation7]  }
   0x4   :  { %s30_s16 = sshll.u32 %s3462_s15, 4  ;;  %s31_s16 = int_to_ptr.vmem [resolvable:$true] %s30_s16 }
   0x5   :  { %s3362_s17 = scalar_lea.vmem %s31_s16, 6144  ;;  %p3367_p1 = scmp.lt.s32.totalorder %s31_s16, %s31_s16 }
   0x6   :  { %p3363_p0 = scmp.ne.s32.totalorder %s31_s16, %s3362_s17  ;;  %p3368_p2 = scmp.lt.s32.totalorder %s3362_s17, %s3362_s17 }
   0x8   :  { %p3369_p3 = por %p3368_p2, %p3367_p1 }
   0xa   :  { %p3370_p4 = pnand %p3369_p3, %p3363_p0 }
   0xc   :  { %3373 = shalt.err (!%p3370_p4)
}
   0xd   :  { %s3463_s18 = smov 384   ;;  %s3464_s19 = smov 24  }
   0xe   :  { %36 = dma.hbm_to_vmem [thread:$0]  %s4768_s1, 6144, %s31_s16, [#allocation8], %s3463_s18, %s3463_s18, %s3464_s19  }
   0xf   :  { %s3465_s22 = smov [#allocation4]  }
  0x10   :  { %s18_s23 = sshll.u32 %s3465_s22, 4  ;;  %s19_s23 = int_to_ptr.vmem [resolvable:$true] %s18_s23 }
  0x11   :  { %s3382_s24 = scalar_lea.vmem %s19_s23, 1024  ;;  %p3387_p6 = scmp.lt.s32.totalorder %s19_s23, %s19_s23 }
  0x12   :  { %p3383_p5 = scmp.ne.s32.totalorder %s19_s23, %s3382_s24  ;;  %p3388_p7 = scmp.lt.s32.totalorder %s3382_s24, %s3382_s24 }
  0x14   :  { %p3389_p8 = por %p3388_p7, %p3387_p6 }
  0x16   :  { %p3390_p9 = pnand %p3389_p8, %p3383_p5 }
  0x18   :  { %3393 = shalt.err (!%p3390_p9)
}
  0x19   :  { %s3466_s25 = smov 128   ;;  %s3467_s26 = smov 8  }
  0x1a   :  { %24 = dma.hbm_to_vmem [thread:$0]  %s4767_s0, 1024, %s19_s23, [#allocation5], %s3466_s25, %s3466_s25, %s3467_s26  }
  0x1b   :  { %s3468_s1 = smov [#allocation9]   ;;  %s3469_s30 = smov [#allocation10]  }
  0x1c   :  { %s42_s29 = sshll.u32 %s3468_s1, 4  ;;  %s54_s5 = sshll.u32 %s3469_s30, 4  ;;  %s43_s29 = int_to_ptr.vmem [resolvable:$true] %s42_s29  ;;  %s55_s5 = int_to_ptr.vmem [resolvable:$true] %s54_s5 }
  0x1d   :  { %s3402_s6 = scalar_lea.vmem %s43_s29, 6144  ;;  %p3407_p11 = scmp.lt.s32.totalorder %s43_s29, %s43_s29 }
  0x1e   :  { %p3403_p10 = scmp.ne.s32.totalorder %s43_s29, %s3402_s6  ;;  %p3408_p12 = scmp.lt.s32.totalorder %s3402_s6, %s3402_s6 }
  0x20   :  { %p3409_p13 = por %p3408_p12, %p3407_p11 }
  0x22   :  { %p3410_p0 = pnand %p3409_p13, %p3403_p10 }
  0x24   :  { %3413 = shalt.err (!%p3410_p0)
}
  0x25   :  { %48 = dma.hbm_to_vmem [thread:$0]  %s4769_s2, 6144, %s43_s29, [#allocation8], %s3463_s18, %s3463_s18, %s3464_s19  }
  0x26   :  { %s3422_s0 = scalar_lea.vmem %s55_s5, 4096  ;;  %p3427_p2 = scmp.lt.s32.totalorder %s55_s5, %s55_s5 }
  0x27   :  { %p3423_p1 = scmp.ne.s32.totalorder %s55_s5, %s3422_s0  ;;  %p3428_p3 = scmp.lt.s32.totalorder %s3422_s0, %s3422_s0 }
  0x29   :  { %p3429_p4 = por %p3428_p3, %p3427_p2 }
  0x2b   :  { %p3430_p5 = pnand %p3429_p4, %p3423_p1 }
  0x2d   :  { %3433 = shalt.err (!%p3430_p5)
}
  0x2e   :  { %60 = dma.hbm_to_vmem [thread:$0]  %s4770_s3, 4096, %s55_s5, [#allocation11], %s3466_s25, %s3466_s25, %s3467_s26  }
  0x2f   :  { %3454 = dma.done.wait [#allocation5], 1024  }
  0x30   :  { %3455 = vsyncadd [#allocation5], 4294966272 }
  0x31   :  { %3456 = dma.done.wait [#allocation8], 12288  }
  0x32   :  { %3457 = vsyncadd [#allocation8], 4294955008 }
  0x33   :  { %3458 = dma.done.wait [#allocation11], 4096  }
  0x34   :  { %3459 = vsyncadd [#allocation11], 4294963200  ;;  %v4772_v0 = vmov 0.0   ;;  %v132_v1 = vld [vmem:[#allocation7 + $0x170] sm:$0xff]  ;;  %v133_v2 = vld [vmem:[#allocation7 + $0x178] sm:$0xff]  ;;  %vm3471_vm0 = vmmov 0  }
  0x35   :  { %198 = vmatprep.mubr.f32.mxu0 %v4772_v0  ;;  %v131_v3 = vld [vmem:[#allocation7 + $0x168] sm:$0xff]  ;;  %134 = vmatprep.subr.mxu0 %v132_v1  ;;  %v129_v4 = vld [vmem:[#allocation7 + $0x158] sm:$0xff]  ;;  %v130_v5 = vld [vmem:[#allocation7 + $0x160] sm:$0xff]  ;;  %s3472_s2 = smov [#allocation12]  }
  0x36   :  { %2866 = vmatprep.subr.mxu1 %v133_v2  ;;  %v128_v6 = vld [vmem:[#allocation7 + $0x150] sm:$0xff]  ;;  %135 = vmatpush1.msra.mxu0 %v131_v3  ;;  %v126_v7 = vld [vmem:[#allocation7 + $0x140] sm:$0xff]  ;;  %v127_v8 = vld [vmem:[#allocation7 + $0x148] sm:$0xff]  ;;  %s2405_s3 = sshll.u32 %s3472_s2, 4  ;;  %s2406_s3 = int_to_ptr.vmem [resolvable:$true] %s2405_s3 }
  0x37   :  { %2867 = vmatpush3.msra.mxu1 %v133_v2  ;;  %136 = vmatprep.subr.mxu0 %v129_v4  ;;  %v125_v9 = vld [vmem:[#allocation7 + $0x138] sm:$0xff]  ;;  %v123_v10 = vld [vmem:[#allocation7 + $0x128] sm:$0xff]  ;;  %v124_v11 = vld [vmem:[#allocation7 + $0x130] sm:$0xff]  ;;  %s3434_s11 = scalar_lea.vmem %s2406_s3, 1024  ;;  %p3439_p7 = scmp.lt.s32.totalorder %s2406_s3, %s2406_s3 }
  0x38   :  { %2868 = vmatprep.subr.mxu1 %v130_v5  ;;  %137 = vmatpush1.msra.mxu0 %v128_v6  ;;  %v122_v12 = vld [vmem:[#allocation7 + $0x120] sm:$0xff]  ;;  %v120_v13 = vld [vmem:[#allocation7 + $0x110] sm:$0xff]  ;;  %v121_v14 = vld [vmem:[#allocation7 + $0x118] sm:$0xff]  ;;  %p3435_p6 = scmp.ne.s32.totalorder %s2406_s3, %s3434_s11  ;;  %p3440_p8 = scmp.lt.s32.totalorder %s3434_s11, %s3434_s11 }
  0x39   :  { %2869 = vmatpush3.msra.mxu1 %v130_v5  ;;  %138 = vmatprep.subr.mxu0 %v126_v7  ;;  %v119_v15 = vld [vmem:[#allocation7 + $0x108] sm:$0xff]  ;;  %v117_v16 = vld [vmem:[#allocation7 + $0xf8] sm:$0xff]  ;;  %v118_v17 = vld [vmem:[#allocation7 + $0x100] sm:$0xff] }
  0x3a   :  { %2870 = vmatprep.subr.mxu1 %v127_v8  ;;  %139 = vmatpush1.msra.mxu0 %v125_v9  ;;  %v116_v18 = vld [vmem:[#allocation7 + $0xf0] sm:$0xff]  ;;  %v114_v19 = vld [vmem:[#allocation7 + $0xe0] sm:$0xff]  ;;  %v115_v20 = vld [vmem:[#allocation7 + $0xe8] sm:$0xff]  ;;  %p3441_p9 = por %p3440_p8, %p3439_p7 }
  0x3b   :  { %2871 = vmatpush3.msra.mxu1 %v127_v8  ;;  %140 = vmatprep.subr.mxu0 %v123_v10  ;;  %v113_v21 = vld [vmem:[#allocation7 + $0xd8] sm:$0xff]  ;;  %v111_v22 = vld [vmem:[#allocation7 + $0xc8] sm:$0xff]  ;;  %v112_v23 = vld [vmem:[#allocation7 + $0xd0] sm:$0xff] }
  0x3c   :  { %2872 = vmatprep.subr.mxu1 %v124_v11  ;;  %141 = vmatpush1.msra.mxu0 %v122_v12  ;;  %v110_v24 = vld [vmem:[#allocation7 + $0xc0] sm:$0xff]  ;;  %v108_v25 = vld [vmem:[#allocation7 + $0xb0] sm:$0xff]  ;;  %v109_v26 = vld [vmem:[#allocation7 + $0xb8] sm:$0xff]  ;;  %p3442_p10 = pnand %p3441_p9, %p3435_p6 }
  0x3d   :  { %2873 = vmatpush3.msra.mxu1 %v124_v11  ;;  %142 = vmatprep.subr.mxu0 %v120_v13  ;;  %v107_v27 = vld [vmem:[#allocation7 + $0xa8] sm:$0xff]  ;;  %v105_v28 = vld [vmem:[#allocation7 + $0x98] sm:$0xff]  ;;  %v106_v29 = vld [vmem:[#allocation7 + $0xa0] sm:$0xff] }
  0x3e   :  { %2874 = vmatprep.subr.mxu1 %v121_v14  ;;  %143 = vmatpush1.msra.mxu0 %v119_v15  ;;  %v104_v30 = vld [vmem:[#allocation7 + $0x90] sm:$0xff]  ;;  %v102_v31 = vld [vmem:[#allocation7 + $0x80] sm:$0xff]  ;;  %v103_v32 = vld [vmem:[#allocation7 + $0x88] sm:$0xff] }
  0x3f   :  { %2875 = vmatpush3.msra.mxu1 %v121_v14  ;;  %144 = vmatprep.subr.mxu0 %v117_v16  ;;  %v101_v33 = vld [vmem:[#allocation7 + $0x78] sm:$0xff]  ;;  %v99_v34 = vld [vmem:[#allocation7 + $0x68] sm:$0xff]  ;;  %v100_v35 = vld [vmem:[#allocation7 + $0x70] sm:$0xff] }
  0x40   :  { %2876 = vmatprep.subr.mxu1 %v118_v17  ;;  %145 = vmatpush1.msra.mxu0 %v116_v18  ;;  %v98_v36 = vld [vmem:[#allocation7 + $0x60] sm:$0xff]  ;;  %v96_v37 = vld [vmem:[#allocation7 + $0x50] sm:$0xff]  ;;  %v97_v38 = vld [vmem:[#allocation7 + $0x58] sm:$0xff] }
  0x41   :  { %2877 = vmatpush3.msra.mxu1 %v118_v17  ;;  %146 = vmatprep.subr.mxu0 %v114_v19  ;;  %v95_v39 = vld [vmem:[#allocation7 + $0x48] sm:$0xff]  ;;  %v93_v40 = vld [vmem:[#allocation7 + $0x38] sm:$0xff]  ;;  %v94_v41 = vld [vmem:[#allocation7 + $0x40] sm:$0xff] }
  0x42   :  { %2878 = vmatprep.subr.mxu1 %v115_v20  ;;  %147 = vmatpush1.msra.mxu0 %v113_v21  ;;  %v92_v42 = vld [vmem:[#allocation7 + $0x30] sm:$0xff]  ;;  %v90_v43 = vld [vmem:[#allocation7 + $0x20] sm:$0xff]  ;;  %v91_v44 = vld [vmem:[#allocation7 + $0x28] sm:$0xff] }
  0x43   :  { %2879 = vmatpush3.msra.mxu1 %v115_v20  ;;  %148 = vmatprep.subr.mxu0 %v111_v22  ;;  %v89_v45 = vld [vmem:[#allocation7 + $0x18] sm:$0xff]  ;;  %v87_v46 = vld [vmem:[#allocation7 + $0x8] sm:$0xff]  ;;  %v88_v47 = vld [vmem:[#allocation7 + $0x10] sm:$0xff] }
  0x44   :  { %2880 = vmatprep.subr.mxu1 %v112_v23  ;;  %149 = vmatpush1.msra.mxu0 %v110_v24  ;;  %v86_v48 = vld [vmem:[#allocation7] sm:$0xff]  ;;  %v3525_v50 = vld [vmem:[#allocation9 + $0x170] sm:$0xff]  ;;  %v3527_v51 = vld [vmem:[#allocation4 + $0x8] sm:$0xff] }
  0x45   :  { %2881 = vmatpush3.msra.mxu1 %v112_v23  ;;  %150 = vmatprep.subr.mxu0 %v108_v25  ;;  %v3523_v49 = vld [vmem:[#allocation4] sm:$0xff]  ;;  %4928 = vst [vmem:[#allocation17_spill] sm:$0xff] %v3527_v51  ;;  %v3529_v52 = vld [vmem:[#allocation9 + $0x168] sm:$0xff]  ;;  %v3533_v53 = vld [vmem:[#allocation9 + $0x178] sm:$0xff] }
  0x46   :  { %2882 = vmatprep.subr.mxu1 %v109_v26  ;;  %151 = vmatpush1.msra.mxu0 %v107_v27  ;;  %v3535_v54 = vld [vmem:[#allocation9 + $0x158] sm:$0xff]  ;;  %v3541_v55 = vld [vmem:[#allocation9 + $0x150] sm:$0xff]  ;;  %v3543_v56 = vld [vmem:[#allocation9 + $0x160] sm:$0xff] }
  0x47   :  { %2883 = vmatpush3.msra.mxu1 %v109_v26  ;;  %152 = vmatprep.subr.mxu0 %v105_v28  ;;  %v3547_v57 = vld [vmem:[#allocation9 + $0x140] sm:$0xff]  ;;  %v3551_v58 = vld [vmem:[#allocation9 + $0x138] sm:$0xff]  ;;  %v3555_v59 = vld [vmem:[#allocation9 + $0x148] sm:$0xff] }
  0x48   :  { %2884 = vmatprep.subr.mxu1 %v106_v29  ;;  %153 = vmatpush1.msra.mxu0 %v104_v30  ;;  %v3557_v60 = vld [vmem:[#allocation9 + $0x128] sm:$0xff]  ;;  %v3563_v61 = vld [vmem:[#allocation9 + $0x120] sm:$0xff]  ;;  %v3565_v62 = vld [vmem:[#allocation9 + $0x130] sm:$0xff] }
  0x49   :  { %2885 = vmatpush3.msra.mxu1 %v106_v29  ;;  %154 = vmatprep.subr.mxu0 %v102_v31  ;;  %v80_v63 = vld [vmem:[#allocation4 + $0x10] sm:$0xff]  ;;  %v3573_v2 = vld [vmem:[#allocation9 + $0x108] sm:$0xff]  ;;  %v3577_v3 = vld [vmem:[#allocation9 + $0x118] sm:$0xff] }
  0x4a   :  { %2886 = vmatprep.subr.mxu1 %v103_v32  ;;  %155 = vmatpush1.msra.mxu0 %v101_v33  ;;  %v3569_v1 = vld [vmem:[#allocation9 + $0x110] sm:$0xff]  ;;  %v3579_v4 = vld [vmem:[#allocation9 + $0xf8] sm:$0xff]  ;;  %v3586_v6 = vld [vmem:[#allocation9 + $0x100] sm:$0xff] }
  0x4b   :  { %2887 = vmatpush3.msra.mxu1 %v103_v32  ;;  %156 = vmatprep.subr.mxu0 %v99_v34  ;;  %v3584_v5 = vld [vmem:[#allocation9 + $0xf0] sm:$0xff]  ;;  %v81_v7 = vld [vmem:[#allocation4 + $0x18] sm:$0xff]  ;;  %v3590_v8 = vld [vmem:[#allocation9 + $0xe0] sm:$0xff] }
  0x4c   :  { %2888 = vmatprep.subr.mxu1 %v100_v35  ;;  %157 = vmatpush1.msra.mxu0 %v98_v36  ;;  %v3594_v9 = vld [vmem:[#allocation9 + $0xd8] sm:$0xff]  ;;  %v3598_v10 = vld [vmem:[#allocation9 + $0xe8] sm:$0xff]  ;;  %v3605_v12 = vld [vmem:[#allocation9 + $0xc0] sm:$0xff] }
  0x4d   :  { %2889 = vmatpush3.msra.mxu1 %v100_v35  ;;  %158 = vmatprep.subr.mxu0 %v96_v37  ;;  %4929 = vst [vmem:[#allocation18_spill] sm:$0xff] %v3594_v9  ;;  %v3600_v11 = vld [vmem:[#allocation9 + $0xc8] sm:$0xff]  ;;  %4931 = vst [vmem:[#allocation20_spill] sm:$0xff] %v3605_v12  ;;  %v3607_v13 = vld [vmem:[#allocation9 + $0xd0] sm:$0xff] }
  0x4e   :  { %2890 = vmatprep.subr.mxu1 %v97_v38  ;;  %159 = vmatpush1.msra.mxu0 %v95_v39  ;;  %4930 = vst [vmem:[#allocation19_spill] sm:$0xff] %v3600_v11  ;;  %v82_v14 = vld [vmem:[#allocation4 + $0x20] sm:$0xff]  ;;  %v3611_v15 = vld [vmem:[#allocation9 + $0xb0] sm:$0xff]  ;;  %v3615_v16 = vld [vmem:[#allocation9 + $0xa8] sm:$0xff] }
  0x4f   :  { %2891 = vmatpush3.msra.mxu1 %v97_v38  ;;  %160 = vmatprep.subr.mxu0 %v93_v40  ;;  %4932 = vst [vmem:[#allocation21_spill] sm:$0xff] %v3611_v15  ;;  %4933 = vst [vmem:[#allocation22_spill] sm:$0xff] %v3615_v16  ;;  %v3619_v17 = vld [vmem:[#allocation9 + $0xb8] sm:$0xff]  ;;  %v3626_v19 = vld [vmem:[#allocation9 + $0x90] sm:$0xff] }
  0x50   :  { %2892 = vmatprep.subr.mxu1 %v94_v41  ;;  %161 = vmatpush1.msra.mxu0 %v92_v42  ;;  %v3621_v18 = vld [vmem:[#allocation9 + $0x98] sm:$0xff]  ;;  %4935 = vst [vmem:[#allocation24_spill] sm:$0xff] %v3626_v19  ;;  %v3630_v20 = vld [vmem:[#allocation9 + $0xa0] sm:$0xff]  ;;  %v83_v21 = vld [vmem:[#allocation4 + $0x28] sm:$0xff] }
  0x51   :  { %2893 = vmatpush3.msra.mxu1 %v94_v41  ;;  %162 = vmatprep.subr.mxu0 %v90_v43  ;;  %4934 = vst [vmem:[#allocation23_spill] sm:$0xff] %v3621_v18  ;;  %v3634_v22 = vld [vmem:[#allocation9 + $0x80] sm:$0xff]  ;;  %v3637_v23 = vld [vmem:[#allocation9 + $0x78] sm:$0xff]  ;;  %v3640_v24 = vld [vmem:[#allocation9 + $0x88] sm:$0xff] }
  0x52   :  { %2894 = vmatprep.subr.mxu1 %v91_v44  ;;  %163 = vmatpush1.msra.mxu0 %v89_v45  ;;  %4936 = vst [vmem:[#allocation25_spill] sm:$0xff] %v3634_v22  ;;  %4937 = vst [vmem:[#allocation26_spill] sm:$0xff] %v3637_v23  ;;  %v3642_v25 = vld [vmem:[#allocation9 + $0x68] sm:$0xff]  ;;  %v3647_v26 = vld [vmem:[#allocation9 + $0x60] sm:$0xff] }
  0x53   :  { %2895 = vmatpush3.msra.mxu1 %v91_v44  ;;  %164 = vmatprep.subr.mxu0 %v87_v46  ;;  %4938 = vst [vmem:[#allocation27_spill] sm:$0xff] %v3642_v25  ;;  %4939 = vst [vmem:[#allocation28_spill] sm:$0xff] %v3647_v26  ;;  %v3651_v27 = vld [vmem:[#allocation9 + $0x70] sm:$0xff]  ;;  %v3658_v30 = vld [vmem:[#allocation9 + $0x48] sm:$0xff] }
  0x54   :  { %2896 = vmatprep.subr.mxu1 %v88_v47  ;;  %165 = vmatpush1.msra.mxu0 %v86_v48  ;;  %v84_v28 = vld [vmem:[#allocation4 + $0x30] sm:$0xff]  ;;  %4941 = vst [vmem:[#allocation30_spill] sm:$0xff] %v3658_v30  ;;  %v3661_v31 = vld [vmem:[#allocation9 + $0x58] sm:$0xff]  ;;  %v3672_v34 = vld [vmem:[#allocation9 + $0x40] sm:$0xff] }
  0x55   :  { %2897 = vmatpush3.msra.mxu1 %v88_v47  ;;  %199 = vmatmul.mubr.f32.vlgmr.msra.gmra.mxu0 %v3523_v49  ;;  %v3655_v29 = vld [vmem:[#allocation9 + $0x50] sm:$0xff]  ;;  %v3663_v32 = vld [vmem:[#allocation9 + $0x38] sm:$0xff]  ;;  %v3676_v36 = vld [vmem:[#allocation9 + $0x20] sm:$0xff] }
  0x56   :  { %2898 = vmatprep.mubr.f32.mxu1 %v3523_v49  ;;  %464 = vmatprep.subr.mxu0 %v3525_v50  ;;  %4940 = vst [vmem:[#allocation29_spill] sm:$0xff] %v3655_v29  ;;  %4942 = vst [vmem:[#allocation31_spill] sm:$0xff] %v3663_v32  ;;  %v3668_v33 = vld [vmem:[#allocation9 + $0x30] sm:$0xff]  ;;  %v85_v35 = vld [vmem:[#allocation4 + $0x38] sm:$0xff] }
  0x57   :  { %2910 = vmatprep.subr.mxu1 %v4772_v0  ;;  %2899 = vmatmul.mubr.f32.vlgmr.msra.gmra.mxu1 %v3527_v51  ;;  %4943 = vst [vmem:[#allocation32_spill] sm:$0xff] %v3668_v33  ;;  %4944 = vst [vmem:[#allocation33_spill] sm:$0xff] %v3676_v36  ;;  %v3679_v37 = vld [vmem:[#allocation9 + $0x18] sm:$0xff]  ;;  %v3682_v38 = vld [vmem:[#allocation9 + $0x28] sm:$0xff] }
  0x58   :  { %465 = vmatpush1.msra.mxu0 %v3529_v52  ;;  %2911 = vmatpush3.msra.mxu1 %v3533_v53  ;;  %4945 = vst [vmem:[#allocation34_spill] sm:$0xff] %v3679_v37  ;;  %v3684_v39 = vld [vmem:[#allocation9 + $0x8] sm:$0xff]  ;;  %v3687_v40 = vld [vmem:[#allocation9] sm:$0xff]  ;;  %v3691_v41 = vld [vmem:[#allocation9 + $0x10] sm:$0xff] }
  0x59   :  { %466 = vmatprep.subr.mxu0 %v3535_v54  ;;  %2912 = vmatprep.subr.mxu1 %v4772_v0  ;;  %4946 = vst [vmem:[#allocation35_spill] sm:$0xff] %v3684_v39  ;;  %4947 = vst [vmem:[#allocation36_spill] sm:$0xff] %v3687_v40  ;;  %v3736_v42 = vld [vmem:[#allocation10 + $0xf8] sm:$0xff]  ;;  %v3742_v44 = vld [vmem:[#allocation10 + $0xf0] sm:$0xff] }
  0x5a   :  { %204 = vmatprep.mubr.f32.mxu0 %v4772_v0  ;;  %467 = vmatpush1.msra.mxu0 %v3541_v55  ;;  %4948 = vst [vmem:[#allocation37_spill] sm:$0xff] %v3736_v42  ;;  %v3740_v43 = vld [vmem:[#allocation10 + $0x78] sm:$0xff]  ;;  %v3746_v45 = vld [vmem:[#allocation10 + $0x70] sm:$0xff]  ;;  %v3748_v46 = vld [vmem:[#allocation10 + $0xe8] sm:$0xff] }
  0x5b   :  { %2913 = vmatpush3.msra.mxu1 %v3543_v56  ;;  %205 = vmatmul.mubr.f32.gmra.mxu0 %v3527_v51  ;;  %v3752_v47 = vld [vmem:[#allocation10 + $0x68] sm:$0xff]  ;;  %v3755_v48 = vld [vmem:[#allocation10 + $0xe0] sm:$0xff] }
  0x5c   :  { %468 = vmatprep.subr.mxu0 %v3547_v57  ;;  %2914 = vmatprep.subr.mxu1 %v4772_v0  ;;  %v3779_v51 = vld [vmem:[#allocation10 + $0xc0] sm:$0xff] }
  0x5d   :  { %469 = vmatpush1.msra.mxu0 %v3551_v58  ;;  %2915 = vmatpush3.msra.mxu1 %v3555_v59  ;;  %4949 = vst [vmem:[#allocation38_spill] sm:$0xff] %v3779_v51 }
  0x5e   :  { %470 = vmatprep.subr.mxu0 %v3557_v60  ;;  %2916 = vmatprep.subr.mxu1 %v4772_v0 }
  0x5f   :  { %210 = vmatprep.mubr.f32.mxu0 %v4772_v0  ;;  %471 = vmatpush1.msra.mxu0 %v3563_v61 }
  0x60   :  { %2917 = vmatpush3.msra.mxu1 %v3565_v62  ;;  %211 = vmatmul.mubr.f32.gmra.mxu0 %v80_v63 }
  0x61   :  { %472 = vmatprep.subr.mxu0 %v3569_v1  ;;  %2918 = vmatprep.subr.mxu1 %v4772_v0 }
  0x62   :  { %473 = vmatpush1.msra.mxu0 %v3573_v2  ;;  %2919 = vmatpush3.msra.mxu1 %v3577_v3 }
  0x63   :  { %474 = vmatprep.subr.mxu0 %v3579_v4  ;;  %2920 = vmatprep.subr.mxu1 %v4772_v0 }
  0x64   :  { %216 = vmatprep.mubr.f32.mxu0 %v4772_v0  ;;  %475 = vmatpush1.msra.mxu0 %v3584_v5 }
  0x65   :  { %2921 = vmatpush3.msra.mxu1 %v3586_v6  ;;  %217 = vmatmul.mubr.f32.gmra.mxu0 %v81_v7 }
  0x66   :  { %476 = vmatprep.subr.mxu0 %v3590_v8  ;;  %2922 = vmatprep.subr.mxu1 %v4772_v0 }
  0x67   :  { %477 = vmatpush1.msra.mxu0 %v3594_v9  ;;  %2923 = vmatpush3.msra.mxu1 %v3598_v10 }
  0x68   :  { %478 = vmatprep.subr.mxu0 %v3600_v11  ;;  %2924 = vmatprep.subr.mxu1 %v4772_v0 }
  0x69   :  { %222 = vmatprep.mubr.f32.mxu0 %v4772_v0  ;;  %479 = vmatpush1.msra.mxu0 %v3605_v12 }
  0x6a   :  { %2925 = vmatpush3.msra.mxu1 %v3607_v13  ;;  %223 = vmatmul.mubr.f32.gmra.mxu0 %v82_v14 }
  0x6b   :  { %480 = vmatprep.subr.mxu0 %v3611_v15  ;;  %2926 = vmatprep.subr.mxu1 %v4772_v0 }
  0x6c   :  { %481 = vmatpush1.msra.mxu0 %v3615_v16  ;;  %2927 = vmatpush3.msra.mxu1 %v3619_v17 }
  0x6d   :  { %482 = vmatprep.subr.mxu0 %v3621_v18  ;;  %2928 = vmatprep.subr.mxu1 %v4772_v0 }
  0x6e   :  { %228 = vmatprep.mubr.f32.mxu0 %v4772_v0  ;;  %2901 = vmatprep.mubr.f32.mxu1 %v80_v63  ;;  %v3758_v63 = vld [vmem:[#allocation10 + $0x60] sm:$0xff] }
  0x6f   :  { %483 = vmatpush1.msra.mxu0 %v3626_v19  ;;  %2929 = vmatpush3.msra.mxu1 %v3630_v20 }
  0x70   :  { %229 = vmatmul.mubr.f32.gmra.mxu0 %v83_v21  ;;  %2902 = vmatmul.mubr.f32.gmra.mxu1 %v81_v7  ;;  %v3761_v7 = vld [vmem:[#allocation10 + $0xd8] sm:$0xff] }
  0x71   :  { %484 = vmatprep.subr.mxu0 %v3634_v22  ;;  %2930 = vmatprep.subr.mxu1 %v4772_v0 }
  0x72   :  { %485 = vmatpush1.msra.mxu0 %v3637_v23  ;;  %2931 = vmatpush3.msra.mxu1 %v3640_v24 }
  0x73   :  { %486 = vmatprep.subr.mxu0 %v3642_v25  ;;  %2932 = vmatprep.subr.mxu1 %v4772_v0 }
  0x74   :  { %234 = vmatprep.mubr.f32.mxu0 %v4772_v0  ;;  %2904 = vmatprep.mubr.f32.mxu1 %v82_v14  ;;  %v3764_v14 = vld [vmem:[#allocation10 + $0x58] sm:$0xff] }
  0x75   :  { %487 = vmatpush1.msra.mxu0 %v3647_v26  ;;  %2933 = vmatpush3.msra.mxu1 %v3651_v27 }
  0x76   :  { %235 = vmatmul.mubr.f32.gmra.mxu0 %v84_v28  ;;  %2905 = vmatmul.mubr.f32.gmra.mxu1 %v83_v21  ;;  %v3767_v21 = vld [vmem:[#allocation10 + $0xd0] sm:$0xff] }
  0x77   :  { %488 = vmatprep.subr.mxu0 %v3655_v29  ;;  %2934 = vmatprep.subr.mxu1 %v4772_v0 }
  0x78   :  { %489 = vmatpush1.msra.mxu0 %v3658_v30  ;;  %2935 = vmatpush3.msra.mxu1 %v3661_v31 }
  0x79   :  { %490 = vmatprep.subr.mxu0 %v3663_v32  ;;  %2936 = vmatprep.subr.mxu1 %v4772_v0 }
  0x7a   :  { %240 = vmatprep.mubr.f32.mxu0 %v4772_v0  ;;  %2907 = vmatprep.mubr.f32.mxu1 %v84_v28  ;;  %v3770_v28 = vld [vmem:[#allocation10 + $0x50] sm:$0xff] }
  0x7b   :  { %491 = vmatpush1.msra.mxu0 %v3668_v33  ;;  %2937 = vmatpush3.msra.mxu1 %v3672_v34 }
  0x7c   :  { %241 = vmatmul.mubr.f32.gmra.mxu0 %v85_v35  ;;  %2908 = vmatmul.mubr.f32.gmra.mxu1 %v85_v35  ;;  %v3773_v35 = vld [vmem:[#allocation10 + $0xc8] sm:$0xff] }
  0x7d   :  { %492 = vmatprep.subr.mxu0 %v3676_v36  ;;  %2938 = vmatprep.subr.mxu1 %v4772_v0 }
  0x7e   :  { %493 = vmatpush1.msra.mxu0 %v3679_v37  ;;  %2939 = vmatpush3.msra.mxu1 %v3682_v38 }
  0x7f   :  { %494 = vmatprep.subr.mxu0 %v3684_v39  ;;  %2940 = vmatprep.subr.mxu1 %v4772_v0 }
  0x80   :  { %495 = vmatpush1.msra.mxu0 %v3687_v40  ;;  %528 = vmatprep.mubr.f32.mxu0 %v4772_v0 }
  0x81   :  { %2941 = vmatpush3.msra.mxu1 %v3691_v41  ;;  %2942 = vmatprep.mubr.msk.f32.mxu1 %vm3471_vm0, %v4772_v0 }
  0x82   :  { %529 = vmatmul.mubr.f32.vlgmr.msra.gmra.mxu0 %v4772_v0  ;;  %2943 = vmatmul.mubr.f32.vlgmr.msra.gmra.mxu1 %v4772_v0 }
  0x83   :  { %706 = vmatprep.subr.mxu1 %v3525_v50  ;;  %770 = vmatprep.mubr.f32.mxu1 %v4772_v0  ;;  %v3776_v0 = vld [vmem:[#allocation10 + $0x48] sm:$0xff] }
  0x84   :  { %707 = vmatpush1.msra.mxu1 %v3529_v52  ;;  %2467 = vmatprep.subr.mxu0 %v3736_v42 }
  0x85   :  { %708 = vmatprep.subr.mxu1 %v3535_v54  ;;  %2468 = vmatpush3.msra.mxu0 %v3740_v43 }
  0x86   :  { %709 = vmatpush1.msra.mxu1 %v3541_v55  ;;  %2469 = vmatprep.subr.mxu0 %v3742_v44 }
  0x87   :  { %710 = vmatprep.subr.mxu1 %v3547_v57  ;;  %2470 = vmatpush3.msra.mxu0 %v3746_v45 }
  0x88   :  { %711 = vmatpush1.msra.mxu1 %v3551_v58  ;;  %2471 = vmatprep.subr.mxu0 %v3748_v46 }
  0x89   :  { %712 = vmatprep.subr.mxu1 %v3557_v60  ;;  %2472 = vmatpush3.msra.mxu0 %v3752_v47 }
  0x8a   :  { %713 = vmatpush1.msra.mxu1 %v3563_v61  ;;  %2473 = vmatprep.subr.mxu0 %v3755_v48 }
  0x8b   :  { %714 = vmatprep.subr.mxu1 %v3569_v1  ;;  %2474 = vmatpush3.msra.mxu0 %v3758_v63 }
  0x8c   :  { %715 = vmatpush1.msra.mxu1 %v3573_v2  ;;  %2475 = vmatprep.subr.mxu0 %v3761_v7 }
  0x8d   :  { %716 = vmatprep.subr.mxu1 %v3579_v4  ;;  %2476 = vmatpush3.msra.mxu0 %v3764_v14 }
  0x8e   :  { %717 = vmatpush1.msra.mxu1 %v3584_v5  ;;  %2477 = vmatprep.subr.mxu0 %v3767_v21 }
  0x8f   :  { %718 = vmatprep.subr.mxu1 %v3590_v8  ;;  %2478 = vmatpush3.msra.mxu0 %v3770_v28 }
  0x90   :  { %719 = vmatpush1.msra.mxu1 %v3594_v9  ;;  %2479 = vmatprep.subr.mxu0 %v3773_v35 }
  0x91   :  { %720 = vmatprep.subr.mxu1 %v3600_v11  ;;  %2480 = vmatpush3.msra.mxu0 %v3776_v0 }
  0x92   :  { %721 = vmatpush1.msra.mxu1 %v3605_v12  ;;  %2481 = vmatprep.subr.mxu0 %v3779_v51 }
  0x93   :  { %722 = vmatprep.subr.mxu1 %v3611_v15 }
  0x94   :  { %723 = vmatpush1.msra.mxu1 %v3615_v16 }
  0x95   :  { %724 = vmatprep.subr.mxu1 %v3621_v18 }
  0x96   :  { %725 = vmatpush1.msra.mxu1 %v3626_v19 }
  0x97   :  { %726 = vmatprep.subr.mxu1 %v3634_v22 }
  0x98   :  { %727 = vmatpush1.msra.mxu1 %v3637_v23  ;;  %v3815_v23 = vld [vmem:[#allocation10 + $0x90] sm:$0xff] }
  0x99   :  { %728 = vmatprep.subr.mxu1 %v3642_v25  ;;  %v3812_v25 = vld [vmem:[#allocation10 + $0x18] sm:$0xff]  ;;  %4961 = vst [vmem:[#allocation50_spill] sm:$0xff] %v3815_v23 }
  0x9a   :  { %729 = vmatpush1.msra.mxu1 %v3647_v26  ;;  %v3809_v26 = vld [vmem:[#allocation10 + $0x98] sm:$0xff]  ;;  %4960 = vst [vmem:[#allocation49_spill] sm:$0xff] %v3812_v25 }
  0x9b   :  { %730 = vmatprep.subr.mxu1 %v3655_v29  ;;  %v3806_v29 = vld [vmem:[#allocation10 + $0x20] sm:$0xff]  ;;  %4959 = vst [vmem:[#allocation48_spill] sm:$0xff] %v3809_v26 }
  0x9c   :  { %731 = vmatpush1.msra.mxu1 %v3658_v30  ;;  %v3803_v30 = vld [vmem:[#allocation10 + $0xa0] sm:$0xff]  ;;  %4958 = vst [vmem:[#allocation47_spill] sm:$0xff] %v3806_v29 }
  0x9d   :  { %732 = vmatprep.subr.mxu1 %v3663_v32  ;;  %v3800_v32 = vld [vmem:[#allocation10 + $0x28] sm:$0xff]  ;;  %4957 = vst [vmem:[#allocation46_spill] sm:$0xff] %v3803_v30 }
  0x9e   :  { %733 = vmatpush1.msra.mxu1 %v3668_v33  ;;  %v3797_v33 = vld [vmem:[#allocation10 + $0xa8] sm:$0xff]  ;;  %4956 = vst [vmem:[#allocation45_spill] sm:$0xff] %v3800_v32 }
  0x9f   :  { %734 = vmatprep.subr.mxu1 %v3676_v36  ;;  %v3794_v36 = vld [vmem:[#allocation10 + $0x30] sm:$0xff]  ;;  %4955 = vst [vmem:[#allocation44_spill] sm:$0xff] %v3797_v33 }
  0xa0   :  { %735 = vmatpush1.msra.mxu1 %v3679_v37  ;;  %v3791_v37 = vld [vmem:[#allocation10 + $0xb0] sm:$0xff]  ;;  %4954 = vst [vmem:[#allocation43_spill] sm:$0xff] %v3794_v36 }
  0xa1   :  { %736 = vmatprep.subr.mxu1 %v3684_v39  ;;  %v3788_v39 = vld [vmem:[#allocation10 + $0x38] sm:$0xff]  ;;  %4953 = vst [vmem:[#allocation42_spill] sm:$0xff] %v3791_v37 }
  0xa2   :  { %737 = vmatpush1.msra.mxu1 %v3687_v40  ;;  %v3785_v40 = vld [vmem:[#allocation10 + $0xb8] sm:$0xff]  ;;  %4952 = vst [vmem:[#allocation41_spill] sm:$0xff] %v3788_v39 }
  0xa3   :  { %2519 = vmatprep.subr.mxu1 %v3736_v42  ;;  %v3782_v42 = vld [vmem:[#allocation10 + $0x40] sm:$0xff]  ;;  %4951 = vst [vmem:[#allocation40_spill] sm:$0xff] %v3785_v40 }
  0xa4   :  { %4950 = vst [vmem:[#allocation39_spill] sm:$0xff] %v3782_v42  ;;  %2482 = vmatpush3.msra.mxu0 %v3782_v42 }
  0xa5   :  { %2483 = vmatprep.subr.mxu0 %v3785_v40 }
  0xa6   :  { %2484 = vmatpush3.msra.mxu0 %v3788_v39 }
  0xa7   :  { %2485 = vmatprep.subr.mxu0 %v3791_v37 }
  0xa8   :  { %2486 = vmatpush3.msra.mxu0 %v3794_v36 }
  0xa9   :  { %2487 = vmatprep.subr.mxu0 %v3797_v33 }
  0xaa   :  { %2488 = vmatpush3.msra.mxu0 %v3800_v32  ;;  %v3818_v32 = vld [vmem:[#allocation10 + $0x10] sm:$0xff] }
  0xab   :  { %2489 = vmatprep.subr.mxu0 %v3803_v30  ;;  %4962 = vst [vmem:[#allocation51_spill] sm:$0xff] %v3818_v32  ;;  %v3821_v30 = vld [vmem:[#allocation10 + $0x88] sm:$0xff] }
  0xac   :  { %2490 = vmatpush3.msra.mxu0 %v3806_v29  ;;  %4963 = vst [vmem:[#allocation52_spill] sm:$0xff] %v3821_v30  ;;  %v3824_v29 = vld [vmem:[#allocation10 + $0x8] sm:$0xff] }
  0xad   :  { %2491 = vmatprep.subr.mxu0 %v3809_v26  ;;  %4964 = vst [vmem:[#allocation53_spill] sm:$0xff] %v3824_v29  ;;  %v3827_v26 = vld [vmem:[#allocation10 + $0x80] sm:$0xff] }
  0xae   :  { %2492 = vmatpush3.msra.mxu0 %v3812_v25  ;;  %4965 = vst [vmem:[#allocation54_spill] sm:$0xff] %v3827_v26  ;;  %v3830_v25 = vld [vmem:[#allocation10] sm:$0xff] }
  0xaf   :  { %2493 = vmatprep.subr.mxu0 %v3815_v23  ;;  %4966 = vst [vmem:[#allocation55_spill] sm:$0xff] %v3830_v25  ;;  %v4967_v23 = vmov 0.0  }
  0xb0   :  { %2494 = vmatpush3.msra.mxu0 %v3818_v32 }
  0xb1   :  { %2495 = vmatprep.subr.mxu0 %v3821_v30 }
  0xb2   :  { %2496 = vmatpush3.msra.mxu0 %v3824_v29 }
  0xb3   :  { %2497 = vmatprep.subr.mxu0 %v3827_v26 }
  0xb4   :  { %2498 = vmatpush3.msra.mxu0 %v3830_v25 }
  0xb5   :  { %2945 = vmatprep.subr.mxu0 %v4967_v23 }
 0x115   :  { %v200_v22 = vpop.f32.mrf.mxu0 }
 0x117   :  { %v202_v32 = vpop.f32.mrf.mxu0  ;;  %v3846_v26 = vpop.f32.mrf.mxu1 }
 0x118   :  { %4974 = vst [vmem:[#allocation62_spill] sm:$0xff] %v3846_v26 }
 0x119   :  { %v313_v16 = vpop.f32.mrf.mxu1 }
 0x11b   :  { %v3834_v33 = vpop.f32.mrf.mxu0 }
 0x11c   :  { %4968 = vst [vmem:[#allocation56_spill] sm:$0xff] %v3834_v33 }
 0x11d   :  { %v3836_v19 = vpop.f32.mrf.mxu0 }
 0x11e   :  { %4969 = vst [vmem:[#allocation57_spill] sm:$0xff] %v3836_v19 }
 0x120   :  { %v3838_v30 = vpop.f32.mrf.mxu0 }
 0x121   :  { %4970 = vst [vmem:[#allocation58_spill] sm:$0xff] %v3838_v30 }
 0x122   :  { %v3840_v36 = vpop.f32.mrf.mxu0 }
 0x123   :  { %4971 = vst [vmem:[#allocation59_spill] sm:$0xff] %v3840_v36 }
 0x125   :  { %v3842_v29 = vpop.f32.mrf.mxu0 }
 0x126   :  { %4972 = vst [vmem:[#allocation60_spill] sm:$0xff] %v3842_v29 }
 0x127   :  { %v3844_v18 = vpop.f32.mrf.mxu0 }
 0x128   :  { %4973 = vst [vmem:[#allocation61_spill] sm:$0xff] %v3844_v18 }
 0x12a   :  { %v3848_v37 = vpop.f32.mrf.mxu0 }
 0x12b   :  { %4975 = vst [vmem:[#allocation63_spill] sm:$0xff] %v3848_v37 }
 0x12c   :  { %v3850_v25 = vpop.f32.mrf.mxu0 }
 0x12d   :  { %4976 = vst [vmem:[#allocation64_spill] sm:$0xff] %v3850_v25 }
 0x130   :  { %v3852_v39 = vpop.f32.mrf.mxu0  ;;  %v3854_v33 = vpop.f32.mrf.mxu1 }
 0x131   :  { %4977 = vst [vmem:[#allocation65_spill] sm:$0xff] %v3852_v39  ;;  %4978 = vst [vmem:[#allocation66_spill] sm:$0xff] %v3854_v33 }
 0x132   :  { %v3856_v19 = vpop.f32.mrf.mxu0  ;;  %v3858_v30 = vpop.f32.mrf.mxu1 }
 0x133   :  { %4979 = vst [vmem:[#allocation67_spill] sm:$0xff] %v3856_v19  ;;  %4980 = vst [vmem:[#allocation68_spill] sm:$0xff] %v3858_v30 }
 0x136   :  { %v3860_v36 = vpop.f32.mrf.mxu0  ;;  %v3862_v29 = vpop.f32.mrf.mxu1 }
 0x137   :  { %4981 = vst [vmem:[#allocation69_spill] sm:$0xff] %v3860_v36  ;;  %4982 = vst [vmem:[#allocation70_spill] sm:$0xff] %v3862_v29 }
 0x138   :  { %v3864_v18 = vpop.f32.mrf.mxu0  ;;  %v3866_v26 = vpop.f32.mrf.mxu1 }
 0x139   :  { %4983 = vst [vmem:[#allocation71_spill] sm:$0xff] %v3864_v18  ;;  %4984 = vst [vmem:[#allocation72_spill] sm:$0xff] %v3866_v26 }
 0x13c   :  { %v3868_v37 = vpop.f32.mrf.mxu0  ;;  %v3870_v25 = vpop.f32.mrf.mxu1 }
 0x13d   :  { %4985 = vst [vmem:[#allocation73_spill] sm:$0xff] %v3868_v37  ;;  %4986 = vst [vmem:[#allocation74_spill] sm:$0xff] %v3870_v25 }
 0x13e   :  { %v3872_v15 = vpop.f32.mrf.mxu0  ;;  %v3874_v39 = vpop.f32.mrf.mxu1 }
 0x13f   :  { %4987 = vst [vmem:[#allocation75_spill] sm:$0xff] %v3872_v15  ;;  %4988 = vst [vmem:[#allocation76_spill] sm:$0xff] %v3874_v39 }
 0x142   :  { %v530_v33 = vpop.f32.mrf.mxu0  ;;  %v601_v40 = vpop.f32.mrf.mxu1 }
 0x143   :  { %v605_v19 = vadd.f32 %v530_v33, %v200_v22  ;;  %v607_v30 = vadd.f32 %v601_v40, %v313_v16  ;;  %v4992_v33 = vld [vmem:[#allocation39_spill] sm:$0xff]  ;;  %v4996_v40 = vld [vmem:[#allocation41_spill] sm:$0xff] }
 0x144   :  { %v532_v12 = vpop.f32.mrf.mxu0  ;;  %v2944_v42 = vpop.f32.mrf.mxu1 }
 0x145   :  { %v606_v36 = vadd.f32 %v532_v12, %v202_v32  ;;  %v610_v29 = vmul.f32 0.5, %v607_v30  ;;  %v4990_v30 = vld [vmem:[#allocation38_spill] sm:$0xff]  ;;  %v4991_v32 = vld [vmem:[#allocation19_spill] sm:$0xff] }
 0x146   :  { %v4997_v42 = vld [vmem:[#allocation22_spill] sm:$0xff] }
 0x147   :  { %v609_v11 = vmul.f32 0.5, %v606_v36  ;;  %3201 = vtanh.f32 %v610_v29  ;;  %v4993_v36 = vld [vmem:[#allocation20_spill] sm:$0xff] }
 0x149   :  { %3203 = vtanh.f32 %v609_v11 }
 0x154   :  { %v3202_v18 = vpop.eup %3201 }
 0x155   :  { %v616_v37 = vadd.f32 1.0, %v3202_v18 }
 0x156   :  { %v3204_v26 = vpop.eup %3203 }
 0x157   :  { %v615_v51 = vadd.f32 1.0, %v3204_v26  ;;  %v619_v25 = vmul.f32 0.5, %v616_v37  ;;  %v4994_v37 = vld [vmem:[#allocation40_spill] sm:$0xff] }
 0x159   :  { %v618_v9 = vmul.f32 0.5, %v615_v51  ;;  %v621_v15 = vmul.f32 0.0, %v619_v25 }
 0x15b   :  { %v620_v39 = vmul.f32 %v618_v9, %v3523_v49  ;;  %686 = vmatprep.mubr.f32.mxu0 %v621_v15  ;;  %v608_v49 = vmul.f32 0.5, %v605_v19  ;;  %v4989_v19 = vld [vmem:[#allocation18_spill] sm:$0xff] }
 0x15d   :  { %687 = vmatmul.mubr.f32.vlgmr.msra.gmra.mxu0 %v620_v39  ;;  %3205 = vtanh.f32 %v608_v49  ;;  %v4995_v39 = vld [vmem:[#allocation21_spill] sm:$0xff]  ;;  %v4998_v49 = vld [vmem:[#allocation42_spill] sm:$0xff] }
 0x15e   :  { %2946 = vmatpush3.msra.mxu0 %v3533_v53  ;;  %2977 = vmatprep.mubr.msk.f32.mxu0 %vm3471_vm0, %v4967_v23 }
 0x15f   :  { %2947 = vmatprep.subr.mxu0 %v4967_v23 }
 0x160   :  { %2948 = vmatpush3.msra.mxu0 %v3543_v56 }
 0x161   :  { %2949 = vmatprep.subr.mxu0 %v4967_v23 }
 0x162   :  { %2950 = vmatpush3.msra.mxu0 %v3555_v59 }
 0x163   :  { %2951 = vmatprep.subr.mxu0 %v4967_v23 }
 0x164   :  { %2952 = vmatpush3.msra.mxu0 %v3565_v62 }
 0x165   :  { %2953 = vmatprep.subr.mxu0 %v4967_v23 }
 0x166   :  { %2954 = vmatpush3.msra.mxu0 %v3577_v3 }
 0x167   :  { %2955 = vmatprep.subr.mxu0 %v4967_v23 }
 0x168   :  { %2956 = vmatpush3.msra.mxu0 %v3586_v6 }
 0x169   :  { %2957 = vmatprep.subr.mxu0 %v4967_v23 }
 0x16a   :  { %2958 = vmatpush3.msra.mxu0 %v3598_v10  ;;  %v3206_v12 = vpop.eup %3205 }
 0x16b   :  { %2959 = vmatprep.subr.mxu0 %v4967_v23  ;;  %v614_v15 = vadd.f32 1.0, %v3206_v12  ;;  %v5002_v12 = vld [vmem:[#allocation44_spill] sm:$0xff] }
 0x16c   :  { %2960 = vmatpush3.msra.mxu0 %v3607_v13 }
 0x16d   :  { %2961 = vmatprep.subr.mxu0 %v4967_v23  ;;  %v617_v16 = vmul.f32 0.5, %v614_v15  ;;  %v5003_v15 = vld [vmem:[#allocation25_spill] sm:$0xff] }
 0x16e   :  { %2962 = vmatpush3.msra.mxu0 %v3619_v17 }
 0x16f   :  { %2963 = vmatprep.subr.mxu0 %v4967_v23  ;;  %v693_v18 = vsub.f32 1.0, %v617_v16 }
 0x170   :  { %2964 = vmatpush3.msra.mxu0 %v3630_v20 }
 0x171   :  { %2965 = vmatprep.subr.mxu0 %v4967_v23  ;;  %v694_v25 = vmul.f32 0.0, %v693_v18  ;;  %v5005_v18 = vld [vmem:[#allocation26_spill] sm:$0xff] }
 0x172   :  { %2966 = vmatpush3.msra.mxu0 %v3640_v24 }
 0x173   :  { %2967 = vmatprep.subr.mxu0 %v4967_v23 }
 0x174   :  { %2968 = vmatpush3.msra.mxu0 %v3651_v27 }
 0x175   :  { %2969 = vmatprep.subr.mxu0 %v4967_v23 }
 0x176   :  { %2970 = vmatpush3.msra.mxu0 %v3661_v31 }
 0x177   :  { %2971 = vmatprep.subr.mxu0 %v4967_v23 }
 0x178   :  { %2972 = vmatpush3.msra.mxu0 %v3672_v34 }
 0x179   :  { %2973 = vmatprep.subr.mxu0 %v4967_v23 }
 0x17a   :  { %2974 = vmatpush3.msra.mxu0 %v3682_v38 }
 0x17b   :  { %2975 = vmatprep.subr.mxu0 %v4967_v23 }
 0x17c   :  { %2976 = vmatpush3.msra.mxu0 %v3691_v41 }
 0x17d   :  { %949 = vmatprep.subr.mxu0 %v3525_v50 }
 0x21d   :  { %v2499_v51 = vpop.f32.mrf.mxu0 }
 0x21f   :  { %v2500_v9 = vpop.f32.mrf.mxu0 }
 0x220   :  { %v2501_v11 = vadd.f32 %v2500_v9, %v2499_v51  ;;  %v4999_v51 = vld [vmem:[#allocation23_spill] sm:$0xff] }
 0x221   :  { %v5000_v9 = vld [vmem:[#allocation43_spill] sm:$0xff] }
 0x222   :  { %3207 = vtanh.f32 %v2501_v11  ;;  %v5001_v11 = vld [vmem:[#allocation24_spill] sm:$0xff] }
 0x22f   :  { %v3208_v22 = vpop.eup %3207 }
 0x230   :  { %v695_v26 = vmul.f32 %v3208_v22, %v617_v16  ;;  %v5004_v16 = vld [vmem:[#allocation45_spill] sm:$0xff]  ;;  %v5006_v22 = vld [vmem:[#allocation46_spill] sm:$0xff] }
 0x232   :  { %v3911_v29 = vadd.f32 %v695_v26, %v694_v25  ;;  %v5007_v25 = vld [vmem:[#allocation27_spill] sm:$0xff] }
 0x233   :  { %v5008_v26 = vld [vmem:[#allocation47_spill] sm:$0xff] }
 0x234   :  { %771 = vmatmul.mubr.f32.vlgmr.msra.gmra.mxu1 %v3911_v29  ;;  %697 = vst [vmem:[#allocation12] sm:$0xff] %v3911_v29  ;;  %2978 = vmatmul.mubr.f32.vlgmr.msra.gmra.mxu0 %v3911_v29 }
 0x235   :  { %2520 = vmatpush3.msra.mxu1 %v3740_v43  ;;  %950 = vmatpush1.msra.mxu0 %v3529_v52 }
 0x236   :  { %2521 = vmatprep.subr.mxu1 %v3742_v44  ;;  %951 = vmatprep.subr.mxu0 %v3535_v54 }
 0x237   :  { %2522 = vmatpush3.msra.mxu1 %v3746_v45  ;;  %952 = vmatpush1.msra.mxu0 %v3541_v55 }
 0x238   :  { %2523 = vmatprep.subr.mxu1 %v3748_v46  ;;  %953 = vmatprep.subr.mxu0 %v3547_v57 }
 0x239   :  { %2524 = vmatpush3.msra.mxu1 %v3752_v47  ;;  %954 = vmatpush1.msra.mxu0 %v3551_v58 }
 0x23a   :  { %2525 = vmatprep.subr.mxu1 %v3755_v48  ;;  %955 = vmatprep.subr.mxu0 %v3557_v60 }
 0x23b   :  { %2526 = vmatpush3.msra.mxu1 %v3758_v63  ;;  %956 = vmatpush1.msra.mxu0 %v3563_v61 }
 0x23c   :  { %2527 = vmatprep.subr.mxu1 %v3761_v7  ;;  %957 = vmatprep.subr.mxu0 %v3569_v1 }
 0x23d   :  { %2528 = vmatpush3.msra.mxu1 %v3764_v14  ;;  %958 = vmatpush1.msra.mxu0 %v3573_v2 }
 0x23e   :  { %2529 = vmatprep.subr.mxu1 %v3767_v21  ;;  %959 = vmatprep.subr.mxu0 %v3579_v4 }
 0x23f   :  { %2530 = vmatpush3.msra.mxu1 %v3770_v28  ;;  %960 = vmatpush1.msra.mxu0 %v3584_v5 }
 0x240   :  { %2531 = vmatprep.subr.mxu1 %v3773_v35  ;;  %961 = vmatprep.subr.mxu0 %v3590_v8 }
 0x241   :  { %2532 = vmatpush3.msra.mxu1 %v3776_v0  ;;  %962 = vmatpush1.msra.mxu0 %v4989_v19 }
 0x242   :  { %2533 = vmatprep.subr.mxu1 %v4990_v30  ;;  %963 = vmatprep.subr.mxu0 %v4991_v32  ;;  %v5029_v32 = vld [vmem:[#allocation17_spill] sm:$0xff] }
 0x243   :  { %2534 = vmatpush3.msra.mxu1 %v4992_v33  ;;  %964 = vmatpush1.msra.mxu0 %v4993_v36 }
 0x244   :  { %2535 = vmatprep.subr.mxu1 %v4994_v37  ;;  %965 = vmatprep.subr.mxu0 %v4995_v39 }
 0x245   :  { %2536 = vmatpush3.msra.mxu1 %v4996_v40  ;;  %966 = vmatpush1.msra.mxu0 %v4997_v42 }
 0x246   :  { %2537 = vmatprep.subr.mxu1 %v4998_v49  ;;  %967 = vmatprep.subr.mxu0 %v4999_v51  ;;  %v5009_v49 = vld [vmem:[#allocation28_spill] sm:$0xff] }
 0x247   :  { %2538 = vmatpush3.msra.mxu1 %v5000_v9  ;;  %968 = vmatpush1.msra.mxu0 %v5001_v11  ;;  %v5010_v51 = vld [vmem:[#allocation48_spill] sm:$0xff]  ;;  %v5011_v9 = vld [vmem:[#allocation29_spill] sm:$0xff] }
 0x248   :  { %2539 = vmatprep.subr.mxu1 %v5002_v12  ;;  %969 = vmatprep.subr.mxu0 %v5003_v15  ;;  %v5012_v11 = vld [vmem:[#allocation49_spill] sm:$0xff]  ;;  %v5013_v12 = vld [vmem:[#allocation30_spill] sm:$0xff] }
 0x249   :  { %2540 = vmatpush3.msra.mxu1 %v5004_v16  ;;  %970 = vmatpush1.msra.mxu0 %v5005_v18  ;;  %v5014_v15 = vld [vmem:[#allocation50_spill] sm:$0xff]  ;;  %v5015_v16 = vld [vmem:[#allocation31_spill] sm:$0xff] }
 0x24a   :  { %2541 = vmatprep.subr.mxu1 %v5006_v22  ;;  %971 = vmatprep.subr.mxu0 %v5007_v25  ;;  %v5016_v18 = vld [vmem:[#allocation51_spill] sm:$0xff]  ;;  %v5017_v22 = vld [vmem:[#allocation32_spill] sm:$0xff] }
 0x24b   :  { %2542 = vmatpush3.msra.mxu1 %v5008_v26  ;;  %972 = vmatpush1.msra.mxu0 %v5009_v49  ;;  %v5018_v25 = vld [vmem:[#allocation52_spill] sm:$0xff]  ;;  %v5019_v26 = vld [vmem:[#allocation33_spill] sm:$0xff] }
 0x24c   :  { %2543 = vmatprep.subr.mxu1 %v5010_v51  ;;  %973 = vmatprep.subr.mxu0 %v5011_v9  ;;  %v5020_v49 = vld [vmem:[#allocation53_spill] sm:$0xff]  ;;  %v5021_v51 = vld [vmem:[#allocation34_spill] sm:$0xff] }
 0x24d   :  { %2544 = vmatpush3.msra.mxu1 %v5012_v11  ;;  %974 = vmatpush1.msra.mxu0 %v5013_v12  ;;  %v5022_v9 = vld [vmem:[#allocation54_spill] sm:$0xff]  ;;  %v5023_v11 = vld [vmem:[#allocation35_spill] sm:$0xff] }
 0x24e   :  { %2545 = vmatprep.subr.mxu1 %v5014_v15  ;;  %975 = vmatprep.subr.mxu0 %v5015_v16  ;;  %v5024_v12 = vld [vmem:[#allocation55_spill] sm:$0xff]  ;;  %v5025_v15 = vld [vmem:[#allocation36_spill] sm:$0xff] }
 0x24f   :  { %2546 = vmatpush3.msra.mxu1 %v5016_v18  ;;  %976 = vmatpush1.msra.mxu0 %v5017_v22  ;;  %v5026_v22 = vld [vmem:[#allocation37_spill] sm:$0xff]  ;;  %v5027_v18 = vld [vmem:[#allocation62_spill] sm:$0xff] }
 0x250   :  { %2547 = vmatprep.subr.mxu1 %v5018_v25  ;;  %977 = vmatprep.subr.mxu0 %v5019_v26 }
 0x251   :  { %2548 = vmatpush3.msra.mxu1 %v5020_v49  ;;  %978 = vmatpush1.msra.mxu0 %v5021_v51 }
 0x252   :  { %2549 = vmatprep.subr.mxu1 %v5022_v9  ;;  %979 = vmatprep.subr.mxu0 %v5023_v11  ;;  %v5028_v9 = vld [vmem:[#allocation57_spill] sm:$0xff] }
 0x253   :  { %2550 = vmatpush3.msra.mxu1 %v5024_v12  ;;  %980 = vmatpush1.msra.mxu0 %v5025_v15 }
 0x254   :  { %2980 = vmatprep.subr.mxu1 %v4967_v23  ;;  %1013 = vmatprep.mubr.f32.mxu0 %v4967_v23 }
 0x255   :  { %2571 = vmatprep.subr.mxu0 %v5026_v22 }
 0x2f4   :  { %v772_v25 = vpop.f32.mrf.mxu1  ;;  %v843_v26 = vpop.f32.mrf.mxu0 }
 0x2f5   :  { %v849_v49 = vadd.f32 %v5027_v18, %v843_v26  ;;  %v5055_v18 = vld [vmem:[#allocation50_spill] sm:$0xff]  ;;  %v5058_v26 = vld [vmem:[#allocation32_spill] sm:$0xff] }
 0x2f6   :  { %v774_v16 = vpop.f32.mrf.mxu1  ;;  %v2979_v51 = vpop.f32.mrf.mxu0 }
 0x2f7   :  { %v852_v42 = vmul.f32 0.5, %v849_v49  ;;  %v848_v40 = vadd.f32 %v774_v16, %v5028_v9  ;;  %v5048_v49 = vld [vmem:[#allocation27_spill] sm:$0xff]  ;;  %v5050_v9 = vld [vmem:[#allocation28_spill] sm:$0xff]  ;;  %v5054_v16 = vld [vmem:[#allocation30_spill] sm:$0xff] }
 0x2f8   :  { %v5049_v51 = vld [vmem:[#allocation47_spill] sm:$0xff] }
 0x2f9   :  { %v851_v11 = vmul.f32 0.5, %v848_v40  ;;  %3209 = vtanh.f32 %v852_v42  ;;  %v5046_v40 = vld [vmem:[#allocation26_spill] sm:$0xff] }
 0x2fa   :  { %v5047_v42 = vld [vmem:[#allocation46_spill] sm:$0xff] }
 0x2fb   :  { %3211 = vtanh.f32 %v851_v11  ;;  %v5051_v11 = vld [vmem:[#allocation48_spill] sm:$0xff] }
 0x306   :  { %v3210_v12 = vpop.eup %3209 }
 0x307   :  { %v858_v39 = vadd.f32 1.0, %v3210_v12  ;;  %v5052_v12 = vld [vmem:[#allocation29_spill] sm:$0xff] }
 0x308   :  { %v3212_v15 = vpop.eup %3211 }
 0x309   :  { %v857_v37 = vadd.f32 1.0, %v3212_v15  ;;  %v861_v36 = vmul.f32 0.5, %v858_v39  ;;  %v5053_v15 = vld [vmem:[#allocation49_spill] sm:$0xff] }
 0x30b   :  { %v860_v33 = vmul.f32 0.5, %v857_v37  ;;  %v863_v22 = vmul.f32 %v861_v36, %v3911_v29 }
 0x30d   :  { %v862_v30 = vmul.f32 %v860_v33, %v5029_v32  ;;  %928 = vmatprep.mubr.f32.mxu1 %v863_v22  ;;  %v5056_v22 = vld [vmem:[#allocation31_spill] sm:$0xff] }
 0x30f   :  { %929 = vmatmul.mubr.f32.vlgmr.msra.gmra.mxu1 %v862_v30 }
 0x310   :  { %2981 = vmatpush3.msra.mxu1 %v3533_v53  ;;  %3012 = vmatprep.mubr.msk.f32.mxu1 %vm3471_vm0, %v4967_v23  ;;  %v5030_v53 = vld [vmem:[#allocation56_spill] sm:$0xff] }
 0x311   :  { %2982 = vmatprep.subr.mxu1 %v4967_v23 }
 0x312   :  { %2983 = vmatpush3.msra.mxu1 %v3543_v56  ;;  %v847_v56 = vadd.f32 %v772_v25, %v5030_v53  ;;  %v5057_v25 = vld [vmem:[#allocation51_spill] sm:$0xff]  ;;  %v5059_v53 = vld [vmem:[#allocation52_spill] sm:$0xff] }
 0x313   :  { %2984 = vmatprep.subr.mxu1 %v4967_v23 }
 0x314   :  { %2985 = vmatpush3.msra.mxu1 %v3555_v59  ;;  %v850_v59 = vmul.f32 0.5, %v847_v56  ;;  %v5060_v56 = vld [vmem:[#allocation33_spill] sm:$0xff] }
 0x315   :  { %2986 = vmatprep.subr.mxu1 %v4967_v23 }
 0x316   :  { %2987 = vmatpush3.msra.mxu1 %v3565_v62  ;;  %3213 = vtanh.f32 %v850_v59  ;;  %v5061_v59 = vld [vmem:[#allocation53_spill] sm:$0xff] }
 0x317   :  { %2988 = vmatprep.subr.mxu1 %v4967_v23 }
 0x318   :  { %2989 = vmatpush3.msra.mxu1 %v3577_v3 }
 0x319   :  { %2990 = vmatprep.subr.mxu1 %v4967_v23 }
 0x31a   :  { %2991 = vmatpush3.msra.mxu1 %v3586_v6 }
 0x31b   :  { %2992 = vmatprep.subr.mxu1 %v4967_v23 }
 0x31c   :  { %2993 = vmatpush3.msra.mxu1 %v3598_v10 }
 0x31d   :  { %2994 = vmatprep.subr.mxu1 %v4967_v23 }
 0x31e   :  { %2995 = vmatpush3.msra.mxu1 %v3607_v13 }
 0x31f   :  { %2996 = vmatprep.subr.mxu1 %v4967_v23 }
 0x320   :  { %2997 = vmatpush3.msra.mxu1 %v3619_v17 }
 0x321   :  { %2998 = vmatprep.subr.mxu1 %v4967_v23 }
 0x322   :  { %2999 = vmatpush3.msra.mxu1 %v3630_v20 }
 0x323   :  { %3000 = vmatprep.subr.mxu1 %v4967_v23  ;;  %v3214_v10 = vpop.eup %3213 }
 0x324   :  { %3001 = vmatpush3.msra.mxu1 %v3640_v24  ;;  %v856_v13 = vadd.f32 1.0, %v3214_v10  ;;  %v5065_v10 = vld [vmem:[#allocation55_spill] sm:$0xff] }
 0x325   :  { %3002 = vmatprep.subr.mxu1 %v4967_v23 }
 0x326   :  { %3003 = vmatpush3.msra.mxu1 %v3651_v27  ;;  %v859_v30 = vmul.f32 0.5, %v856_v13  ;;  %v5066_v13 = vld [vmem:[#allocation36_spill] sm:$0xff] }
 0x327   :  { %3004 = vmatprep.subr.mxu1 %v4967_v23 }
 0x328   :  { %3005 = vmatpush3.msra.mxu1 %v3661_v31  ;;  %v935_v32 = vsub.f32 1.0, %v859_v30 }
 0x329   :  { %3006 = vmatprep.subr.mxu1 %v4967_v23 }
 0x32a   :  { %3007 = vmatpush3.msra.mxu1 %v3672_v34  ;;  %v936_v36 = vmul.f32 %v935_v32, %v3911_v29  ;;  %v5044_v29 = vld [vmem:[#allocation25_spill] sm:$0xff] }
 0x32b   :  { %3008 = vmatprep.subr.mxu1 %v4967_v23 }
 0x32c   :  { %3009 = vmatpush3.msra.mxu1 %v3682_v38 }
 0x32d   :  { %3010 = vmatprep.subr.mxu1 %v4967_v23 }
 0x32e   :  { %3011 = vmatpush3.msra.mxu1 %v3691_v41 }
 0x32f   :  { %1192 = vmatprep.subr.mxu1 %v3525_v50  ;;  %v5031_v50 = vld [vmem:[#allocation38_spill] sm:$0xff] }
 0x3cf   :  { %v2551_v62 = vpop.f32.mrf.mxu1 }
 0x3d1   :  { %v2552_v3 = vpop.f32.mrf.mxu1 }
 0x3d2   :  { %v2553_v6 = vadd.f32 %v2552_v3, %v2551_v62  ;;  %v5062_v62 = vld [vmem:[#allocation34_spill] sm:$0xff] }
 0x3d3   :  { %v5063_v3 = vld [vmem:[#allocation54_spill] sm:$0xff] }
 0x3d4   :  { %3215 = vtanh.f32 %v2553_v6  ;;  %v5064_v6 = vld [vmem:[#allocation35_spill] sm:$0xff] }
 0x3e1   :  { %v3216_v33 = vpop.eup %3215 }
 0x3e2   :  { %v937_v37 = vmul.f32 %v3216_v33, %v859_v30  ;;  %v5067_v30 = vld [vmem:[#allocation37_spill] sm:$0xff] }
 0x3e4   :  { %v4021_v39 = vadd.f32 %v937_v37, %v936_v36  ;;  %v5068_v36 = vld [vmem:[#allocation68_spill] sm:$0xff] }
 0x3e6   :  { %1014 = vmatmul.mubr.f32.vlgmr.msra.gmra.mxu0 %v4021_v39  ;;  %940 = vst [vmem:[#allocation12 + $0x8] sm:$0xff] %v4021_v39  ;;  %3013 = vmatmul.mubr.f32.vlgmr.msra.gmra.mxu1 %v4021_v39 }
 0x3e7   :  { %2572 = vmatpush3.msra.mxu0 %v3740_v43  ;;  %1193 = vmatpush1.msra.mxu1 %v3529_v52  ;;  %v5032_v52 = vld [vmem:[#allocation19_spill] sm:$0xff] }
 0x3e8   :  { %2573 = vmatprep.subr.mxu0 %v3742_v44  ;;  %1194 = vmatprep.subr.mxu1 %v3535_v54  ;;  %v5033_v54 = vld [vmem:[#allocation39_spill] sm:$0xff] }
 0x3e9   :  { %2574 = vmatpush3.msra.mxu0 %v3746_v45  ;;  %1195 = vmatpush1.msra.mxu1 %v3541_v55  ;;  %v5034_v55 = vld [vmem:[#allocation20_spill] sm:$0xff] }
 0x3ea   :  { %2575 = vmatprep.subr.mxu0 %v3748_v46  ;;  %1196 = vmatprep.subr.mxu1 %v3547_v57  ;;  %v5035_v57 = vld [vmem:[#allocation40_spill] sm:$0xff] }
 0x3eb   :  { %2576 = vmatpush3.msra.mxu0 %v3752_v47  ;;  %1197 = vmatpush1.msra.mxu1 %v3551_v58  ;;  %v5036_v58 = vld [vmem:[#allocation21_spill] sm:$0xff] }
 0x3ec   :  { %2577 = vmatprep.subr.mxu0 %v3755_v48  ;;  %1198 = vmatprep.subr.mxu1 %v3557_v60  ;;  %v5037_v60 = vld [vmem:[#allocation41_spill] sm:$0xff] }
 0x3ed   :  { %2578 = vmatpush3.msra.mxu0 %v3758_v63  ;;  %1199 = vmatpush1.msra.mxu1 %v3563_v61  ;;  %v5038_v61 = vld [vmem:[#allocation22_spill] sm:$0xff] }
 0x3ee   :  { %2579 = vmatprep.subr.mxu0 %v3761_v7  ;;  %1200 = vmatprep.subr.mxu1 %v3569_v1  ;;  %v5039_v1 = vld [vmem:[#allocation42_spill] sm:$0xff] }
 0x3ef   :  { %2580 = vmatpush3.msra.mxu0 %v3764_v14  ;;  %1201 = vmatpush1.msra.mxu1 %v3573_v2  ;;  %v5040_v2 = vld [vmem:[#allocation23_spill] sm:$0xff] }
 0x3f0   :  { %2581 = vmatprep.subr.mxu0 %v3767_v21  ;;  %1202 = vmatprep.subr.mxu1 %v3579_v4  ;;  %v5041_v4 = vld [vmem:[#allocation43_spill] sm:$0xff] }
 0x3f1   :  { %2582 = vmatpush3.msra.mxu0 %v3770_v28  ;;  %1203 = vmatpush1.msra.mxu1 %v3584_v5  ;;  %v5042_v5 = vld [vmem:[#allocation24_spill] sm:$0xff] }
 0x3f2   :  { %2583 = vmatprep.subr.mxu0 %v3773_v35  ;;  %1204 = vmatprep.subr.mxu1 %v3590_v8  ;;  %v5043_v8 = vld [vmem:[#allocation44_spill] sm:$0xff] }
 0x3f3   :  { %2584 = vmatpush3.msra.mxu0 %v3776_v0  ;;  %1205 = vmatpush1.msra.mxu1 %v4989_v19  ;;  %v5045_v19 = vld [vmem:[#allocation45_spill] sm:$0xff] }
 0x3f4   :  { %2585 = vmatprep.subr.mxu0 %v5031_v50  ;;  %1206 = vmatprep.subr.mxu1 %v5032_v52 }
 0x3f5   :  { %2586 = vmatpush3.msra.mxu0 %v5033_v54  ;;  %1207 = vmatpush1.msra.mxu1 %v5034_v55 }
 0x3f6   :  { %2587 = vmatprep.subr.mxu0 %v5035_v57  ;;  %1208 = vmatprep.subr.mxu1 %v5036_v58 }
 0x3f7   :  { %2588 = vmatpush3.msra.mxu0 %v5037_v60  ;;  %1209 = vmatpush1.msra.mxu1 %v5038_v61  ;;  %v5069_v61 = vld [vmem:[#allocation59_spill] sm:$0xff] }
 0x3f8   :  { %2589 = vmatprep.subr.mxu0 %v5039_v1  ;;  %1210 = vmatprep.subr.mxu1 %v5040_v2 }
 0x3f9   :  { %2590 = vmatpush3.msra.mxu0 %v5041_v4  ;;  %1211 = vmatpush1.msra.mxu1 %v5042_v5 }
 0x3fa   :  { %2591 = vmatprep.subr.mxu0 %v5043_v8  ;;  %1212 = vmatprep.subr.mxu1 %v5044_v29 }
 0x3fb   :  { %2592 = vmatpush3.msra.mxu0 %v5045_v19  ;;  %1213 = vmatpush1.msra.mxu1 %v5046_v40 }
 0x3fc   :  { %2593 = vmatprep.subr.mxu0 %v5047_v42  ;;  %1214 = vmatprep.subr.mxu1 %v5048_v49 }
 0x3fd   :  { %2594 = vmatpush3.msra.mxu0 %v5049_v51  ;;  %1215 = vmatpush1.msra.mxu1 %v5050_v9 }
 0x3fe   :  { %2595 = vmatprep.subr.mxu0 %v5051_v11  ;;  %1216 = vmatprep.subr.mxu1 %v5052_v12 }
 0x3ff   :  { %2596 = vmatpush3.msra.mxu0 %v5053_v15  ;;  %1217 = vmatpush1.msra.mxu1 %v5054_v16 }
 0x400   :  { %2597 = vmatprep.subr.mxu0 %v5055_v18  ;;  %1218 = vmatprep.subr.mxu1 %v5056_v22 }
 0x401   :  { %2598 = vmatpush3.msra.mxu0 %v5057_v25  ;;  %1219 = vmatpush1.msra.mxu1 %v5058_v26  ;;  %v3265_v26 = vld [vmem:[#allocation4 + $0x10] sm:$0xff] }
 0x402   :  { %2599 = vmatprep.subr.mxu0 %v5059_v53  ;;  %1220 = vmatprep.subr.mxu1 %v5060_v56 }
 0x403   :  { %2600 = vmatpush3.msra.mxu0 %v5061_v59  ;;  %1221 = vmatpush1.msra.mxu1 %v5062_v62  ;;  %v4096_v62 = vld [vmem:[#allocation9 + $0x178] sm:$0xff] }
 0x404   :  { %2601 = vmatprep.subr.mxu0 %v5063_v3  ;;  %1222 = vmatprep.subr.mxu1 %v5064_v6  ;;  %v4102_v6 = vld [vmem:[#allocation9 + $0x160] sm:$0xff] }
 0x405   :  { %2602 = vmatpush3.msra.mxu0 %v5065_v10  ;;  %1223 = vmatpush1.msra.mxu1 %v5066_v13  ;;  %v4106_v13 = vld [vmem:[#allocation9 + $0x148] sm:$0xff] }
 0x406   :  { %3015 = vmatprep.subr.mxu0 %v4967_v23  ;;  %1256 = vmatprep.mubr.f32.mxu1 %v4967_v23 }
 0x407   :  { %2623 = vmatprep.subr.mxu1 %v5067_v30 }
 0x4a6   :  { %v4091_v32 = vpop.f32.mrf.mxu0  ;;  %v1086_v33 = vpop.f32.mrf.mxu1 }
 0x4a7   :  { %v1092_v37 = vadd.f32 %v1086_v33, %v5068_v36  ;;  %v4110_v33 = vld [vmem:[#allocation9 + $0x130] sm:$0xff]  ;;  %v4114_v36 = vld [vmem:[#allocation9 + $0x118] sm:$0xff] }
 0x4a8   :  { %v1017_v52 = vpop.f32.mrf.mxu0  ;;  %v3014_v55 = vpop.f32.mrf.mxu1 }
 0x4a9   :  { %v1095_v58 = vmul.f32 0.5, %v1092_v37  ;;  %v1091_v2 = vadd.f32 %v1017_v52, %v5069_v61  ;;  %v4118_v37 = vld [vmem:[#allocation9 + $0x100] sm:$0xff]  ;;  %v4122_v52 = vld [vmem:[#allocation9 + $0xe8] sm:$0xff]  ;;  %v4126_v55 = vld [vmem:[#allocation9 + $0xd0] sm:$0xff] }
 0x4ab   :  { %v1094_v5 = vmul.f32 0.5, %v1091_v2  ;;  %3217 = vtanh.f32 %v1095_v58 }
 0x4ad   :  { %3219 = vtanh.f32 %v1094_v5 }
 0x4b8   :  { %v3218_v29 = vpop.eup %3217 }
 0x4b9   :  { %v1101_v49 = vadd.f32 1.0, %v3218_v29 }
 0x4ba   :  { %v3220_v40 = vpop.eup %3219 }
 0x4bb   :  { %v1100_v9 = vadd.f32 1.0, %v3220_v40  ;;  %v1104_v12 = vmul.f32 0.5, %v1101_v49 }
 0x4bd   :  { %v1103_v16 = vmul.f32 0.5, %v1100_v9  ;;  %v1106_v22 = vmul.f32 %v1104_v12, %v4021_v39  ;;  %v4161_v9 = vld [vmem:[#allocation9 + $0x158] sm:$0xff]  ;;  %v4169_v12 = vld [vmem:[#allocation9 + $0x140] sm:$0xff] }
 0x4bf   :  { %v1105_v56 = vmul.f32 %v3265_v26, %v1103_v16  ;;  %1171 = vmatprep.mubr.f32.mxu0 %v1106_v22  ;;  %v5089_v16 = vld [vmem:[#allocation66_spill] sm:$0xff] }
 0x4c1   :  { %1172 = vmatmul.mubr.f32.vlgmr.msra.gmra.mxu0 %v1105_v56 }
 0x4c2   :  { %3016 = vmatpush3.msra.mxu0 %v4096_v62  ;;  %3047 = vmatprep.mubr.msk.f32.mxu0 %vm3471_vm0, %v4967_v23 }
 0x4c3   :  { %3017 = vmatprep.subr.mxu0 %v4967_v23 }
 0x4c4   :  { %3018 = vmatpush3.msra.mxu0 %v4102_v6 }
 0x4c5   :  { %3019 = vmatprep.subr.mxu0 %v4967_v23 }
 0x4c6   :  { %3020 = vmatpush3.msra.mxu0 %v4106_v13 }
 0x4c7   :  { %3021 = vmatprep.subr.mxu0 %v4967_v23 }
 0x4c8   :  { %3022 = vmatpush3.msra.mxu0 %v4110_v33 }
 0x4c9   :  { %3023 = vmatprep.subr.mxu0 %v4967_v23 }
 0x4ca   :  { %3024 = vmatpush3.msra.mxu0 %v4114_v36 }
 0x4cb   :  { %3025 = vmatprep.subr.mxu0 %v4967_v23 }
 0x4cc   :  { %3026 = vmatpush3.msra.mxu0 %v4118_v37 }
 0x4cd   :  { %3027 = vmatprep.subr.mxu0 %v4967_v23 }
 0x4ce   :  { %3028 = vmatpush3.msra.mxu0 %v4122_v52 }
 0x4cf   :  { %3029 = vmatprep.subr.mxu0 %v4967_v23 }
 0x4d0   :  { %3030 = vmatpush3.msra.mxu0 %v4126_v55 }
 0x4d1   :  { %3031 = vmatprep.subr.mxu0 %v4967_v23 }
 0x4d2   :  { %3032 = vmatpush3.msra.mxu0 %v3619_v17  ;;  %v4145_v17 = vld [vmem:[#allocation9 + $0x170] sm:$0xff] }
 0x4d3   :  { %3033 = vmatprep.subr.mxu0 %v4967_v23 }
 0x4d4   :  { %3034 = vmatpush3.msra.mxu0 %v3630_v20  ;;  %v5070_v20 = vld [vmem:[#allocation58_spill] sm:$0xff] }
 0x4d5   :  { %3035 = vmatprep.subr.mxu0 %v4967_v23 }
 0x4d6   :  { %3036 = vmatpush3.msra.mxu0 %v3640_v24  ;;  %v1090_v24 = vadd.f32 %v4091_v32, %v5070_v20  ;;  %v4157_v32 = vld [vmem:[#allocation9 + $0x168] sm:$0xff]  ;;  %v5090_v20 = vld [vmem:[#allocation61_spill] sm:$0xff] }
 0x4d7   :  { %3037 = vmatprep.subr.mxu0 %v4967_v23 }
 0x4d8   :  { %3038 = vmatpush3.msra.mxu0 %v3651_v27  ;;  %v1093_v27 = vmul.f32 0.5, %v1090_v24 }
 0x4d9   :  { %3039 = vmatprep.subr.mxu0 %v4967_v23 }
 0x4da   :  { %3040 = vmatpush3.msra.mxu0 %v3661_v31  ;;  %3221 = vtanh.f32 %v1093_v27 }
 0x4db   :  { %3041 = vmatprep.subr.mxu0 %v4967_v23 }
 0x4dc   :  { %3042 = vmatpush3.msra.mxu0 %v3672_v34 }
 0x4dd   :  { %3043 = vmatprep.subr.mxu0 %v4967_v23 }
 0x4de   :  { %3044 = vmatpush3.msra.mxu0 %v3682_v38 }
 0x4df   :  { %3045 = vmatprep.subr.mxu0 %v4967_v23 }
 0x4e0   :  { %3046 = vmatpush3.msra.mxu0 %v3691_v41 }
 0x4e1   :  { %1435 = vmatprep.subr.mxu0 %v4145_v17 }
 0x4e7   :  { %v3222_v61 = vpop.eup %3221 }
 0x4e8   :  { %v1099_v2 = vadd.f32 1.0, %v3222_v61 }
 0x4ea   :  { %v1102_v38 = vmul.f32 0.5, %v1099_v2  ;;  %v1185_v2 = vld [vmem:[#allocation4 + $0x18] sm:$0xff] }
 0x4ec   :  { %v1178_v5 = vsub.f32 1.0, %v1102_v38 }
 0x4ee   :  { %v1179_v41 = vmul.f32 %v1178_v5, %v4021_v39  ;;  %v4165_v39 = vld [vmem:[#allocation9 + $0x150] sm:$0xff] }
 0x581   :  { %v2603_v31 = vpop.f32.mrf.mxu0 }
 0x583   :  { %v2604_v58 = vpop.f32.mrf.mxu0 }
 0x584   :  { %v2605_v34 = vadd.f32 %v2604_v58, %v2603_v31 }
 0x586   :  { %3223 = vtanh.f32 %v2605_v34 }
 0x593   :  { %v3224_v29 = vpop.eup %3223 }
 0x594   :  { %v1180_v40 = vmul.f32 %v3224_v29, %v1102_v38  ;;  %v4304_v29 = vld [vmem:[#allocation9 + $0xb8] sm:$0xff] }
 0x596   :  { %v4151_v49 = vadd.f32 %v1180_v40, %v1179_v41  ;;  %v4308_v41 = vld [vmem:[#allocation9 + $0xa0] sm:$0xff]  ;;  %v4312_v40 = vld [vmem:[#allocation9 + $0x88] sm:$0xff] }
 0x598   :  { %1257 = vmatmul.mubr.f32.vlgmr.msra.gmra.mxu1 %v4151_v49  ;;  %1183 = vst [vmem:[#allocation12 + $0x10] sm:$0xff] %v4151_v49  ;;  %3048 = vmatmul.mubr.f32.vlgmr.msra.gmra.mxu0 %v4151_v49 }
 0x599   :  { %2624 = vmatpush3.msra.mxu1 %v3740_v43  ;;  %1436 = vmatpush1.msra.mxu0 %v4157_v32  ;;  %v4173_v43 = vld [vmem:[#allocation9 + $0x138] sm:$0xff] }
 0x59a   :  { %2625 = vmatprep.subr.mxu1 %v3742_v44  ;;  %1437 = vmatprep.subr.mxu0 %v4161_v9  ;;  %v4177_v44 = vld [vmem:[#allocation9 + $0x128] sm:$0xff] }
 0x59b   :  { %2626 = vmatpush3.msra.mxu1 %v3746_v45  ;;  %1438 = vmatpush1.msra.mxu0 %v4165_v39  ;;  %v4181_v45 = vld [vmem:[#allocation9 + $0x120] sm:$0xff] }
 0x59c   :  { %2627 = vmatprep.subr.mxu1 %v3748_v46  ;;  %1439 = vmatprep.subr.mxu0 %v4169_v12  ;;  %v4185_v46 = vld [vmem:[#allocation9 + $0x110] sm:$0xff] }
 0x59d   :  { %2628 = vmatpush3.msra.mxu1 %v3752_v47  ;;  %1440 = vmatpush1.msra.mxu0 %v4173_v43  ;;  %v4189_v47 = vld [vmem:[#allocation9 + $0x108] sm:$0xff] }
 0x59e   :  { %2629 = vmatprep.subr.mxu1 %v3755_v48  ;;  %1441 = vmatprep.subr.mxu0 %v4177_v44  ;;  %v4193_v48 = vld [vmem:[#allocation9 + $0xf8] sm:$0xff] }
 0x59f   :  { %2630 = vmatpush3.msra.mxu1 %v3758_v63  ;;  %1442 = vmatpush1.msra.mxu0 %v4181_v45  ;;  %v4197_v63 = vld [vmem:[#allocation9 + $0xf0] sm:$0xff] }
 0x5a0   :  { %2631 = vmatprep.subr.mxu1 %v3761_v7  ;;  %1443 = vmatprep.subr.mxu0 %v4185_v46  ;;  %v4201_v7 = vld [vmem:[#allocation9 + $0xe0] sm:$0xff] }
 0x5a1   :  { %2632 = vmatpush3.msra.mxu1 %v3764_v14  ;;  %1444 = vmatpush1.msra.mxu0 %v4189_v47  ;;  %v4205_v14 = vld [vmem:[#allocation9 + $0xd8] sm:$0xff] }
 0x5a2   :  { %2633 = vmatprep.subr.mxu1 %v3767_v21  ;;  %1445 = vmatprep.subr.mxu0 %v4193_v48  ;;  %v4209_v21 = vld [vmem:[#allocation9 + $0xc8] sm:$0xff] }
 0x5a3   :  { %2634 = vmatpush3.msra.mxu1 %v3770_v28  ;;  %1446 = vmatpush1.msra.mxu0 %v4197_v63  ;;  %5071 = vst [vmem:[#allocation18_spill] sm:$0xff] %v4209_v21  ;;  %v4213_v28 = vld [vmem:[#allocation9 + $0xc0] sm:$0xff] }
 0x5a4   :  { %2635 = vmatprep.subr.mxu1 %v3773_v35  ;;  %1447 = vmatprep.subr.mxu0 %v4201_v7  ;;  %5072 = vst [vmem:[#allocation62_spill] sm:$0xff] %v4213_v28  ;;  %v4217_v35 = vld [vmem:[#allocation9 + $0xb0] sm:$0xff] }
 0x5a5   :  { %2636 = vmatpush3.msra.mxu1 %v3776_v0  ;;  %1448 = vmatpush1.msra.mxu0 %v4205_v14  ;;  %5073 = vst [vmem:[#allocation57_spill] sm:$0xff] %v4217_v35  ;;  %v4221_v0 = vld [vmem:[#allocation9 + $0xa8] sm:$0xff] }
 0x5a6   :  { %2637 = vmatprep.subr.mxu1 %v5031_v50  ;;  %1449 = vmatprep.subr.mxu0 %v4209_v21  ;;  %5074 = vst [vmem:[#allocation17_spill] sm:$0xff] %v4221_v0  ;;  %v4225_v50 = vld [vmem:[#allocation9 + $0x98] sm:$0xff] }
 0x5a7   :  { %2638 = vmatpush3.msra.mxu1 %v5033_v54  ;;  %1450 = vmatpush1.msra.mxu0 %v4213_v28  ;;  %5075 = vst [vmem:[#allocation56_spill] sm:$0xff] %v4225_v50  ;;  %v4229_v54 = vld [vmem:[#allocation9 + $0x90] sm:$0xff] }
 0x5a8   :  { %2639 = vmatprep.subr.mxu1 %v5035_v57  ;;  %1451 = vmatprep.subr.mxu0 %v4217_v35  ;;  %5076 = vst [vmem:[#allocation38_spill] sm:$0xff] %v4229_v54  ;;  %v4233_v57 = vld [vmem:[#allocation9 + $0x80] sm:$0xff] }
 0x5a9   :  { %2640 = vmatpush3.msra.mxu1 %v5037_v60  ;;  %1452 = vmatpush1.msra.mxu0 %v4221_v0  ;;  %5077 = vst [vmem:[#allocation19_spill] sm:$0xff] %v4233_v57  ;;  %v4237_v60 = vld [vmem:[#allocation9 + $0x78] sm:$0xff] }
 0x5aa   :  { %2641 = vmatprep.subr.mxu1 %v5039_v1  ;;  %1453 = vmatprep.subr.mxu0 %v4225_v50  ;;  %5078 = vst [vmem:[#allocation39_spill] sm:$0xff] %v4237_v60  ;;  %v4241_v1 = vld [vmem:[#allocation9 + $0x68] sm:$0xff] }
 0x5ab   :  { %2642 = vmatpush3.msra.mxu1 %v5041_v4  ;;  %1454 = vmatpush1.msra.mxu0 %v4229_v54  ;;  %5079 = vst [vmem:[#allocation20_spill] sm:$0xff] %v4241_v1  ;;  %v4245_v4 = vld [vmem:[#allocation9 + $0x60] sm:$0xff] }
 0x5ac   :  { %2643 = vmatprep.subr.mxu1 %v5043_v8  ;;  %1455 = vmatprep.subr.mxu0 %v4233_v57  ;;  %5080 = vst [vmem:[#allocation40_spill] sm:$0xff] %v4245_v4  ;;  %v4249_v8 = vld [vmem:[#allocation9 + $0x50] sm:$0xff] }
 0x5ad   :  { %2644 = vmatpush3.msra.mxu1 %v5045_v19  ;;  %1456 = vmatpush1.msra.mxu0 %v4237_v60  ;;  %5081 = vst [vmem:[#allocation21_spill] sm:$0xff] %v4249_v8  ;;  %v4253_v19 = vld [vmem:[#allocation9 + $0x48] sm:$0xff] }
 0x5ae   :  { %2645 = vmatprep.subr.mxu1 %v5047_v42  ;;  %1457 = vmatprep.subr.mxu0 %v4241_v1  ;;  %5082 = vst [vmem:[#allocation41_spill] sm:$0xff] %v4253_v19  ;;  %v4257_v42 = vld [vmem:[#allocation9 + $0x38] sm:$0xff] }
 0x5af   :  { %2646 = vmatpush3.msra.mxu1 %v5049_v51  ;;  %1458 = vmatpush1.msra.mxu0 %v4245_v4  ;;  %5083 = vst [vmem:[#allocation22_spill] sm:$0xff] %v4257_v42  ;;  %v4261_v51 = vld [vmem:[#allocation9 + $0x30] sm:$0xff] }
 0x5b0   :  { %2647 = vmatprep.subr.mxu1 %v5051_v11  ;;  %1459 = vmatprep.subr.mxu0 %v4249_v8  ;;  %5084 = vst [vmem:[#allocation42_spill] sm:$0xff] %v4261_v51  ;;  %v4265_v11 = vld [vmem:[#allocation9 + $0x20] sm:$0xff] }
 0x5b1   :  { %2648 = vmatpush3.msra.mxu1 %v5053_v15  ;;  %1460 = vmatpush1.msra.mxu0 %v4253_v19  ;;  %5085 = vst [vmem:[#allocation23_spill] sm:$0xff] %v4265_v11  ;;  %v4269_v15 = vld [vmem:[#allocation9 + $0x18] sm:$0xff] }
 0x5b2   :  { %2649 = vmatprep.subr.mxu1 %v5055_v18  ;;  %1461 = vmatprep.subr.mxu0 %v4257_v42  ;;  %5086 = vst [vmem:[#allocation43_spill] sm:$0xff] %v4269_v15  ;;  %v4273_v18 = vld [vmem:[#allocation9 + $0x8] sm:$0xff] }
 0x5b3   :  { %2650 = vmatpush3.msra.mxu1 %v5057_v25  ;;  %1462 = vmatpush1.msra.mxu0 %v4261_v51  ;;  %5087 = vst [vmem:[#allocation24_spill] sm:$0xff] %v4273_v18  ;;  %v4277_v25 = vld [vmem:[#allocation9] sm:$0xff] }
 0x5b4   :  { %2651 = vmatprep.subr.mxu1 %v5059_v53  ;;  %1463 = vmatprep.subr.mxu0 %v4265_v11  ;;  %5088 = vst [vmem:[#allocation44_spill] sm:$0xff] %v4277_v25 }
 0x5b5   :  { %2652 = vmatpush3.msra.mxu1 %v5061_v59  ;;  %1464 = vmatpush1.msra.mxu0 %v4269_v15 }
 0x5b6   :  { %2653 = vmatprep.subr.mxu1 %v5063_v3  ;;  %1465 = vmatprep.subr.mxu0 %v4273_v18 }
 0x5b7   :  { %2654 = vmatpush3.msra.mxu1 %v5065_v10  ;;  %1466 = vmatpush1.msra.mxu0 %v4277_v25 }
 0x5b8   :  { %3050 = vmatprep.subr.mxu1 %v4967_v23  ;;  %1499 = vmatprep.mubr.f32.mxu0 %v4967_v23 }
 0x5b9   :  { %2675 = vmatprep.subr.mxu0 %v5067_v30 }
 0x658   :  { %v1258_v53 = vpop.f32.mrf.mxu1  ;;  %v1329_v59 = vpop.f32.mrf.mxu0 }
 0x659   :  { %v1335_v3 = vadd.f32 %v5089_v16, %v1329_v59  ;;  %v4316_v59 = vld [vmem:[#allocation9 + $0x70] sm:$0xff]  ;;  %v4320_v16 = vld [vmem:[#allocation9 + $0x58] sm:$0xff] }
 0x65a   :  { %v1260_v22 = vpop.f32.mrf.mxu1  ;;  %v3049_v26 = vpop.f32.mrf.mxu0 }
 0x65b   :  { %v1338_v56 = vmul.f32 0.5, %v1335_v3  ;;  %v1334_v24 = vadd.f32 %v1260_v22, %v5090_v20  ;;  %v4324_v3 = vld [vmem:[#allocation9 + $0x40] sm:$0xff]  ;;  %v4328_v22 = vld [vmem:[#allocation9 + $0x28] sm:$0xff]  ;;  %v4332_v26 = vld [vmem:[#allocation9 + $0x10] sm:$0xff] }
 0x65c   :  { %5091 = vst [vmem:[#allocation25_spill] sm:$0xff] %v4328_v22 }
 0x65d   :  { %v1337_v10 = vmul.f32 0.5, %v1334_v24  ;;  %3225 = vtanh.f32 %v1338_v56  ;;  %v5092_v56 = vld [vmem:[#allocation60_spill] sm:$0xff] }
 0x65e   :  { %v1333_v20 = vadd.f32 %v1258_v53, %v5092_v56  ;;  %v4343_v53 = vld [vmem:[#allocation10 + $0x78] sm:$0xff]  ;;  %v4347_v56 = vld [vmem:[#allocation10 + $0xf0] sm:$0xff] }
 0x65f   :  { %3227 = vtanh.f32 %v1337_v10 }
 0x660   :  { %v1336_v24 = vmul.f32 0.5, %v1333_v20  ;;  %v4355_v20 = vld [vmem:[#allocation10 + $0xe8] sm:$0xff] }
 0x662   :  { %3229 = vtanh.f32 %v1336_v24  ;;  %v4359_v24 = vld [vmem:[#allocation10 + $0x68] sm:$0xff] }
 0x66a   :  { %v3226_v27 = vpop.eup %3225 }
 0x66b   :  { %v1344_v58 = vadd.f32 1.0, %v3226_v27 }
 0x66c   :  { %v3228_v31 = vpop.eup %3227 }
 0x66d   :  { %v1343_v34 = vadd.f32 1.0, %v3228_v31  ;;  %v1347_v61 = vmul.f32 0.5, %v1344_v58 }
 0x66f   :  { %v1346_v38 = vmul.f32 0.5, %v1343_v34  ;;  %v1349_v30 = vmul.f32 %v1347_v61, %v4151_v49  ;;  %v3230_v58 = vpop.eup %3229 }
 0x670   :  { %v1342_v34 = vadd.f32 1.0, %v3230_v58  ;;  %v4375_v58 = vld [vmem:[#allocation10 + $0x58] sm:$0xff] }
 0x671   :  { %v1348_v5 = vmul.f32 %v1346_v38, %v1185_v2  ;;  %1414 = vmatprep.mubr.f32.mxu1 %v1349_v30 }
 0x672   :  { %v1345_v61 = vmul.f32 0.5, %v1342_v34  ;;  %v4379_v34 = vld [vmem:[#allocation10 + $0xd0] sm:$0xff] }
 0x673   :  { %1415 = vmatmul.mubr.f32.vlgmr.msra.gmra.mxu1 %v1348_v5 }
 0x674   :  { %3051 = vmatpush3.msra.mxu1 %v4096_v62  ;;  %3082 = vmatprep.mubr.msk.f32.mxu1 %vm3471_vm0, %v4967_v23  ;;  %v1421_v2 = vsub.f32 1.0, %v1345_v61 }
 0x675   :  { %3052 = vmatprep.subr.mxu1 %v4967_v23 }
 0x676   :  { %3053 = vmatpush3.msra.mxu1 %v4102_v6  ;;  %v1422_v30 = vmul.f32 %v1421_v2, %v4151_v49  ;;  %v4351_v49 = vld [vmem:[#allocation10 + $0x70] sm:$0xff]  ;;  %v4387_v2 = vld [vmem:[#allocation10 + $0xc8] sm:$0xff] }
 0x677   :  { %3054 = vmatprep.subr.mxu1 %v4967_v23  ;;  %5093 = vst [vmem:[#allocation45_spill] sm:$0xff] %v4387_v2 }
 0x678   :  { %3055 = vmatpush3.msra.mxu1 %v4106_v13 }
 0x679   :  { %3056 = vmatprep.subr.mxu1 %v4967_v23 }
 0x67a   :  { %3057 = vmatpush3.msra.mxu1 %v4110_v33 }
 0x67b   :  { %3058 = vmatprep.subr.mxu1 %v4967_v23 }
 0x67c   :  { %3059 = vmatpush3.msra.mxu1 %v4114_v36 }
 0x67d   :  { %3060 = vmatprep.subr.mxu1 %v4967_v23 }
 0x67e   :  { %3061 = vmatpush3.msra.mxu1 %v4118_v37 }
 0x67f   :  { %3062 = vmatprep.subr.mxu1 %v4967_v23 }
 0x680   :  { %3063 = vmatpush3.msra.mxu1 %v4122_v52 }
 0x681   :  { %3064 = vmatprep.subr.mxu1 %v4967_v23 }
 0x682   :  { %3065 = vmatpush3.msra.mxu1 %v4126_v55 }
 0x683   :  { %3066 = vmatprep.subr.mxu1 %v4967_v23 }
 0x684   :  { %3067 = vmatpush3.msra.mxu1 %v4304_v29 }
 0x685   :  { %3068 = vmatprep.subr.mxu1 %v4967_v23 }
 0x686   :  { %3069 = vmatpush3.msra.mxu1 %v4308_v41 }
 0x687   :  { %3070 = vmatprep.subr.mxu1 %v4967_v23 }
 0x688   :  { %3071 = vmatpush3.msra.mxu1 %v4312_v40 }
 0x689   :  { %3072 = vmatprep.subr.mxu1 %v4967_v23 }
 0x68a   :  { %3073 = vmatpush3.msra.mxu1 %v4316_v59 }
 0x68b   :  { %3074 = vmatprep.subr.mxu1 %v4967_v23 }
 0x68c   :  { %3075 = vmatpush3.msra.mxu1 %v4320_v16 }
 0x68d   :  { %3076 = vmatprep.subr.mxu1 %v4967_v23 }
 0x68e   :  { %3077 = vmatpush3.msra.mxu1 %v4324_v3 }
 0x68f   :  { %3078 = vmatprep.subr.mxu1 %v4967_v23 }
 0x690   :  { %3079 = vmatpush3.msra.mxu1 %v4328_v22 }
 0x691   :  { %3080 = vmatprep.subr.mxu1 %v4967_v23 }
 0x692   :  { %3081 = vmatpush3.msra.mxu1 %v4332_v26 }
 0x693   :  { %1678 = vmatprep.subr.mxu1 %v4145_v17 }
 0x733   :  { %v2655_v10 = vpop.f32.mrf.mxu1 }
 0x735   :  { %v2656_v27 = vpop.f32.mrf.mxu1 }
 0x736   :  { %v2657_v31 = vadd.f32 %v2656_v27, %v2655_v10  ;;  %v4363_v10 = vld [vmem:[#allocation10 + $0xe0] sm:$0xff] }
 0x737   :  { %v4367_v27 = vld [vmem:[#allocation10 + $0x60] sm:$0xff] }
 0x738   :  { %3231 = vtanh.f32 %v2657_v31  ;;  %v4371_v31 = vld [vmem:[#allocation10 + $0xd8] sm:$0xff] }
 0x745   :  { %v3232_v38 = vpop.eup %3231 }
 0x746   :  { %v1423_v5 = vmul.f32 %v3232_v38, %v1345_v61  ;;  %v4383_v61 = vld [vmem:[#allocation10 + $0x50] sm:$0xff]  ;;  %v4391_v38 = vld [vmem:[#allocation10 + $0x48] sm:$0xff] }
 0x747   :  { %5094 = vst [vmem:[#allocation26_spill] sm:$0xff] %v4391_v38 }
 0x748   :  { %v4338_v22 = vadd.f32 %v1423_v5, %v1422_v30  ;;  %v4395_v30 = vld [vmem:[#allocation10 + $0xc0] sm:$0xff] }
 0x749   :  { %5095 = vst [vmem:[#allocation46_spill] sm:$0xff] %v4395_v30  ;;  %v4399_v5 = vld [vmem:[#allocation10 + $0x40] sm:$0xff] }
 0x74a   :  { %1500 = vmatmul.mubr.f32.vlgmr.msra.gmra.mxu0 %v4338_v22  ;;  %1426 = vst [vmem:[#allocation12 + $0x18] sm:$0xff] %v4338_v22  ;;  %3083 = vmatmul.mubr.f32.vlgmr.msra.gmra.mxu1 %v4338_v22  ;;  %5096 = vst [vmem:[#allocation27_spill] sm:$0xff] %v4399_v5 }
 0x74b   :  { %2676 = vmatpush3.msra.mxu0 %v4343_v53  ;;  %1679 = vmatpush1.msra.mxu1 %v4157_v32 }
 0x74c   :  { %2677 = vmatprep.subr.mxu0 %v4347_v56  ;;  %1680 = vmatprep.subr.mxu1 %v4161_v9 }
 0x74d   :  { %2678 = vmatpush3.msra.mxu0 %v4351_v49  ;;  %1681 = vmatpush1.msra.mxu1 %v4165_v39 }
 0x74e   :  { %2679 = vmatprep.subr.mxu0 %v4355_v20  ;;  %1682 = vmatprep.subr.mxu1 %v4169_v12 }
 0x74f   :  { %2680 = vmatpush3.msra.mxu0 %v4359_v24  ;;  %1683 = vmatpush1.msra.mxu1 %v4173_v43 }
 0x750   :  { %2681 = vmatprep.subr.mxu0 %v4363_v10  ;;  %1684 = vmatprep.subr.mxu1 %v4177_v44 }
 0x751   :  { %2682 = vmatpush3.msra.mxu0 %v4367_v27  ;;  %1685 = vmatpush1.msra.mxu1 %v4181_v45 }
 0x752   :  { %2683 = vmatprep.subr.mxu0 %v4371_v31  ;;  %1686 = vmatprep.subr.mxu1 %v4185_v46 }
 0x753   :  { %2684 = vmatpush3.msra.mxu0 %v4375_v58  ;;  %1687 = vmatpush1.msra.mxu1 %v4189_v47 }
 0x754   :  { %2685 = vmatprep.subr.mxu0 %v4379_v34  ;;  %1688 = vmatprep.subr.mxu1 %v4193_v48 }
 0x755   :  { %2686 = vmatpush3.msra.mxu0 %v4383_v61  ;;  %1689 = vmatpush1.msra.mxu1 %v4197_v63 }
 0x756   :  { %2687 = vmatprep.subr.mxu0 %v4387_v2  ;;  %1690 = vmatprep.subr.mxu1 %v4201_v7  ;;  %v4403_v2 = vld [vmem:[#allocation10 + $0xb8] sm:$0xff] }
 0x757   :  { %2688 = vmatpush3.msra.mxu0 %v4391_v38  ;;  %1691 = vmatpush1.msra.mxu1 %v4205_v14  ;;  %5097 = vst [vmem:[#allocation47_spill] sm:$0xff] %v4403_v2  ;;  %v4407_v38 = vld [vmem:[#allocation10 + $0x38] sm:$0xff] }
 0x758   :  { %2689 = vmatprep.subr.mxu0 %v4395_v30  ;;  %1692 = vmatprep.subr.mxu1 %v4209_v21  ;;  %5098 = vst [vmem:[#allocation28_spill] sm:$0xff] %v4407_v38  ;;  %v4411_v30 = vld [vmem:[#allocation10 + $0xb0] sm:$0xff] }
 0x759   :  { %2690 = vmatpush3.msra.mxu0 %v4399_v5  ;;  %1693 = vmatpush1.msra.mxu1 %v4213_v28  ;;  %5099 = vst [vmem:[#allocation48_spill] sm:$0xff] %v4411_v30  ;;  %v4415_v5 = vld [vmem:[#allocation10 + $0x30] sm:$0xff] }
 0x75a   :  { %2691 = vmatprep.subr.mxu0 %v4403_v2  ;;  %1694 = vmatprep.subr.mxu1 %v4217_v35  ;;  %5100 = vst [vmem:[#allocation29_spill] sm:$0xff] %v4415_v5  ;;  %v4419_v2 = vld [vmem:[#allocation10 + $0xa8] sm:$0xff] }
 0x75b   :  { %2692 = vmatpush3.msra.mxu0 %v4407_v38  ;;  %1695 = vmatpush1.msra.mxu1 %v4221_v0  ;;  %5101 = vst [vmem:[#allocation49_spill] sm:$0xff] %v4419_v2  ;;  %v4423_v38 = vld [vmem:[#allocation10 + $0x28] sm:$0xff] }
 0x75c   :  { %2693 = vmatprep.subr.mxu0 %v4411_v30  ;;  %1696 = vmatprep.subr.mxu1 %v4225_v50  ;;  %5102 = vst [vmem:[#allocation30_spill] sm:$0xff] %v4423_v38  ;;  %v4427_v30 = vld [vmem:[#allocation10 + $0xa0] sm:$0xff] }
 0x75d   :  { %2694 = vmatpush3.msra.mxu0 %v4415_v5  ;;  %1697 = vmatpush1.msra.mxu1 %v4229_v54  ;;  %5103 = vst [vmem:[#allocation50_spill] sm:$0xff] %v4427_v30  ;;  %v4431_v5 = vld [vmem:[#allocation10 + $0x20] sm:$0xff] }
 0x75e   :  { %2695 = vmatprep.subr.mxu0 %v4419_v2  ;;  %1698 = vmatprep.subr.mxu1 %v4233_v57  ;;  %5104 = vst [vmem:[#allocation31_spill] sm:$0xff] %v4431_v5  ;;  %v4435_v2 = vld [vmem:[#allocation10 + $0x98] sm:$0xff]  ;;  %v1428_v54 = vld [vmem:[#allocation4 + $0x20] sm:$0xff] }
 0x75f   :  { %2696 = vmatpush3.msra.mxu0 %v4423_v38  ;;  %1699 = vmatpush1.msra.mxu1 %v4237_v60  ;;  %5105 = vst [vmem:[#allocation51_spill] sm:$0xff] %v4435_v2  ;;  %v4439_v38 = vld [vmem:[#allocation10 + $0x18] sm:$0xff] }
 0x760   :  { %2697 = vmatprep.subr.mxu0 %v4427_v30  ;;  %1700 = vmatprep.subr.mxu1 %v4241_v1  ;;  %5106 = vst [vmem:[#allocation32_spill] sm:$0xff] %v4439_v38  ;;  %v4443_v30 = vld [vmem:[#allocation10 + $0x90] sm:$0xff] }
 0x761   :  { %2698 = vmatpush3.msra.mxu0 %v4431_v5  ;;  %1701 = vmatpush1.msra.mxu1 %v4245_v4  ;;  %5107 = vst [vmem:[#allocation52_spill] sm:$0xff] %v4443_v30  ;;  %v4447_v5 = vld [vmem:[#allocation10 + $0x10] sm:$0xff] }
 0x762   :  { %2699 = vmatprep.subr.mxu0 %v4435_v2  ;;  %1702 = vmatprep.subr.mxu1 %v4249_v8  ;;  %5108 = vst [vmem:[#allocation33_spill] sm:$0xff] %v4447_v5  ;;  %v4451_v2 = vld [vmem:[#allocation10 + $0x88] sm:$0xff] }
 0x763   :  { %2700 = vmatpush3.msra.mxu0 %v4439_v38  ;;  %1703 = vmatpush1.msra.mxu1 %v4253_v19  ;;  %5109 = vst [vmem:[#allocation53_spill] sm:$0xff] %v4451_v2  ;;  %v4455_v38 = vld [vmem:[#allocation10 + $0x8] sm:$0xff]  ;;  %v5115_v19 = vld [vmem:[#allocation64_spill] sm:$0xff] }
 0x764   :  { %2701 = vmatprep.subr.mxu0 %v4443_v30  ;;  %1704 = vmatprep.subr.mxu1 %v4257_v42  ;;  %5110 = vst [vmem:[#allocation34_spill] sm:$0xff] %v4455_v38  ;;  %v4459_v30 = vld [vmem:[#allocation10 + $0x80] sm:$0xff] }
 0x765   :  { %2702 = vmatpush3.msra.mxu0 %v4447_v5  ;;  %1705 = vmatpush1.msra.mxu1 %v4261_v51  ;;  %5111 = vst [vmem:[#allocation54_spill] sm:$0xff] %v4459_v30  ;;  %v4463_v5 = vld [vmem:[#allocation10] sm:$0xff] }
 0x766   :  { %2703 = vmatprep.subr.mxu0 %v4451_v2  ;;  %1706 = vmatprep.subr.mxu1 %v4265_v11  ;;  %5112 = vst [vmem:[#allocation35_spill] sm:$0xff] %v4463_v5  ;;  %v4469_v11 = vld [vmem:[#allocation10 + $0xf8] sm:$0xff] }
 0x767   :  { %2704 = vmatpush3.msra.mxu0 %v4455_v38  ;;  %1707 = vmatpush1.msra.mxu1 %v4269_v15  ;;  %5113 = vst [vmem:[#allocation55_spill] sm:$0xff] %v4469_v11  ;;  %v5114_v2 = vld [vmem:[#allocation72_spill] sm:$0xff] }
 0x768   :  { %2705 = vmatprep.subr.mxu0 %v4459_v30  ;;  %1708 = vmatprep.subr.mxu1 %v4273_v18 }
 0x769   :  { %2706 = vmatpush3.msra.mxu0 %v4463_v5  ;;  %1709 = vmatpush1.msra.mxu1 %v4277_v25 }
 0x76a   :  { %3085 = vmatprep.subr.mxu0 %v4967_v23  ;;  %1742 = vmatprep.mubr.f32.mxu1 %v4967_v23 }
 0x76b   :  { %2727 = vmatprep.subr.mxu1 %v4469_v11 }
 0x80a   :  { %v1501_v15 = vpop.f32.mrf.mxu0  ;;  %v1572_v38 = vpop.f32.mrf.mxu1 }
 0x80b   :  { %v1578_v30 = vadd.f32 %v1572_v38, %v5114_v2  ;;  %v5120_v38 = vld [vmem:[#allocation46_spill] sm:$0xff] }
 0x80c   :  { %v1503_v51 = vpop.f32.mrf.mxu0  ;;  %v3084_v18 = vpop.f32.mrf.mxu1 }
 0x80d   :  { %v1581_v42 = vmul.f32 0.5, %v1578_v30  ;;  %v1577_v8 = vadd.f32 %v1503_v51, %v5115_v19  ;;  %v5121_v30 = vld [vmem:[#allocation27_spill] sm:$0xff] }
 0x80f   :  { %v1580_v5 = vmul.f32 0.5, %v1577_v8  ;;  %3233 = vtanh.f32 %v1581_v42 }
 0x811   :  { %3235 = vtanh.f32 %v1580_v5  ;;  %v5122_v5 = vld [vmem:[#allocation47_spill] sm:$0xff] }
 0x81c   :  { %v3234_v25 = vpop.eup %3233 }
 0x81d   :  { %v1587_v1 = vadd.f32 1.0, %v3234_v25 }
 0x81e   :  { %v3236_v4 = vpop.eup %3235 }
 0x81f   :  { %v1586_v60 = vadd.f32 1.0, %v3236_v4  ;;  %v1590_v57 = vmul.f32 0.5, %v1587_v1 }
 0x821   :  { %v1589_v50 = vmul.f32 0.5, %v1586_v60  ;;  %v1592_v11 = vmul.f32 %v1590_v57, %v4338_v22 }
 0x823   :  { %v1591_v0 = vmul.f32 %v1589_v50, %v1428_v54  ;;  %1657 = vmatprep.mubr.f32.mxu0 %v1592_v11  ;;  %v5117_v50 = vld [vmem:[#allocation63_spill] sm:$0xff] }
 0x824   :  { %v1576_v54 = vadd.f32 %v1501_v15, %v5117_v50  ;;  %v5118_v15 = vld [vmem:[#allocation45_spill] sm:$0xff]  ;;  %v5123_v50 = vld [vmem:[#allocation28_spill] sm:$0xff] }
 0x825   :  { %1658 = vmatmul.mubr.f32.vlgmr.msra.gmra.mxu0 %v1591_v0  ;;  %v5116_v0 = vld [vmem:[#allocation25_spill] sm:$0xff] }
 0x826   :  { %3086 = vmatpush3.msra.mxu0 %v4096_v62  ;;  %3117 = vmatprep.mubr.msk.f32.mxu0 %vm3471_vm0, %v4967_v23  ;;  %v1579_v57 = vmul.f32 0.5, %v1576_v54  ;;  %v5124_v54 = vld [vmem:[#allocation17_spill] sm:$0xff] }
 0x827   :  { %3087 = vmatprep.subr.mxu0 %v4967_v23 }
 0x828   :  { %3088 = vmatpush3.msra.mxu0 %v4102_v6  ;;  %3237 = vtanh.f32 %v1579_v57  ;;  %v5125_v57 = vld [vmem:[#allocation48_spill] sm:$0xff] }
 0x829   :  { %3089 = vmatprep.subr.mxu0 %v4967_v23 }
 0x82a   :  { %3090 = vmatpush3.msra.mxu0 %v4106_v13 }
 0x82b   :  { %3091 = vmatprep.subr.mxu0 %v4967_v23 }
 0x82c   :  { %3092 = vmatpush3.msra.mxu0 %v4110_v33 }
 0x82d   :  { %3093 = vmatprep.subr.mxu0 %v4967_v23 }
 0x82e   :  { %3094 = vmatpush3.msra.mxu0 %v4114_v36 }
 0x82f   :  { %3095 = vmatprep.subr.mxu0 %v4967_v23 }
 0x830   :  { %3096 = vmatpush3.msra.mxu0 %v4118_v37 }
 0x831   :  { %3097 = vmatprep.subr.mxu0 %v4967_v23 }
 0x832   :  { %3098 = vmatpush3.msra.mxu0 %v4122_v52 }
 0x833   :  { %3099 = vmatprep.subr.mxu0 %v4967_v23 }
 0x834   :  { %3100 = vmatpush3.msra.mxu0 %v4126_v55 }
 0x835   :  { %3101 = vmatprep.subr.mxu0 %v4967_v23  ;;  %v3238_v8 = vpop.eup %3237 }
 0x836   :  { %3102 = vmatpush3.msra.mxu0 %v4304_v29  ;;  %v1585_v19 = vadd.f32 1.0, %v3238_v8  ;;  %v5129_v8 = vld [vmem:[#allocation49_spill] sm:$0xff] }
 0x837   :  { %3103 = vmatprep.subr.mxu0 %v4967_v23 }
 0x838   :  { %3104 = vmatpush3.msra.mxu0 %v4308_v41  ;;  %v1588_v42 = vmul.f32 0.5, %v1585_v19  ;;  %v5130_v19 = vld [vmem:[#allocation19_spill] sm:$0xff] }
 0x839   :  { %3105 = vmatprep.subr.mxu0 %v4967_v23 }
 0x83a   :  { %3106 = vmatpush3.msra.mxu0 %v4312_v40  ;;  %v1664_v51 = vsub.f32 1.0, %v1588_v42 }
 0x83b   :  { %3107 = vmatprep.subr.mxu0 %v4967_v23 }
 0x83c   :  { %3108 = vmatpush3.msra.mxu0 %v4316_v59  ;;  %v1665_v18 = vmul.f32 %v1664_v51, %v4338_v22  ;;  %v5119_v22 = vld [vmem:[#allocation26_spill] sm:$0xff]  ;;  %v5132_v51 = vld [vmem:[#allocation39_spill] sm:$0xff] }
 0x83d   :  { %3109 = vmatprep.subr.mxu0 %v4967_v23 }
 0x83e   :  { %3110 = vmatpush3.msra.mxu0 %v4320_v16 }
 0x83f   :  { %3111 = vmatprep.subr.mxu0 %v4967_v23 }
 0x840   :  { %3112 = vmatpush3.msra.mxu0 %v4324_v3 }
 0x841   :  { %3113 = vmatprep.subr.mxu0 %v4967_v23 }
 0x842   :  { %3114 = vmatpush3.msra.mxu0 %v5116_v0 }
 0x843   :  { %3115 = vmatprep.subr.mxu0 %v4967_v23 }
 0x844   :  { %3116 = vmatpush3.msra.mxu0 %v4332_v26 }
 0x845   :  { %1921 = vmatprep.subr.mxu0 %v4145_v17 }
 0x8e5   :  { %v2707_v60 = vpop.f32.mrf.mxu0 }
 0x8e7   :  { %v2708_v1 = vpop.f32.mrf.mxu0 }
 0x8e8   :  { %v2709_v4 = vadd.f32 %v2708_v1, %v2707_v60  ;;  %v5126_v60 = vld [vmem:[#allocation56_spill] sm:$0xff]  ;;  %v5127_v1 = vld [vmem:[#allocation29_spill] sm:$0xff] }
 0x8ea   :  { %3239 = vtanh.f32 %v2709_v4  ;;  %v5128_v4 = vld [vmem:[#allocation38_spill] sm:$0xff] }
 0x8f7   :  { %v3240_v11 = vpop.eup %3239 }
 0x8f8   :  { %v1666_v25 = vmul.f32 %v3240_v11, %v1588_v42  ;;  %v5131_v42 = vld [vmem:[#allocation30_spill] sm:$0xff] }
 0x8f9   :  { %v5133_v11 = vld [vmem:[#allocation50_spill] sm:$0xff] }
 0x8fa   :  { %v4511_v2 = vadd.f32 %v1666_v25, %v1665_v18  ;;  %v5134_v18 = vld [vmem:[#allocation20_spill] sm:$0xff]  ;;  %v5135_v25 = vld [vmem:[#allocation31_spill] sm:$0xff] }
 0x8fc   :  { %1743 = vmatmul.mubr.f32.vlgmr.msra.gmra.mxu1 %v4511_v2  ;;  %1669 = vst [vmem:[#allocation12 + $0x20] sm:$0xff] %v4511_v2  ;;  %3118 = vmatmul.mubr.f32.vlgmr.msra.gmra.mxu0 %v4511_v2 }
 0x8fd   :  { %2728 = vmatpush3.msra.mxu1 %v4343_v53  ;;  %1922 = vmatpush1.msra.mxu0 %v4157_v32 }
 0x8fe   :  { %2729 = vmatprep.subr.mxu1 %v4347_v56  ;;  %1923 = vmatprep.subr.mxu0 %v4161_v9 }
 0x8ff   :  { %2730 = vmatpush3.msra.mxu1 %v4351_v49  ;;  %1924 = vmatpush1.msra.mxu0 %v4165_v39 }
 0x900   :  { %2731 = vmatprep.subr.mxu1 %v4355_v20  ;;  %1925 = vmatprep.subr.mxu0 %v4169_v12 }
 0x901   :  { %2732 = vmatpush3.msra.mxu1 %v4359_v24  ;;  %1926 = vmatpush1.msra.mxu0 %v4173_v43 }
 0x902   :  { %2733 = vmatprep.subr.mxu1 %v4363_v10  ;;  %1927 = vmatprep.subr.mxu0 %v4177_v44 }
 0x903   :  { %2734 = vmatpush3.msra.mxu1 %v4367_v27  ;;  %1928 = vmatpush1.msra.mxu0 %v4181_v45 }
 0x904   :  { %2735 = vmatprep.subr.mxu1 %v4371_v31  ;;  %1929 = vmatprep.subr.mxu0 %v4185_v46 }
 0x905   :  { %2736 = vmatpush3.msra.mxu1 %v4375_v58  ;;  %1930 = vmatpush1.msra.mxu0 %v4189_v47 }
 0x906   :  { %2737 = vmatprep.subr.mxu1 %v4379_v34  ;;  %1931 = vmatprep.subr.mxu0 %v4193_v48 }
 0x907   :  { %2738 = vmatpush3.msra.mxu1 %v4383_v61  ;;  %1932 = vmatpush1.msra.mxu0 %v4197_v63 }
 0x908   :  { %2739 = vmatprep.subr.mxu1 %v5118_v15  ;;  %1933 = vmatprep.subr.mxu0 %v4201_v7 }
 0x909   :  { %2740 = vmatpush3.msra.mxu1 %v5119_v22  ;;  %1934 = vmatpush1.msra.mxu0 %v4205_v14 }
 0x90a   :  { %2741 = vmatprep.subr.mxu1 %v5120_v38  ;;  %1935 = vmatprep.subr.mxu0 %v4209_v21 }
 0x90b   :  { %2742 = vmatpush3.msra.mxu1 %v5121_v30  ;;  %1936 = vmatpush1.msra.mxu0 %v4213_v28  ;;  %v1671_v30 = vld [vmem:[#allocation4 + $0x28] sm:$0xff] }
 0x90c   :  { %2743 = vmatprep.subr.mxu1 %v5122_v5  ;;  %1937 = vmatprep.subr.mxu0 %v4217_v35 }
 0x90d   :  { %2744 = vmatpush3.msra.mxu1 %v5123_v50  ;;  %1938 = vmatpush1.msra.mxu0 %v5124_v54 }
 0x90e   :  { %2745 = vmatprep.subr.mxu1 %v5125_v57  ;;  %1939 = vmatprep.subr.mxu0 %v5126_v60  ;;  %v5136_v57 = vld [vmem:[#allocation40_spill] sm:$0xff]  ;;  %v5137_v60 = vld [vmem:[#allocation51_spill] sm:$0xff] }
 0x90f   :  { %2746 = vmatpush3.msra.mxu1 %v5127_v1  ;;  %1940 = vmatpush1.msra.mxu0 %v5128_v4  ;;  %v5138_v1 = vld [vmem:[#allocation21_spill] sm:$0xff]  ;;  %v5139_v4 = vld [vmem:[#allocation32_spill] sm:$0xff] }
 0x910   :  { %2747 = vmatprep.subr.mxu1 %v5129_v8  ;;  %1941 = vmatprep.subr.mxu0 %v5130_v19  ;;  %v5140_v8 = vld [vmem:[#allocation41_spill] sm:$0xff]  ;;  %v5141_v19 = vld [vmem:[#allocation52_spill] sm:$0xff] }
 0x911   :  { %2748 = vmatpush3.msra.mxu1 %v5131_v42  ;;  %1942 = vmatpush1.msra.mxu0 %v5132_v51  ;;  %v5142_v42 = vld [vmem:[#allocation22_spill] sm:$0xff]  ;;  %v5143_v51 = vld [vmem:[#allocation33_spill] sm:$0xff] }
 0x912   :  { %2749 = vmatprep.subr.mxu1 %v5133_v11  ;;  %1943 = vmatprep.subr.mxu0 %v5134_v18  ;;  %v5144_v11 = vld [vmem:[#allocation42_spill] sm:$0xff]  ;;  %v5145_v18 = vld [vmem:[#allocation53_spill] sm:$0xff] }
 0x913   :  { %2750 = vmatpush3.msra.mxu1 %v5135_v25  ;;  %1944 = vmatpush1.msra.mxu0 %v5136_v57  ;;  %v5146_v25 = vld [vmem:[#allocation23_spill] sm:$0xff]  ;;  %v5147_v57 = vld [vmem:[#allocation34_spill] sm:$0xff] }
 0x914   :  { %2751 = vmatprep.subr.mxu1 %v5137_v60  ;;  %1945 = vmatprep.subr.mxu0 %v5138_v1  ;;  %v5148_v60 = vld [vmem:[#allocation43_spill] sm:$0xff]  ;;  %v5149_v1 = vld [vmem:[#allocation54_spill] sm:$0xff] }
 0x915   :  { %2752 = vmatpush3.msra.mxu1 %v5139_v4  ;;  %1946 = vmatpush1.msra.mxu0 %v5140_v8  ;;  %v5150_v4 = vld [vmem:[#allocation24_spill] sm:$0xff]  ;;  %v5151_v8 = vld [vmem:[#allocation35_spill] sm:$0xff] }
 0x916   :  { %2753 = vmatprep.subr.mxu1 %v5141_v19  ;;  %1947 = vmatprep.subr.mxu0 %v5142_v42  ;;  %v5152_v19 = vld [vmem:[#allocation44_spill] sm:$0xff] }
 0x917   :  { %2754 = vmatpush3.msra.mxu1 %v5143_v51  ;;  %1948 = vmatpush1.msra.mxu0 %v5144_v11  ;;  %v5153_v11 = vld [vmem:[#allocation55_spill] sm:$0xff]  ;;  %v5154_v51 = vld [vmem:[#allocation70_spill] sm:$0xff] }
 0x918   :  { %2755 = vmatprep.subr.mxu1 %v5145_v18  ;;  %1949 = vmatprep.subr.mxu0 %v5146_v25 }
 0x919   :  { %2756 = vmatpush3.msra.mxu1 %v5147_v57  ;;  %1950 = vmatpush1.msra.mxu0 %v5148_v60 }
 0x91a   :  { %2757 = vmatprep.subr.mxu1 %v5149_v1  ;;  %1951 = vmatprep.subr.mxu0 %v5150_v4  ;;  %v5155_v1 = vld [vmem:[#allocation67_spill] sm:$0xff] }
 0x91b   :  { %2758 = vmatpush3.msra.mxu1 %v5151_v8  ;;  %1952 = vmatpush1.msra.mxu0 %v5152_v19 }
 0x91c   :  { %3120 = vmatprep.subr.mxu1 %v4967_v23  ;;  %1985 = vmatprep.mubr.f32.mxu0 %v4967_v23 }
 0x91d   :  { %2779 = vmatprep.subr.mxu0 %v5153_v11 }
 0x9bc   :  { %v1744_v18 = vpop.f32.mrf.mxu1  ;;  %v1815_v25 = vpop.f32.mrf.mxu0 }
 0x9bd   :  { %v1821_v57 = vadd.f32 %v5154_v51, %v1815_v25  ;;  %v5181_v51 = vld [vmem:[#allocation52_spill] sm:$0xff]  ;;  %v5184_v25 = vld [vmem:[#allocation42_spill] sm:$0xff] }
 0x9be   :  { %v1746_v42 = vpop.f32.mrf.mxu1  ;;  %v3119_v60 = vpop.f32.mrf.mxu0 }
 0x9bf   :  { %v1824_v54 = vmul.f32 0.5, %v1821_v57  ;;  %v1820_v50 = vadd.f32 %v1746_v42, %v5155_v1  ;;  %v5174_v57 = vld [vmem:[#allocation20_spill] sm:$0xff]  ;;  %v5175_v60 = vld [vmem:[#allocation31_spill] sm:$0xff]  ;;  %v5180_v42 = vld [vmem:[#allocation41_spill] sm:$0xff] }
 0x9c0   :  { %v5176_v1 = vld [vmem:[#allocation40_spill] sm:$0xff] }
 0x9c1   :  { %v1823_v4 = vmul.f32 0.5, %v1820_v50  ;;  %3241 = vtanh.f32 %v1824_v54  ;;  %v5172_v50 = vld [vmem:[#allocation39_spill] sm:$0xff]  ;;  %v5173_v54 = vld [vmem:[#allocation50_spill] sm:$0xff] }
 0x9c3   :  { %3243 = vtanh.f32 %v1823_v4  ;;  %v5177_v4 = vld [vmem:[#allocation51_spill] sm:$0xff] }
 0x9ce   :  { %v3242_v8 = vpop.eup %3241 }
 0x9cf   :  { %v1830_v35 = vadd.f32 1.0, %v3242_v8  ;;  %v5178_v8 = vld [vmem:[#allocation21_spill] sm:$0xff] }
 0x9d0   :  { %v3244_v19 = vpop.eup %3243 }
 0x9d1   :  { %v1829_v5 = vadd.f32 1.0, %v3244_v19  ;;  %v1833_v28 = vmul.f32 0.5, %v1830_v35  ;;  %v5179_v19 = vld [vmem:[#allocation32_spill] sm:$0xff] }
 0x9d3   :  { %v1832_v21 = vmul.f32 0.5, %v1829_v5  ;;  %v1835_v11 = vmul.f32 %v1833_v28, %v4511_v2 }
 0x9d5   :  { %v1834_v38 = vmul.f32 %v1832_v21, %v1671_v30  ;;  %1900 = vmatprep.mubr.f32.mxu1 %v1835_v11  ;;  %v5182_v11 = vld [vmem:[#allocation22_spill] sm:$0xff] }
 0x9d7   :  { %1901 = vmatmul.mubr.f32.vlgmr.msra.gmra.mxu1 %v1834_v38 }
 0x9d8   :  { %3121 = vmatpush3.msra.mxu1 %v4096_v62  ;;  %3152 = vmatprep.mubr.msk.f32.mxu1 %vm3471_vm0, %v4967_v23  ;;  %v5156_v62 = vld [vmem:[#allocation65_spill] sm:$0xff] }
 0x9d9   :  { %3122 = vmatprep.subr.mxu1 %v4967_v23 }
 0x9da   :  { %3123 = vmatpush3.msra.mxu1 %v4102_v6  ;;  %v1819_v6 = vadd.f32 %v1744_v18, %v5156_v62  ;;  %v5183_v18 = vld [vmem:[#allocation33_spill] sm:$0xff] }
 0x9db   :  { %3124 = vmatprep.subr.mxu1 %v4967_v23  ;;  %v5185_v62 = vld [vmem:[#allocation53_spill] sm:$0xff] }
 0x9dc   :  { %3125 = vmatpush3.msra.mxu1 %v4106_v13  ;;  %v1822_v13 = vmul.f32 0.5, %v1819_v6  ;;  %v5186_v6 = vld [vmem:[#allocation23_spill] sm:$0xff] }
 0x9dd   :  { %3126 = vmatprep.subr.mxu1 %v4967_v23 }
 0x9de   :  { %3127 = vmatpush3.msra.mxu1 %v4110_v33  ;;  %3245 = vtanh.f32 %v1822_v13  ;;  %v5187_v13 = vld [vmem:[#allocation34_spill] sm:$0xff] }
 0x9df   :  { %3128 = vmatprep.subr.mxu1 %v4967_v23 }
 0x9e0   :  { %3129 = vmatpush3.msra.mxu1 %v4114_v36 }
 0x9e1   :  { %3130 = vmatprep.subr.mxu1 %v4967_v23 }
 0x9e2   :  { %3131 = vmatpush3.msra.mxu1 %v4118_v37 }
 0x9e3   :  { %3132 = vmatprep.subr.mxu1 %v4967_v23 }
 0x9e4   :  { %3133 = vmatpush3.msra.mxu1 %v4122_v52 }
 0x9e5   :  { %3134 = vmatprep.subr.mxu1 %v4967_v23 }
 0x9e6   :  { %3135 = vmatpush3.msra.mxu1 %v4126_v55 }
 0x9e7   :  { %3136 = vmatprep.subr.mxu1 %v4967_v23 }
 0x9e8   :  { %3137 = vmatpush3.msra.mxu1 %v4304_v29 }
 0x9e9   :  { %3138 = vmatprep.subr.mxu1 %v4967_v23 }
 0x9ea   :  { %3139 = vmatpush3.msra.mxu1 %v4308_v41 }
 0x9eb   :  { %3140 = vmatprep.subr.mxu1 %v4967_v23  ;;  %v3246_v52 = vpop.eup %3245 }
 0x9ec   :  { %3141 = vmatpush3.msra.mxu1 %v4312_v40  ;;  %v1828_v55 = vadd.f32 1.0, %v3246_v52  ;;  %v5191_v52 = vld [vmem:[#allocation35_spill] sm:$0xff] }
 0x9ed   :  { %3142 = vmatprep.subr.mxu1 %v4967_v23 }
 0x9ee   :  { %3143 = vmatpush3.msra.mxu1 %v4316_v59  ;;  %v1831_v21 = vmul.f32 0.5, %v1828_v55  ;;  %v5192_v55 = vld [vmem:[#allocation44_spill] sm:$0xff] }
 0x9ef   :  { %3144 = vmatprep.subr.mxu1 %v4967_v23 }
 0x9f0   :  { %3145 = vmatpush3.msra.mxu1 %v4320_v16  ;;  %v1907_v28 = vsub.f32 1.0, %v1831_v21 }
 0x9f1   :  { %3146 = vmatprep.subr.mxu1 %v4967_v23 }
 0x9f2   :  { %3147 = vmatpush3.msra.mxu1 %v4324_v3  ;;  %v1908_v38 = vmul.f32 %v1907_v28, %v4511_v2  ;;  %v5171_v2 = vld [vmem:[#allocation30_spill] sm:$0xff] }
 0x9f3   :  { %3148 = vmatprep.subr.mxu1 %v4967_v23 }
 0x9f4   :  { %3149 = vmatpush3.msra.mxu1 %v5116_v0 }
 0x9f5   :  { %3150 = vmatprep.subr.mxu1 %v4967_v23 }
 0x9f6   :  { %3151 = vmatpush3.msra.mxu1 %v4332_v26 }
 0x9f7   :  { %2164 = vmatprep.subr.mxu1 %v4145_v17  ;;  %v5157_v17 = vld [vmem:[#allocation46_spill] sm:$0xff] }
 0xa97   :  { %v2759_v33 = vpop.f32.mrf.mxu1 }
 0xa99   :  { %v2760_v36 = vpop.f32.mrf.mxu1 }
 0xa9a   :  { %v2761_v37 = vadd.f32 %v2760_v36, %v2759_v33  ;;  %v5188_v33 = vld [vmem:[#allocation43_spill] sm:$0xff]  ;;  %v5189_v36 = vld [vmem:[#allocation54_spill] sm:$0xff] }
 0xa9c   :  { %3247 = vtanh.f32 %v2761_v37  ;;  %v5190_v37 = vld [vmem:[#allocation24_spill] sm:$0xff] }
 0xaa9   :  { %v3248_v35 = vpop.eup %3247 }
 0xaaa   :  { %v1909_v30 = vmul.f32 %v3248_v35, %v1831_v21  ;;  %v5193_v21 = vld [vmem:[#allocation55_spill] sm:$0xff] }
 0xaac   :  { %v4620_v5 = vadd.f32 %v1909_v30, %v1908_v38  ;;  %v5194_v38 = vld [vmem:[#allocation76_spill] sm:$0xff] }
 0xaae   :  { %1986 = vmatmul.mubr.f32.vlgmr.msra.gmra.mxu0 %v4620_v5  ;;  %1912 = vst [vmem:[#allocation12 + $0x28] sm:$0xff] %v4620_v5  ;;  %3153 = vmatmul.mubr.f32.vlgmr.msra.gmra.mxu1 %v4620_v5 }
 0xaaf   :  { %2780 = vmatpush3.msra.mxu0 %v4343_v53  ;;  %2165 = vmatpush1.msra.mxu1 %v4157_v32  ;;  %v5158_v32 = vld [vmem:[#allocation18_spill] sm:$0xff] }
 0xab0   :  { %2781 = vmatprep.subr.mxu0 %v4347_v56  ;;  %2166 = vmatprep.subr.mxu1 %v4161_v9  ;;  %v5159_v9 = vld [vmem:[#allocation27_spill] sm:$0xff] }
 0xab1   :  { %2782 = vmatpush3.msra.mxu0 %v4351_v49  ;;  %2167 = vmatpush1.msra.mxu1 %v4165_v39  ;;  %v5160_v39 = vld [vmem:[#allocation62_spill] sm:$0xff] }
 0xab2   :  { %2783 = vmatprep.subr.mxu0 %v4355_v20  ;;  %2168 = vmatprep.subr.mxu1 %v4169_v12  ;;  %v5161_v12 = vld [vmem:[#allocation47_spill] sm:$0xff] }
 0xab3   :  { %2784 = vmatpush3.msra.mxu0 %v4359_v24  ;;  %2169 = vmatpush1.msra.mxu1 %v4173_v43  ;;  %v5162_v43 = vld [vmem:[#allocation57_spill] sm:$0xff] }
 0xab4   :  { %2785 = vmatprep.subr.mxu0 %v4363_v10  ;;  %2170 = vmatprep.subr.mxu1 %v4177_v44  ;;  %v5163_v44 = vld [vmem:[#allocation28_spill] sm:$0xff] }
 0xab5   :  { %2786 = vmatpush3.msra.mxu0 %v4367_v27  ;;  %2171 = vmatpush1.msra.mxu1 %v4181_v45  ;;  %v5164_v45 = vld [vmem:[#allocation17_spill] sm:$0xff] }
 0xab6   :  { %2787 = vmatprep.subr.mxu0 %v4371_v31  ;;  %2172 = vmatprep.subr.mxu1 %v4185_v46  ;;  %v5165_v46 = vld [vmem:[#allocation48_spill] sm:$0xff] }
 0xab7   :  { %2788 = vmatpush3.msra.mxu0 %v4375_v58  ;;  %2173 = vmatpush1.msra.mxu1 %v4189_v47  ;;  %v5166_v47 = vld [vmem:[#allocation56_spill] sm:$0xff] }
 0xab8   :  { %2789 = vmatprep.subr.mxu0 %v4379_v34  ;;  %2174 = vmatprep.subr.mxu1 %v4193_v48  ;;  %v5167_v48 = vld [vmem:[#allocation29_spill] sm:$0xff] }
 0xab9   :  { %2790 = vmatpush3.msra.mxu0 %v4383_v61  ;;  %2175 = vmatpush1.msra.mxu1 %v4197_v63  ;;  %v5168_v63 = vld [vmem:[#allocation38_spill] sm:$0xff] }
 0xaba   :  { %2791 = vmatprep.subr.mxu0 %v5118_v15  ;;  %2176 = vmatprep.subr.mxu1 %v4201_v7  ;;  %v5169_v7 = vld [vmem:[#allocation49_spill] sm:$0xff] }
 0xabb   :  { %2792 = vmatpush3.msra.mxu0 %v5119_v22  ;;  %2177 = vmatpush1.msra.mxu1 %v4205_v14  ;;  %v5170_v14 = vld [vmem:[#allocation19_spill] sm:$0xff] }
 0xabc   :  { %2793 = vmatprep.subr.mxu0 %v5157_v17  ;;  %2178 = vmatprep.subr.mxu1 %v5158_v32 }
 0xabd   :  { %2794 = vmatpush3.msra.mxu0 %v5159_v9  ;;  %2179 = vmatpush1.msra.mxu1 %v5160_v39 }
 0xabe   :  { %2795 = vmatprep.subr.mxu0 %v5161_v12  ;;  %2180 = vmatprep.subr.mxu1 %v5162_v43 }
 0xabf   :  { %2796 = vmatpush3.msra.mxu0 %v5163_v44  ;;  %2181 = vmatpush1.msra.mxu1 %v5164_v45  ;;  %v5195_v45 = vld [vmem:[#allocation71_spill] sm:$0xff] }
 0xac0   :  { %2797 = vmatprep.subr.mxu0 %v5165_v46  ;;  %2182 = vmatprep.subr.mxu1 %v5166_v47 }
 0xac1   :  { %2798 = vmatpush3.msra.mxu0 %v5167_v48  ;;  %2183 = vmatpush1.msra.mxu1 %v5168_v63 }
 0xac2   :  { %2799 = vmatprep.subr.mxu0 %v5169_v7  ;;  %2184 = vmatprep.subr.mxu1 %v5170_v14 }
 0xac3   :  { %2800 = vmatpush3.msra.mxu0 %v5171_v2  ;;  %2185 = vmatpush1.msra.mxu1 %v5172_v50 }
 0xac4   :  { %2801 = vmatprep.subr.mxu0 %v5173_v54  ;;  %2186 = vmatprep.subr.mxu1 %v5174_v57 }
 0xac5   :  { %2802 = vmatpush3.msra.mxu0 %v5175_v60  ;;  %2187 = vmatpush1.msra.mxu1 %v5176_v1 }
 0xac6   :  { %2803 = vmatprep.subr.mxu0 %v5177_v4  ;;  %2188 = vmatprep.subr.mxu1 %v5178_v8 }
 0xac7   :  { %2804 = vmatpush3.msra.mxu0 %v5179_v19  ;;  %2189 = vmatpush1.msra.mxu1 %v5180_v42  ;;  %v1914_v42 = vld [vmem:[#allocation4 + $0x30] sm:$0xff] }
 0xac8   :  { %2805 = vmatprep.subr.mxu0 %v5181_v51  ;;  %2190 = vmatprep.subr.mxu1 %v5182_v11 }
 0xac9   :  { %2806 = vmatpush3.msra.mxu0 %v5183_v18  ;;  %2191 = vmatpush1.msra.mxu1 %v5184_v25 }
 0xaca   :  { %2807 = vmatprep.subr.mxu0 %v5185_v62  ;;  %2192 = vmatprep.subr.mxu1 %v5186_v6 }
 0xacb   :  { %2808 = vmatpush3.msra.mxu0 %v5187_v13  ;;  %2193 = vmatpush1.msra.mxu1 %v5188_v33  ;;  %v3346_v33 = vld [vmem:[#allocation9 + $0x178] sm:$0xff] }
 0xacc   :  { %2809 = vmatprep.subr.mxu0 %v5189_v36  ;;  %2194 = vmatprep.subr.mxu1 %v5190_v37  ;;  %v3347_v37 = vld [vmem:[#allocation9 + $0x160] sm:$0xff] }
 0xacd   :  { %2810 = vmatpush3.msra.mxu0 %v5191_v52  ;;  %2195 = vmatpush1.msra.mxu1 %v5192_v55  ;;  %v3348_v55 = vld [vmem:[#allocation9 + $0x148] sm:$0xff] }
 0xace   :  { %3155 = vmatprep.subr.mxu0 %v4967_v23  ;;  %2228 = vmatprep.mubr.f32.mxu1 %v4967_v23 }
 0xacf   :  { %2831 = vmatprep.subr.mxu1 %v5193_v21  ;;  %v3349_v21 = vld [vmem:[#allocation9 + $0x130] sm:$0xff] }
 0xb6e   :  { %v1987_v28 = vpop.f32.mrf.mxu0  ;;  %v2058_v35 = vpop.f32.mrf.mxu1 }
 0xb6f   :  { %v2064_v30 = vadd.f32 %v2058_v35, %v5194_v38  ;;  %v3350_v35 = vld [vmem:[#allocation9 + $0x118] sm:$0xff]  ;;  %v3351_v38 = vld [vmem:[#allocation9 + $0x100] sm:$0xff] }
 0xb70   :  { %v1989_v32 = vpop.f32.mrf.mxu0  ;;  %v3154_v39 = vpop.f32.mrf.mxu1 }
 0xb71   :  { %v2067_v43 = vmul.f32 0.5, %v2064_v30  ;;  %v2063_v47 = vadd.f32 %v1989_v32, %v5195_v45  ;;  %v3352_v30 = vld [vmem:[#allocation9 + $0xe8] sm:$0xff]  ;;  %v3353_v32 = vld [vmem:[#allocation9 + $0xd0] sm:$0xff] }
 0xb73   :  { %v2066_v63 = vmul.f32 0.5, %v2063_v47  ;;  %3249 = vtanh.f32 %v2067_v43 }
 0xb75   :  { %3251 = vtanh.f32 %v2066_v63 }
 0xb80   :  { %v3250_v14 = vpop.eup %3249 }
 0xb81   :  { %v2073_v57 = vadd.f32 1.0, %v3250_v14 }
 0xb82   :  { %v3252_v50 = vpop.eup %3251 }
 0xb83   :  { %v2072_v1 = vadd.f32 1.0, %v3252_v50  ;;  %v2076_v8 = vmul.f32 0.5, %v2073_v57 }
 0xb85   :  { %v2075_v11 = vmul.f32 0.5, %v2072_v1  ;;  %v2078_v25 = vmul.f32 %v2076_v8, %v4620_v5 }
 0xb87   :  { %v2077_v6 = vmul.f32 %v2075_v11, %v1914_v42  ;;  %2143 = vmatprep.mubr.f32.mxu0 %v2078_v25 }
 0xb89   :  { %2144 = vmatmul.mubr.f32.vlgmr.msra.gmra.mxu0 %v2077_v6 }
 0xb8a   :  { %3156 = vmatpush3.msra.mxu0 %v3346_v33  ;;  %3187 = vmatprep.mubr.msk.f32.mxu0 %vm3471_vm0, %v4967_v23 }
 0xb8b   :  { %3157 = vmatprep.subr.mxu0 %v4967_v23 }
 0xb8c   :  { %3158 = vmatpush3.msra.mxu0 %v3347_v37 }
 0xb8d   :  { %3159 = vmatprep.subr.mxu0 %v4967_v23 }
 0xb8e   :  { %3160 = vmatpush3.msra.mxu0 %v3348_v55 }
 0xb8f   :  { %3161 = vmatprep.subr.mxu0 %v4967_v23 }
 0xb90   :  { %3162 = vmatpush3.msra.mxu0 %v3349_v21 }
 0xb91   :  { %3163 = vmatprep.subr.mxu0 %v4967_v23 }
 0xb92   :  { %3164 = vmatpush3.msra.mxu0 %v3350_v35 }
 0xb93   :  { %3165 = vmatprep.subr.mxu0 %v4967_v23 }
 0xb94   :  { %3166 = vmatpush3.msra.mxu0 %v3351_v38 }
 0xb95   :  { %3167 = vmatprep.subr.mxu0 %v4967_v23 }
 0xb96   :  { %3168 = vmatpush3.msra.mxu0 %v3352_v30 }
 0xb97   :  { %3169 = vmatprep.subr.mxu0 %v4967_v23 }
 0xb98   :  { %3170 = vmatpush3.msra.mxu0 %v3353_v32 }
 0xb99   :  { %3171 = vmatprep.subr.mxu0 %v4967_v23 }
 0xb9a   :  { %3172 = vmatpush3.msra.mxu0 %v4304_v29  ;;  %v5196_v29 = vld [vmem:[#allocation69_spill] sm:$0xff] }
 0xb9b   :  { %3173 = vmatprep.subr.mxu0 %v4967_v23 }
 0xb9c   :  { %3174 = vmatpush3.msra.mxu0 %v4308_v41  ;;  %v2062_v41 = vadd.f32 %v1987_v28, %v5196_v29 }
 0xb9d   :  { %3175 = vmatprep.subr.mxu0 %v4967_v23 }
 0xb9e   :  { %3176 = vmatpush3.msra.mxu0 %v4312_v40  ;;  %v2065_v40 = vmul.f32 0.5, %v2062_v41 }
 0xb9f   :  { %3177 = vmatprep.subr.mxu0 %v4967_v23 }
 0xba0   :  { %3178 = vmatpush3.msra.mxu0 %v4316_v59  ;;  %3253 = vtanh.f32 %v2065_v40 }
 0xba1   :  { %3179 = vmatprep.subr.mxu0 %v4967_v23 }
 0xba2   :  { %3180 = vmatpush3.msra.mxu0 %v4320_v16 }
 0xba3   :  { %3181 = vmatprep.subr.mxu0 %v4967_v23 }
 0xba4   :  { %3182 = vmatpush3.msra.mxu0 %v4324_v3 }
 0xba5   :  { %3183 = vmatprep.subr.mxu0 %v4967_v23 }
 0xba6   :  { %3184 = vmatpush3.msra.mxu0 %v5116_v0 }
 0xba7   :  { %3185 = vmatprep.subr.mxu0 %v4967_v23 }
 0xba8   :  { %3186 = vmatpush3.msra.mxu0 %v4332_v26 }
 0xbad   :  { %v3254_v16 = vpop.eup %3253 }
 0xbae   :  { %v2071_v45 = vadd.f32 1.0, %v3254_v16 }
 0xbb0   :  { %v2074_v47 = vmul.f32 0.5, %v2071_v45 }
 0xbb2   :  { %v2150_v3 = vsub.f32 1.0, %v2074_v47 }
 0xbb4   :  { %v2151_v14 = vmul.f32 %v2150_v3, %v4620_v5  ;;  %v2157_v5 = vld [vmem:[#allocation4 + $0x38] sm:$0xff] }
 0xc49   :  { %v2811_v59 = vpop.f32.mrf.mxu0 }
 0xc4b   :  { %v2812_v39 = vpop.f32.mrf.mxu0 }
 0xc4c   :  { %v2813_v43 = vadd.f32 %v2812_v39, %v2811_v59 }
 0xc4e   :  { %3255 = vtanh.f32 %v2813_v43 }
 0xc5b   :  { %v3256_v63 = vpop.eup %3255 }
 0xc5c   :  { %v2152_v0 = vmul.f32 %v3256_v63, %v2074_v47 }
 0xc5e   :  { %v4720_v50 = vadd.f32 %v2152_v0, %v2151_v14 }
 0xc60   :  { %2229 = vmatmul.mubr.f32.vlgmr.msra.gmra.mxu1 %v4720_v50  ;;  %2155 = vst [vmem:[#allocation12 + $0x30] sm:$0xff] %v4720_v50  ;;  %3188 = vmatmul.mubr.f32.vlgmr.msra.gmra.mxu0 %v4720_v50 }
 0xc61   :  { %2832 = vmatpush3.msra.mxu1 %v4343_v53  ;;  %v5197_v53 = vld [vmem:[#allocation74_spill] sm:$0xff] }
 0xc62   :  { %2833 = vmatprep.subr.mxu1 %v4347_v56 }
 0xc63   :  { %2834 = vmatpush3.msra.mxu1 %v4351_v49 }
 0xc64   :  { %2835 = vmatprep.subr.mxu1 %v4355_v20 }
 0xc65   :  { %2836 = vmatpush3.msra.mxu1 %v4359_v24 }
 0xc66   :  { %2837 = vmatprep.subr.mxu1 %v4363_v10  ;;  %v5198_v10 = vld [vmem:[#allocation75_spill] sm:$0xff] }
 0xc67   :  { %2838 = vmatpush3.msra.mxu1 %v4367_v27 }
 0xc68   :  { %2839 = vmatprep.subr.mxu1 %v4371_v31 }
 0xc69   :  { %2840 = vmatpush3.msra.mxu1 %v4375_v58 }
 0xc6a   :  { %2841 = vmatprep.subr.mxu1 %v4379_v34 }
 0xc6b   :  { %2842 = vmatpush3.msra.mxu1 %v4383_v61 }
 0xc6c   :  { %2843 = vmatprep.subr.mxu1 %v5118_v15 }
 0xc6d   :  { %2844 = vmatpush3.msra.mxu1 %v5119_v22 }
 0xc6e   :  { %2845 = vmatprep.subr.mxu1 %v5157_v17 }
 0xc6f   :  { %2846 = vmatpush3.msra.mxu1 %v5159_v9 }
 0xc70   :  { %2847 = vmatprep.subr.mxu1 %v5161_v12 }
 0xc71   :  { %2848 = vmatpush3.msra.mxu1 %v5163_v44  ;;  %v5199_v44 = vld [vmem:[#allocation73_spill] sm:$0xff] }
 0xc72   :  { %2849 = vmatprep.subr.mxu1 %v5165_v46 }
 0xc73   :  { %2850 = vmatpush3.msra.mxu1 %v5167_v48 }
 0xc74   :  { %2851 = vmatprep.subr.mxu1 %v5169_v7 }
 0xc75   :  { %2852 = vmatpush3.msra.mxu1 %v5171_v2 }
 0xc76   :  { %2853 = vmatprep.subr.mxu1 %v5173_v54 }
 0xc77   :  { %2854 = vmatpush3.msra.mxu1 %v5175_v60 }
 0xc78   :  { %2855 = vmatprep.subr.mxu1 %v5177_v4 }
 0xc79   :  { %2856 = vmatpush3.msra.mxu1 %v5179_v19 }
 0xc7a   :  { %2857 = vmatprep.subr.mxu1 %v5181_v51 }
 0xc7b   :  { %2858 = vmatpush3.msra.mxu1 %v5183_v18 }
 0xc7c   :  { %2859 = vmatprep.subr.mxu1 %v5185_v62 }
 0xc7d   :  { %2860 = vmatpush3.msra.mxu1 %v5187_v13 }
 0xc7e   :  { %2861 = vmatprep.subr.mxu1 %v5189_v36 }
 0xc7f   :  { %2862 = vmatpush3.msra.mxu1 %v5191_v52 }
 0xd20   :  { %v2230_v23 = vpop.f32.mrf.mxu1  ;;  %v2301_v26 = vpop.f32.mrf.mxu0 }
 0xd21   :  { %v2307_v56 = vadd.f32 %v5197_v53, %v2301_v26  ;;  %v2305_v46 = vadd.f32 %v2230_v23, %v5199_v44 }
 0xd22   :  { %v2232_v49 = vpop.f32.mrf.mxu1  ;;  %v3189_v20 = vpop.f32.mrf.mxu0 }
 0xd23   :  { %v2310_v24 = vmul.f32 0.5, %v2307_v56  ;;  %v2306_v27 = vadd.f32 %v2232_v49, %v5198_v10  ;;  %v2308_v48 = vmul.f32 0.5, %v2305_v46 }
 0xd25   :  { %v2309_v31 = vmul.f32 0.5, %v2306_v27  ;;  %3257 = vtanh.f32 %v2310_v24 }
 0xd27   :  { %3259 = vtanh.f32 %v2309_v31 }
 0xd28   :  { %3261 = vtanh.f32 %v2308_v48 }
 0xd32   :  { %v3258_v58 = vpop.eup %3257 }
 0xd33   :  { %v2316_v61 = vadd.f32 1.0, %v3258_v58 }
 0xd34   :  { %v3260_v34 = vpop.eup %3259 }
 0xd35   :  { %v2315_v15 = vadd.f32 1.0, %v3260_v34  ;;  %v2319_v22 = vmul.f32 0.5, %v2316_v61  ;;  %v3262_v60 = vpop.eup %3261 }
 0xd36   :  { %v2314_v4 = vadd.f32 1.0, %v3262_v60 }
 0xd37   :  { %v2318_v17 = vmul.f32 0.5, %v2315_v15  ;;  %v2321_v9 = vmul.f32 %v2319_v22, %v4720_v50 }
 0xd38   :  { %v2317_v19 = vmul.f32 0.5, %v2314_v4 }
 0xd39   :  { %v2320_v12 = vmul.f32 %v2318_v17, %v2157_v5  ;;  %2386 = vmatprep.mubr.f32.mxu1 %v2321_v9 }
 0xd3a   :  { %v2393_v51 = vsub.f32 1.0, %v2317_v19 }
 0xd3b   :  { %2387 = vmatmul.mubr.f32.vlgmr.msra.gmra.mxu1 %v2320_v12 }
 0xd3c   :  { %v2394_v62 = vmul.f32 %v2393_v51, %v4720_v50 }
 0xdfb   :  { %v2863_v7 = vpop.f32.mrf.mxu1 }
 0xdfd   :  { %v2864_v2 = vpop.f32.mrf.mxu1 }
 0xdfe   :  { %v2865_v54 = vadd.f32 %v2864_v2, %v2863_v7 }
 0xe00   :  { %3263 = vtanh.f32 %v2865_v54 }
 0xe0d   :  { %v3264_v18 = vpop.eup %3263 }
 0xe0e   :  { %v2395_v13 = vmul.f32 %v3264_v18, %v2317_v19 }
 0xe10   :  { %v2396_v36 = vadd.f32 %v2395_v13, %v2394_v62 }
 0xe12   :  { %2398 = vst [vmem:[#allocation12 + $0x38] sm:$0xff] %v2396_v36 }
 0xe13   :  { %3445 = shalt.err (!%p3442_p10)
}
 0xe14   :  { %2411 = dma.vmem_to_hbm [thread:$0]  %s2406_s3, 1024, %s4771_s4, [#allocation6], %s3466_s25, %s3466_s25, %s3467_s26  }
 0xe15   :  { %3460 = dma.done.wait [#allocation6], 1024  }
 0xe16   :  { %3461 = vsyncadd [#allocation6], 4294966272 }
 0xe17   :  { %2415 = vsyncpa [#allocation5], 1 }
 0xe18   :  { %2416 = vsyncpa [#allocation8], 1 }
 0xe19   :  { %2417 = vsyncpa [#allocation11], 1 }
 0xe1a   :  { %2418 = vsyncpa [#allocation6], 1 }

</bundles_post_ra>
